<compile_context>
chip_gen: v7x
topology: tpu7x:2x2x1
jax: 0.10.0
libtpu: 0.0.40
codegen_flags: <defaults>
</compile_context>

<pallas_src>
import jax
import jax.numpy as jnp
from jax.experimental import pallas as pl
from jax.experimental.pallas import tpu as pltpu


def _round_up(x, m):
    return (x + m - 1) // m * m


def _pick_block_rows(n, requested):
    """Pick a sublane-aligned row tile.

    Prefers (a) a tile that divides n exactly (no host-side padding copy) and
    (b) an even grid length so v7x's 2 TensorCores both get work, as long as
    that does not shrink the tile by more than 2x.

    Returns (bm, needs_pad).
    """
    target = max(8, (min(requested, n) // 8) * 8)
    best_div = None
    best_even = None
    for bm in range(target, 7, -8):
        if n % bm == 0:
            if best_div is None:
                best_div = bm
            if (n // bm) % 2 == 0:
                best_even = bm
                break
    if best_even is not None and best_div is not None and best_even * 2 >= best_div:
        return best_even, False
    if best_div is not None:
        return best_div, False
    return target, True


def _gated_kernel(xp_ref, xc_ref,
                  ws_ref, bs_ref,
                  wd_ref, bd_ref,
                  w1_ref, b1_ref,
                  w2_ref, b2_ref,
                  o_ref):
    """One row-tile of the GatedMechanism forward pass.

    K-fused projections:
      xcat = [x_prev, x_curr]                       (bm, 2*d_model)
      s    = xcat @ [Wp; Wc]  + (bp + bc)   ==  xp + xc
      d    = xcat @ [-Wp; Wc] + (bc - bp)   ==  xc - xp
      g    = sigmoid(s)
      h    = 0.5*s + (g - 0.5)*d            ==  (1-g)*xp + g*xc
    """
    cd = ws_ref.dtype                 # compute dtype (bf16 MXU fast path)
    f32 = jnp.float32

    # Concatenate the two row tiles along lanes (d_model-aligned), then cast
    # to the MXU operand dtype.
    xcat = jnp.concatenate([xp_ref[...], xc_ref[...]], axis=-1).astype(cd)

    s = jnp.dot(xcat, ws_ref[...], preferred_element_type=f32) + bs_ref[...]
    d = jnp.dot(xcat, wd_ref[...], preferred_element_type=f32) + bd_ref[...]

    g = jax.nn.sigmoid(s)             # EUP
    h = 0.5 * s + (g - 0.5) * d       # == (1-g)*xp + g*xc

    # dropout(p) in eval mode == identity
    x = jnp.dot(h.astype(cd), w1_ref[...], preferred_element_type=f32) + b1_ref[...]
    x = jnp.maximum(x, 0.0)           # activation = nn.ReLU
    x = jnp.dot(x.astype(cd), w2_ref[...], preferred_element_type=f32) + b2_ref[...]

    o_ref[...] = x.astype(o_ref.dtype)


def gated_mechanism(x_prev, x_curr, params, *, block_rows=512,
                    compute_dtype=jnp.bfloat16):
    """x_prev, x_curr: [batch, seq, d_model]  ->  [batch, seq, d_model]."""
    wp, bp, wc, bc, w1, b1, w2, b2 = params
    b, s_len, d_model = x_prev.shape
    d_ff = wp.shape[1]
    n = b * s_len
    f32 = jnp.float32
    cd = compute_dtype

    bm, needs_pad = _pick_block_rows(n, block_rows)
    n_pad = _round_up(n, bm) if needs_pad else n

    xp2 = x_prev.reshape(n, d_model)
    xc2 = x_curr.reshape(n, d_model)
    if n_pad != n:
        pad = ((0, n_pad - n), (0, 0))
        xp2 = jnp.pad(xp2, pad)
        xc2 = jnp.pad(xc2, pad)

    # K-stacked projection weights (so the MXU sees K = 2*d_model) in the
    # compute dtype, biases kept in f32 and folded for the s/d formulation.
    # These are tiny one-off casts compared to the row-dimension work.
    w_s = jnp.concatenate([wp, wc], axis=0).astype(cd)      # -> s = xp + xc
    w_d = jnp.concatenate([-wp, wc], axis=0).astype(cd)     # -> d = xc - xp
    b_s = (bp.astype(f32) + bc.astype(f32)).reshape(1, d_ff)
    b_d = (bc.astype(f32) - bp.astype(f32)).reshape(1, d_ff)
    w1c = w1.astype(cd)
    w2c = w2.astype(cd)
    b1c = b1.astype(f32).reshape(1, d_ff)
    b2c = b2.astype(f32).reshape(1, d_model)

    grid = (n_pad // bm,)
    row_spec = pl.BlockSpec((bm, d_model), lambda i: (i, 0))

    x_bytes = jnp.dtype(x_prev.dtype).itemsize
    cd_bytes = jnp.dtype(cd).itemsize
    w_elems = 2 * (2 * d_model) * d_ff + d_ff * d_ff + d_ff * d_model
    b_elems = 3 * d_ff + d_model
    cost = pl.CostEstimate(
        flops=2 * n_pad * (2 * (2 * d_model) * d_ff + d_ff * d_ff + d_ff * d_model),
        transcendentals=n_pad * d_ff,                         # sigmoid
        bytes_accessed=3 * n_pad * d_model * x_bytes + w_elems * cd_bytes + b_elems * 4,
    )

    def vmem_estimate(weight_buffers):
        io = 2 * 2 * bm * d_model * x_bytes + 2 * bm * d_model * x_bytes
        w = weight_buffers * (w_elems * cd_bytes + b_elems * 4)
        tmp = bm * 2 * d_model * 4 + 6 * bm * d_ff * 4        # concat + f32 temps
        return io + w + tmp

    def run(single_buffer_weights):
        def const_spec(shape):
            if single_buffer_weights:
                # Constant index_map -> double-buffering is pure VMEM waste.
                return pl.BlockSpec(shape, lambda i: (0, 0),
                                    pipeline_mode=pl.Buffered(1))
            return pl.BlockSpec(shape, lambda i: (0, 0))

        n_buf = 1 if single_buffer_weights else 2
        vmem_limit = int(min(48 * 2**20, max(2 * vmem_estimate(n_buf), 16 * 2**20)))

        return pl.pallas_call(
            _gated_kernel,
            out_shape=jax.ShapeDtypeStruct((n_pad, d_model), x_prev.dtype),
            grid_spec=pltpu.PrefetchScalarGridSpec(
                num_scalar_prefetch=0,
                grid=grid,
                in_specs=[
                    row_spec,                             # x_prev rows
                    row_spec,                             # x_curr rows
                    const_spec((2 * d_model, d_ff)),      # [Wp; Wc]
                    const_spec((1, d_ff)),                # bp + bc
                    const_spec((2 * d_model, d_ff)),      # [-Wp; Wc]
                    const_spec((1, d_ff)),                # bc - bp
                    const_spec((d_ff, d_ff)),             # W1
                    const_spec((1, d_ff)),                # b1
                    const_spec((d_ff, d_model)),          # W2
                    const_spec((1, d_model)),             # b2
                ],
                out_specs=row_spec,
            ),
            compiler_params=pltpu.CompilerParams(
                dimension_semantics=("parallel",),
                vmem_limit_bytes=vmem_limit,
            ),
            cost_estimate=cost,
        )(xp2, xc2, w_s, b_s, w_d, b_d, w1c, b1c, w2c, b2c)

    try:
        out = run(single_buffer_weights=True)
    except Exception:
        # pipeline_mode=pl.Buffered(1) unsupported in this jax build; fall back
        # to default double-buffered weights (correct, just uses more VMEM).
        out = run(single_buffer_weights=False)

    if n_pad != n:
        out = out[:n]
    return out.reshape(b, s_len, d_model)


def _reference(x_prev, x_curr, params, compute_dtype=jnp.float32):
    """Module semantics; compute_dtype controls matmul operand precision."""
    wp, bp, wc, bc, w1, b1, w2, b2 = params
    cd, f32 = compute_dtype, jnp.float32

    def mm(x, w):
        return jnp.dot(x.astype(cd), w.astype(cd), preferred_element_type=f32)

    xp = mm(x_prev, wp) + bp.astype(f32)
    xc = mm(x_curr, wc) + bc.astype(f32)
    g = jax.nn.sigmoid(xp + xc)
    h = (1.0 - g) * xp + g * xc
    x = jnp.maximum(mm(h, w1) + b1.astype(f32), 0.0)
    return mm(x, w2) + b2.astype(f32)


def init_params(key, d_model, d_ff, dtype=jnp.float32):
    ks = jax.random.split(key, 8)
    scale_in = 1.0 / jnp.sqrt(d_model)
    scale_ff = 1.0 / jnp.sqrt(d_ff)
    wp = (jax.random.normal(ks[0], (d_model, d_ff)) * scale_in).astype(dtype)
    bp = (jax.random.normal(ks[1], (d_ff,)) * 0.01).astype(dtype)
    wc = (jax.random.normal(ks[2], (d_model, d_ff)) * scale_in).astype(dtype)
    bc = (jax.random.normal(ks[3], (d_ff,)) * 0.01).astype(dtype)
    w1 = (jax.random.normal(ks[4], (d_ff, d_ff)) * scale_ff).astype(dtype)
    b1 = (jax.random.normal(ks[5], (d_ff,)) * 0.01).astype(dtype)
    w2 = (jax.random.normal(ks[6], (d_ff, d_model)) * scale_ff).astype(dtype)
    b2 = (jax.random.normal(ks[7], (d_model,)) * 0.01).astype(dtype)
    return (wp, bp, wc, bc, w1, b1, w2, b2)


if __name__ == "__main__":
    # Lane-dense small demo: d_model / d_ff multiples of 128; N = 512 rows so
    # the picker chooses bm=256 -> a 2-step parallel grid (keeps both v7x TCs
    # busy) with no host-side padding copy.
    batch, seq, d_model, d_ff = 4, 128, 128, 256

    key = jax.random.PRNGKey(0)
    kx, kp = jax.random.split(key)
    k1, k2 = jax.random.split(kx)
    x_prev = jax.random.normal(k1, (batch, seq, d_model), jnp.float32)
    x_curr = jax.random.normal(k2, (batch, seq, d_model), jnp.float32)

    params = init_params(kp, d_model, d_ff, dtype=jnp.float32)

    out = gated_mechanism(x_prev, x_curr, params,
                          block_rows=512, compute_dtype=jnp.bfloat16)
    out = jax.block_until_ready(out)
    assert out.shape == (batch, seq, d_model)

    # Tight check vs a reference with matching numerics (bf16 operands,
    # f32 accumulation) -- validates the kernel math / indexing.
    ref_bf16 = _reference(x_prev, x_curr, params, compute_dtype=jnp.bfloat16)
    assert jnp.allclose(out, ref_bf16, atol=5e-3, rtol=5e-3), "mismatch vs bf16 reference"

    # Loose check vs the pure-f32 module semantics (only bf16 operand drift).
    ref_f32 = _reference(x_prev, x_curr, params, compute_dtype=jnp.float32)
    assert jnp.allclose(out, ref_f32, atol=1e-1, rtol=1e-1), "mismatch vs f32 reference"

    print("KERNEL_OK")
</pallas_src>

<mosaic_0001>
module attributes {stable_mosaic.version = 11 : i64} {
  func.func @_gated_kernel(%arg0: i32, %arg1: memref<256x128xf32, #tpu.memory_space<vmem>>, %arg2: memref<256x128xf32, #tpu.memory_space<vmem>>, %arg3: memref<256x256xbf16, #tpu.memory_space<vmem>>, %arg4: memref<1x256xf32, #tpu.memory_space<vmem>>, %arg5: memref<256x256xbf16, #tpu.memory_space<vmem>>, %arg6: memref<1x256xf32, #tpu.memory_space<vmem>>, %arg7: memref<256x256xbf16, #tpu.memory_space<vmem>>, %arg8: memref<1x256xf32, #tpu.memory_space<vmem>>, %arg9: memref<256x128xbf16, #tpu.memory_space<vmem>>, %arg10: memref<1x128xf32, #tpu.memory_space<vmem>>, %arg11: memref<256x128xf32, #tpu.memory_space<vmem>>) attributes {dimension_semantics = [#tpu.dimension_semantics<parallel>], iteration_bounds = array<i64: 2>, scalar_prefetch = 0 : i64, scratch_operands = 0 : i64, tpu.core_type = #tpu.core_type<tc>, window_params = [{transform_indices = @transform_0, window_bounds = array<i64: 256, 128>}, {transform_indices = @transform_1, window_bounds = array<i64: 256, 128>}, {pipeline_mode = #tpu.pipeline_mode<synchronous>, transform_indices = @transform_2, window_bounds = array<i64: 256, 256>}, {pipeline_mode = #tpu.pipeline_mode<synchronous>, transform_indices = @transform_3, window_bounds = array<i64: 1, 256>}, {pipeline_mode = #tpu.pipeline_mode<synchronous>, transform_indices = @transform_4, window_bounds = array<i64: 256, 256>}, {pipeline_mode = #tpu.pipeline_mode<synchronous>, transform_indices = @transform_5, window_bounds = array<i64: 1, 256>}, {pipeline_mode = #tpu.pipeline_mode<synchronous>, transform_indices = @transform_6, window_bounds = array<i64: 256, 256>}, {pipeline_mode = #tpu.pipeline_mode<synchronous>, transform_indices = @transform_7, window_bounds = array<i64: 1, 256>}, {pipeline_mode = #tpu.pipeline_mode<synchronous>, transform_indices = @transform_8, window_bounds = array<i64: 256, 128>}, {pipeline_mode = #tpu.pipeline_mode<synchronous>, transform_indices = @transform_9, window_bounds = array<i64: 1, 128>}, {transform_indices = @transform_10, window_bounds = array<i64: 256, 128>}]} {
    %c0 = arith.constant 0 : index
    %c0_0 = arith.constant 0 : index
    %0 = vector.load %arg1[%c0, %c0_0] : memref<256x128xf32, #tpu.memory_space<vmem>>, vector<256x128xf32>
    %c0_1 = arith.constant 0 : index
    %c0_2 = arith.constant 0 : index
    %1 = vector.load %arg2[%c0_1, %c0_2] : memref<256x128xf32, #tpu.memory_space<vmem>>, vector<256x128xf32>
    %2 = tpu.concatenate %0, %1 in 1 : vector<256x128xf32>, vector<256x128xf32> -> vector<256x256xf32>
    %3 = arith.truncf %2 : vector<256x256xf32> to vector<256x256xbf16>
    %c0_3 = arith.constant 0 : index
    %c0_4 = arith.constant 0 : index
    %4 = vector.load %arg3[%c0_3, %c0_4] : memref<256x256xbf16, #tpu.memory_space<vmem>>, vector<256x256xbf16>
    %cst = arith.constant dense<0.000000e+00> : vector<256x256xf32>
    %5 = tpu.matmul %3, %4, %cst {dimension_numbers = #tpu.dot_dimension_numbers<[1], [0], [0], [1], [0, 0, 1, 1], [], []>} : vector<256x256xbf16>, vector<256x256xbf16>, vector<256x256xf32> -> vector<256x256xf32>
    %c0_5 = arith.constant 0 : index
    %c0_6 = arith.constant 0 : index
    %6 = vector.load %arg4[%c0_5, %c0_6] : memref<1x256xf32, #tpu.memory_space<vmem>>, vector<1x256xf32>
    %7 = vector.broadcast %6 : vector<1x256xf32> to vector<256x256xf32>
    %8 = arith.addf %5, %7 : vector<256x256xf32>
    %c0_7 = arith.constant 0 : index
    %c0_8 = arith.constant 0 : index
    %9 = vector.load %arg5[%c0_7, %c0_8] : memref<256x256xbf16, #tpu.memory_space<vmem>>, vector<256x256xbf16>
    %cst_9 = arith.constant dense<0.000000e+00> : vector<256x256xf32>
    %10 = tpu.matmul %3, %9, %cst_9 {dimension_numbers = #tpu.dot_dimension_numbers<[1], [0], [0], [1], [0, 0, 1, 1], [], []>} : vector<256x256xbf16>, vector<256x256xbf16>, vector<256x256xf32> -> vector<256x256xf32>
    %c0_10 = arith.constant 0 : index
    %c0_11 = arith.constant 0 : index
    %11 = vector.load %arg6[%c0_10, %c0_11] : memref<1x256xf32, #tpu.memory_space<vmem>>, vector<1x256xf32>
    %12 = vector.broadcast %11 : vector<1x256xf32> to vector<256x256xf32>
    %13 = arith.addf %10, %12 : vector<256x256xf32>
    %14 = arith.negf %8 : vector<256x256xf32>
    %15 = math.exp %14 : vector<256x256xf32>
    %cst_12 = arith.constant 1.000000e+00 : f32
    %16 = vector.broadcast %cst_12 : f32 to vector<256x256xf32>
    %17 = arith.addf %16, %15 : vector<256x256xf32>
    %18 = arith.divf %16, %17 : vector<256x256xf32>
    %cst_13 = arith.constant 5.000000e-01 : f32
    %19 = vector.broadcast %cst_13 : f32 to vector<256x256xf32>
    %20 = arith.mulf %19, %8 : vector<256x256xf32>
    %cst_14 = arith.constant 5.000000e-01 : f32
    %21 = vector.broadcast %cst_14 : f32 to vector<256x256xf32>
    %22 = arith.subf %18, %21 : vector<256x256xf32>
    %23 = arith.mulf %22, %13 : vector<256x256xf32>
    %24 = arith.addf %20, %23 : vector<256x256xf32>
    %25 = arith.truncf %24 : vector<256x256xf32> to vector<256x256xbf16>
    %c0_15 = arith.constant 0 : index
    %c0_16 = arith.constant 0 : index
    %26 = vector.load %arg7[%c0_15, %c0_16] : memref<256x256xbf16, #tpu.memory_space<vmem>>, vector<256x256xbf16>
    %cst_17 = arith.constant dense<0.000000e+00> : vector<256x256xf32>
    %27 = tpu.matmul %25, %26, %cst_17 {dimension_numbers = #tpu.dot_dimension_numbers<[1], [0], [0], [1], [0, 0, 1, 1], [], []>} : vector<256x256xbf16>, vector<256x256xbf16>, vector<256x256xf32> -> vector<256x256xf32>
    %c0_18 = arith.constant 0 : index
    %c0_19 = arith.constant 0 : index
    %28 = vector.load %arg8[%c0_18, %c0_19] : memref<1x256xf32, #tpu.memory_space<vmem>>, vector<1x256xf32>
    %29 = vector.broadcast %28 : vector<1x256xf32> to vector<256x256xf32>
    %30 = arith.addf %27, %29 : vector<256x256xf32>
    %cst_20 = arith.constant 0.000000e+00 : f32
    %31 = vector.broadcast %cst_20 : f32 to vector<256x256xf32>
    %32 = arith.maximumf %30, %31 : vector<256x256xf32>
    %33 = arith.truncf %32 : vector<256x256xf32> to vector<256x256xbf16>
    %c0_21 = arith.constant 0 : index
    %c0_22 = arith.constant 0 : index
    %34 = vector.load %arg9[%c0_21, %c0_22] : memref<256x128xbf16, #tpu.memory_space<vmem>>, vector<256x128xbf16>
    %cst_23 = arith.constant dense<0.000000e+00> : vector<256x128xf32>
    %35 = tpu.matmul %33, %34, %cst_23 {dimension_numbers = #tpu.dot_dimension_numbers<[1], [0], [0], [1], [0, 0, 1, 1], [], []>} : vector<256x256xbf16>, vector<256x128xbf16>, vector<256x128xf32> -> vector<256x128xf32>
    %c0_24 = arith.constant 0 : index
    %c0_25 = arith.constant 0 : index
    %36 = vector.load %arg10[%c0_24, %c0_25] : memref<1x128xf32, #tpu.memory_space<vmem>>, vector<1x128xf32>
    %37 = vector.broadcast %36 : vector<1x128xf32> to vector<256x128xf32>
    %38 = arith.addf %35, %37 : vector<256x128xf32>
    %c0_26 = arith.constant 0 : index
    %c0_27 = arith.constant 0 : index
    %39 = vector.load %arg11[%c0_26, %c0_27] : memref<256x128xf32, #tpu.memory_space<vmem>>, vector<256x128xf32>
    tpu.vector_store %arg11[%c0_26, %c0_27], %38 {strides = array<i32>} : memref<256x128xf32, #tpu.memory_space<vmem>>, vector<256x128xf32>,
    return
  }
  func.func @transform_0(%arg0: i32) -> (i32, i32) {
    %c0_i32 = arith.constant 0 : i32
    %c0_i32_0 = arith.constant 0 : i32
    return %arg0, %c0_i32 : i32, i32
  }
  func.func @transform_1(%arg0: i32) -> (i32, i32) {
    %c0_i32 = arith.constant 0 : i32
    %c0_i32_0 = arith.constant 0 : i32
    return %arg0, %c0_i32 : i32, i32
  }
  func.func @transform_2(%arg0: i32) -> (i32, i32) {
    %c0_i32 = arith.constant 0 : i32
    %c0_i32_0 = arith.constant 0 : i32
    %c0_i32_1 = arith.constant 0 : i32
    return %c0_i32, %c0_i32_0 : i32, i32
  }
  func.func @transform_3(%arg0: i32) -> (i32, i32) {
    %c0_i32 = arith.constant 0 : i32
    %c0_i32_0 = arith.constant 0 : i32
    %c0_i32_1 = arith.constant 0 : i32
    return %c0_i32, %c0_i32_0 : i32, i32
  }
  func.func @transform_4(%arg0: i32) -> (i32, i32) {
    %c0_i32 = arith.constant 0 : i32
    %c0_i32_0 = arith.constant 0 : i32
    %c0_i32_1 = arith.constant 0 : i32
    return %c0_i32, %c0_i32_0 : i32, i32
  }
  func.func @transform_5(%arg0: i32) -> (i32, i32) {
    %c0_i32 = arith.constant 0 : i32
    %c0_i32_0 = arith.constant 0 : i32
    %c0_i32_1 = arith.constant 0 : i32
    return %c0_i32, %c0_i32_0 : i32, i32
  }
  func.func @transform_6(%arg0: i32) -> (i32, i32) {
    %c0_i32 = arith.constant 0 : i32
    %c0_i32_0 = arith.constant 0 : i32
    %c0_i32_1 = arith.constant 0 : i32
    return %c0_i32, %c0_i32_0 : i32, i32
  }
  func.func @transform_7(%arg0: i32) -> (i32, i32) {
    %c0_i32 = arith.constant 0 : i32
    %c0_i32_0 = arith.constant 0 : i32
    %c0_i32_1 = arith.constant 0 : i32
    return %c0_i32, %c0_i32_0 : i32, i32
  }
  func.func @transform_8(%arg0: i32) -> (i32, i32) {
    %c0_i32 = arith.constant 0 : i32
    %c0_i32_0 = arith.constant 0 : i32
    %c0_i32_1 = arith.constant 0 : i32
    return %c0_i32, %c0_i32_0 : i32, i32
  }
  func.func @transform_9(%arg0: i32) -> (i32, i32) {
    %c0_i32 = arith.constant 0 : i32
    %c0_i32_0 = arith.constant 0 : i32
    %c0_i32_1 = arith.constant 0 : i32
    return %c0_i32, %c0_i32_0 : i32, i32
  }
  func.func @transform_10(%arg0: i32) -> (i32, i32) {
    %c0_i32 = arith.constant 0 : i32
    %c0_i32_0 = arith.constant 0 : i32
    return %arg0, %c0_i32 : i32, i32
  }
}

module attributes {stable_mosaic.version = 11 : i64} {
  func.func @_gated_kernel(%arg0: i32, %arg1: memref<256x128xf32, #tpu.memory_space<vmem>>, %arg2: memref<256x128xf32, #tpu.memory_space<vmem>>, %arg3: memref<256x256xbf16, #tpu.memory_space<vmem>>, %arg4: memref<1x256xf32, #tpu.memory_space<vmem>>, %arg5: memref<256x256xbf16, #tpu.memory_space<vmem>>, %arg6: memref<1x256xf32, #tpu.memory_space<vmem>>, %arg7: memref<256x256xbf16, #tpu.memory_space<vmem>>, %arg8: memref<1x256xf32, #tpu.memory_space<vmem>>, %arg9: memref<256x128xbf16, #tpu.memory_space<vmem>>, %arg10: memref<1x128xf32, #tpu.memory_space<vmem>>, %arg11: memref<256x128xf32, #tpu.memory_space<vmem>>) attributes {dimension_semantics = [#tpu.dimension_semantics<parallel>], iteration_bounds = array<i64: 2>, scalar_prefetch = 0 : i64, scratch_operands = 0 : i64, tpu.core_type = #tpu.core_type<tc>, window_params = [{transform_indices = @transform_0, window_bounds = array<i64: 256, 128>}, {transform_indices = @transform_1, window_bounds = array<i64: 256, 128>}, {pipeline_mode = #tpu.pipeline_mode<synchronous>, transform_indices = @transform_2, window_bounds = array<i64: 256, 256>}, {pipeline_mode = #tpu.pipeline_mode<synchronous>, transform_indices = @transform_3, window_bounds = array<i64: 1, 256>}, {pipeline_mode = #tpu.pipeline_mode<synchronous>, transform_indices = @transform_4, window_bounds = array<i64: 256, 256>}, {pipeline_mode = #tpu.pipeline_mode<synchronous>, transform_indices = @transform_5, window_bounds = array<i64: 1, 256>}, {pipeline_mode = #tpu.pipeline_mode<synchronous>, transform_indices = @transform_6, window_bounds = array<i64: 256, 256>}, {pipeline_mode = #tpu.pipeline_mode<synchronous>, transform_indices = @transform_7, window_bounds = array<i64: 1, 256>}, {pipeline_mode = #tpu.pipeline_mode<synchronous>, transform_indices = @transform_8, window_bounds = array<i64: 256, 128>}, {pipeline_mode = #tpu.pipeline_mode<synchronous>, transform_indices = @transform_9, window_bounds = array<i64: 1, 128>}, {transform_indices = @transform_10, window_bounds = array<i64: 256, 128>}]} {
    %c0 = arith.constant 0 : index
    %c0_0 = arith.constant 0 : index
    %0 = vector.load %arg1[%c0, %c0_0] : memref<256x128xf32, #tpu.memory_space<vmem>>, vector<256x128xf32>
    %c0_1 = arith.constant 0 : index
    %c0_2 = arith.constant 0 : index
    %1 = vector.load %arg2[%c0_1, %c0_2] : memref<256x128xf32, #tpu.memory_space<vmem>>, vector<256x128xf32>
    %2 = tpu.concatenate %0, %1 in 1 : vector<256x128xf32>, vector<256x128xf32> -> vector<256x256xf32>
    %3 = arith.truncf %2 : vector<256x256xf32> to vector<256x256xbf16>
    %c0_3 = arith.constant 0 : index
    %c0_4 = arith.constant 0 : index
    %4 = vector.load %arg3[%c0_3, %c0_4] : memref<256x256xbf16, #tpu.memory_space<vmem>>, vector<256x256xbf16>
    %cst = arith.constant dense<0.000000e+00> : vector<256x256xf32>
    %5 = tpu.matmul %3, %4, %cst {dimension_numbers = #tpu.dot_dimension_numbers<[1], [0], [0], [1], [0, 0, 1, 1], [], []>} : vector<256x256xbf16>, vector<256x256xbf16>, vector<256x256xf32> -> vector<256x256xf32>
    %c0_5 = arith.constant 0 : index
    %c0_6 = arith.constant 0 : index
    %6 = vector.load %arg4[%c0_5, %c0_6] : memref<1x256xf32, #tpu.memory_space<vmem>>, vector<1x256xf32>
    %7 = vector.broadcast %6 : vector<1x256xf32> to vector<256x256xf32>
    %8 = arith.addf %5, %7 : vector<256x256xf32>
    %c0_7 = arith.constant 0 : index
    %c0_8 = arith.constant 0 : index
    %9 = vector.load %arg5[%c0_7, %c0_8] : memref<256x256xbf16, #tpu.memory_space<vmem>>, vector<256x256xbf16>
    %cst_9 = arith.constant dense<0.000000e+00> : vector<256x256xf32>
    %10 = tpu.matmul %3, %9, %cst_9 {dimension_numbers = #tpu.dot_dimension_numbers<[1], [0], [0], [1], [0, 0, 1, 1], [], []>} : vector<256x256xbf16>, vector<256x256xbf16>, vector<256x256xf32> -> vector<256x256xf32>
    %c0_10 = arith.constant 0 : index
    %c0_11 = arith.constant 0 : index
    %11 = vector.load %arg6[%c0_10, %c0_11] : memref<1x256xf32, #tpu.memory_space<vmem>>, vector<1x256xf32>
    %12 = vector.broadcast %11 : vector<1x256xf32> to vector<256x256xf32>
    %13 = arith.addf %10, %12 : vector<256x256xf32>
    %14 = arith.negf %8 : vector<256x256xf32>
    %15 = math.exp %14 : vector<256x256xf32>
    %cst_12 = arith.constant 1.000000e+00 : f32
    %16 = vector.broadcast %cst_12 : f32 to vector<256x256xf32>
    %17 = arith.addf %16, %15 : vector<256x256xf32>
    %18 = arith.divf %16, %17 : vector<256x256xf32>
    %cst_13 = arith.constant 5.000000e-01 : f32
    %19 = vector.broadcast %cst_13 : f32 to vector<256x256xf32>
    %20 = arith.mulf %19, %8 : vector<256x256xf32>
    %cst_14 = arith.constant 5.000000e-01 : f32
    %21 = vector.broadcast %cst_14 : f32 to vector<256x256xf32>
    %22 = arith.subf %18, %21 : vector<256x256xf32>
    %23 = arith.mulf %22, %13 : vector<256x256xf32>
    %24 = arith.addf %20, %23 : vector<256x256xf32>
    %25 = arith.truncf %24 : vector<256x256xf32> to vector<256x256xbf16>
    %c0_15 = arith.constant 0 : index
    %c0_16 = arith.constant 0 : index
    %26 = vector.load %arg7[%c0_15, %c0_16] : memref<256x256xbf16, #tpu.memory_space<vmem>>, vector<256x256xbf16>
    %cst_17 = arith.constant dense<0.000000e+00> : vector<256x256xf32>
    %27 = tpu.matmul %25, %26, %cst_17 {dimension_numbers = #tpu.dot_dimension_numbers<[1], [0], [0], [1], [0, 0, 1, 1], [], []>} : vector<256x256xbf16>, vector<256x256xbf16>, vector<256x256xf32> -> vector<256x256xf32>
    %c0_18 = arith.constant 0 : index
    %c0_19 = arith.constant 0 : index
    %28 = vector.load %arg8[%c0_18, %c0_19] : memref<1x256xf32, #tpu.memory_space<vmem>>, vector<1x256xf32>
    %29 = vector.broadcast %28 : vector<1x256xf32> to vector<256x256xf32>
    %30 = arith.addf %27, %29 : vector<256x256xf32>
    %cst_20 = arith.constant 0.000000e+00 : f32
    %31 = vector.broadcast %cst_20 : f32 to vector<256x256xf32>
    %32 = arith.maximumf %30, %31 : vector<256x256xf32>
    %33 = arith.truncf %32 : vector<256x256xf32> to vector<256x256xbf16>
    %c0_21 = arith.constant 0 : index
    %c0_22 = arith.constant 0 : index
    %34 = vector.load %arg9[%c0_21, %c0_22] : memref<256x128xbf16, #tpu.memory_space<vmem>>, vector<256x128xbf16>
    %cst_23 = arith.constant dense<0.000000e+00> : vector<256x128xf32>
    %35 = tpu.matmul %33, %34, %cst_23 {dimension_numbers = #tpu.dot_dimension_numbers<[1], [0], [0], [1], [0, 0, 1, 1], [], []>} : vector<256x256xbf16>, vector<256x128xbf16>, vector<256x128xf32> -> vector<256x128xf32>
    %c0_24 = arith.constant 0 : index
    %c0_25 = arith.constant 0 : index
    %36 = vector.load %arg10[%c0_24, %c0_25] : memref<1x128xf32, #tpu.memory_space<vmem>>, vector<1x128xf32>
    %37 = vector.broadcast %36 : vector<1x128xf32> to vector<256x128xf32>
    %38 = arith.addf %35, %37 : vector<256x128xf32>
    %c0_26 = arith.constant 0 : index
    %c0_27 = arith.constant 0 : index
    %39 = vector.load %arg11[%c0_26, %c0_27] : memref<256x128xf32, #tpu.memory_space<vmem>>, vector<256x128xf32>
    tpu.vector_store %arg11[%c0_26, %c0_27], %38 {strides = array<i32>} : memref<256x128xf32, #tpu.memory_space<vmem>>, vector<256x128xf32>,
    return
  }
  func.func @transform_0(%arg0: i32) -> (i32, i32) {
    %c0_i32 = arith.constant 0 : i32
    %c0_i32_0 = arith.constant 0 : i32
    return %arg0, %c0_i32 : i32, i32
  }
  func.func @transform_1(%arg0: i32) -> (i32, i32) {
    %c0_i32 = arith.constant 0 : i32
    %c0_i32_0 = arith.constant 0 : i32
    return %arg0, %c0_i32 : i32, i32
  }
  func.func @transform_2(%arg0: i32) -> (i32, i32) {
    %c0_i32 = arith.constant 0 : i32
    %c0_i32_0 = arith.constant 0 : i32
    %c0_i32_1 = arith.constant 0 : i32
    return %c0_i32, %c0_i32_0 : i32, i32
  }
  func.func @transform_3(%arg0: i32) -> (i32, i32) {
    %c0_i32 = arith.constant 0 : i32
    %c0_i32_0 = arith.constant 0 : i32
    %c0_i32_1 = arith.constant 0 : i32
    return %c0_i32, %c0_i32_0 : i32, i32
  }
  func.func @transform_4(%arg0: i32) -> (i32, i32) {
    %c0_i32 = arith.constant 0 : i32
    %c0_i32_0 = arith.constant 0 : i32
    %c0_i32_1 = arith.constant 0 : i32
    return %c0_i32, %c0_i32_0 : i32, i32
  }
  func.func @transform_5(%arg0: i32) -> (i32, i32) {
    %c0_i32 = arith.constant 0 : i32
    %c0_i32_0 = arith.constant 0 : i32
    %c0_i32_1 = arith.constant 0 : i32
    return %c0_i32, %c0_i32_0 : i32, i32
  }
  func.func @transform_6(%arg0: i32) -> (i32, i32) {
    %c0_i32 = arith.constant 0 : i32
    %c0_i32_0 = arith.constant 0 : i32
    %c0_i32_1 = arith.constant 0 : i32
    return %c0_i32, %c0_i32_0 : i32, i32
  }
  func.func @transform_7(%arg0: i32) -> (i32, i32) {
    %c0_i32 = arith.constant 0 : i32
    %c0_i32_0 = arith.constant 0 : i32
    %c0_i32_1 = arith.constant 0 : i32
    return %c0_i32, %c0_i32_0 : i32, i32
  }
  func.func @transform_8(%arg0: i32) -> (i32, i32) {
    %c0_i32 = arith.constant 0 : i32
    %c0_i32_0 = arith.constant 0 : i32
    %c0_i32_1 = arith.constant 0 : i32
    return %c0_i32, %c0_i32_0 : i32, i32
  }
  func.func @transform_9(%arg0: i32) -> (i32, i32) {
    %c0_i32 = arith.constant 0 : i32
    %c0_i32_0 = arith.constant 0 : i32
    %c0_i32_1 = arith.constant 0 : i32
    return %c0_i32, %c0_i32_0 : i32, i32
  }
  func.func @transform_10(%arg0: i32) -> (i32, i32) {
    %c0_i32 = arith.constant 0 : i32
    %c0_i32_0 = arith.constant 0 : i32
    return %arg0, %c0_i32 : i32, i32
  }
}

</mosaic_0001>

<bundles_post_ra>
// kernel: tpu_custom_call.1
= control target key start
LH: loop header
LB: loop body
LE: loop exit
PB: predicated region body
PF: predicated region fallthrough
CT: control target
= control target key end

     0   :  { %s5707_s0 = inlined_call_operand.hbm [shape: f32[512,128], index: 0, kind: input, shape index: {}]   ;;  %s5708_s1 = inlined_call_operand.hbm [shape: f32[512,128], index: 1, kind: input, shape index: {}]   ;;  %s5709_s2 = inlined_call_operand.hbm [shape: bf16[256,256], index: 2, kind: input, shape index: {}]   ;;  %s5710_s3 = inlined_call_operand.vmem [shape: f32[1,256], index: 3, kind: input, shape index: {}]   ;;  %s5711_s4 = inlined_call_operand.hbm [shape: bf16[256,256], index: 4, kind: input, shape index: {}]   ;;  %s5712_s5 = inlined_call_operand.vmem [shape: f32[1,256], index: 5, kind: input, shape index: {}]   ;;  %s5713_s6 = inlined_call_operand.hbm [shape: bf16[256,256], index: 6, kind: input, shape index: {}]   ;;  %s5714_s7 = inlined_call_operand.vmem [shape: f32[1,256], index: 7, kind: input, shape index: {}]   ;;  %s5715_s8 = inlined_call_operand.hbm [shape: bf16[256,128], index: 8, kind: input, shape index: {}]   ;;  %s5716_s9 = inlined_call_operand.vmem [shape: f32[1,128], index: 9, kind: input, shape index: {}]   ;;  %s5717_s10 = inlined_call_operand.hbm [shape: f32[512,128], index: 10, kind: output, shape index: {}]  }
   0x1   :  { %5730 = sst [smem:[#allocation36_spill]] %s5707_s0 }
   0x2   :  { %5731 = sst [smem:[#allocation37_spill]] %s5709_s2 }
   0x3   :  { %5732 = sst [smem:[#allocation38_spill]] %s5711_s4 }
   0x4   :  { %5733 = sst [smem:[#allocation39_spill]] %s5716_s9 }
   0x5   :  { %5734 = sst [smem:[#allocation40_spill]] %s5717_s10 }
   0x6   :  { %15 = vsyncpa [#allocation3], 0 }
   0x7   :  { %17 = vsyncpa [#allocation3 + $0x1], 0 }
   0x8   :  { %18 = vsyncpa [#allocation6], 0 }
   0x9   :  { %20 = vsyncpa [#allocation6 + $0x1], 0 }
   0xa   :  { %21 = vsyncpa [#allocation9], 0 }
   0xb   :  { %22 = vsyncpa [#allocation12], 0 }
   0xc   :  { %23 = vsyncpa [#allocation4], 0 }
   0xd   :  { %25 = vsyncpa [#allocation4 + $0x1], 0  ;;  %s4231_s13 = smov 0   ;;  %s4233_s14 = smov 0  }
   0xe   :  { %s4235_s15 = smov 0   ;;  %s4237_s16 = smov 0  }
   0xf LB: > { %5735 = sst [smem:[#allocation20_spill]] %s4149_s13  ;;  %s4252_s17 = sadd.s32 4294967295, %s4161_s16   ;;  %s4161_s16 = sphi %s4237_s16, %s5801_s16   ;;  %s4157_s15 = sphi %s4235_s15, %s5800_s15   ;;  %s4153_s14 = sphi %s4233_s14, %s5799_s14   ;;  %s4149_s13 = sphi %s4231_s13, %s5798_s13  }
  0x10   : > { %s3011_s18 = sadd.s32 4294967294, %s4161_s16   ;;  %p51_p0 = scmp.ne.s32.totalorder %s4153_s14, %s4149_s13 }
  0x11   : > { %p5718_p1 = scmp.eq.s32.totalorder %s4252_s17, 0  ;;  %p275_p3 = scmp.eq.s32.totalorder %s3011_s18, 1 }
  0x12   : > { %p3012_p5 = scmp.ge.s32.totalorder %s4161_s16, 1  ;;  %p282_p7 = scmp.lt.s32.totalorder %s4161_s16, 3 }
  0x13   : > { %p4261_p4 = por %p5718_p1, %p51_p0  ;;  %p4266_p6 = por %p275_p3, %p51_p0 }
  0x14   : > { %p4271_p8 = pnand %p3012_p5, %p282_p7  ;;  %s4163_s22 = smov [#allocation7]  }
  0x15   : > { %s5736_s19 = scalar_select %p4261_p4, 1, 0 }
  0x16   : > { %s5737_s20 = scalar_select %p4266_p6, 1, 0 }
  0x17   : > { %s5739_s21 = scalar_select %p4271_p8, 1, 0 }
  0x18   : > { %5738 = sst [smem:[#allocation21_spill]] %s5737_s20  ;;  %s294_s23 = sshll.u32 %s4163_s22, 4  ;;  %s4275_s23 = int_to_ptr.vmem [resolvable:$true] %s294_s23 }
  0x19   : > { %p3415_p9 = pneg %p4271_p8  ;;  %s4164_s25 = smov [#allocation8]  }
  0x1a   : > { %s310_s26 = sshll.u32 %s4164_s25, 4  ;;  %s4165_s27 = smov [#allocation10]   ;;  %s4286_s26 = int_to_ptr.vmem [resolvable:$true] %s310_s26 }
  0x1b   : > { %p4282_p11 = pnand %p3415_p9, %p5718_p1  ;;  %s4288_s28 = sshll.u32 %s4165_s27, 4  ;;  %s327_s28 = int_to_ptr.vmem [resolvable:$true] %s4288_s28 }
  0x1c   : > { %s5741_s2 = sld [smem:[#allocation37_spill]] }
  0x1d   : > { %p4298_p13 = pneg %p4282_p11 }
  0x22   : > { %s3907_s11 = scalar_lea.hbm %s5741_s2, 4096 }
  0x23   : > { %p3908_p12 = scmp.ne.s32.totalorder %s5741_s2, %s3907_s11  ;;  %p3914_p5 = scmp.lt.u32.totalorder %s3907_s11, %s5741_s2 }
  0x25   : > { %p3910_p0 = pnand %p4298_p13, %p3908_p12 }
  0x27   : > { %p3911_p3 = pneg %p3910_p0 }
  0x29   : > { %p3916_p7 = pnand %p3914_p5, %p3911_p3 }
  0x2b   : > { %3919 = shalt.err (!%p3916_p7)
}
  0x2c   : > { %s3920_s29 = scalar_lea.vmem %s4275_s23, 4096  ;;  %p3928_p2 = scmp.lt.s32.totalorder %s4275_s23, %s4275_s23 }
  0x2d   : > { %p3921_p9 = scmp.ne.s32.totalorder %s4275_s23, %s3920_s29  ;;  %p3929_p6 = scmp.lt.s32.totalorder %s3920_s29, %s3920_s29 }
  0x2f   : > { %p3923_p10 = pnand %p3921_p9, %p4298_p13  ;;  %p3930_p12 = por %p3929_p6, %p3928_p2 }
  0x31   : > { %p3924_p1 = pneg %p3923_p10 }
  0x33   : > { %p3931_p0 = pnand %p3930_p12, %p3924_p1 }
  0x35   : > { %3934 = shalt.err (!%p3931_p0)
}
  0x36   : > { %s5724_s30 = smov 128   ;;  %s5726_s11 = smov 8  }
  0x37   : > { %3418 = dma.hbm_to_vmem [thread:$0]  (!%p4282_p11), %s5741_s2, 4096, %s4275_s23, [#allocation6], %s5724_s30, %s5724_s30, %s5726_s11  }
  0x38   : > { %s5743_s4 = sld [smem:[#allocation38_spill]] }
  0x3e   : > { %s3935_s29 = scalar_lea.hbm %s5743_s4, 4096 }
  0x3f   : > { %p3936_p1 = scmp.ne.s32.totalorder %s5743_s4, %s3935_s29  ;;  %p3942_p10 = scmp.lt.u32.totalorder %s3935_s29, %s5743_s4 }
  0x41   : > { %p3938_p2 = pnand %p3936_p1, %p4298_p13 }
  0x43   : > { %p3939_p6 = pneg %p3938_p2 }
  0x45   : > { %p3944_p3 = pnand %p3942_p10, %p3939_p6 }
  0x47   : > { %3947 = shalt.err (!%p3944_p3)
}
  0x48   : > { %s3948_s23 = scalar_lea.vmem %s4286_s26, 4096  ;;  %p3956_p12 = scmp.lt.s32.totalorder %s4286_s26, %s4286_s26 }
  0x49   : > { %p3949_p5 = scmp.ne.s32.totalorder %s4286_s26, %s3948_s23  ;;  %p3957_p0 = scmp.lt.s32.totalorder %s3948_s23, %s3948_s23 }
  0x4b   : > { %p3951_p7 = pnand %p3949_p5, %p4298_p13  ;;  %p3958_p1 = por %p3957_p0, %p3956_p12 }
  0x4d   : > { %p3952_p9 = pneg %p3951_p7 }
  0x4f   : > { %p3959_p2 = pnand %p3958_p1, %p3952_p9 }
  0x51   : > { %3962 = shalt.err (!%p3959_p2)
}
  0x52   : > { %3421 = dma.hbm_to_vmem [thread:$0]  (!%p4282_p11), %s5743_s4, 4096, %s4286_s26, [#allocation9], %s5724_s30, %s5724_s30, %s5726_s11  }
  0x53   : > { %s3963_s12 = scalar_lea.hbm %s5713_s6, 4096 }
  0x54   : > { %p3964_p6 = scmp.ne.s32.totalorder %s5713_s6, %s3963_s12  ;;  %p3970_p5 = scmp.lt.u32.totalorder %s3963_s12, %s5713_s6 }
  0x56   : > { %p3966_p10 = pnand %p3964_p6, %p4298_p13 }
  0x58   : > { %p3967_p3 = pneg %p3966_p10 }
  0x5a   : > { %p3972_p7 = pnand %p3970_p5, %p3967_p3 }
  0x5c   : > { %3975 = shalt.err (!%p3972_p7)
}
  0x5d   : > { %s3976_s23 = scalar_lea.vmem %s327_s28, 4096  ;;  %p3984_p1 = scmp.lt.s32.totalorder %s327_s28, %s327_s28 }
  0x5e   : > { %p3977_p9 = scmp.ne.s32.totalorder %s327_s28, %s3976_s23  ;;  %p3985_p2 = scmp.lt.s32.totalorder %s3976_s23, %s3976_s23 }
  0x60   : > { %p3979_p12 = pnand %p3977_p9, %p4298_p13  ;;  %p3986_p4 = por %p3985_p2, %p3984_p1 }
  0x62   : > { %p3980_p0 = pneg %p3979_p12 }
  0x64   : > { %p3987_p8 = pnand %p3986_p4, %p3980_p0 }
  0x66   : > { %3990 = shalt.err (!%p3987_p8)
}
  0x67   : > { %3424 = dma.hbm_to_vmem [thread:$0]  (!%p4282_p11), %s5713_s6, 4096, %s327_s28, [#allocation9], %s5724_s30, %s5724_s30, %s5726_s11  }
  0x68   : > { %s4168_s10 = smov [#allocation11]   ;;  %s3991_s18 = scalar_lea.hbm %s5715_s8, 2048 }
  0x69   : > { %s342_s13 = sshll.u32 %s4168_s10, 4  ;;  %p3992_p4 = scmp.ne.s32.totalorder %s5715_s8, %s3991_s18  ;;  %s343_s13 = int_to_ptr.vmem [resolvable:$true] %s342_s13 }
  0x6a   : > { %p3998_p10 = scmp.lt.u32.totalorder %s3991_s18, %s5715_s8 }
  0x6b   : > { %p3994_p8 = pnand %p3992_p4, %p4298_p13 }
  0x6d   : > { %p3995_p6 = pneg %p3994_p8 }
  0x6f   : > { %p4000_p3 = pnand %p3998_p10, %p3995_p6 }
  0x71   : > { %4003 = shalt.err (!%p4000_p3)
}
  0x72   : > { %s4004_s28 = scalar_lea.vmem %s343_s13, 2048  ;;  %p4012_p12 = scmp.lt.s32.totalorder %s343_s13, %s343_s13 }
  0x73   : > { %p4005_p5 = scmp.ne.s32.totalorder %s343_s13, %s4004_s28  ;;  %p4013_p0 = scmp.lt.s32.totalorder %s4004_s28, %s4004_s28 }
  0x75   : > { %p4007_p7 = pnand %p4005_p5, %p4298_p13  ;;  %p4014_p1 = por %p4013_p0, %p4012_p12 }
  0x77   : > { %p4008_p9 = pneg %p4007_p7 }
  0x79   : > { %p4015_p2 = pnand %p4014_p1, %p4008_p9 }
  0x7b   : > { %4018 = shalt.err (!%p4015_p2)
}
  0x7c   : > { %s4169_s26 = smov 64   ;;  %s4170_s22 = smov 4  }
  0x7d   : > { %3427 = dma.hbm_to_vmem [thread:$0]  (!%p4282_p11), %s5715_s8, 2048, %s343_s13, [#allocation12], %s4169_s26, %s4169_s26, %s4170_s22  }
  0x7e   : > { %s4389_s20 = sadd.s32 1, %s4161_s16   ;;  %s38_s18 = sadd.s32 1, %s4157_s15 }
  0x7f   : > { %s35_s12 = ssub.s32 %s4161_s16, %s4389_s20  ;;  %p45_p4 = scmp.ne.s32.totalorder %s4157_s15, %s4153_s14 }
  0x80   : > { %p36_p13 = scmp.eq.s32.totalorder %s35_s12, 0  ;;  %p46_p8 = scmp.eq.s32.totalorder %s4161_s16, 0 }
  0x81   : > { %p5744_p10 = scmp.eq.s32.totalorder %s4252_s17, 1  ;;  %p3443_p5 = scmp.lt.s32.totalorder %s4161_s16, 2 }
  0x82   : > { %s4398_s25 = scalar_select %p36_p13, %s4157_s15, %s38_s18  }
  0x83   : > { %p47_p6 = por %p46_p8, %p45_p4  ;;  %p4402_p3 = por %p5744_p10, %p45_p4 }
  0x84   : > { %s359_s24 = sand.u32 1, %s4157_s15   ;;  %s3278_s13 = sshll.u32 %s4161_s16, 12 }
  0x85   : > { %s3018_s29 = sshll.u32 %s359_s24, 8  ;;  %s5746_s0 = sld [smem:[#allocation36_spill]] }
  0x86   : > { %s363_s22 = scalar_lea.vmem [#allocation2], %s3018_s29  ;;  %p4416_p11 = pnand %p3443_p5, %p47_p6 }
  0x87   : > { %s370_s9 = sshll.u32 %s363_s22, 4  ;;  %s4423_s23 = scalar_lea.hbm %s5708_s1, %s3278_s13  ;;  %s4414_s9 = int_to_ptr.vmem [resolvable:$true] %s370_s9 }
  0x88   : > { %s384_s28 = scalar_lea.vmem [#allocation5], %s3018_s29  ;;  %s4427_s11 = scalar_lea.sflag [#allocation3], %s359_s24 }
  0x89   : > { %s4425_s30 = sshll.u32 %s384_s28, 4  ;;  %p4021_p9 = pneg %p4416_p11  ;;  %s4459_s30 = int_to_ptr.vmem [resolvable:$true] %s4425_s30 }
  0x8b   : > { %s4412_s26 = scalar_lea.hbm %s5746_s0, %s3278_s13  ;;  %s4024_s12 = scalar_lea.hbm %s5746_s0, 8192 }
  0x8c   : > { %s4019_s22 = scalar_lea.hbm %s4412_s26, 4096  ;;  %p4025_p1 = scmp.lt.u32.totalorder %s4412_s26, %s5746_s0 }
  0x8d   : > { %p4020_p7 = scmp.ne.s32.totalorder %s4412_s26, %s4019_s22  ;;  %p4026_p2 = scmp.lt.u32.totalorder %s4024_s12, %s4019_s22 }
  0x8e   : > { %p4028_p4 = scmp.lt.u32.totalorder %s4019_s22, %s4412_s26 }
  0x8f   : > { %p4022_p12 = pnand %p4021_p9, %p4020_p7  ;;  %p4027_p13 = por %p4026_p2, %p4025_p1 }
  0x91   : > { %p4023_p0 = pneg %p4022_p12  ;;  %p4029_p8 = por %p4028_p4, %p4027_p13 }
  0x93   : > { %p4030_p6 = pnand %p4029_p8, %p4023_p0 }
  0x95   : > { %4033 = shalt.err (!%p4030_p6)
}
  0x96   : > { %s4034_s24 = scalar_lea.vmem %s4414_s9, 4096  ;;  %s4171_s2 = smov [#allocation2]  }
  0x97   : > { %p4035_p10 = scmp.ne.s32.totalorder %s4414_s9, %s4034_s24  ;;  %s4039_s4 = sshll.u32 %s4171_s2, 4  ;;  %s4040_s4 = int_to_ptr.vmem [resolvable:$false] %s4039_s4 }
  0x98   : > { %s4041_s29 = scalar_lea.vmem %s4040_s4, 8192  ;;  %p4042_p12 = scmp.lt.s32.totalorder %s4414_s9, %s4040_s4 }
  0x99   : > { %p4037_p5 = pnand %p4035_p10, %p4021_p9  ;;  %p4043_p1 = scmp.lt.s32.totalorder %s4041_s29, %s4034_s24 }
  0x9b   : > { %p4038_p7 = pneg %p4037_p5  ;;  %p4044_p2 = por %p4043_p1, %p4042_p12 }
  0x9d   : > { %p4045_p13 = pnand %p4044_p2, %p4038_p7 }
  0x9f   : > { %4048 = shalt.err (!%p4045_p13)
}
  0xa0   : > { %s5748_s28 = smov 8   ;;  %s5749_s22 = smov 128  }
  0xa1   : > { %3431 = dma.hbm_to_vmem [thread:$0]  (!%p4416_p11), %s4412_s26, 4096, %s4414_s9, %s4427_s11, %s5749_s22, %s5749_s22, %s5748_s28  }
  0xa2   : > { %s380_s12 = sand.u32 1, %s4161_s16   ;;  %s4049_s13 = scalar_lea.hbm %s4423_s23, 4096 }
  0xa3   : > { %s4462_s18 = scalar_lea.sflag [#allocation6], %s380_s12  ;;  %p4050_p0 = scmp.ne.s32.totalorder %s4423_s23, %s4049_s13 }
  0xa4   : > { %s4054_s4 = scalar_lea.hbm %s5708_s1, 8192  ;;  %p4055_p6 = scmp.lt.u32.totalorder %s4423_s23, %s5708_s1 }
  0xa5   : > { %p4052_p4 = pnand %p4050_p0, %p4021_p9  ;;  %p4056_p10 = scmp.lt.u32.totalorder %s4054_s4, %s4049_s13 }
  0xa6   : > { %p4058_p7 = scmp.lt.u32.totalorder %s4049_s13, %s4423_s23 }
  0xa7   : > { %p4053_p8 = pneg %p4052_p4  ;;  %p4057_p5 = por %p4056_p10, %p4055_p6 }
  0xa9   : > { %p4059_p12 = por %p4058_p7, %p4057_p5 }
  0xab   : > { %p4060_p1 = pnand %p4059_p12, %p4053_p8 }
  0xad   : > { %4063 = shalt.err (!%p4060_p1)
}
  0xae   : > { %s4064_s11 = scalar_lea.vmem %s4459_s30, 4096  ;;  %s4172_s26 = smov [#allocation5]  }
  0xaf   : > { %p4065_p2 = scmp.ne.s32.totalorder %s4459_s30, %s4064_s11  ;;  %s4069_s9 = sshll.u32 %s4172_s26, 4  ;;  %s4070_s9 = int_to_ptr.vmem [resolvable:$false] %s4069_s9 }
  0xb0   : > { %s4071_s0 = scalar_lea.vmem %s4070_s9, 8192  ;;  %p4072_p4 = scmp.lt.s32.totalorder %s4459_s30, %s4070_s9 }
  0xb1   : > { %p4067_p13 = pnand %p4065_p2, %p4021_p9  ;;  %p4073_p6 = scmp.lt.s32.totalorder %s4071_s0, %s4064_s11 }
  0xb3   : > { %p4068_p0 = pneg %p4067_p13  ;;  %p4074_p10 = por %p4073_p6, %p4072_p4 }
  0xb5   : > { %p4075_p5 = pnand %p4074_p10, %p4068_p0 }
  0xb7   : > { %4078 = shalt.err (!%p4075_p5)
}
  0xb8   : > { %3434 = dma.hbm_to_vmem [thread:$0]  (!%p4416_p11), %s4423_s23, 4096, %s4459_s30, %s4462_s18, %s5749_s22, %s5749_s22, %s5748_s28  }
  0xb9   : > { %p5750_p9 = scmp.ne.s32.totalorder %s5739_s21, 0 }
  0xbb   : > { %403 = sbr.rel (%p5750_p9) target bundleno = 1138 (0x472), region = 60 }
  0xc2   : > { %s4494_s12 = sand.u32 1, %s4153_s14   ;;  %p5751_p8 = scmp.ne.s32.totalorder %s5736_s19, 0 }
  0xc3   : > { %s4497_s13 = sshll.u32 %s4494_s12, 8  ;;  %s406_s10 = scalar_lea.sflag [#allocation3], %s4494_s12 }
  0xc4   : > { %s4501_s24 = scalar_lea.vmem [#allocation2], %s4497_s13 }
  0xc5   : > { %4124 = dma.done.wait (%p5751_p8), %s406_s10, 4096  }
  0xc6   : > { %4126 = vsyncadd (%p5751_p8), %s406_s10, 4294963200  ;;  %s414_s21 = sand.u32 1, %s4252_s17   ;;  %s4509_s23 = scalar_lea.vmem [#allocation5], %s4497_s13 }
  0xc7   : > { %s415_s30 = scalar_lea.sflag [#allocation6], %s414_s21 }
  0xc8   : > { %4128 = dma.done.wait (%p5751_p8), %s415_s30, 4096  }
  0xc9   : > { %4130 = vsyncadd (%p5751_p8), %s415_s30, 4294963200  ;;  %p5752_p11 = scmp.eq.s32.totalorder %s4252_s17, 0 }
  0xcb   : > { %4132 = dma.done.wait (%p5752_p11), [#allocation6], 4096   ;;  %p5753_p7 = pmov %p5752_p11 }
  0xcd   : > { %4134 = vsyncadd (%p5753_p7), [#allocation6], 4294963200  ;;  %p5754_p12 = pmov %p5753_p7 }
  0xce   : > { %p5755_p1 = pmov %p5753_p7 }
  0xcf   : > { %4136 = dma.done.wait (%p5754_p12), [#allocation9], 8192  }
  0xd0   : > { %4138 = vsyncadd (%p5755_p1), [#allocation9], 4294959104  ;;  %p5756_p2 = pmov %p5755_p1 }
  0xd1   : > { %p5757_p13 = pmov %p5755_p1 }
  0xd2   : > { %4140 = dma.done.wait (%p5756_p2), [#allocation12], 2048  }
  0xd3   : > { %4142 = vsyncadd (%p5757_p13), [#allocation12], 4294965248  ;;  %v3491_v0 = vld [vmem:[#allocation7 + $0x4] ss:$8 sps:$4 sm:$0xff]   ;;  %v3493_v1 = vld [vmem:[#allocation7] ss:$8 sps:$4 sm:$0xff]  }
  0xd4   : > { %780 = vmatprep.subr.bf16.mxu0 %v3491_v0  ;;  %v3494_v2 = vld [vmem:[#allocation7 + $0x14] ss:$8 sps:$4 sm:$0xff]   ;;  %v3496_v3 = vld [vmem:[#allocation7 + $0x10] ss:$8 sps:$4 sm:$0xff]   ;;  %v3497_v4 = vld [vmem:[#allocation7 + $0x24] ss:$8 sps:$4 sm:$0xff]  }
  0xd5   : > { %781 = vmatpush1.bf16.msra.mxu0 %v3493_v1  ;;  %v3499_v5 = vld [vmem:[#allocation7 + $0x20] ss:$8 sps:$4 sm:$0xff]   ;;  %v3500_v6 = vld [vmem:[#allocation7 + $0x34] ss:$8 sps:$4 sm:$0xff]   ;;  %v3512_v7 = vld [vmem:[#allocation8 + $0x4] ss:$8 sps:$4 sm:$0xff]  }
  0xd6   : > { %782 = vmatprep.subr.bf16.mxu0 %v3494_v2  ;;  %v3514_v8 = vld [vmem:[#allocation8] ss:$8 sps:$4 sm:$0xff]   ;;  %v3502_v9 = vld [vmem:[#allocation7 + $0x30] ss:$8 sps:$4 sm:$0xff]   ;;  %v3503_v10 = vld [vmem:[#allocation7 + $0x44] ss:$8 sps:$4 sm:$0xff]   ;;  %1177 = vmatprep.subr.bf16.mxu1 %v3512_v7 }
  0xd7   : > { %v3518_v11 = vld [vmem:[#allocation8 + $0x14] ss:$8 sps:$4 sm:$0xff]   ;;  %1178 = vmatpush1.bf16.msra.mxu1 %v3514_v8  ;;  %v3520_v12 = vld [vmem:[#allocation8 + $0x10] ss:$8 sps:$4 sm:$0xff]   ;;  %v3505_v13 = vld [vmem:[#allocation7 + $0x40] ss:$8 sps:$4 sm:$0xff]  }
  0xd8   : > { %1179 = vmatprep.subr.bf16.mxu1 %v3518_v11  ;;  %v3524_v14 = vld [vmem:[#allocation8 + $0x24] ss:$8 sps:$4 sm:$0xff]   ;;  %v3506_v15 = vld [vmem:[#allocation7 + $0x54] ss:$8 sps:$4 sm:$0xff]   ;;  %v3526_v16 = vld [vmem:[#allocation8 + $0x20] ss:$8 sps:$4 sm:$0xff]  }
  0xd9   : > { %783 = vmatpush1.bf16.msra.mxu0 %v3496_v3  ;;  %v3530_v17 = vld [vmem:[#allocation8 + $0x34] ss:$8 sps:$4 sm:$0xff]   ;;  %v3508_v18 = vld [vmem:[#allocation7 + $0x50] ss:$8 sps:$4 sm:$0xff]   ;;  %v3509_v19 = vld [vmem:[#allocation7 + $0x64] ss:$8 sps:$4 sm:$0xff]  }
  0xda   : > { %784 = vmatprep.subr.bf16.mxu0 %v3497_v4  ;;  %v3532_v20 = vld [vmem:[#allocation8 + $0x30] ss:$8 sps:$4 sm:$0xff]   ;;  %v3536_v21 = vld [vmem:[#allocation8 + $0x44] ss:$8 sps:$4 sm:$0xff]   ;;  %v3511_v22 = vld [vmem:[#allocation7 + $0x60] ss:$8 sps:$4 sm:$0xff]  }
  0xdb   : > { %1180 = vmatpush1.bf16.msra.mxu1 %v3520_v12  ;;  %v3515_v23 = vld [vmem:[#allocation7 + $0x74] ss:$8 sps:$4 sm:$0xff]   ;;  %v3538_v24 = vld [vmem:[#allocation8 + $0x40] ss:$8 sps:$4 sm:$0xff]   ;;  %v3517_v26 = vld [vmem:[#allocation7 + $0x70] ss:$8 sps:$4 sm:$0xff]  }
  0xdc   : > { %1181 = vmatprep.subr.bf16.mxu1 %v3524_v14  ;;  %v3542_v25 = vld [vmem:[#allocation8 + $0x54] ss:$8 sps:$4 sm:$0xff]   ;;  %v3521_v27 = vld [vmem:[#allocation7 + $0x84] ss:$8 sps:$4 sm:$0xff]   ;;  %v3544_v28 = vld [vmem:[#allocation8 + $0x50] ss:$8 sps:$4 sm:$0xff]  }
  0xdd   : > { %785 = vmatpush1.bf16.msra.mxu0 %v3499_v5  ;;  %v3548_v29 = vld [vmem:[#allocation8 + $0x64] ss:$8 sps:$4 sm:$0xff]   ;;  %v3523_v30 = vld [vmem:[#allocation7 + $0x80] ss:$8 sps:$4 sm:$0xff]   ;;  %v3527_v31 = vld [vmem:[#allocation7 + $0x94] ss:$8 sps:$4 sm:$0xff]  }
  0xde   : > { %786 = vmatprep.subr.bf16.mxu0 %v3500_v6  ;;  %v3550_v32 = vld [vmem:[#allocation8 + $0x60] ss:$8 sps:$4 sm:$0xff]   ;;  %v3554_v33 = vld [vmem:[#allocation8 + $0x74] ss:$8 sps:$4 sm:$0xff]   ;;  %v3529_v35 = vld [vmem:[#allocation7 + $0x90] ss:$8 sps:$4 sm:$0xff]  }
  0xdf   : > { %1182 = vmatpush1.bf16.msra.mxu1 %v3526_v16  ;;  %v512_v34 = vld [vmem:[%s4509_s23] sm:$0xff]  ;;  %v513_v36 = vld [vmem:[%s4509_s23 + $0x8] sm:$0xff]  ;;  %v3556_v39 = vld [vmem:[#allocation8 + $0x70] ss:$8 sps:$4 sm:$0xff]   ;;  %s5792_s26 = sld [smem:[#allocation39_spill]]  ;;  %s5591_s9 = scalar_lea.vmem [#allocation13], %s4497_s13 }
  0xe0   : > { %1183 = vmatprep.subr.bf16.mxu1 %v3530_v17  ;;  %v3533_v37 = vld [vmem:[#allocation7 + $0xa4] ss:$8 sps:$4 sm:$0xff]   ;;  %v545_v38 = vpack.c.bf16 %v513_v36, %v512_v34  ;;  %v3535_v41 = vld [vmem:[#allocation7 + $0xa0] ss:$8 sps:$4 sm:$0xff]   ;;  %v3539_v42 = vld [vmem:[#allocation7 + $0xb4] ss:$8 sps:$4 sm:$0xff]  }
  0xe1   : > { %787 = vmatpush1.bf16.msra.mxu0 %v3502_v9  ;;  %v3560_v40 = vld [vmem:[#allocation8 + $0x84] ss:$8 sps:$4 sm:$0xff]   ;;  %v3562_v43 = vld [vmem:[#allocation8 + $0x80] ss:$8 sps:$4 sm:$0xff]   ;;  %v3566_v44 = vld [vmem:[#allocation8 + $0x94] ss:$8 sps:$4 sm:$0xff]  }
  0xe2   : > { %788 = vmatprep.subr.bf16.mxu0 %v3503_v10  ;;  %812 = vmatprep.mubr.bf16.mxu0 %v545_v38  ;;  %v3541_v45 = vld [vmem:[#allocation7 + $0xb0] ss:$8 sps:$4 sm:$0xff]   ;;  %v3545_v46 = vld [vmem:[#allocation7 + $0xc4] ss:$8 sps:$4 sm:$0xff]   ;;  %v3547_v49 = vld [vmem:[#allocation7 + $0xc0] ss:$8 sps:$4 sm:$0xff]  }
  0xe3   : > { %1184 = vmatpush1.bf16.msra.mxu1 %v3532_v20  ;;  %1209 = vmatprep.mubr.bf16.mxu1 %v545_v38  ;;  %v3568_v47 = vld [vmem:[#allocation8 + $0x90] ss:$8 sps:$4 sm:$0xff]   ;;  %v3569_v48 = vld [vmem:[#allocation8 + $0xa4] ss:$8 sps:$4 sm:$0xff]   ;;  %v3551_v50 = vld [vmem:[#allocation7 + $0xd4] ss:$8 sps:$4 sm:$0xff]  }
  0xe4   : > { %1185 = vmatprep.subr.bf16.mxu1 %v3536_v21  ;;  %v3571_v51 = vld [vmem:[#allocation8 + $0xa0] ss:$8 sps:$4 sm:$0xff]   ;;  %v3572_v52 = vld [vmem:[#allocation8 + $0xb4] ss:$8 sps:$4 sm:$0xff]   ;;  %v3553_v53 = vld [vmem:[#allocation7 + $0xd0] ss:$8 sps:$4 sm:$0xff]  }
  0xe5   : > { %789 = vmatpush1.bf16.msra.mxu0 %v3505_v13  ;;  %v3557_v54 = vld [vmem:[#allocation7 + $0xe4] ss:$8 sps:$4 sm:$0xff]   ;;  %v3574_v55 = vld [vmem:[#allocation8 + $0xb0] ss:$8 sps:$4 sm:$0xff]   ;;  %v3559_v57 = vld [vmem:[#allocation7 + $0xe0] ss:$8 sps:$4 sm:$0xff]  }
  0xe6   : > { %790 = vmatprep.subr.bf16.mxu0 %v3506_v15  ;;  %v3575_v56 = vld [vmem:[#allocation8 + $0xc4] ss:$8 sps:$4 sm:$0xff]   ;;  %v3563_v58 = vld [vmem:[#allocation7 + $0xf4] ss:$8 sps:$4 sm:$0xff]   ;;  %v3577_v59 = vld [vmem:[#allocation8 + $0xc0] ss:$8 sps:$4 sm:$0xff]  }
  0xe7   : > { %1186 = vmatpush1.bf16.msra.mxu1 %v3538_v24  ;;  %v3578_v60 = vld [vmem:[#allocation8 + $0xd4] ss:$8 sps:$4 sm:$0xff]   ;;  %v3565_v61 = vld [vmem:[#allocation7 + $0xf0] ss:$8 sps:$4 sm:$0xff]   ;;  %v480_v62 = vld [vmem:[%s4501_s24] sm:$0xff]  ;;  %s3280_s0 = sshll.u32 %s4252_s17, 12 }
  0xe8   : > { %1187 = vmatprep.subr.bf16.mxu1 %v3542_v25  ;;  %v481_v63 = vld [vmem:[%s4501_s24 + $0x8] sm:$0xff]  ;;  %v514_v0 = vld [vmem:[%s4509_s23 + $0x10] sm:$0xff]  ;;  %v515_v1 = vld [vmem:[%s4509_s23 + $0x18] sm:$0xff]  ;;  %s2877_s13 = sshll.u32 %s5591_s9, 4  ;;  %s5793_s21 = sld [smem:[#allocation40_spill]]  ;;  %s5660_s13 = int_to_ptr.vmem [resolvable:$true] %s2877_s13 }
  0xe9   : > { %791 = vmatpush1.bf16.msra.mxu0 %v3508_v18  ;;  %v3580_v2 = vld [vmem:[#allocation8 + $0xd0] ss:$8 sps:$4 sm:$0xff]   ;;  %v544_v3 = vpack.c.bf16 %v481_v63, %v480_v62  ;;  %v3581_v4 = vld [vmem:[#allocation8 + $0xe4] ss:$8 sps:$4 sm:$0xff]   ;;  %v547_v5 = vpack.c.bf16 %v515_v1, %v514_v0  ;;  %v3583_v6 = vld [vmem:[#allocation8 + $0xe0] ss:$8 sps:$4 sm:$0xff]  }
  0xea   : > { %792 = vmatprep.subr.bf16.mxu0 %v3509_v19  ;;  %v3587_v7 = vld [vmem:[#allocation10] ss:$8 sps:$4 sm:$0xff]   ;;  %v482_v8 = vld [vmem:[%s4501_s24 + $0x10] sm:$0xff]  ;;  %v483_v9 = vld [vmem:[%s4501_s24 + $0x18] sm:$0xff]  ;;  %s2864_s17 = scalar_lea.sflag [#allocation4], %s4494_s12  ;;  %s4173_s19 = smov [#allocation13]  }
  0xeb   : > { %1188 = vmatpush1.bf16.msra.mxu1 %v3544_v28  ;;  %v3589_v10 = vld [vmem:[#allocation10 + $0x4] ss:$8 sps:$4 sm:$0xff]   ;;  %v3584_v12 = vld [vmem:[#allocation8 + $0xf4] ss:$8 sps:$4 sm:$0xff]   ;;  %v3586_v15 = vld [vmem:[#allocation8 + $0xf0] ss:$8 sps:$4 sm:$0xff]   ;;  %v546_v18 = vpack.c.bf16 %v483_v9, %v482_v8 }
  0xec   : > { %1189 = vmatprep.subr.bf16.mxu1 %v3548_v29  ;;  %v516_v11 = vld [vmem:[%s4509_s23 + $0x20] sm:$0xff]  ;;  %v3592_v13 = vld [vmem:[#allocation10 + $0x14] ss:$8 sps:$4 sm:$0xff]   ;;  %v517_v14 = vld [vmem:[%s4509_s23 + $0x28] sm:$0xff]  ;;  %s4083_s28 = sshll.u32 %s4173_s19, 4  ;;  %s4084_s28 = int_to_ptr.vmem [resolvable:$false] %s4083_s28 }
  0xed   : > { %793 = vmatpush1.bf16.msra.mxu0 %v3511_v22  ;;  %v3590_v16 = vld [vmem:[#allocation10 + $0x10] ss:$8 sps:$4 sm:$0xff]   ;;  %v3595_v17 = vld [vmem:[#allocation10 + $0x24] ss:$8 sps:$4 sm:$0xff]   ;;  %v549_v19 = vpack.c.bf16 %v517_v14, %v516_v11  ;;  %v3593_v20 = vld [vmem:[#allocation10 + $0x20] ss:$8 sps:$4 sm:$0xff]   ;;  %p4086_p10 = scmp.lt.s32.totalorder %s5660_s13, %s4084_s28 }
  0xee   : > { %794 = vmatprep.subr.bf16.mxu0 %v3515_v23  ;;  %v3598_v21 = vld [vmem:[#allocation10 + $0x34] ss:$8 sps:$4 sm:$0xff]   ;;  %v484_v22 = vld [vmem:[%s4501_s24 + $0x20] sm:$0xff]  ;;  %v485_v23 = vld [vmem:[%s4501_s24 + $0x28] sm:$0xff]  ;;  %s5658_s30 = scalar_lea.hbm %s5793_s21, %s3280_s0  ;;  %s4085_s22 = scalar_lea.vmem %s4084_s28, 8192 }
  0xef   : > { %1190 = vmatpush1.bf16.msra.mxu1 %v3550_v32  ;;  %v518_v24 = vld [vmem:[%s4509_s23 + $0x30] sm:$0xff]  ;;  %v519_v25 = vld [vmem:[%s4509_s23 + $0x38] sm:$0xff]  ;;  %v548_v28 = vpack.c.bf16 %v485_v23, %v484_v22  ;;  %v3599_v29 = vld [vmem:[#allocation10 + $0x40] ss:$8 sps:$4 sm:$0xff]  }
  0xf0   : > { %1191 = vmatprep.subr.bf16.mxu1 %v3554_v33  ;;  %v486_v32 = vld [vmem:[%s4501_s24 + $0x30] sm:$0xff]  ;;  %v487_v33 = vld [vmem:[%s4501_s24 + $0x38] sm:$0xff]  ;;  %v520_v34 = vld [vmem:[%s4509_s23 + $0x40] sm:$0xff] }
  0xf1   : > { %795 = vmatpush1.bf16.msra.mxu0 %v3517_v26  ;;  %v3596_v26 = vld [vmem:[#allocation10 + $0x30] ss:$8 sps:$4 sm:$0xff]   ;;  %v550_v38 = vpack.c.bf16 %v487_v33, %v486_v32  ;;  %v493_v62 = vld [vmem:[%s4501_s24 + $0x68] sm:$0xff]  ;;  %v496_v9 = vld [vmem:[%s4501_s24 + $0x80] sm:$0xff] }
  0xf2   : > { %796 = vmatprep.subr.bf16.mxu0 %v3521_v27  ;;  %v3601_v27 = vld [vmem:[#allocation10 + $0x44] ss:$8 sps:$4 sm:$0xff]   ;;  %v3602_v36 = vld [vmem:[#allocation10 + $0x50] ss:$8 sps:$4 sm:$0xff]  }
  0xf3   : > { %1192 = vmatpush1.bf16.msra.mxu1 %v3556_v39  ;;  %v3605_v39 = vld [vmem:[#allocation10 + $0x60] ss:$8 sps:$4 sm:$0xff]   ;;  %v526_v63 = vld [vmem:[%s4509_s23 + $0x70] sm:$0xff]  ;;  %v527_v0 = vld [vmem:[%s4509_s23 + $0x78] sm:$0xff] }
  0xf4   : > { %1193 = vmatprep.subr.bf16.mxu1 %v3560_v40  ;;  %v530_v11 = vld [vmem:[%s4509_s23 + $0x90] sm:$0xff]  ;;  %v501_v22 = vld [vmem:[%s4501_s24 + $0xa8] sm:$0xff]  ;;  %v504_v33 = vld [vmem:[%s4501_s24 + $0xc0] sm:$0xff] }
  0xf5   : > { %797 = vmatpush1.bf16.msra.mxu0 %v3523_v30  ;;  %v551_v30 = vpack.c.bf16 %v519_v25, %v518_v24  ;;  %v534_v23 = vld [vmem:[%s4509_s23 + $0xb0] sm:$0xff]  ;;  %v535_v24 = vld [vmem:[%s4509_s23 + $0xb8] sm:$0xff] }
  0xf6   : > { %798 = vmatprep.subr.bf16.mxu0 %v3527_v31  ;;  %v3604_v31 = vld [vmem:[#allocation10 + $0x54] ss:$8 sps:$4 sm:$0xff]  }
  0xf7   : > { %1194 = vmatpush1.bf16.msra.mxu1 %v3562_v43  ;;  %v489_v43 = vld [vmem:[%s4501_s24 + $0x48] sm:$0xff] }
  0xf8   : > { %1195 = vmatprep.subr.bf16.mxu1 %v3566_v44  ;;  %v522_v44 = vld [vmem:[%s4509_s23 + $0x50] sm:$0xff] }
  0xf9   : > { %799 = vmatpush1.bf16.msra.mxu0 %v3529_v35  ;;  %v521_v35 = vld [vmem:[%s4509_s23 + $0x48] sm:$0xff] }
  0xfa   : > { %800 = vmatprep.subr.bf16.mxu0 %v3533_v37  ;;  %v3607_v37 = vld [vmem:[#allocation10 + $0x64] ss:$8 sps:$4 sm:$0xff]   ;;  %v553_v40 = vpack.c.bf16 %v521_v35, %v520_v34  ;;  %v538_v35 = vld [vmem:[%s4509_s23 + $0xd0] sm:$0xff] }
  0xfb   : > { %1196 = vmatpush1.bf16.msra.mxu1 %v3568_v47  ;;  %v3613_v47 = vld [vmem:[#allocation10 + $0x84] ss:$8 sps:$4 sm:$0xff]  }
  0xfc   : > { %1197 = vmatprep.subr.bf16.mxu1 %v3569_v48  ;;  %v505_v34 = vld [vmem:[%s4501_s24 + $0xc8] sm:$0xff] }
  0xfd   : > { %801 = vmatpush1.bf16.msra.mxu0 %v3535_v41  ;;  %v3610_v41 = vld [vmem:[#allocation10 + $0x74] ss:$8 sps:$4 sm:$0xff]  }
  0xfe   : > { %802 = vmatprep.subr.bf16.mxu0 %v3539_v42  ;;  %v488_v42 = vld [vmem:[%s4501_s24 + $0x40] sm:$0xff] }
  0xff   : > { %1198 = vmatpush1.bf16.msra.mxu1 %v3571_v51  ;;  %v552_v48 = vpack.c.bf16 %v489_v43, %v488_v42  ;;  %v3616_v51 = vld [vmem:[#allocation10 + $0x94] ss:$8 sps:$4 sm:$0xff]   ;;  %v541_v42 = vld [vmem:[%s4509_s23 + $0xe8] sm:$0xff] }
 0x100   : > { %1199 = vmatprep.subr.bf16.mxu1 %v3572_v52  ;;  %v490_v52 = vld [vmem:[%s4501_s24 + $0x50] sm:$0xff] }
 0x101   : > { %803 = vmatpush1.bf16.msra.mxu0 %v3541_v45  ;;  %v523_v45 = vld [vmem:[%s4509_s23 + $0x58] sm:$0xff] }
 0x102   : > { %804 = vmatprep.subr.bf16.mxu0 %v3545_v46  ;;  %v3608_v46 = vld [vmem:[#allocation10 + $0x70] ss:$8 sps:$4 sm:$0xff]  }
 0x103   : > { %1200 = vmatpush1.bf16.msra.mxu1 %v3574_v55  ;;  %v525_v55 = vld [vmem:[%s4509_s23 + $0x68] sm:$0xff] }
 0x104   : > { %1201 = vmatprep.subr.bf16.mxu1 %v3575_v56  ;;  %v3614_v56 = vld [vmem:[#allocation10 + $0x90] ss:$8 sps:$4 sm:$0xff]  }
 0x105   : > { %805 = vmatpush1.bf16.msra.mxu0 %v3547_v49  ;;  %v555_v49 = vpack.c.bf16 %v523_v45, %v522_v44  ;;  %v3620_v45 = vld [vmem:[#allocation10 + $0xb0] ss:$8 sps:$4 sm:$0xff]  }
 0x106   : > { %806 = vmatprep.subr.bf16.mxu0 %v3551_v50  ;;  %v3611_v50 = vld [vmem:[#allocation10 + $0x80] ss:$8 sps:$4 sm:$0xff]  }
 0x107   : > { %1202 = vmatpush1.bf16.msra.mxu1 %v3577_v59 }
 0x108   : > { %1203 = vmatprep.subr.bf16.mxu1 %v3578_v60  ;;  %v3617_v60 = vld [vmem:[#allocation10 + $0xa0] ss:$8 sps:$4 sm:$0xff]  }
 0x109   : > { %807 = vmatpush1.bf16.msra.mxu0 %v3553_v53  ;;  %v491_v53 = vld [vmem:[%s4501_s24 + $0x58] sm:$0xff] }
 0x10a   : > { %808 = vmatprep.subr.bf16.mxu0 %v3557_v54  ;;  %v524_v54 = vld [vmem:[%s4509_s23 + $0x60] sm:$0xff] }
 0x10b   : > { %1204 = vmatpush1.bf16.msra.mxu1 %v3580_v2  ;;  %v557_v59 = vpack.c.bf16 %v525_v55, %v524_v54  ;;  %v559_v2 = vpack.c.bf16 %v527_v0, %v526_v63  ;;  %v3628_v55 = vld [vmem:[#allocation10 + $0xd4] ss:$8 sps:$4 sm:$0xff]   ;;  %v3632_v63 = vld [vmem:[#allocation10 + $0xf0] ss:$8 sps:$4 sm:$0xff]   ;;  %v610_v0 = vlaneseq }
 0x10c   : > { %1205 = vmatprep.subr.bf16.mxu1 %v3581_v4  ;;  %v495_v4 = vld [vmem:[%s4501_s24 + $0x78] sm:$0xff] }
 0x10d   : > { %809 = vmatpush1.bf16.msra.mxu0 %v3559_v57  ;;  %v3619_v57 = vld [vmem:[#allocation10 + $0xa4] ss:$8 sps:$4 sm:$0xff]  }
 0x10e   : > { %810 = vmatprep.subr.bf16.mxu0 %v3563_v58  ;;  %v554_v58 = vpack.c.bf16 %v491_v53, %v490_v52  ;;  %v3623_v52 = vld [vmem:[#allocation10 + $0xc0] ss:$8 sps:$4 sm:$0xff]  }
 0x10f   : > { %1206 = vmatpush1.bf16.msra.mxu1 %v3583_v6  ;;  %v529_v6 = vld [vmem:[%s4509_s23 + $0x88] sm:$0xff] }
 0x110   : > { %1207 = vmatprep.subr.bf16.mxu1 %v3584_v12  ;;  %v531_v12 = vld [vmem:[%s4509_s23 + $0x98] sm:$0xff] }
 0x111   : > { %811 = vmatpush1.bf16.msra.mxu0 %v3565_v61  ;;  %v492_v61 = vld [vmem:[%s4501_s24 + $0x60] sm:$0xff]  ;;  %v563_v14 = vpack.c.bf16 %v531_v12, %v530_v11 }
 0x112   : > { %2246 = vmatprep.subr.bf16.mxu0 %v3589_v10  ;;  %v556_v1 = vpack.c.bf16 %v493_v62, %v492_v61  ;;  %v497_v10 = vld [vmem:[%s4501_s24 + $0x88] sm:$0xff]  ;;  %v3634_v62 = vld [vmem:[#allocation10 + $0xf4] ss:$8 sps:$4 sm:$0xff]  }
 0x113   : > { %1208 = vmatpush1.bf16.msra.mxu1 %v3586_v15  ;;  %v498_v15 = vld [vmem:[%s4501_s24 + $0x90] sm:$0xff]  ;;  %v3629_v61 = vld [vmem:[#allocation10 + $0xe0] ss:$8 sps:$4 sm:$0xff]  }
 0x114   : > { %813 = vmatmul.mubr.bf16.vlgmr.msra.gmra.mrb[0].mxu0 %v544_v3 }
 0x115   : > { %822 = vmatprep.mubr.bf16.mxu0 %v547_v5  ;;  %2247 = vmatpush1.bf16.msra.mxu0 %v3587_v7 }
 0x116   : > { %2248 = vmatprep.subr.bf16.mxu0 %v3592_v13  ;;  %1210 = vmatmul.mubr.bf16.vlgmr.msra.gmra.mrb[0].mxu1 %v544_v3  ;;  %v494_v3 = vld [vmem:[%s4501_s24 + $0x70] sm:$0xff]  ;;  %v560_v13 = vpack.c.bf16 %v497_v10, %v496_v9 }
 0x117   : > { %1219 = vmatprep.mubr.bf16.mxu1 %v547_v5  ;;  %v528_v5 = vld [vmem:[%s4509_s23 + $0x80] sm:$0xff]  ;;  %v558_v7 = vpack.c.bf16 %v495_v4, %v494_v3 }
 0x118   : > { %v561_v8 = vpack.c.bf16 %v529_v6, %v528_v5  ;;  %v608_v3 = vld [vmem:[%s5710_s3] sm:$0x3] }
 0x119   : > { %2249 = vmatpush1.bf16.msra.mxu0 %v3590_v16  ;;  %v499_v16 = vld [vmem:[%s4501_s24 + $0x98] sm:$0xff] }
 0x11a   : > { %2250 = vmatprep.subr.bf16.mxu0 %v3595_v17  ;;  %v532_v17 = vld [vmem:[%s4509_s23 + $0xa0] sm:$0xff] }
 0x11c   : > { %823 = vmatmul.mubr.bf16.gmra.mrb[4].mxu0 %v546_v18 }
 0x11d   : > { %832 = vmatprep.mubr.bf16.mxu0 %v549_v19  ;;  %2251 = vmatpush1.bf16.msra.mxu0 %v3593_v20 }
 0x11e   : > { %2252 = vmatprep.subr.bf16.mxu0 %v3598_v21  ;;  %1220 = vmatmul.mubr.bf16.gmra.mrb[4].mxu1 %v546_v18  ;;  %v533_v18 = vld [vmem:[%s4509_s23 + $0xa8] sm:$0xff]  ;;  %v500_v21 = vld [vmem:[%s4501_s24 + $0xa0] sm:$0xff] }
 0x11f   : > { %1229 = vmatprep.mubr.bf16.mxu1 %v549_v19  ;;  %v562_v19 = vpack.c.bf16 %v499_v16, %v498_v15  ;;  %v565_v20 = vpack.c.bf16 %v533_v18, %v532_v17  ;;  %v564_v25 = vpack.c.bf16 %v501_v22, %v500_v21 }
 0x121   : > { %2253 = vmatpush1.bf16.msra.mxu0 %v3596_v26  ;;  %v567_v26 = vpack.c.bf16 %v535_v24, %v534_v23 }
 0x122   : > { %2254 = vmatprep.subr.bf16.mxu0 %v3601_v27  ;;  %v502_v27 = vld [vmem:[%s4501_s24 + $0xb0] sm:$0xff] }
 0x124   : > { %833 = vmatmul.mubr.bf16.gmra.mrb[8].mxu0 %v548_v28 }
 0x125   : > { %842 = vmatprep.mubr.bf16.mxu0 %v551_v30  ;;  %2255 = vmatpush1.bf16.msra.mxu0 %v3599_v29  ;;  %v536_v29 = vld [vmem:[%s4509_s23 + $0xc0] sm:$0xff] }
 0x126   : > { %2256 = vmatprep.subr.bf16.mxu0 %v3604_v31  ;;  %1230 = vmatmul.mubr.bf16.gmra.mrb[8].mxu1 %v548_v28  ;;  %v503_v28 = vld [vmem:[%s4501_s24 + $0xb8] sm:$0xff] }
 0x127   : > { %1239 = vmatprep.mubr.bf16.mxu1 %v551_v30  ;;  %v537_v30 = vld [vmem:[%s4509_s23 + $0xc8] sm:$0xff]  ;;  %v566_v31 = vpack.c.bf16 %v503_v28, %v502_v27 }
 0x128   : > { %v569_v32 = vpack.c.bf16 %v537_v30, %v536_v29 }
 0x129   : > { %2257 = vmatpush1.bf16.msra.mxu0 %v3602_v36  ;;  %v539_v36 = vld [vmem:[%s4509_s23 + $0xd8] sm:$0xff] }
 0x12a   : > { %2258 = vmatprep.subr.bf16.mxu0 %v3607_v37  ;;  %v568_v37 = vpack.c.bf16 %v505_v34, %v504_v33 }
 0x12c   : > { %843 = vmatmul.mubr.bf16.gmra.mrb[12].mxu0 %v550_v38 }
 0x12d   : > { %852 = vmatprep.mubr.bf16.mxu0 %v553_v40  ;;  %2259 = vmatpush1.bf16.msra.mxu0 %v3605_v39  ;;  %v506_v39 = vld [vmem:[%s4501_s24 + $0xd0] sm:$0xff] }
 0x12e   : > { %2260 = vmatprep.subr.bf16.mxu0 %v3610_v41  ;;  %1240 = vmatmul.mubr.bf16.gmra.mrb[12].mxu1 %v550_v38  ;;  %v571_v38 = vpack.c.bf16 %v539_v36, %v538_v35  ;;  %v540_v41 = vld [vmem:[%s4509_s23 + $0xe0] sm:$0xff] }
 0x12f   : > { %1249 = vmatprep.mubr.bf16.mxu1 %v553_v40  ;;  %v507_v40 = vld [vmem:[%s4501_s24 + $0xd8] sm:$0xff]  ;;  %v573_v44 = vpack.c.bf16 %v541_v42, %v540_v41  ;;  %v1005_v35 = vld [vmem:[%s5712_s5] sm:$0x3] }
 0x130   : > { %v570_v43 = vpack.c.bf16 %v507_v40, %v506_v39 }
 0x131   : > { %2261 = vmatpush1.bf16.msra.mxu0 %v3608_v46  ;;  %v3622_v46 = vld [vmem:[#allocation10 + $0xb4] ss:$8 sps:$4 sm:$0xff]  }
 0x132   : > { %2262 = vmatprep.subr.bf16.mxu0 %v3613_v47  ;;  %v508_v47 = vld [vmem:[%s4501_s24 + $0xe0] sm:$0xff] }
 0x134   : > { %853 = vmatmul.mubr.bf16.gmra.mrb[16].mxu0 %v552_v48 }
 0x135   : > { %862 = vmatprep.mubr.bf16.mxu0 %v555_v49  ;;  %2263 = vmatpush1.bf16.msra.mxu0 %v3611_v50  ;;  %v543_v50 = vld [vmem:[%s4509_s23 + $0xf8] sm:$0xff] }
 0x136   : > { %2264 = vmatprep.subr.bf16.mxu0 %v3616_v51  ;;  %1250 = vmatmul.mubr.bf16.gmra.mrb[16].mxu1 %v552_v48  ;;  %v509_v48 = vld [vmem:[%s4501_s24 + $0xe8] sm:$0xff] }
 0x137   : > { %1259 = vmatprep.mubr.bf16.mxu1 %v555_v49  ;;  %v542_v49 = vld [vmem:[%s4509_s23 + $0xf0] sm:$0xff]  ;;  %v3625_v51 = vld [vmem:[#allocation10 + $0xc4] ss:$8 sps:$4 sm:$0xff]   ;;  %v572_v53 = vpack.c.bf16 %v509_v48, %v508_v47  ;;  %s4079_s23 = scalar_lea.vmem %s5660_s13, 4096 }
 0x138   : > { %v575_v54 = vpack.c.bf16 %v543_v50, %v542_v49  ;;  %p4080_p0 = scmp.ne.s32.totalorder %s5660_s13, %s4079_s23  ;;  %p4087_p5 = scmp.lt.s32.totalorder %s4085_s22, %s4079_s23 }
 0x139   : > { %2265 = vmatpush1.bf16.msra.mxu0 %v3614_v56  ;;  %v3626_v56 = vld [vmem:[#allocation10 + $0xd0] ss:$8 sps:$4 sm:$0xff]  }
 0x13a   : > { %2266 = vmatprep.subr.bf16.mxu0 %v3619_v57  ;;  %v510_v57 = vld [vmem:[%s4501_s24 + $0xf0] sm:$0xff]  ;;  %p4081_p4 = pnand %p4080_p0, %p4402_p3  ;;  %p4088_p9 = por %p4087_p5, %p4086_p10 }
 0x13c   : > { %863 = vmatmul.mubr.bf16.gmra.mrb[20].mxu0 %v554_v58  ;;  %p4082_p6 = pneg %p4081_p4 }
 0x13d   : > { %872 = vmatprep.mubr.bf16.mxu0 %v557_v59  ;;  %2267 = vmatpush1.bf16.msra.mxu0 %v3617_v60 }
 0x13e   : > { %1260 = vmatmul.mubr.bf16.gmra.mrb[20].mxu1 %v554_v58  ;;  %2268 = vmatprep.subr.bf16.mxu0 %v3622_v46  ;;  %v511_v58 = vld [vmem:[%s4501_s24 + $0xf8] sm:$0xff]  ;;  %p4089_p8 = pnand %p4088_p9, %p4082_p6 }
 0x13f   : > { %1269 = vmatprep.mubr.bf16.mxu1 %v557_v59  ;;  %v3631_v59 = vld [vmem:[#allocation10 + $0xe4] ss:$8 sps:$4 sm:$0xff]   ;;  %v574_v60 = vpack.c.bf16 %v511_v58, %v510_v57 }
 0x141   : > { %2269 = vmatpush1.bf16.msra.mxu0 %v3620_v45 }
 0x142   : > { %2270 = vmatprep.subr.bf16.mxu0 %v3625_v51 }
 0x144   : > { %873 = vmatmul.mubr.bf16.gmra.mrb[24].mxu0 %v556_v1 }
 0x145   : > { %882 = vmatprep.mubr.bf16.mxu0 %v559_v2  ;;  %2271 = vmatpush1.bf16.msra.mxu0 %v3623_v52 }
 0x146   : > { %1270 = vmatmul.mubr.bf16.gmra.mrb[24].mxu1 %v556_v1  ;;  %2272 = vmatprep.subr.bf16.mxu0 %v3628_v55  ;;  %v611_v1 = vshrl.u32 %v610_v0, 7 }
 0x147   : > { %1279 = vmatprep.mubr.bf16.mxu1 %v559_v2 }
 0x148   : > { %v4591_v2 = vsub.s32 0, %v611_v1  ;;  %v4596_v4 = vsub.s32 1, %v611_v1 }
 0x149   : > { %2273 = vmatpush1.bf16.msra.mxu0 %v3626_v56 }
 0x14a   : > { %2274 = vmatprep.subr.bf16.mxu0 %v3631_v59  ;;  %5758 = vst [vmem:[#allocation22_spill] sm:$0xff] %v4591_v2  ;;  %5759 = vst [vmem:[#allocation23_spill] sm:$0xff] %v4596_v4  ;;  %v4599_v5 = vrot.slane %v608_v3, %v4591_v2  ;;  %v4602_v6 = vrot.slane %v608_v3, %v4596_v4  ;;  %v4623_v49 = vrot.slane %v1005_v35, %v4596_v4 }
 0x14c   : > { %883 = vmatmul.mubr.bf16.gmra.mrb[28].mxu0 %v558_v7 }
 0x14d   : > { %892 = vmatprep.mubr.bf16.mxu0 %v561_v8  ;;  %2275 = vmatpush1.bf16.msra.mxu0 %v3629_v61 }
 0x14e   : > { %1280 = vmatmul.mubr.bf16.gmra.mrb[28].mxu1 %v558_v7  ;;  %2276 = vmatprep.subr.bf16.mxu0 %v3634_v62 }
 0x14f   : > { %1289 = vmatprep.mubr.bf16.mxu1 %v561_v8 }
 0x151   : > { %2277 = vmatpush1.bf16.msra.mxu0 %v3632_v63 }
 0x154   : > { %893 = vmatmul.mubr.bf16.gmra.mrb[32].mxu0 %v560_v13 }
 0x155   : > { %902 = vmatprep.mubr.bf16.mxu0 %v563_v14 }
 0x156   : > { %1290 = vmatmul.mubr.bf16.gmra.mrb[32].mxu1 %v560_v13 }
 0x157   : > { %1299 = vmatprep.mubr.bf16.mxu1 %v563_v14 }
 0x15c   : > { %903 = vmatmul.mubr.bf16.gmra.mrb[36].mxu0 %v562_v19 }
 0x15d   : > { %912 = vmatprep.mubr.bf16.mxu0 %v565_v20 }
 0x15e   : > { %1300 = vmatmul.mubr.bf16.gmra.mrb[36].mxu1 %v562_v19 }
 0x15f   : > { %1309 = vmatprep.mubr.bf16.mxu1 %v565_v20 }
 0x164   : > { %913 = vmatmul.mubr.bf16.gmra.mrb[40].mxu0 %v564_v25 }
 0x165   : > { %922 = vmatprep.mubr.bf16.mxu0 %v567_v26 }
 0x166   : > { %1310 = vmatmul.mubr.bf16.gmra.mrb[40].mxu1 %v564_v25 }
 0x167   : > { %1319 = vmatprep.mubr.bf16.mxu1 %v567_v26 }
 0x16c   : > { %923 = vmatmul.mubr.bf16.gmra.mrb[44].mxu0 %v566_v31 }
 0x16d   : > { %932 = vmatprep.mubr.bf16.mxu0 %v569_v32 }
 0x16e   : > { %1320 = vmatmul.mubr.bf16.gmra.mrb[44].mxu1 %v566_v31 }
 0x16f   : > { %1329 = vmatprep.mubr.bf16.mxu1 %v569_v32 }
 0x174   : > { %933 = vmatmul.mubr.bf16.gmra.mrb[48].mxu0 %v568_v37 }
 0x175   : > { %942 = vmatprep.mubr.bf16.mxu0 %v571_v38 }
 0x176   : > { %1330 = vmatmul.mubr.bf16.gmra.mrb[48].mxu1 %v568_v37 }
 0x177   : > { %1339 = vmatprep.mubr.bf16.mxu1 %v571_v38 }
 0x17c   : > { %943 = vmatmul.mubr.bf16.gmra.mrb[52].mxu0 %v570_v43 }
 0x17d   : > { %952 = vmatprep.mubr.bf16.mxu0 %v573_v44 }
 0x17e   : > { %1340 = vmatmul.mubr.bf16.gmra.mrb[52].mxu1 %v570_v43 }
 0x17f   : > { %1349 = vmatprep.mubr.bf16.mxu1 %v573_v44  ;;  %v4619_v44 = vrot.slane %v1005_v35, %v4591_v2 }
 0x184   : > { %953 = vmatmul.mubr.bf16.gmra.mrb[56].mxu0 %v572_v53 }
 0x185   : > { %962 = vmatprep.mubr.bf16.mxu0 %v575_v54 }
 0x186   : > { %1350 = vmatmul.mubr.bf16.gmra.mrb[56].mxu1 %v572_v53 }
 0x187   : > { %1359 = vmatprep.mubr.bf16.mxu1 %v575_v54 }
 0x18c   : > { %963 = vmatmul.mubr.bf16.gmra.mrb[60].mxu0 %v574_v60 }
 0x18e   : > { %1360 = vmatmul.mubr.bf16.gmra.mrb[60].mxu1 %v574_v60 }
 0x1e7   : > { %v814_v7 = vpop.f32.mrb[0].mxu0 }
 0x1e8   : > { %v815_v8 = vadd.f32 %v814_v7, %v4599_v5  ;;  %v816_v9 = vpop.f32.mrb[1].mxu0 }
 0x1e9   : > { %v817_v10 = vadd.f32 %v816_v9, %v4602_v6  ;;  %v818_v11 = vpop.f32.mrb[2].mxu0  ;;  %v1211_v24 = vpop.f32.mrb[0].mxu1 }
 0x1ea   : > { %v3096_v12 = vmul.f32 -1.442695, %v815_v8  ;;  %v819_v13 = vadd.f32 %v818_v11, %v4599_v5  ;;  %v820_v14 = vpop.f32.mrb[3].mxu0  ;;  %v1213_v28 = vpop.f32.mrb[1].mxu1  ;;  %v4625_v51 = vmul.f32 0.5, %v815_v8  ;;  %v1212_v3 = vadd.f32 %v1211_v24, %v4619_v44 }
 0x1eb   : > { %v3097_v15 = vmul.f32 -1.442695, %v817_v10  ;;  %v821_v16 = vadd.f32 %v820_v14, %v4602_v6  ;;  %v1215_v31 = vpop.f32.mrb[2].mxu1  ;;  %v4627_v56 = vmul.f32 0.5, %v817_v10  ;;  %v1214_v10 = vadd.f32 %v1213_v28, %v4623_v49 }
 0x1ec   : > { %3651 = vpow2.f32 %v3096_v12  ;;  %v3098_v17 = vmul.f32 -1.442695, %v819_v13  ;;  %v4612_v33 = vpop.f32.mrb[3].mxu1  ;;  %v4632_v60 = vmul.f32 0.5, %v819_v13 }
 0x1ed   : > { %3653 = vpow2.f32 %v3097_v15  ;;  %v3099_v18 = vmul.f32 -1.442695, %v821_v16  ;;  %v4634_v61 = vmul.f32 0.5, %v821_v16  ;;  %v1216_v15 = vadd.f32 %v1215_v31, %v4619_v44 }
 0x1ee   : > { %3655 = vpow2.f32 %v3098_v17 }
 0x1ef   : > { %3657 = vpow2.f32 %v3099_v18  ;;  %v824_v19 = vpop.f32.mrb[4].mxu0 }
 0x1f0   : > { %v825_v20 = vadd.f32 %v824_v19, %v4599_v5  ;;  %v826_v21 = vpop.f32.mrb[5].mxu0 }
 0x1f1   : > { %v827_v22 = vadd.f32 %v826_v21, %v4602_v6  ;;  %v828_v23 = vpop.f32.mrb[6].mxu0  ;;  %v1221_v50 = vpop.f32.mrb[4].mxu1 }
 0x1f2   : > { %v3100_v25 = vmul.f32 -1.442695, %v825_v20  ;;  %v829_v26 = vadd.f32 %v828_v23, %v4599_v5  ;;  %v830_v27 = vpop.f32.mrb[7].mxu0  ;;  %v1223_v55 = vpop.f32.mrb[5].mxu1  ;;  %v4641_v0 = vmul.f32 0.5, %v825_v20 }
 0x1f3   : > { %v3101_v29 = vmul.f32 -1.442695, %v827_v22  ;;  %v831_v30 = vadd.f32 %v830_v27, %v4602_v6  ;;  %v4630_v59 = vpop.f32.mrb[6].mxu1  ;;  %v4644_v8 = vmul.f32 0.5, %v827_v22 }
 0x1f4   : > { %3659 = vpow2.f32 %v3100_v25  ;;  %v3102_v32 = vmul.f32 -1.442695, %v829_v26  ;;  %v4639_v63 = vpop.f32.mrb[7].mxu1  ;;  %v4648_v13 = vmul.f32 0.5, %v829_v26  ;;  %v1218_v25 = vadd.f32 %v4612_v33, %v4623_v49 }
 0x1f5   : > { %3661 = vpow2.f32 %v3101_v29  ;;  %v3103_v34 = vmul.f32 -1.442695, %v831_v30  ;;  %v4651_v18 = vmul.f32 0.5, %v831_v30 }
 0x1f6   : > { %v3652_v36 = vpop.eup %3651  ;;  %3663 = vpow2.f32 %v3102_v32 }
 0x1f7   : > { %v3654_v37 = vpop.eup %3653  ;;  %v1562_v38 = vadd.f32 1.0, %v3652_v36  ;;  %3665 = vpow2.f32 %v3103_v34  ;;  %v834_v39 = vpop.f32.mrb[8].mxu0 }
 0x1f8   : > { %v3656_v40 = vpop.eup %3655  ;;  %v1563_v41 = vadd.f32 1.0, %v3654_v37  ;;  %v835_v42 = vadd.f32 %v834_v39, %v4599_v5  ;;  %v836_v43 = vpop.f32.mrb[9].mxu0 }
 0x1f9   : > { %v3658_v45 = vpop.eup %3657  ;;  %3667 = vrcp.f32 %v1562_v38  ;;  %v1564_v46 = vadd.f32 1.0, %v3656_v40  ;;  %v837_v47 = vadd.f32 %v836_v43, %v4602_v6  ;;  %v838_v48 = vpop.f32.mrb[10].mxu0  ;;  %v1222_v40 = vadd.f32 %v1221_v50, %v4619_v44 }
 0x1fa   : > { %3669 = vrcp.f32 %v1563_v41  ;;  %v1565_v52 = vadd.f32 1.0, %v3658_v45  ;;  %v3104_v53 = vmul.f32 -1.442695, %v835_v42  ;;  %v840_v54 = vpop.f32.mrb[11].mxu0  ;;  %v839_v58 = vadd.f32 %v838_v48, %v4599_v5  ;;  %v4661_v26 = vpop.f32.mrb[8].mxu1 }
 0x1fb   : > { %3671 = vrcp.f32 %v1564_v46  ;;  %v3105_v57 = vmul.f32 -1.442695, %v837_v47  ;;  %v4637_v62 = vadd.f32 %v840_v54, %v4602_v6  ;;  %v4663_v28 = vmul.f32 0.5, %v835_v42  ;;  %v4666_v31 = vpop.f32.mrb[9].mxu1 }
 0x1fc   : > { %3673 = vrcp.f32 %v1565_v52  ;;  %v3106_v1 = vmul.f32 -1.442695, %v839_v58  ;;  %v4668_v34 = vmul.f32 0.5, %v837_v47  ;;  %v4674_v33 = vpop.f32.mrb[10].mxu1  ;;  %v1224_v46 = vadd.f32 %v1223_v55, %v4623_v49 }
 0x1fd   : > { %3675 = vpow2.f32 %v3104_v53  ;;  %v3107_v9 = vmul.f32 -1.442695, %v4637_v62  ;;  %v4680_v41 = vpop.f32.mrb[11].mxu1  ;;  %v4684_v48 = vmul.f32 0.5, %v839_v58 }
 0x1fe   : > { %v3660_v7 = vpop.eup %3659  ;;  %3677 = vpow2.f32 %v3105_v57 }
 0x1ff   : > { %v3662_v11 = vpop.eup %3661  ;;  %v1566_v12 = vadd.f32 1.0, %v3660_v7  ;;  %3679 = vpow2.f32 %v3106_v1  ;;  %v844_v14 = vpop.f32.mrb[12].mxu0 }
 0x200   : > { %v3664_v16 = vpop.eup %3663  ;;  %v1567_v17 = vadd.f32 1.0, %v3662_v11  ;;  %3681 = vpow2.f32 %v3107_v9  ;;  %v4654_v19 = vadd.f32 %v844_v14, %v4599_v5  ;;  %v846_v20 = vpop.f32.mrb[13].mxu0 }
 0x201   : > { %v3666_v21 = vpop.eup %3665  ;;  %3683 = vrcp.f32 %v1566_v12  ;;  %v1568_v22 = vadd.f32 1.0, %v3664_v16  ;;  %v4657_v23 = vadd.f32 %v846_v20, %v4602_v6  ;;  %v848_v24 = vpop.f32.mrb[14].mxu0 }
 0x202   : > { %3685 = vrcp.f32 %v1567_v17  ;;  %v1569_v27 = vadd.f32 1.0, %v3666_v21  ;;  %v3108_v29 = vmul.f32 -1.442695, %v4654_v19  ;;  %v850_v30 = vpop.f32.mrb[15].mxu0  ;;  %v4672_v36 = vadd.f32 %v848_v24, %v4599_v5  ;;  %v4696_v21 = vpop.f32.mrb[12].mxu1 }
 0x203   : > { %v3668_v32 = vpop.eup %3667  ;;  %3687 = vrcp.f32 %v1568_v22  ;;  %v3109_v35 = vmul.f32 -1.442695, %v4657_v23  ;;  %v4677_v39 = vadd.f32 %v850_v30, %v4602_v6  ;;  %v4701_v30 = vpop.f32.mrb[13].mxu1 }
 0x204   : > { %v3670_v37 = vpop.eup %3669  ;;  %3689 = vrcp.f32 %v1569_v27  ;;  %v3160_v38 = vadd.f32 -0.5, %v3668_v32  ;;  %v3110_v43 = vmul.f32 -1.442695, %v4672_v36 }
 0x205   : > { %v3672_v42 = vpop.eup %3671  ;;  %3691 = vpow2.f32 %v3108_v29  ;;  %v3161_v45 = vadd.f32 -0.5, %v3670_v37  ;;  %v3111_v53 = vmul.f32 -1.442695, %v4677_v39  ;;  %v1226_v29 = vadd.f32 %v4630_v59, %v4619_v44 }
 0x206   : > { %v3674_v47 = vpop.eup %3673  ;;  %3693 = vpow2.f32 %v3109_v35  ;;  %v1882_v52 = vmul.f32 %v3160_v38, %v1212_v3  ;;  %v3162_v50 = vadd.f32 -0.5, %v3672_v42  ;;  %v4707_v35 = vpop.f32.mrb[14].mxu1  ;;  %v4710_v38 = vmul.f32 0.5, %v4637_v62 }
 0x207   : > { %v3676_v54 = vpop.eup %3675  ;;  %3695 = vpow2.f32 %v3110_v43  ;;  %v1883_v57 = vmul.f32 %v3161_v45, %v1214_v10  ;;  %v3163_v1 = vadd.f32 -0.5, %v3674_v47  ;;  %v854_v7 = vpop.f32.mrb[16].mxu0 }
 0x208   : > { %v3678_v9 = vpop.eup %3677  ;;  %v1570_v11 = vadd.f32 1.0, %v3676_v54  ;;  %v4688_v12 = vadd.f32 %v1882_v52, %v4625_v51  ;;  %3697 = vpow2.f32 %v3111_v53  ;;  %v4691_v55 = vadd.f32 %v854_v7, %v4599_v5  ;;  %v856_v58 = vpop.f32.mrb[17].mxu0 }
 0x209   : > { %v3680_v14 = vpop.eup %3679  ;;  %v1571_v3 = vadd.f32 1.0, %v3678_v9  ;;  %v4694_v16 = vadd.f32 %v1883_v57, %v4627_v56  ;;  %v1884_v17 = vmul.f32 %v3162_v50, %v1216_v15  ;;  %v1885_v10 = vmul.f32 %v3163_v1, %v1218_v25  ;;  %v858_v20 = vpop.f32.mrb[18].mxu0 }
 0x20a   : > { %v3682_v22 = vpop.eup %3681  ;;  %3699 = vrcp.f32 %v1570_v11  ;;  %v1572_v24 = vadd.f32 1.0, %v3680_v14  ;;  %v3112_v51 = vmul.f32 -1.442695, %v4691_v55  ;;  %v860_v27 = vpop.f32.mrb[19].mxu0  ;;  %v4713_v42 = vadd.f32 %v856_v58, %v4602_v6 }
 0x20b   : > { %v3684_v32 = vpop.eup %3683  ;;  %3701 = vrcp.f32 %v1571_v3  ;;  %v1573_v56 = vadd.f32 1.0, %v3682_v22  ;;  %v4704_v15 = vadd.f32 %v1884_v17, %v4632_v60  ;;  %v1949_v25 = vadd.f32 %v1885_v10, %v4634_v61  ;;  %v4718_v45 = vpop.f32.mrb[15].mxu1 }
 0x20c   : > { %v3686_v37 = vpop.eup %3685  ;;  %v3164_v59 = vadd.f32 -0.5, %v3684_v32  ;;  %v4716_v43 = vadd.f32 %v858_v20, %v4599_v5  ;;  %3703 = vrcp.f32 %v1572_v24  ;;  %v4723_v52 = vadd.f32 %v860_v27, %v4602_v6  ;;  %v4739_v22 = vpop.f32.mrb[16].mxu1 }
 0x20d   : > { %v3688_v47 = vpop.eup %3687  ;;  %v2010_v60 = vpack.c.bf16 %v4704_v15, %v4688_v12  ;;  %v3165_v61 = vadd.f32 -0.5, %v3686_v37  ;;  %3705 = vpow2.f32 %v3112_v51  ;;  %v3113_v53 = vmul.f32 -1.442695, %v4713_v42  ;;  %v4744_v32 = vpop.f32.mrb[17].mxu1 }
 0x20e   : > { %v3690_v62 = vpop.eup %3689  ;;  %v1886_v54 = vmul.f32 %v3164_v59, %v1222_v40  ;;  %v1228_v57 = vadd.f32 %v4639_v63, %v4623_v49  ;;  %3707 = vrcp.f32 %v1573_v56  ;;  %v4729_v1 = vmul.f32 0.5, %v4654_v19  ;;  %v4752_v59 = vpop.f32.mrb[18].mxu1 }
 0x20f   : > { %v3692_v50 = vpop.eup %3691  ;;  %v3114_v7 = vmul.f32 -1.442695, %v4716_v43  ;;  %v1887_v9 = vmul.f32 %v3165_v61, %v1224_v46  ;;  %v864_v11 = vpop.f32.mrb[20].mxu0  ;;  %3709 = vpow2.f32 %v3113_v53  ;;  %v3115_v40 = vmul.f32 -1.442695, %v4723_v52 }
 0x210   : > { %v3694_v12 = vpop.eup %3693  ;;  %v1574_v58 = vadd.f32 1.0, %v3692_v50  ;;  %v4733_v14 = vadd.f32 %v1886_v54, %v4641_v0  ;;  %v866_v3 = vpop.f32.mrb[21].mxu0  ;;  %v3166_v19 = vadd.f32 -0.5, %v3688_v47  ;;  %v3167_v51 = vadd.f32 -0.5, %v3690_v62 }
 0x211   : > { %v3696_v17 = vpop.eup %3695  ;;  %v1575_v63 = vadd.f32 1.0, %v3694_v12  ;;  %3711 = vpow2.f32 %v3114_v7  ;;  %v4737_v10 = vadd.f32 %v1887_v9, %v4644_v8  ;;  %v868_v20 = vpop.f32.mrb[22].mxu0  ;;  %v4742_v0 = vadd.f32 %v864_v11, %v4599_v5  ;;  %v3635_v7 = vld [vmem:[#allocation11 + $0x40] sm:$0xff]  }
 0x212   : > { %v3698_v46 = vpop.eup %3697  ;;  %3713 = vrcp.f32 %v1574_v58  ;;  %v1576_v24 = vadd.f32 1.0, %v3696_v17  ;;  %v870_v27 = vpop.f32.mrb[23].mxu0  ;;  %v4747_v56 = vmul.f32 0.5, %v4657_v23  ;;  %v1888_v15 = vmul.f32 %v3166_v19, %v1226_v29  ;;  %v3636_v9 = vld [vmem:[#allocation11] sm:$0xff]   ;;  %3281 = vmatprep.subr.bf16.mxu1 %v3635_v7 }
 0x213   : > { %v2011_v8 = vpack.c.bf16 %v1949_v25, %v4694_v16  ;;  %v1232_v37 = vadd.f32 %v4661_v26, %v4619_v44  ;;  %3715 = vrcp.f32 %v1575_v63  ;;  %v1577_v61 = vadd.f32 1.0, %v3698_v46  ;;  %v4755_v54 = vpop.f32.mrb[19].mxu1  ;;  %3282 = vmatpush3.bf16.msra.mxu1 %v3636_v9 }
 0x214   : > { %v3700_v47 = vpop.eup %3699  ;;  %v1889_v62 = vmul.f32 %v3167_v51, %v1228_v57  ;;  %v3116_v53 = vmul.f32 -1.442695, %v4742_v0  ;;  %3717 = vrcp.f32 %v1576_v24  ;;  %v4758_v23 = vadd.f32 %v1888_v15, %v4648_v13  ;;  %v4783_v24 = vpop.f32.mrb[20].mxu1 }
 0x215   : > { %v3702_v50 = vpop.eup %3701  ;;  %2278 = vmatprep.mubr.bf16.mxu0 %v2011_v8  ;;  %v4761_v16 = vadd.f32 %v866_v3, %v4602_v6  ;;  %v3168_v26 = vadd.f32 -0.5, %v3700_v47  ;;  %3719 = vpow2.f32 %v3115_v40  ;;  %v4765_v25 = vadd.f32 %v868_v20, %v4599_v5 }
 0x216   : > { %v1953_v29 = vadd.f32 %v1889_v62, %v4651_v18  ;;  %2279 = vmatmul.mubr.bf16.vlgmr.msra.gmra.mrb[64].mxu0 %v2010_v60  ;;  %v1234_v57 = vadd.f32 %v4666_v31, %v4623_v49  ;;  %v3704_v11 = vpop.eup %3703  ;;  %v4770_v13 = vmul.f32 0.5, %v4672_v36  ;;  %3721 = vpow2.f32 %v3116_v53 }
 0x217   : > { %v3117_v12 = vmul.f32 -1.442695, %v4761_v16  ;;  %v1890_v58 = vmul.f32 %v3168_v26, %v1232_v37  ;;  %v874_v40 = vpop.f32.mrb[24].mxu0  ;;  %v3706_v3 = vpop.eup %3705  ;;  %3723 = vrcp.f32 %v1577_v61  ;;  %v3118_v18 = vmul.f32 -1.442695, %v4765_v25 }
 0x218   : > { %v3169_v60 = vadd.f32 -0.5, %v3702_v50  ;;  %v4775_v17 = vadd.f32 %v870_v27, %v4602_v6  ;;  %v876_v31 = vpop.f32.mrb[25].mxu0  ;;  %v3708_v63 = vpop.eup %3707  ;;  %v4778_v19 = vmul.f32 0.5, %v4677_v39  ;;  %v1578_v36 = vadd.f32 1.0, %v3706_v3 }
 0x219   : > { %3725 = vpow2.f32 %v3117_v12  ;;  %v4781_v20 = vadd.f32 %v1890_v58, %v4663_v28  ;;  %v878_v46 = vpop.f32.mrb[26].mxu0  ;;  %v3710_v51 = vpop.eup %3709  ;;  %v4786_v15 = vmul.f32 0.5, %v4691_v55  ;;  %v4792_v28 = vmul.f32 0.5, %v4713_v42 }
 0x21a   : > { %3727 = vpow2.f32 %v3118_v18  ;;  %v1891_v27 = vmul.f32 %v3169_v60, %v1234_v57  ;;  %v3119_v8 = vmul.f32 -1.442695, %v4775_v17  ;;  %v880_v37 = vpop.f32.mrb[27].mxu0  ;;  %v4789_v39 = vpop.f32.mrb[21].mxu1  ;;  %v1236_v61 = vadd.f32 %v4674_v33, %v4619_v44 }
 0x21b   : > { %v3712_v47 = vpop.eup %3711  ;;  %3729 = vrcp.f32 %v1578_v36  ;;  %v3170_v62 = vadd.f32 -0.5, %v3704_v11  ;;  %v4796_v53 = vpop.f32.mrb[22].mxu1  ;;  %v1579_v50 = vadd.f32 1.0, %v3710_v51  ;;  %v1238_v57 = vadd.f32 %v4680_v41, %v4623_v49 }
 0x21c   : > { %v3714_v55 = vpop.eup %3713  ;;  %v4799_v26 = vadd.f32 %v1891_v27, %v4668_v34  ;;  %v3171_v7 = vadd.f32 -0.5, %v3708_v63  ;;  %v4803_v9 = vpop.f32.mrb[23].mxu1  ;;  %v1580_v12 = vadd.f32 1.0, %v3712_v47  ;;  %v4806_v58 = vadd.f32 %v874_v40, %v4599_v5 }
 0x21d   : > { %v1892_v42 = vmul.f32 %v3170_v62, %v1236_v61  ;;  %v2013_v33 = vpack.c.bf16 %v1953_v29, %v4737_v10  ;;  %v3716_v11 = vpop.eup %3715  ;;  %3731 = vpow2.f32 %v3119_v8  ;;  %v4810_v18 = vadd.f32 %v876_v31, %v4602_v6  ;;  %v4832_v62 = vpop.f32.mrb[24].mxu1 }
 0x21e   : > { %v1893_v3 = vmul.f32 %v3171_v7, %v1238_v57  ;;  %v1242_v34 = vadd.f32 %v4696_v21, %v4619_v44  ;;  %v3718_v41 = vpop.eup %3717  ;;  %v4815_v60 = vmul.f32 0.5, %v4716_v43  ;;  %v3120_v40 = vmul.f32 -1.442695, %v4806_v58  ;;  %v4841_v57 = vpop.f32.mrb[25].mxu1 }
 0x21f   : > { %v4818_v63 = vadd.f32 %v1892_v42, %v4684_v48  ;;  %2288 = vmatprep.mubr.bf16.mxu0 %v2013_v33  ;;  %v3172_v10 = vadd.f32 -0.5, %v3714_v55  ;;  %v884_v29 = vpop.f32.mrb[28].mxu0  ;;  %v3720_v36 = vpop.eup %3719  ;;  %3733 = vrcp.f32 %v1579_v50  ;;  %v3121_v51 = vmul.f32 -1.442695, %v4810_v18 }
 0x220   : > { %v4822_v31 = vadd.f32 %v1893_v3, %v4710_v38  ;;  %v2012_v21 = vpack.c.bf16 %v4758_v23, %v4733_v14  ;;  %v886_v43 = vpop.f32.mrb[29].mxu0  ;;  %v3722_v27 = vpop.eup %3721  ;;  %v1581_v8 = vadd.f32 1.0, %v3720_v36  ;;  %3735 = vpow2.f32 %v3120_v40 }
 0x221   : > { %v1894_v48 = vmul.f32 %v3172_v10, %v1242_v34  ;;  %v4828_v47 = vadd.f32 %v878_v46, %v4599_v5  ;;  %v4830_v61 = vpop.f32.mrb[30].mxu0  ;;  %v3724_v55 = vpop.eup %3723  ;;  %3737 = vrcp.f32 %v1580_v12  ;;  %v4835_v38 = vmul.f32 0.5, %v4723_v52 }
 0x222   : > { %2289 = vmatmul.mubr.bf16.gmra.mrb[68].mxu0 %v2012_v21  ;;  %v1244_v14 = vadd.f32 %v4701_v30, %v4623_v49  ;;  %v3173_v23 = vadd.f32 -0.5, %v3716_v11  ;;  %v4839_v50 = vpop.f32.mrb[31].mxu0  ;;  %v1582_v7 = vadd.f32 1.0, %v3722_v27  ;;  %3739 = vpow2.f32 %v3121_v51  ;;  %v4847_v33 = vpop.f32.mrb[26].mxu1  ;;  %v3637_v51 = vld [vmem:[#allocation11 + $0x48] sm:$0xff]  }
 0x223   : > { %v3726_v46 = vpop.eup %3725  ;;  %v4844_v42 = vadd.f32 %v1894_v48, %v4729_v1  ;;  %v3122_v12 = vmul.f32 -1.442695, %v4828_v47  ;;  %3741 = vrcp.f32 %v1581_v8  ;;  %v4850_v3 = vmul.f32 0.5, %v4742_v0  ;;  %v4855_v34 = vpop.f32.mrb[27].mxu1  ;;  %v3638_v21 = vld [vmem:[#allocation11 + $0x8] sm:$0xff]   ;;  %3283 = vmatprep.subr.bf16.mxu1 %v3637_v51 }
 0x224   : > { %v3728_v52 = vpop.eup %3727  ;;  %v1895_v30 = vmul.f32 %v3173_v23, %v1244_v14  ;;  %v4853_v11 = vadd.f32 %v880_v37, %v4602_v6  ;;  %v1583_v10 = vadd.f32 1.0, %v3726_v46  ;;  %v1246_v1 = vadd.f32 %v4707_v35, %v4619_v44  ;;  %3284 = vmatpush3.bf16.msra.mxu1 %v3638_v21 }
 0x225   : > { %v3730_v40 = vpop.eup %3729  ;;  %3743 = vpow2.f32 %v3122_v12  ;;  %v3174_v36 = vadd.f32 -0.5, %v3718_v41  ;;  %v4860_v27 = vmul.f32 0.5, %v4761_v16  ;;  %v1584_v0 = vadd.f32 1.0, %v3728_v52 }
 0x226   : > { %v4863_v8 = vadd.f32 %v1895_v30, %v4747_v56  ;;  %v3123_v37 = vmul.f32 -1.442695, %v4853_v11  ;;  %3745 = vrcp.f32 %v1582_v7  ;;  %v4867_v48 = vmul.f32 0.5, %v4765_v25 }
 0x227   : > { %v1896_v14 = vmul.f32 %v3174_v36, %v1246_v1  ;;  %v1248_v35 = vadd.f32 %v4718_v45, %v4623_v49  ;;  %v4871_v41 = vpop.f32.mrb[32].mxu0  ;;  %v3732_v23 = vpop.eup %3731  ;;  %v3175_v16 = vadd.f32 -0.5, %v3724_v55  ;;  %v4874_v46 = vadd.f32 %v884_v29, %v4599_v5 }
 0x228   : > { %3747 = vpow2.f32 %v3123_v37  ;;  %v2015_v56 = vpack.c.bf16 %v4822_v31, %v4799_v26  ;;  %v4878_v7 = vpop.f32.mrb[33].mxu0  ;;  %v4884_v45 = vadd.f32 %v886_v43, %v4602_v6  ;;  %v1252_v12 = vadd.f32 %v4739_v22, %v4619_v44  ;;  %v4890_v29 = vpop.f32.mrb[28].mxu1  ;;  %v3640_v37 = vld [vmem:[#allocation11 + $0x10] sm:$0xff]  }
 0x229   : > { %3749 = vrcp.f32 %v1583_v10  ;;  %v4881_v25 = vadd.f32 %v1896_v14, %v4770_v13  ;;  %v4888_v55 = vpop.f32.mrb[34].mxu0  ;;  %v3734_v52 = vpop.eup %3733  ;;  %v1897_v26 = vmul.f32 %v3175_v16, %v1248_v35  ;;  %v3124_v31 = vmul.f32 -1.442695, %v4874_v46 }
 0x22a   : > { %3751 = vrcp.f32 %v1584_v0  ;;  %2298 = vmatprep.mubr.bf16.mxu0 %v2015_v56  ;;  %v3176_v30 = vadd.f32 -0.5, %v3730_v40  ;;  %v4893_v10 = vpop.f32.mrb[35].mxu0  ;;  %v4895_v13 = vpop.f32.mrb[29].mxu1  ;;  %v1585_v1 = vadd.f32 1.0, %v3732_v23  ;;  %v3125_v36 = vmul.f32 -1.442695, %v4884_v45 }
 0x22b   : > { %v3736_v43 = vpop.eup %3735  ;;  %v2014_v22 = vpack.c.bf16 %v4818_v63, %v4781_v20  ;;  %v4902_v51 = vadd.f32 %v4830_v61, %v4599_v5  ;;  %v4904_v21 = vpop.f32.mrb[30].mxu1  ;;  %v3639_v0 = vld [vmem:[#allocation11 + $0x50] sm:$0xff]   ;;  %v4907_v14 = vmul.f32 0.5, %v4775_v17  ;;  %v1961_v35 = vadd.f32 %v1897_v26, %v4778_v19  ;;  %v3641_v56 = vld [vmem:[#allocation11 + $0x58] sm:$0xff]  }
 0x22c   : > { %v3738_v40 = vpop.eup %3737  ;;  %3753 = vpow2.f32 %v3124_v31  ;;  %v1898_v23 = vmul.f32 %v3176_v30, %v1252_v12  ;;  %v4910_v16 = vpop.f32.mrb[31].mxu1  ;;  %v4913_v63 = vmul.f32 0.5, %v4806_v58  ;;  %v4916_v61 = vmul.f32 0.5, %v4810_v18  ;;  %3285 = vmatprep.subr.bf16.mxu1 %v3639_v0  ;;  %v3642_v58 = vld [vmem:[#allocation11 + $0x18] sm:$0xff]  }
 0x22d   : > { %5760 = vst [vmem:[#allocation24_spill] sm:$0xff] %v4910_v16  ;;  %v3740_v20 = vpop.eup %3739  ;;  %3755 = vpow2.f32 %v3125_v36  ;;  %2299 = vmatmul.mubr.bf16.gmra.mrb[72].mxu0 %v2014_v22  ;;  %v3126_v4 = vmul.f32 -1.442695, %v4902_v51  ;;  %v1586_v2 = vadd.f32 1.0, %v3736_v43  ;;  %v1254_v12 = vadd.f32 %v4744_v32, %v4623_v49  ;;  %3286 = vmatpush3.bf16.msra.mxu1 %v3640_v37 }
 0x22e   : > { %v3742_v17 = vpop.eup %3741  ;;  %v4920_v19 = vadd.f32 %v1898_v23, %v4786_v15  ;;  %v3177_v26 = vadd.f32 -0.5, %v3734_v52  ;;  %3757 = vrcp.f32 %v1585_v1  ;;  %v4926_v18 = vadd.f32 %v4839_v50, %v4602_v6  ;;  %3287 = vmatprep.subr.bf16.mxu1 %v3641_v56  ;;  %v3643_v15 = vld [vmem:[#allocation11 + $0x60] sm:$0xff]  }
 0x22f   : > { %v3744_v31 = vpop.eup %3743  ;;  %v1256_v30 = vadd.f32 %v4752_v59, %v4619_v44  ;;  %v3178_v36 = vadd.f32 -0.5, %v3738_v40  ;;  %v4930_v43 = vpop.f32.mrb[36].mxu0  ;;  %v1587_v22 = vadd.f32 1.0, %v3740_v20  ;;  %3759 = vpow2.f32 %v3126_v4 }
 0x230   : > { %v1588_v0 = vadd.f32 1.0, %v3744_v31  ;;  %v1899_v32 = vmul.f32 %v3177_v26, %v1254_v12  ;;  %v4932_v52 = vpop.f32.mrb[37].mxu0  ;;  %v3746_v37 = vpop.eup %3745  ;;  %v3127_v1 = vmul.f32 -1.442695, %v4926_v18  ;;  %v1258_v50 = vadd.f32 %v4755_v54, %v4623_v49  ;;  %v3644_v54 = vld [vmem:[#allocation11 + $0x20] sm:$0xff]  }
 0x231   : > { %v1900_v23 = vmul.f32 %v3178_v36, %v1256_v30  ;;  %v3179_v16 = vadd.f32 -0.5, %v3742_v17  ;;  %v4937_v59 = vpop.f32.mrb[38].mxu0  ;;  %v4939_v40 = vpop.f32.mrb[32].mxu1  ;;  %3761 = vrcp.f32 %v1586_v2  ;;  %v4946_v4 = vadd.f32 %v4871_v41, %v4599_v5  ;;  %3288 = vmatpush3.bf16.msra.mxu1 %v3642_v58  ;;  %v3645_v41 = vld [vmem:[#allocation11 + $0x68] sm:$0xff]  }
 0x232   : > { %v3748_v56 = vpop.eup %3747  ;;  %v4942_v20 = vadd.f32 %v1899_v32, %v4792_v28  ;;  %v2017_v12 = vpack.c.bf16 %v1961_v35, %v4863_v8  ;;  %v4949_v26 = vpop.f32.mrb[39].mxu0  ;;  %3763 = vpow2.f32 %v3127_v1  ;;  %3289 = vmatprep.subr.bf16.mxu1 %v3643_v15  ;;  %v4961_v35 = vadd.f32 %v4878_v7, %v4602_v6 }
 0x233   : > { %v4951_v31 = vpop.f32.mrb[33].mxu1  ;;  %v3750_v17 = vpop.eup %3749  ;;  %v1589_v30 = vadd.f32 1.0, %v3748_v56  ;;  %v4954_v2 = vadd.f32 %v1900_v23, %v4815_v60  ;;  %v1901_v28 = vmul.f32 %v3179_v16, %v1258_v50  ;;  %3765 = vrcp.f32 %v1587_v22 }
 0x234   : > { %v4956_v36 = vpop.f32.mrb[34].mxu1  ;;  %v3752_v32 = vpop.eup %3751  ;;  %v3128_v8 = vmul.f32 -1.442695, %v4946_v4  ;;  %2308 = vmatprep.mubr.bf16.mxu0 %v2017_v12  ;;  %v1262_v58 = vadd.f32 %v4783_v24, %v4619_v44  ;;  %3767 = vrcp.f32 %v1588_v0  ;;  %v3180_v16 = vadd.f32 -0.5, %v3746_v37  ;;  %v3646_v0 = vld [vmem:[#allocation11 + $0x28] sm:$0xff]  }
 0x235   : > { %v4965_v1 = vpop.f32.mrb[35].mxu1  ;;  %v4968_v60 = vadd.f32 %v1901_v28, %v4835_v38  ;;  %v2016_v15 = vpack.c.bf16 %v4881_v25, %v4844_v42  ;;  %v4973_v23 = vmul.f32 0.5, %v4828_v47  ;;  %3769 = vrcp.f32 %v1589_v30  ;;  %3290 = vmatpush3.bf16.msra.mxu1 %v3644_v54  ;;  %v3647_v47 = vld [vmem:[#allocation11 + $0x70] sm:$0xff]  }
 0x236   : > { %5761 = vst [vmem:[#allocation25_spill] sm:$0xff] %v4965_v1  ;;  %v3754_v22 = vpop.eup %3753  ;;  %v3129_v7 = vmul.f32 -1.442695, %v4961_v35  ;;  %v4978_v24 = vadd.f32 %v4888_v55, %v4599_v5  ;;  %3771 = vpow2.f32 %v3128_v8  ;;  %v1902_v38 = vmul.f32 %v3180_v16, %v1262_v58  ;;  %3291 = vmatprep.subr.bf16.mxu1 %v3645_v41  ;;  %v5002_v8 = vpop.f32.mrb[36].mxu1 }
 0x237   : > { %v3756_v50 = vpop.eup %3755  ;;  %2309 = vmatmul.mubr.bf16.gmra.mrb[76].mxu0 %v2016_v15  ;;  %v1264_v42 = vadd.f32 %v4789_v39, %v4623_v49  ;;  %v3181_v25 = vadd.f32 -0.5, %v3750_v17  ;;  %v4982_v37 = vpop.f32.mrb[40].mxu0  ;;  %v4985_v56 = vmul.f32 0.5, %v4853_v11  ;;  %v4988_v55 = vmul.f32 0.5, %v4874_v46  ;;  %5762 = vst [vmem:[#allocation26_spill] sm:$0xff] %v5002_v8 }
 0x238   : > { %3773 = vpow2.f32 %v3129_v7  ;;  %v3130_v12 = vmul.f32 -1.442695, %v4978_v24  ;;  %v4991_v54 = vpop.f32.mrb[41].mxu0  ;;  %v3758_v30 = vpop.eup %3757  ;;  %v1590_v28 = vadd.f32 1.0, %v3754_v22  ;;  %v4994_v39 = vadd.f32 %v1902_v38, %v4850_v3 }
 0x239   : > { %v1903_v17 = vmul.f32 %v3181_v25, %v1264_v42  ;;  %v4998_v41 = vadd.f32 %v4893_v10, %v4602_v6  ;;  %v5000_v11 = vpop.f32.mrb[42].mxu0  ;;  %v3760_v46 = vpop.eup %3759  ;;  %v1591_v58 = vadd.f32 1.0, %v3756_v50  ;;  %v5005_v16 = vmul.f32 0.5, %v4884_v45  ;;  %3292 = vmatpush3.bf16.msra.mxu1 %v3646_v0  ;;  %v3648_v10 = vld [vmem:[#allocation11 + $0x30] sm:$0xff]  }
 0x23a   : > { %v1266_v15 = vadd.f32 %v4796_v53, %v4619_v44  ;;  %v3182_v22 = vadd.f32 -0.5, %v3752_v32  ;;  %v5009_v3 = vpop.f32.mrb[43].mxu0  ;;  %v5011_v7 = vpop.f32.mrb[37].mxu1  ;;  %3775 = vpow2.f32 %v3130_v12  ;;  %v1268_v45 = vadd.f32 %v4803_v9, %v4623_v49  ;;  %3293 = vmatprep.subr.bf16.mxu1 %v3647_v47  ;;  %v3649_v53 = vld [vmem:[#allocation11 + $0x78] sm:$0xff]  }
 0x23b   : > { %v5014_v38 = vadd.f32 %v1903_v17, %v4860_v27  ;;  %v3131_v42 = vmul.f32 -1.442695, %v4998_v41  ;;  %v5019_v50 = vpop.f32.mrb[38].mxu1  ;;  %v3762_v32 = vpop.eup %3761  ;;  %v1592_v25 = vadd.f32 1.0, %v3760_v46  ;;  %v3183_v1 = vadd.f32 -0.5, %v3758_v30 }
 0x23c   : > { %v1904_v8 = vmul.f32 %v3182_v22, %v1266_v15  ;;  %v5023_v0 = vadd.f32 %v4930_v43, %v4599_v5  ;;  %v5025_v12 = vpop.f32.mrb[39].mxu1  ;;  %v3764_v27 = vpop.eup %3763  ;;  %3777 = vrcp.f32 %v1590_v28  ;;  %v5028_v17 = vmul.f32 0.5, %v4902_v51  ;;  %v3650_v28 = vld [vmem:[#allocation11 + $0x38] sm:$0xff]  }
 0x23d   : > { %v2019_v9 = vpack.c.bf16 %v4968_v60, %v4942_v20  ;;  %v5034_v47 = vadd.f32 %v4932_v52, %v4602_v6  ;;  %v3766_v46 = vpop.eup %3765  ;;  %3779 = vpow2.f32 %v3131_v42  ;;  %v1905_v43 = vmul.f32 %v3183_v1, %v1268_v45  ;;  %3294 = vmatpush3.bf16.msra.mxu1 %v3648_v10 }
 0x23e   : > { %v5037_v30 = vadd.f32 %v1904_v8, %v4867_v48  ;;  %v1272_v15 = vadd.f32 %v4832_v62, %v4619_v44  ;;  %v3768_v51 = vpop.eup %3767  ;;  %3781 = vrcp.f32 %v1591_v58  ;;  %v1593_v22 = vadd.f32 1.0, %v3764_v27  ;;  %3295 = vmatprep.subr.bf16.mxu1 %v3649_v53 }
 0x23f   : > { %v3132_v20 = vmul.f32 -1.442695, %v5023_v0  ;;  %2318 = vmatprep.mubr.bf16.mxu0 %v2019_v9  ;;  %v3133_v52 = vmul.f32 -1.442695, %v5034_v47  ;;  %v3770_v60 = vpop.eup %3769  ;;  %3783 = vrcp.f32 %v1592_v25  ;;  %v1969_v48 = vadd.f32 %v1905_v43, %v4907_v14  ;;  %v5046_v62 = vpop.f32.mrb[44].mxu0 }
 0x240   : > { %v3184_v8 = vadd.f32 -0.5, %v3762_v32  ;;  %v2018_v1 = vpack.c.bf16 %v4954_v2, %v4920_v19  ;;  %v3772_v10 = vpop.eup %3771  ;;  %v5049_v58 = vmul.f32 0.5, %v4926_v18  ;;  %v5053_v42 = vadd.f32 %v4937_v59, %v4599_v5  ;;  %v5057_v53 = vpop.f32.mrb[45].mxu0 }
 0x241   : > { %3785 = vpow2.f32 %v3132_v20  ;;  %v1274_v45 = vadd.f32 %v4841_v57, %v4623_v49  ;;  %v5059_v14 = vpop.f32.mrb[40].mxu1  ;;  %v3185_v2 = vadd.f32 -0.5, %v3766_v46  ;;  %v5063_v18 = vadd.f32 %v4949_v26, %v4602_v6  ;;  %v5065_v25 = vpop.f32.mrb[46].mxu0  ;;  %3296 = vmatpush3.bf16.msra.mxu1 %v3650_v28 }
 0x242   : > { %v3774_v32 = vpop.eup %3773  ;;  %3787 = vpow2.f32 %v3133_v52  ;;  %v1906_v19 = vmul.f32 %v3184_v8, %v1272_v15  ;;  %2319 = vmatmul.mubr.bf16.gmra.mrb[80].mxu0 %v2018_v1  ;;  %v5067_v59 = vpop.f32.mrb[41].mxu1  ;;  %v5070_v57 = vmul.f32 0.5, %v4946_v4  ;;  %v5073_v27 = vmul.f32 0.5, %v4961_v35 }
 0x243   : > { %5763 = vst [vmem:[#allocation27_spill] sm:$0xff] %v5067_v59  ;;  %3789 = vrcp.f32 %v1593_v22  ;;  %v3134_v9 = vmul.f32 -1.442695, %v5053_v42  ;;  %v5076_v43 = vpop.f32.mrb[47].mxu0  ;;  %v5078_v46 = vpop.f32.mrb[42].mxu1  ;;  %v1594_v26 = vadd.f32 1.0, %v3772_v10  ;;  %v1907_v20 = vmul.f32 %v3185_v2, %v1274_v45 }
 0x244   : > { %v5081_v15 = vadd.f32 %v1906_v19, %v4913_v63  ;;  %v3135_v28 = vmul.f32 -1.442695, %v5063_v18  ;;  %v5084_v22 = vpop.f32.mrb[43].mxu1  ;;  %v3776_v4 = vpop.eup %3775  ;;  %v1595_v52 = vadd.f32 1.0, %v3774_v32  ;;  %v1276_v35 = vadd.f32 %v4847_v33, %v4619_v44 }
 0x245   : > { %v3186_v8 = vadd.f32 -0.5, %v3768_v51  ;;  %v1278_v1 = vadd.f32 %v4855_v34, %v4623_v49  ;;  %v1596_v59 = vadd.f32 1.0, %v3776_v4  ;;  %3791 = vpow2.f32 %v3134_v9 }
 0x246   : > { %v5091_v10 = vadd.f32 %v1907_v20, %v4916_v61  ;;  %v3187_v63 = vadd.f32 -0.5, %v3770_v60  ;;  %v3778_v45 = vpop.eup %3777  ;;  %3793 = vpow2.f32 %v3135_v28  ;;  %v5095_v2 = vadd.f32 %v4982_v37, %v4599_v5 }
 0x247   : > { %v1908_v19 = vmul.f32 %v3186_v8, %v1276_v35  ;;  %v2021_v32 = vpack.c.bf16 %v1969_v48, %v5014_v38  ;;  %v5098_v33 = vpop.f32.mrb[48].mxu0  ;;  %v3780_v51 = vpop.eup %3779  ;;  %3795 = vrcp.f32 %v1594_v26  ;;  %v5102_v9 = vadd.f32 %v4991_v54, %v4602_v6 }
 0x248   : > { %v1909_v34 = vmul.f32 %v3187_v63, %v1278_v1  ;;  %v1282_v61 = vadd.f32 %v4890_v29, %v4619_v44  ;;  %v5106_v60 = vpop.f32.mrb[49].mxu0  ;;  %v3782_v20 = vpop.eup %3781  ;;  %3797 = vrcp.f32 %v1595_v52  ;;  %v5109_v37 = vmul.f32 0.5, %v4978_v24 }
 0x249   : > { %v5112_v38 = vadd.f32 %v1908_v19, %v4973_v23  ;;  %v3136_v48 = vmul.f32 -1.442695, %v5095_v2  ;;  %2328 = vmatprep.mubr.bf16.mxu0 %v2021_v32  ;;  %v5115_v26 = vpop.f32.mrb[50].mxu0  ;;  %v5117_v54 = vpop.f32.mrb[44].mxu1  ;;  %v1597_v4 = vadd.f32 1.0, %v3780_v51  ;;  %v3188_v52 = vadd.f32 -0.5, %v3778_v45 }
 0x24a   : > { %5764 = vst [vmem:[#allocation28_spill] sm:$0xff] %v5117_v54  ;;  %v3784_v28 = vpop.eup %3783  ;;  %v1973_v29 = vadd.f32 %v1909_v34, %v4985_v56  ;;  %v3137_v35 = vmul.f32 -1.442695, %v5102_v9  ;;  %v5121_v8 = vpop.f32.mrb[51].mxu0  ;;  %3799 = vrcp.f32 %v1596_v59  ;;  %v2020_v1 = vpack.c.bf16 %v5037_v30, %v4994_v39 }
 0x24b   : > { %v5123_v24 = vpop.f32.mrb[45].mxu1  ;;  %v3786_v23 = vpop.eup %3785  ;;  %v5129_v63 = vadd.f32 %v5000_v11, %v4599_v5  ;;  %v1284_v19 = vadd.f32 %v4895_v13, %v4623_v49  ;;  %3801 = vpow2.f32 %v3136_v48  ;;  %v1910_v51 = vmul.f32 %v3188_v52, %v1282_v61 }
 0x24c   : > { %5765 = vst [vmem:[#allocation29_spill] sm:$0xff] %v5123_v24  ;;  %v5133_v56 = vpop.f32.mrb[46].mxu1  ;;  %v3788_v32 = vpop.eup %3787  ;;  %v1598_v45 = vadd.f32 1.0, %v3786_v23  ;;  %v3189_v34 = vadd.f32 -0.5, %v3782_v20  ;;  %v5138_v54 = vmul.f32 0.5, %v4998_v41  ;;  %v5141_v39 = vmul.f32 0.5, %v5023_v0  ;;  %2329 = vmatmul.mubr.bf16.gmra.mrb[84].mxu0 %v2020_v1 }
 0x24d   : > { %v5135_v24 = vpop.f32.mrb[47].mxu1  ;;  %v3790_v59 = vpop.eup %3789  ;;  %3803 = vpow2.f32 %v3137_v35  ;;  %v3138_v13 = vmul.f32 -1.442695, %v5129_v63  ;;  %v5145_v11 = vadd.f32 %v1910_v51, %v4988_v55  ;;  %v5149_v61 = vadd.f32 %v5009_v3, %v4602_v6  ;;  %v5766_v3 = vld [vmem:[#allocation24_spill] sm:$0xff] }
 0x24e   : > { %3805 = vrcp.f32 %v1597_v4  ;;  %v1911_v30 = vmul.f32 %v3189_v34, %v1284_v19  ;;  %v1599_v20 = vadd.f32 1.0, %v3788_v32  ;;  %v5152_v41 = vmul.f32 0.5, %v5034_v47 }
 0x24f   : > { %v1286_v0 = vadd.f32 %v4904_v21, %v4619_v44  ;;  %v3190_v48 = vadd.f32 -0.5, %v3784_v28  ;;  %v5156_v35 = vpop.f32.mrb[52].mxu0  ;;  %v3792_v52 = vpop.eup %3791  ;;  %3807 = vrcp.f32 %v1598_v45  ;;  %v3139_v4 = vmul.f32 -1.442695, %v5149_v61 }
 0x250   : > { %v5159_v55 = vadd.f32 %v1911_v30, %v5005_v16  ;;  %v1288_v23 = vadd.f32 %v5766_v3, %v4623_v49  ;;  %v5164_v1 = vpop.f32.mrb[53].mxu0  ;;  %v3794_v47 = vpop.eup %3793  ;;  %3809 = vpow2.f32 %v3138_v13  ;;  %v3191_v32 = vadd.f32 -0.5, %v3790_v59 }
 0x251   : > { %v1912_v19 = vmul.f32 %v3190_v48, %v1286_v0  ;;  %v5168_v21 = vadd.f32 %v5046_v62, %v4599_v5  ;;  %v5170_v28 = vpop.f32.mrb[54].mxu0  ;;  %v5172_v45 = vpop.f32.mrb[48].mxu1  ;;  %v5175_v51 = vmul.f32 0.5, %v5053_v42  ;;  %3811 = vpow2.f32 %v3139_v4 }
 0x252   : > { %5767 = vst [vmem:[#allocation24_spill] sm:$0xff] %v5172_v45  ;;  %v3796_v16 = vpop.eup %3795  ;;  %v2023_v34 = vpack.c.bf16 %v1973_v29, %v5091_v10  ;;  %v5180_v13 = vadd.f32 %v5057_v53, %v4602_v6  ;;  %v5182_v59 = vpop.f32.mrb[55].mxu0  ;;  %v1600_v0 = vadd.f32 1.0, %v3792_v52  ;;  %v1913_v3 = vmul.f32 %v3191_v32, %v1288_v23 }
 0x253   : > { %v5184_v30 = vpop.f32.mrb[49].mxu1  ;;  %v3798_v62 = vpop.eup %3797  ;;  %v5187_v48 = vadd.f32 %v1912_v19, %v5028_v17  ;;  %v3140_v42 = vmul.f32 -1.442695, %v5168_v21  ;;  %3813 = vrcp.f32 %v1599_v20  ;;  %v1601_v10 = vadd.f32 1.0, %v3794_v47 }
 0x254   : > { %5768 = vst [vmem:[#allocation30_spill] sm:$0xff] %v5184_v30  ;;  %v5190_v45 = vpop.f32.mrb[50].mxu1  ;;  %v5193_v29 = vmul.f32 0.5, %v5063_v18  ;;  %2338 = vmatprep.mubr.bf16.mxu0 %v2023_v34  ;;  %v3141_v53 = vmul.f32 -1.442695, %v5180_v13  ;;  %v3800_v30 = vpop.eup %3799  ;;  %v1977_v52 = vadd.f32 %v1913_v3, %v5049_v58  ;;  %v1292_v17 = vadd.f32 %v4939_v40, %v4619_v44 }
 0x255   : > { %5769 = vst [vmem:[#allocation31_spill] sm:$0xff] %v5190_v45  ;;  %v5196_v4 = vpop.f32.mrb[51].mxu1  ;;  %3815 = vpow2.f32 %v3140_v42  ;;  %v3192_v23 = vadd.f32 -0.5, %v3796_v16  ;;  %v3802_v19 = vpop.eup %3801  ;;  %v2022_v20 = vpack.c.bf16 %v5112_v38, %v5081_v15  ;;  %v5205_v18 = vadd.f32 %v5065_v25, %v4599_v5 }
 0x256   : > { %5770 = vst [vmem:[#allocation32_spill] sm:$0xff] %v5196_v4  ;;  %3817 = vpow2.f32 %v3141_v53  ;;  %v1294_v47 = vadd.f32 %v4951_v31, %v4623_v49  ;;  %v3193_v34 = vadd.f32 -0.5, %v3798_v62  ;;  %v5211_v40 = vadd.f32 %v5076_v43, %v4602_v6 }
 0x257   : > { %v3804_v32 = vpop.eup %3803  ;;  %3819 = vrcp.f32 %v1600_v0  ;;  %v1914_v58 = vmul.f32 %v3192_v23, %v1292_v17  ;;  %v5213_v16 = vpop.f32.mrb[56].mxu0  ;;  %v5216_v15 = vmul.f32 0.5, %v5095_v2  ;;  %v5219_v25 = vmul.f32 0.5, %v5102_v9  ;;  %2339 = vmatmul.mubr.bf16.gmra.mrb[88].mxu0 %v2022_v20 }
 0x258   : > { %v3806_v3 = vpop.eup %3805  ;;  %3821 = vrcp.f32 %v1601_v10  ;;  %v3142_v31 = vmul.f32 -1.442695, %v5205_v18  ;;  %v5222_v38 = vpop.f32.mrb[57].mxu0  ;;  %v1602_v62 = vadd.f32 1.0, %v3802_v19  ;;  %v1915_v43 = vmul.f32 %v3193_v34, %v1294_v47  ;;  %v5773_v34 = vld [vmem:[#allocation25_spill] sm:$0xff] }
 0x259   : > { %v5225_v0 = vadd.f32 %v1914_v58, %v5070_v57  ;;  %v3143_v42 = vmul.f32 -1.442695, %v5211_v40  ;;  %v5228_v53 = vpop.f32.mrb[58].mxu0  ;;  %v5230_v10 = vpop.f32.mrb[52].mxu1  ;;  %v1603_v17 = vadd.f32 1.0, %v3804_v32  ;;  %v5233_v9 = vmul.f32 0.5, %v5129_v63 }
 0x25a   : > { %5771 = vst [vmem:[#allocation33_spill] sm:$0xff] %v5230_v10  ;;  %v3808_v2 = vpop.eup %3807  ;;  %v1296_v23 = vadd.f32 %v4956_v36, %v4619_v44  ;;  %v3194_v20 = vadd.f32 -0.5, %v3800_v30  ;;  %v5237_v19 = vpop.f32.mrb[59].mxu0  ;;  %3823 = vpow2.f32 %v3142_v31  ;;  %v5242_v58 = vadd.f32 %v1915_v43, %v5073_v27 }
 0x25b   : > { %v5239_v57 = vpop.f32.mrb[53].mxu1  ;;  %v3810_v47 = vpop.eup %3809  ;;  %v1298_v10 = vadd.f32 %v5773_v34, %v4623_v49  ;;  %v3195_v32 = vadd.f32 -0.5, %v3806_v3  ;;  %3825 = vpow2.f32 %v3143_v42  ;;  %v5250_v36 = vadd.f32 %v5098_v33, %v4599_v5 }
 0x25c   : > { %5772 = vst [vmem:[#allocation34_spill] sm:$0xff] %v5239_v57  ;;  %v5246_v4 = vpop.f32.mrb[54].mxu1  ;;  %v3812_v63 = vpop.eup %3811  ;;  %v1916_v45 = vmul.f32 %v3194_v20, %v1296_v23  ;;  %v2025_v30 = vpack.c.bf16 %v1977_v52, %v5159_v55  ;;  %3827 = vrcp.f32 %v1602_v62  ;;  %v5256_v27 = vmul.f32 0.5, %v5149_v61  ;;  %v5775_v55 = vld [vmem:[#allocation26_spill] sm:$0xff] }
 0x25d   : > { %v5253_v57 = vpop.f32.mrb[55].mxu1  ;;  %v1917_v31 = vmul.f32 %v3195_v32, %v1298_v10  ;;  %v5260_v3 = vadd.f32 %v5106_v60, %v4602_v6  ;;  %v3814_v43 = vpop.eup %3813  ;;  %v1604_v42 = vadd.f32 1.0, %v3810_v47  ;;  %v3144_v33 = vmul.f32 -1.442695, %v5250_v36 }
 0x25e   : > { %5774 = vst [vmem:[#allocation25_spill] sm:$0xff] %v5253_v57  ;;  %v5263_v23 = vadd.f32 %v1916_v45, %v5109_v37  ;;  %2348 = vmatprep.mubr.bf16.mxu0 %v2025_v30  ;;  %v1302_v52 = vadd.f32 %v5775_v55, %v4619_v44  ;;  %3829 = vrcp.f32 %v1603_v17  ;;  %v1605_v61 = vadd.f32 1.0, %v3812_v63 }
 0x25f   : > { %v3816_v62 = vpop.eup %3815  ;;  %v1981_v10 = vadd.f32 %v1917_v31, %v5138_v54  ;;  %v3145_v20 = vmul.f32 -1.442695, %v5260_v3  ;;  %v5270_v60 = vpop.f32.mrb[60].mxu0  ;;  %v5273_v47 = vmul.f32 0.5, %v5168_v21  ;;  %3831 = vpow2.f32 %v3144_v33 }
 0x260   : > { %v3818_v34 = vpop.eup %3817  ;;  %v3196_v37 = vadd.f32 -0.5, %v3808_v2  ;;  %v2024_v45 = vpack.c.bf16 %v5187_v48, %v5145_v11  ;;  %v5277_v32 = vpop.f32.mrb[61].mxu0  ;;  %v5280_v17 = vmul.f32 0.5, %v5180_v13  ;;  %v5284_v54 = vadd.f32 %v5115_v26, %v4599_v5 }
 0x261   : > { %v3820_v30 = vpop.eup %3819  ;;  %3833 = vpow2.f32 %v3145_v20  ;;  %v1304_v21 = vadd.f32 %v5011_v7, %v4623_v49  ;;  %v5288_v63 = vpop.f32.mrb[62].mxu0  ;;  %v3197_v48 = vadd.f32 -0.5, %v3814_v43  ;;  %v5294_v13 = vadd.f32 %v5121_v8, %v4602_v6 }
 0x262   : > { %v5290_v2 = vpop.f32.mrb[56].mxu1  ;;  %v3822_v31 = vpop.eup %3821  ;;  %3835 = vrcp.f32 %v1604_v42  ;;  %v1918_v11 = vmul.f32 %v3196_v37, %v1302_v52  ;;  %2349 = vmatmul.mubr.bf16.gmra.mrb[92].mxu0 %v2024_v45  ;;  %v1606_v55 = vadd.f32 1.0, %v3816_v62  ;;  %v1607_v7 = vadd.f32 1.0, %v3818_v34 }
 0x263   : > { %v5296_v33 = vpop.f32.mrb[63].mxu0  ;;  %v5298_v26 = vpop.f32.mrb[57].mxu1  ;;  %3837 = vrcp.f32 %v1605_v61  ;;  %v3146_v20 = vmul.f32 -1.442695, %v5284_v54  ;;  %v1919_v52 = vmul.f32 %v3197_v48, %v1304_v21  ;;  %v3147_v43 = vmul.f32 -1.442695, %v5294_v13 }
 0x264   : > { %5776 = vst [vmem:[#allocation26_spill] sm:$0xff] %v5298_v26  ;;  %v5301_v57 = vpop.f32.mrb[58].mxu1  ;;  %v5304_v42 = vadd.f32 %v1918_v11, %v5141_v39  ;;  %v1306_v8 = vadd.f32 %v5019_v50, %v4619_v44  ;;  %v3824_v45 = vpop.eup %3823  ;;  %v3198_v61 = vadd.f32 -0.5, %v3820_v30  ;;  %v1308_v62 = vadd.f32 %v5025_v12, %v4623_v49 }
 0x265   : > { %5777 = vst [vmem:[#allocation35_spill] sm:$0xff] %v5301_v57  ;;  %v5309_v37 = vpop.f32.mrb[59].mxu1  ;;  %3839 = vpow2.f32 %v3146_v20  ;;  %v3199_v34 = vadd.f32 -0.5, %v3822_v31  ;;  %v3826_v26 = vpop.eup %3825  ;;  %v1608_v57 = vadd.f32 1.0, %v3824_v45  ;;  %v5314_v39 = vadd.f32 %v1919_v52, %v5152_v41 }
 0x266   : > { %3841 = vpow2.f32 %v3147_v43  ;;  %v5318_v21 = vadd.f32 %v5156_v35, %v4599_v5  ;;  %v3828_v50 = vpop.eup %3827  ;;  %v1920_v11 = vmul.f32 %v3198_v61, %v1306_v8  ;;  %v2027_v30 = vpack.c.bf16 %v1981_v10, %v5242_v58  ;;  %v5332_v58 = vpop.f32.mrb[60].mxu1  ;;  %v5778_v8 = vld [vmem:[#allocation27_spill] sm:$0xff] }
 0x267   : > { %3843 = vrcp.f32 %v1606_v55  ;;  %v1921_v48 = vmul.f32 %v3199_v34, %v1308_v62  ;;  %v1609_v20 = vadd.f32 1.0, %v3826_v26  ;;  %v5324_v31 = vadd.f32 %v5164_v1, %v4602_v6 }
 0x268   : > { %3845 = vrcp.f32 %v1607_v7  ;;  %v3148_v12 = vmul.f32 -1.442695, %v5318_v21  ;;  %v3830_v41 = vpop.eup %3829  ;;  %v5327_v52 = vadd.f32 %v1920_v11, %v5175_v51  ;;  %2358 = vmatprep.mubr.bf16.mxu0 %v2027_v30  ;;  %v1312_v55 = vadd.f32 %v5059_v14, %v4619_v44 }
 0x269   : > { %3847 = vrcp.f32 %v1608_v57  ;;  %v1985_v35 = vadd.f32 %v1921_v48, %v5193_v29  ;;  %v3832_v10 = vpop.eup %3831  ;;  %v5335_v26 = vmul.f32 0.5, %v5205_v18  ;;  %v3149_v1 = vmul.f32 -1.442695, %v5324_v31  ;;  %v5338_v57 = vpop.f32.mrb[61].mxu1 }
 0x26a   : > { %3849 = vpow2.f32 %v3148_v12  ;;  %v3200_v7 = vadd.f32 -0.5, %v3828_v50  ;;  %v1610_v43 = vadd.f32 1.0, %v3832_v10  ;;  %v2026_v29 = vpack.c.bf16 %v5263_v23, %v5225_v0  ;;  %v5348_v18 = vpop.f32.mrb[62].mxu1 }
 0x26b   : > { %v3834_v51 = vpop.eup %3833  ;;  %v5344_v14 = vadd.f32 %v5170_v28, %v4599_v5  ;;  %v1314_v45 = vadd.f32 %v5778_v8, %v4623_v49  ;;  %v5351_v62 = vmul.f32 0.5, %v5211_v40  ;;  %3851 = vpow2.f32 %v3149_v1  ;;  %v5353_v11 = vpop.f32.mrb[63].mxu1 }
 0x26c   : > { %v3836_v61 = vpop.eup %3835  ;;  %v1922_v34 = vmul.f32 %v3200_v7, %v1312_v55  ;;  %v3201_v50 = vadd.f32 -0.5, %v3830_v41  ;;  %3853 = vrcp.f32 %v1609_v20  ;;  %v5356_v0 = vmul.f32 0.5, %v5250_v36  ;;  %2359 = vmatmul.mubr.bf16.gmra.mrb[96].mxu0 %v2026_v29 }
 0x26d   : > { %v3838_v48 = vpop.eup %3837  ;;  %v3150_v28 = vmul.f32 -1.442695, %v5344_v14  ;;  %v5361_v23 = vadd.f32 %v5182_v59, %v4602_v6  ;;  %3855 = vrcp.f32 %v1610_v43  ;;  %v1611_v40 = vadd.f32 1.0, %v3834_v51 }
 0x26e   : > { %v5364_v30 = vadd.f32 %v1922_v34, %v5216_v15  ;;  %v1923_v12 = vmul.f32 %v3201_v50, %v1314_v45  ;;  %v1316_v36 = vadd.f32 %v5078_v46, %v4619_v44  ;;  %v3202_v55 = vadd.f32 -0.5, %v3836_v61 }
 0x26f   : > { %v3840_v41 = vpop.eup %3839  ;;  %3857 = vpow2.f32 %v3150_v28  ;;  %v3151_v20 = vmul.f32 -1.442695, %v5361_v23  ;;  %v1318_v59 = vadd.f32 %v5084_v22, %v4623_v49  ;;  %v3203_v51 = vadd.f32 -0.5, %v3838_v48 }
 0x270   : > { %v3842_v10 = vpop.eup %3841  ;;  %v1612_v1 = vadd.f32 1.0, %v3840_v41  ;;  %v5370_v7 = vadd.f32 %v1923_v12, %v5219_v25  ;;  %v5375_v43 = vmul.f32 0.5, %v5260_v3  ;;  %v1924_v29 = vmul.f32 %v3202_v55, %v1316_v36 }
 0x271   : > { %v3844_v15 = vpop.eup %3843  ;;  %3859 = vpow2.f32 %v3151_v20  ;;  %v5379_v8 = vadd.f32 %v5213_v16, %v4599_v5  ;;  %v5382_v45 = vmul.f32 0.5, %v5284_v54  ;;  %v1925_v25 = vmul.f32 %v3203_v51, %v1318_v59 }
 0x272   : > { %v3846_v46 = vpop.eup %3845  ;;  %v2029_v61 = vpack.c.bf16 %v1985_v35, %v5314_v39  ;;  %v5387_v22 = vadd.f32 %v5222_v38, %v4602_v6  ;;  %3861 = vrcp.f32 %v1611_v40  ;;  %v1613_v3 = vadd.f32 1.0, %v3842_v10  ;;  %v5779_v39 = vld [vmem:[#allocation28_spill] sm:$0xff] }
 0x273   : > { %v3848_v34 = vpop.eup %3847  ;;  %v5390_v50 = vadd.f32 %v1924_v29, %v5233_v9  ;;  %v3152_v16 = vmul.f32 -1.442695, %v5379_v8  ;;  %3863 = vrcp.f32 %v1612_v1  ;;  %v1989_v54 = vadd.f32 %v1925_v25, %v5256_v27  ;;  %v5780_v27 = vld [vmem:[#allocation29_spill] sm:$0xff] }
 0x274   : > { %v3850_v48 = vpop.eup %3849  ;;  %2368 = vmatprep.mubr.bf16.mxu0 %v2029_v61  ;;  %v3153_v28 = vmul.f32 -1.442695, %v5387_v22  ;;  %v1322_v35 = vadd.f32 %v5779_v39, %v4619_v44  ;;  %v3204_v12 = vadd.f32 -0.5, %v3844_v15  ;;  %v2028_v40 = vpack.c.bf16 %v5327_v52, %v5304_v42 }
 0x275   : > { %v1614_v38 = vadd.f32 1.0, %v3850_v48  ;;  %3865 = vpow2.f32 %v3152_v16  ;;  %v3852_v9 = vpop.eup %3851  ;;  %v5401_v41 = vadd.f32 %v5228_v53, %v4599_v5  ;;  %v1324_v20 = vadd.f32 %v5780_v27, %v4623_v49 }
 0x276   : > { %3867 = vpow2.f32 %v3153_v28  ;;  %v3205_v36 = vadd.f32 -0.5, %v3846_v46  ;;  %v3854_v55 = vpop.eup %3853  ;;  %v5406_v10 = vmul.f32 0.5, %v5294_v13  ;;  %v1926_v1 = vmul.f32 %v3204_v12, %v1322_v35  ;;  %2369 = vmatmul.mubr.bf16.gmra.mrb[100].mxu0 %v2028_v40 }
 0x277   : > { %3869 = vrcp.f32 %v1613_v3  ;;  %v5410_v42 = vadd.f32 %v5237_v19, %v4602_v6  ;;  %v3856_v52 = vpop.eup %3855  ;;  %v5413_v59 = vmul.f32 0.5, %v5318_v21  ;;  %v1615_v53 = vadd.f32 1.0, %v3852_v9 }
 0x278   : > { %v3154_v51 = vmul.f32 -1.442695, %v5401_v41  ;;  %v1927_v15 = vmul.f32 %v3205_v36, %v1324_v20  ;;  %3871 = vrcp.f32 %v1614_v38  ;;  %v5417_v46 = vadd.f32 %v1926_v1, %v5273_v47 }
 0x279   : > { %v3858_v29 = vpop.eup %3857  ;;  %v3155_v13 = vmul.f32 -1.442695, %v5410_v42  ;;  %v1326_v25 = vadd.f32 %v5133_v56, %v4619_v44  ;;  %v3206_v21 = vadd.f32 -0.5, %v3848_v34  ;;  %v1328_v16 = vadd.f32 %v5135_v24, %v4623_v49 }
 0x27a   : > { %v1616_v19 = vadd.f32 1.0, %v3858_v29  ;;  %3873 = vpow2.f32 %v3154_v51  ;;  %v5423_v61 = vadd.f32 %v1927_v15, %v5280_v17  ;;  %v3207_v48 = vadd.f32 -0.5, %v3854_v55 }
 0x27b   : > { %v3860_v3 = vpop.eup %3859  ;;  %3875 = vpow2.f32 %v3155_v13  ;;  %v5429_v47 = vadd.f32 %v5270_v60, %v4599_v5  ;;  %v1928_v39 = vmul.f32 %v3206_v21, %v1326_v25  ;;  %v2031_v56 = vpack.c.bf16 %v1989_v54, %v5370_v7  ;;  %v5781_v60 = vld [vmem:[#allocation24_spill] sm:$0xff]  ;;  %v5783_v13 = vld [vmem:[#allocation31_spill] sm:$0xff] }
 0x27c   : > { %3877 = vrcp.f32 %v1615_v53  ;;  %v1617_v28 = vadd.f32 1.0, %v3860_v3  ;;  %v3862_v35 = vpop.eup %3861  ;;  %v1929_v17 = vmul.f32 %v3207_v48, %v1328_v16  ;;  %v5435_v38 = vadd.f32 %v5277_v32, %v4602_v6  ;;  %v5784_v21 = vld [vmem:[#allocation32_spill] sm:$0xff] }
 0x27d   : > { %3879 = vrcp.f32 %v1616_v19  ;;  %v3156_v34 = vmul.f32 -1.442695, %v5429_v47  ;;  %v3864_v24 = vpop.eup %3863  ;;  %v1992_v12 = vadd.f32 %v1928_v39, %v5335_v26  ;;  %2378 = vmatprep.mubr.bf16.mxu0 %v2031_v56  ;;  %v1332_v40 = vadd.f32 %v5781_v60, %v4619_v44 }
 0x27e   : > { %3881 = vrcp.f32 %v1617_v28  ;;  %v3208_v9 = vadd.f32 -0.5, %v3856_v52  ;;  %v5441_v7 = vmul.f32 0.5, %v5324_v31  ;;  %v1993_v54 = vadd.f32 %v1929_v17, %v5351_v62  ;;  %v5782_v31 = vld [vmem:[#allocation30_spill] sm:$0xff] }
 0x27f   : > { %v3866_v27 = vpop.eup %3865  ;;  %3883 = vpow2.f32 %v3156_v34  ;;  %v3157_v20 = vmul.f32 -1.442695, %v5435_v38  ;;  %v2030_v26 = vpack.c.bf16 %v5390_v50, %v5364_v30  ;;  %v5449_v1 = vadd.f32 %v5288_v63, %v4599_v5 }
 0x280   : > { %v3868_v32 = vpop.eup %3867  ;;  %v1618_v36 = vadd.f32 1.0, %v3866_v27  ;;  %v1930_v55 = vmul.f32 %v3208_v9, %v1332_v40  ;;  %v1334_v51 = vadd.f32 %v5782_v31, %v4623_v49  ;;  %v3209_v62 = vadd.f32 -0.5, %v3862_v35 }
 0x281   : > { %v3870_v52 = vpop.eup %3869  ;;  %v1619_v53 = vadd.f32 1.0, %v3868_v32  ;;  %3885 = vpow2.f32 %v3157_v20  ;;  %v5454_v15 = vmul.f32 0.5, %v5344_v14  ;;  %2379 = vmatmul.mubr.bf16.gmra.mrb[104].mxu0 %v2030_v26  ;;  %v3158_v30 = vmul.f32 -1.442695, %v5449_v1  ;;  %v5786_v32 = vld [vmem:[#allocation34_spill] sm:$0xff] }
 0x282   : > { %3887 = vrcp.f32 %v1618_v36  ;;  %v5457_v29 = vadd.f32 %v1930_v55, %v5356_v0  ;;  %v3872_v50 = vpop.eup %3871  ;;  %v1931_v5 = vmul.f32 %v3209_v62, %v1334_v51  ;;  %v5462_v63 = vadd.f32 %v5296_v33, %v4602_v6 }
 0x283   : > { %3889 = vrcp.f32 %v1619_v53  ;;  %v1336_v25 = vadd.f32 %v5783_v13, %v4619_v44  ;;  %v3210_v14 = vadd.f32 -0.5, %v3864_v24  ;;  %v1338_v0 = vadd.f32 %v5784_v21, %v4623_v49  ;;  %v5785_v24 = vld [vmem:[#allocation33_spill] sm:$0xff] }
 0x284   : > { %v3874_v19 = vpop.eup %3873  ;;  %3891 = vpow2.f32 %v3158_v30  ;;  %v3211_v3 = vadd.f32 -0.5, %v3870_v52  ;;  %v1809_v48 = vmul.f32 0.5, %v5361_v23  ;;  %v1995_v39 = vadd.f32 %v1931_v5, %v5375_v43 }
 0x285   : > { %v3876_v16 = vpop.eup %3875  ;;  %v1620_v28 = vadd.f32 1.0, %v3874_v19  ;;  %v3159_v56 = vmul.f32 -1.442695, %v5462_v63  ;;  %v1932_v35 = vmul.f32 %v3210_v14, %v1336_v25  ;;  %v2033_v34 = vpack.c.bf16 %v1993_v54, %v5423_v61 }
 0x286   : > { %v3878_v6 = vpop.eup %3877  ;;  %v1621_v33 = vadd.f32 1.0, %v3876_v16  ;;  %v1933_v17 = vmul.f32 %v3211_v3, %v1338_v0  ;;  %v1342_v40 = vadd.f32 %v5785_v24, %v4619_v44  ;;  %v3212_v9 = vadd.f32 -0.5, %v3872_v50  ;;  %v5788_v0 = vld [vmem:[#allocation26_spill] sm:$0xff] }
 0x287   : > { %v3880_v60 = vpop.eup %3879  ;;  %3893 = vrcp.f32 %v1620_v28  ;;  %v2032_v27 = vpack.c.bf16 %v1992_v12, %v5417_v46  ;;  %v1996_v43 = vadd.f32 %v1932_v35, %v5382_v45  ;;  %2388 = vmatprep.mubr.bf16.mxu0 %v2033_v34  ;;  %v1344_v36 = vadd.f32 %v5786_v32, %v4623_v49  ;;  %v5787_v12 = vld [vmem:[#allocation25_spill] sm:$0xff] }
 0x288   : > { %v3882_v23 = vpop.eup %3881  ;;  %3895 = vrcp.f32 %v1621_v33  ;;  %v1997_v20 = vadd.f32 %v1933_v17, %v5406_v10  ;;  %v1934_v61 = vmul.f32 %v3212_v9, %v1342_v40  ;;  %v3213_v54 = vadd.f32 -0.5, %v3878_v6  ;;  %v5789_v40 = vld [vmem:[#allocation35_spill] sm:$0xff] }
 0x289   : > { %v3884_v55 = vpop.eup %3883  ;;  %3897 = vpow2.f32 %v3159_v56  ;;  %v1346_v26 = vadd.f32 %v5246_v4, %v4619_v44  ;;  %2389 = vmatmul.mubr.bf16.gmra.mrb[108].mxu0 %v2032_v27  ;;  %v3214_v46 = vadd.f32 -0.5, %v3880_v60  ;;  %v1348_v53 = vadd.f32 %v5787_v12, %v4623_v49 }
 0x28a   : > { %v1622_v52 = vadd.f32 1.0, %v3884_v55  ;;  %v3215_v45 = vadd.f32 -0.5, %v3882_v23  ;;  %v1998_v10 = vadd.f32 %v1934_v61, %v5413_v59  ;;  %v1935_v51 = vmul.f32 %v3213_v54, %v1344_v36 }
 0x28b   : > { %v3886_v31 = vpop.eup %3885  ;;  %v2035_v62 = vpack.c.bf16 %v1997_v20, %v1995_v39  ;;  %v1352_v30 = vadd.f32 %v5290_v2, %v4619_v44  ;;  %v1936_v13 = vmul.f32 %v3214_v46, %v1346_v26  ;;  %v2034_v21 = vpack.c.bf16 %v1996_v43, %v5457_v29 }
 0x28c   : > { %v3888_v50 = vpop.eup %3887  ;;  %3899 = vrcp.f32 %v1622_v52  ;;  %v1623_v5 = vadd.f32 1.0, %v3886_v31  ;;  %v1937_v4 = vmul.f32 %v3215_v45, %v1348_v53  ;;  %v1999_v19 = vadd.f32 %v1935_v51, %v5441_v7 }
 0x28d   : > { %v3890_v25 = vpop.eup %3889  ;;  %2398 = vmatprep.mubr.bf16.mxu0 %v2035_v62  ;;  %v3216_v14 = vadd.f32 -0.5, %v3888_v50  ;;  %v1354_v59 = vadd.f32 %v5788_v0, %v4623_v49  ;;  %v2000_v16 = vadd.f32 %v1936_v13, %v5454_v15  ;;  %v1810_v39 = vmul.f32 0.5, %v5379_v8  ;;  %v5791_v0 = vld [vmem:[#allocation23_spill] sm:$0xff] }
 0x28e   : > { %v3892_v3 = vpop.eup %3891  ;;  %3901 = vrcp.f32 %v1623_v5  ;;  %v2001_v2 = vadd.f32 %v1937_v4, %v1809_v48  ;;  %v3217_v28 = vadd.f32 -0.5, %v3890_v25  ;;  %v1811_v33 = vmul.f32 0.5, %v5387_v22 }
 0x28f   : > { %v1624_v56 = vadd.f32 1.0, %v3892_v3  ;;  %v1938_v6 = vmul.f32 %v3216_v14, %v1352_v30  ;;  %v2036_v17 = vpack.c.bf16 %v2000_v16, %v1998_v10  ;;  %v1356_v15 = vadd.f32 %v5789_v40, %v4619_v44 }
 0x290   : > { %v1939_v7 = vmul.f32 %v3217_v28, %v1354_v59  ;;  %v2037_v35 = vpack.c.bf16 %v2001_v2, %v1999_v19  ;;  %v1358_v8 = vadd.f32 %v5309_v37, %v4623_v49  ;;  %v1812_v22 = vmul.f32 0.5, %v5401_v41 }
 0x291   : > { %v3894_v34 = vpop.eup %3893  ;;  %3903 = vrcp.f32 %v1624_v56  ;;  %v2002_v29 = vadd.f32 %v1938_v6, %v1810_v39  ;;  %2399 = vmatmul.mubr.bf16.gmra.mrb[112].mxu0 %v2034_v21  ;;  %v1813_v20 = vmul.f32 0.5, %v5410_v42  ;;  %v1362_v36 = vadd.f32 %v5332_v58, %v4619_v44 }
 0x292   : > { %v3896_v60 = vpop.eup %3895  ;;  %v2003_v24 = vadd.f32 %v1939_v7, %v1811_v33  ;;  %v3218_v48 = vadd.f32 -0.5, %v3894_v34  ;;  %2408 = vmatprep.mubr.bf16.mxu0 %v2037_v35  ;;  %v1364_v37 = vadd.f32 %v5338_v57, %v4623_v49  ;;  %v1814_v41 = vmul.f32 0.5, %v5429_v47 }
 0x293   : > { %v3898_v9 = vpop.eup %3897  ;;  %v3219_v27 = vadd.f32 -0.5, %v3896_v60  ;;  %v1815_v31 = vmul.f32 0.5, %v5435_v38  ;;  %v1366_v51 = vadd.f32 %v5348_v18, %v4619_v44  ;;  %v1816_v57 = vmul.f32 0.5, %v5449_v1  ;;  %v2074_v44 = vld [vmem:[%s5714_s7] sm:$0x3] }
 0x294   : > { %v1625_v23 = vadd.f32 1.0, %v3898_v9  ;;  %v1940_v43 = vmul.f32 %v3218_v48, %v1356_v15  ;;  %v1368_v13 = vadd.f32 %v5353_v11, %v4623_v49  ;;  %v1817_v38 = vmul.f32 0.5, %v5462_v63  ;;  %v5790_v18 = vld [vmem:[#allocation22_spill] sm:$0xff] }
 0x295   : > { %v1941_v32 = vmul.f32 %v3219_v27, %v1358_v8  ;;  %v5515_v1 = vrot.slane %v2074_v44, %v5790_v18  ;;  %v5518_v59 = vrot.slane %v2074_v44, %v5791_v0 }
 0x296   : > { %v3900_v55 = vpop.eup %3899  ;;  %3905 = vrcp.f32 %v1625_v23  ;;  %v2004_v61 = vadd.f32 %v1940_v43, %v1812_v22 }
 0x297   : > { %v2005_v54 = vadd.f32 %v1941_v32, %v1813_v20  ;;  %v3220_v26 = vadd.f32 -0.5, %v3900_v55 }
 0x298   : > { %v3902_v52 = vpop.eup %3901  ;;  %v2038_v46 = vpack.c.bf16 %v2004_v61, %v2002_v29 }
 0x299   : > { %v1942_v12 = vmul.f32 %v3220_v26, %v1362_v36  ;;  %v3221_v53 = vadd.f32 -0.5, %v3902_v52  ;;  %v2039_v45 = vpack.c.bf16 %v2005_v54, %v2003_v24  ;;  %2409 = vmatmul.mubr.bf16.gmra.mrb[116].mxu0 %v2036_v17 }
 0x29b   : > { %v3904_v42 = vpop.eup %3903  ;;  %v2006_v58 = vadd.f32 %v1942_v12, %v1814_v41  ;;  %v1943_v10 = vmul.f32 %v3221_v53, %v1364_v37  ;;  %2418 = vmatprep.mubr.bf16.mxu0 %v2039_v45 }
 0x29c   : > { %v3222_v62 = vadd.f32 -0.5, %v3904_v42 }
 0x29d   : > { %v2007_v30 = vadd.f32 %v1943_v10, %v1815_v31 }
 0x29e   : > { %v1944_v50 = vmul.f32 %v3222_v62, %v1366_v51 }
 0x2a0   : > { %v3906_v5 = vpop.eup %3905  ;;  %v2008_v47 = vadd.f32 %v1944_v50, %v1816_v57 }
 0x2a1   : > { %v3223_v4 = vadd.f32 -0.5, %v3906_v5  ;;  %2419 = vmatmul.mubr.bf16.gmra.mrb[120].mxu0 %v2038_v46 }
 0x2a2   : > { %v2040_v25 = vpack.c.bf16 %v2008_v47, %v2006_v58 }
 0x2a3   : > { %v1945_v19 = vmul.f32 %v3223_v4, %v1368_v13 }
 0x2a5   : > { %v2009_v14 = vadd.f32 %v1945_v19, %v1817_v38 }
 0x2a7   : > { %v2041_v21 = vpack.c.bf16 %v2009_v14, %v2007_v30 }
 0x2a9   : > { %2428 = vmatprep.mubr.bf16.mxu0 %v2041_v21 }
 0x2aa   : > { %2429 = vmatmul.mubr.bf16.gmra.mrb[124].mxu0 %v2040_v25 }
 0x2e9   : > { %v2280_v49 = vpop.f32.mrb[64].mxu0 }
 0x2ea   : > { %v2281_v11 = vadd.f32 %v2280_v49, %v5515_v1  ;;  %v2282_v3 = vpop.f32.mrb[65].mxu0 }
 0x2eb   : > { %v2283_v63 = vadd.f32 %v2282_v3, %v5518_v59  ;;  %v2284_v16 = vpop.f32.mrb[66].mxu0 }
 0x2ec   : > { %v2285_v2 = vadd.f32 %v2284_v16, %v5515_v1  ;;  %v2286_v28 = vpop.f32.mrb[67].mxu0  ;;  %v2439_v56 = vmax.f32 %v2281_v11, 0.0 }
 0x2ed   : > { %v2287_v39 = vadd.f32 %v2286_v28, %v5518_v59  ;;  %v2440_v33 = vmax.f32 %v2283_v63, 0.0 }
 0x2ee   : > { %v2441_v6 = vmax.f32 %v2285_v2, 0.0 }
 0x2ef   : > { %v2442_v7 = vmax.f32 %v2287_v39, 0.0 }
 0x2f0   : > { %v2503_v35 = vpack.c.bf16 %v2441_v6, %v2439_v56 }
 0x2f1   : > { %v2504_v17 = vpack.c.bf16 %v2442_v7, %v2440_v33 }
 0x2f3   : > { %2702 = vmatprep.mubr.bf16.mxu1 %v2504_v17 }
 0x2f4   : > { %2703 = vmatmul.mubr.bf16.vlgmr.msra.gmra.mrb[64].mxu1 %v2503_v35 }
 0x2f5   : > { %v2290_v34 = vpop.f32.mrb[68].mxu0 }
 0x2f6   : > { %v2291_v29 = vadd.f32 %v2290_v34, %v5515_v1  ;;  %v2292_v60 = vpop.f32.mrb[69].mxu0 }
 0x2f7   : > { %v2293_v24 = vadd.f32 %v2292_v60, %v5518_v59  ;;  %v2294_v40 = vpop.f32.mrb[70].mxu0 }
 0x2f8   : > { %v2295_v15 = vadd.f32 %v2294_v40, %v5515_v1  ;;  %v2296_v48 = vpop.f32.mrb[71].mxu0  ;;  %v2443_v8 = vmax.f32 %v2291_v29, 0.0 }
 0x2f9   : > { %v2297_v9 = vadd.f32 %v2296_v48, %v5518_v59  ;;  %v2444_v22 = vmax.f32 %v2293_v24, 0.0 }
 0x2fa   : > { %v2445_v27 = vmax.f32 %v2295_v15, 0.0 }
 0x2fb   : > { %v2446_v23 = vmax.f32 %v2297_v9, 0.0 }
 0x2fc   : > { %v2505_v43 = vpack.c.bf16 %v2445_v27, %v2443_v8 }
 0x2fd   : > { %v2506_v20 = vpack.c.bf16 %v2446_v23, %v2444_v22 }
 0x2ff   : > { %2710 = vmatprep.mubr.bf16.mxu1 %v2506_v20 }
 0x300   : > { %v2300_v32 = vpop.f32.mrb[72].mxu0  ;;  %2711 = vmatmul.mubr.bf16.gmra.mrb[68].mxu1 %v2505_v43 }
 0x301   : > { %v2301_v36 = vadd.f32 %v2300_v32, %v5515_v1  ;;  %v2302_v55 = vpop.f32.mrb[73].mxu0 }
 0x302   : > { %v2303_v61 = vadd.f32 %v2302_v55, %v5518_v59  ;;  %v2304_v54 = vpop.f32.mrb[74].mxu0 }
 0x303   : > { %v2305_v26 = vadd.f32 %v2304_v54, %v5515_v1  ;;  %v2306_v37 = vpop.f32.mrb[75].mxu0  ;;  %v2447_v46 = vmax.f32 %v2301_v36, 0.0 }
 0x304   : > { %v2307_v52 = vadd.f32 %v2306_v37, %v5518_v59  ;;  %v2448_v12 = vmax.f32 %v2303_v61, 0.0 }
 0x305   : > { %v2449_v41 = vmax.f32 %v2305_v26, 0.0 }
 0x306   : > { %v2450_v53 = vmax.f32 %v2307_v52, 0.0 }
 0x307   : > { %v2507_v45 = vpack.c.bf16 %v2449_v41, %v2447_v46 }
 0x308   : > { %v2508_v42 = vpack.c.bf16 %v2450_v53, %v2448_v12 }
 0x30a   : > { %v2310_v31 = vpop.f32.mrb[76].mxu0  ;;  %2718 = vmatprep.mubr.bf16.mxu1 %v2508_v42 }
 0x30b   : > { %v2311_v58 = vadd.f32 %v2310_v31, %v5515_v1  ;;  %v2312_v10 = vpop.f32.mrb[77].mxu0  ;;  %2719 = vmatmul.mubr.bf16.gmra.mrb[72].mxu1 %v2507_v45 }
 0x30c   : > { %v2313_v51 = vadd.f32 %v2312_v10, %v5518_v59  ;;  %v2314_v62 = vpop.f32.mrb[78].mxu0 }
 0x30d   : > { %v2315_v30 = vadd.f32 %v2314_v62, %v5515_v1  ;;  %v2316_v57 = vpop.f32.mrb[79].mxu0  ;;  %v2451_v5 = vmax.f32 %v2311_v58, 0.0 }
 0x30e   : > { %v2317_v50 = vadd.f32 %v2316_v57, %v5518_v59  ;;  %v2452_v13 = vmax.f32 %v2313_v51, 0.0 }
 0x30f   : > { %v2453_v47 = vmax.f32 %v2315_v30, 0.0 }
 0x310   : > { %v2454_v4 = vmax.f32 %v2317_v50, 0.0 }
 0x311   : > { %v2509_v25 = vpack.c.bf16 %v2453_v47, %v2451_v5 }
 0x312   : > { %v2510_v38 = vpack.c.bf16 %v2454_v4, %v2452_v13 }
 0x314   : > { %2726 = vmatprep.mubr.bf16.mxu1 %v2510_v38 }
 0x315   : > { %v2320_v19 = vpop.f32.mrb[80].mxu0  ;;  %2727 = vmatmul.mubr.bf16.gmra.mrb[76].mxu1 %v2509_v25 }
 0x316   : > { %v2321_v14 = vadd.f32 %v2320_v19, %v5515_v1  ;;  %v2322_v21 = vpop.f32.mrb[81].mxu0 }
 0x317   : > { %v2323_v44 = vadd.f32 %v2322_v21, %v5518_v59  ;;  %v2324_v18 = vpop.f32.mrb[82].mxu0 }
 0x318   : > { %v2325_v0 = vadd.f32 %v2324_v18, %v5515_v1  ;;  %v2326_v49 = vpop.f32.mrb[83].mxu0  ;;  %v2455_v3 = vmax.f32 %v2321_v14, 0.0 }
 0x319   : > { %v2327_v11 = vadd.f32 %v2326_v49, %v5518_v59  ;;  %v2456_v16 = vmax.f32 %v2323_v44, 0.0 }
 0x31a   : > { %v2457_v63 = vmax.f32 %v2325_v0, 0.0 }
 0x31b   : > { %v2458_v2 = vmax.f32 %v2327_v11, 0.0 }
 0x31c   : > { %v2511_v28 = vpack.c.bf16 %v2457_v63, %v2455_v3 }
 0x31d   : > { %v2512_v39 = vpack.c.bf16 %v2458_v2, %v2456_v16 }
 0x31f   : > { %2734 = vmatprep.mubr.bf16.mxu1 %v2512_v39  ;;  %v2330_v56 = vpop.f32.mrb[84].mxu0 }
 0x320   : > { %2735 = vmatmul.mubr.bf16.gmra.mrb[80].mxu1 %v2511_v28  ;;  %v2331_v6 = vadd.f32 %v2330_v56, %v5515_v1  ;;  %v2332_v33 = vpop.f32.mrb[85].mxu0 }
 0x321   : > { %v2333_v7 = vadd.f32 %v2332_v33, %v5518_v59  ;;  %v2334_v35 = vpop.f32.mrb[86].mxu0 }
 0x322   : > { %v2335_v17 = vadd.f32 %v2334_v35, %v5515_v1  ;;  %v2336_v34 = vpop.f32.mrb[87].mxu0  ;;  %v2459_v60 = vmax.f32 %v2331_v6, 0.0 }
 0x323   : > { %v2337_v29 = vadd.f32 %v2336_v34, %v5518_v59  ;;  %v2460_v40 = vmax.f32 %v2333_v7, 0.0 }
 0x324   : > { %v2461_v24 = vmax.f32 %v2335_v17, 0.0 }
 0x325   : > { %v2462_v15 = vmax.f32 %v2337_v29, 0.0 }
 0x326   : > { %v2513_v48 = vpack.c.bf16 %v2461_v24, %v2459_v60 }
 0x327   : > { %v2514_v9 = vpack.c.bf16 %v2462_v15, %v2460_v40 }
 0x329   : > { %2742 = vmatprep.mubr.bf16.mxu1 %v2514_v9 }
 0x32a   : > { %v2340_v8 = vpop.f32.mrb[88].mxu0  ;;  %2743 = vmatmul.mubr.bf16.gmra.mrb[84].mxu1 %v2513_v48 }
 0x32b   : > { %v2341_v27 = vadd.f32 %v2340_v8, %v5515_v1  ;;  %v2342_v22 = vpop.f32.mrb[89].mxu0 }
 0x32c   : > { %v2343_v23 = vadd.f32 %v2342_v22, %v5518_v59  ;;  %v2344_v43 = vpop.f32.mrb[90].mxu0 }
 0x32d   : > { %v2345_v20 = vadd.f32 %v2344_v43, %v5515_v1  ;;  %v2346_v32 = vpop.f32.mrb[91].mxu0  ;;  %v2463_v55 = vmax.f32 %v2341_v27, 0.0 }
 0x32e   : > { %v2347_v36 = vadd.f32 %v2346_v32, %v5518_v59  ;;  %v2464_v54 = vmax.f32 %v2343_v23, 0.0 }
 0x32f   : > { %v2465_v61 = vmax.f32 %v2345_v20, 0.0 }
 0x330   : > { %v2466_v26 = vmax.f32 %v2347_v36, 0.0 }
 0x331   : > { %v2515_v37 = vpack.c.bf16 %v2465_v61, %v2463_v55 }
 0x332   : > { %v2516_v52 = vpack.c.bf16 %v2466_v26, %v2464_v54 }
 0x334   : > { %2750 = vmatprep.mubr.bf16.mxu1 %v2516_v52 }
 0x335   : > { %v2350_v46 = vpop.f32.mrb[92].mxu0  ;;  %2751 = vmatmul.mubr.bf16.gmra.mrb[88].mxu1 %v2515_v37 }
 0x336   : > { %v2351_v41 = vadd.f32 %v2350_v46, %v5515_v1  ;;  %v2352_v12 = vpop.f32.mrb[93].mxu0 }
 0x337   : > { %v2353_v53 = vadd.f32 %v2352_v12, %v5518_v59  ;;  %v2354_v45 = vpop.f32.mrb[94].mxu0 }
 0x338   : > { %v2355_v42 = vadd.f32 %v2354_v45, %v5515_v1  ;;  %v2356_v31 = vpop.f32.mrb[95].mxu0  ;;  %v2467_v10 = vmax.f32 %v2351_v41, 0.0 }
 0x339   : > { %v2357_v58 = vadd.f32 %v2356_v31, %v5518_v59  ;;  %v2468_v62 = vmax.f32 %v2353_v53, 0.0 }
 0x33a   : > { %v2469_v51 = vmax.f32 %v2355_v42, 0.0 }
 0x33b   : > { %v2470_v30 = vmax.f32 %v2357_v58, 0.0 }
 0x33c   : > { %v2517_v57 = vpack.c.bf16 %v2469_v51, %v2467_v10 }
 0x33d   : > { %v2518_v50 = vpack.c.bf16 %v2470_v30, %v2468_v62 }
 0x33f   : > { %2758 = vmatprep.mubr.bf16.mxu1 %v2518_v50  ;;  %v2360_v5 = vpop.f32.mrb[96].mxu0 }
 0x340   : > { %2759 = vmatmul.mubr.bf16.gmra.mrb[92].mxu1 %v2517_v57  ;;  %v2361_v47 = vadd.f32 %v2360_v5, %v5515_v1  ;;  %v2362_v13 = vpop.f32.mrb[97].mxu0 }
 0x341   : > { %v2363_v4 = vadd.f32 %v2362_v13, %v5518_v59  ;;  %v2364_v25 = vpop.f32.mrb[98].mxu0 }
 0x342   : > { %v2365_v38 = vadd.f32 %v2364_v25, %v5515_v1  ;;  %v2366_v19 = vpop.f32.mrb[99].mxu0  ;;  %v2471_v21 = vmax.f32 %v2361_v47, 0.0 }
 0x343   : > { %v2367_v14 = vadd.f32 %v2366_v19, %v5518_v59  ;;  %v2472_v18 = vmax.f32 %v2363_v4, 0.0 }
 0x344   : > { %v2473_v44 = vmax.f32 %v2365_v38, 0.0 }
 0x345   : > { %v2474_v0 = vmax.f32 %v2367_v14, 0.0 }
 0x346   : > { %v2519_v49 = vpack.c.bf16 %v2473_v44, %v2471_v21 }
 0x347   : > { %v2520_v11 = vpack.c.bf16 %v2474_v0, %v2472_v18 }
 0x349   : > { %v2370_v3 = vpop.f32.mrb[100].mxu0  ;;  %2766 = vmatprep.mubr.bf16.mxu1 %v2520_v11 }
 0x34a   : > { %v2371_v63 = vadd.f32 %v2370_v3, %v5515_v1  ;;  %v2372_v16 = vpop.f32.mrb[101].mxu0  ;;  %2767 = vmatmul.mubr.bf16.gmra.mrb[96].mxu1 %v2519_v49 }
 0x34b   : > { %v2373_v2 = vadd.f32 %v2372_v16, %v5518_v59  ;;  %v2374_v28 = vpop.f32.mrb[102].mxu0 }
 0x34c   : > { %v2375_v39 = vadd.f32 %v2374_v28, %v5515_v1  ;;  %v2376_v56 = vpop.f32.mrb[103].mxu0  ;;  %v2475_v33 = vmax.f32 %v2371_v63, 0.0 }
 0x34d   : > { %v2377_v6 = vadd.f32 %v2376_v56, %v5518_v59  ;;  %v2476_v35 = vmax.f32 %v2373_v2, 0.0 }
 0x34e   : > { %v2477_v7 = vmax.f32 %v2375_v39, 0.0 }
 0x34f   : > { %v2478_v17 = vmax.f32 %v2377_v6, 0.0 }
 0x350   : > { %v2521_v34 = vpack.c.bf16 %v2477_v7, %v2475_v33 }
 0x351   : > { %v2522_v29 = vpack.c.bf16 %v2478_v17, %v2476_v35 }
 0x353   : > { %2774 = vmatprep.mubr.bf16.mxu1 %v2522_v29 }
 0x354   : > { %v2380_v60 = vpop.f32.mrb[104].mxu0  ;;  %2775 = vmatmul.mubr.bf16.gmra.mrb[100].mxu1 %v2521_v34 }
 0x355   : > { %v2381_v24 = vadd.f32 %v2380_v60, %v5515_v1  ;;  %v2382_v40 = vpop.f32.mrb[105].mxu0 }
 0x356   : > { %v2383_v15 = vadd.f32 %v2382_v40, %v5518_v59  ;;  %v2384_v48 = vpop.f32.mrb[106].mxu0 }
 0x357   : > { %v2385_v9 = vadd.f32 %v2384_v48, %v5515_v1  ;;  %v2386_v8 = vpop.f32.mrb[107].mxu0  ;;  %v2479_v22 = vmax.f32 %v2381_v24, 0.0 }
 0x358   : > { %v2387_v27 = vadd.f32 %v2386_v8, %v5518_v59  ;;  %v2480_v43 = vmax.f32 %v2383_v15, 0.0 }
 0x359   : > { %v2481_v23 = vmax.f32 %v2385_v9, 0.0 }
 0x35a   : > { %v2482_v20 = vmax.f32 %v2387_v27, 0.0 }
 0x35b   : > { %v2523_v32 = vpack.c.bf16 %v2481_v23, %v2479_v22 }
 0x35c   : > { %v2524_v36 = vpack.c.bf16 %v2482_v20, %v2480_v43  ;;  %v2390_v55 = vpop.f32.mrb[108].mxu0 }
 0x35d   : > { %v2391_v61 = vadd.f32 %v2390_v55, %v5515_v1  ;;  %v2392_v54 = vpop.f32.mrb[109].mxu0 }
 0x35e   : > { %v2393_v26 = vadd.f32 %v2392_v54, %v5518_v59  ;;  %v2394_v37 = vpop.f32.mrb[110].mxu0  ;;  %2782 = vmatprep.mubr.bf16.mxu1 %v2524_v36 }
 0x35f   : > { %v2395_v52 = vadd.f32 %v2394_v37, %v5515_v1  ;;  %v2396_v46 = vpop.f32.mrb[111].mxu0  ;;  %2783 = vmatmul.mubr.bf16.gmra.mrb[104].mxu1 %v2523_v32  ;;  %v2483_v12 = vmax.f32 %v2391_v61, 0.0 }
 0x360   : > { %v2397_v41 = vadd.f32 %v2396_v46, %v5518_v59  ;;  %v2484_v45 = vmax.f32 %v2393_v26, 0.0 }
 0x361   : > { %v2485_v53 = vmax.f32 %v2395_v52, 0.0 }
 0x362   : > { %v2486_v42 = vmax.f32 %v2397_v41, 0.0 }
 0x363   : > { %v2525_v31 = vpack.c.bf16 %v2485_v53, %v2483_v12  ;;  %v5587_v53 = vld [vmem:[%s5792_s26] ss:$0 sm:$0xff] }
 0x364   : > { %v2526_v58 = vpack.c.bf16 %v2486_v42, %v2484_v45  ;;  %v2400_v10 = vpop.f32.mrb[112].mxu0 }
 0x365   : > { %v2401_v51 = vadd.f32 %v2400_v10, %v5515_v1  ;;  %v2402_v62 = vpop.f32.mrb[113].mxu0 }
 0x366   : > { %v2403_v30 = vadd.f32 %v2402_v62, %v5518_v59  ;;  %v2404_v57 = vpop.f32.mrb[114].mxu0  ;;  %2790 = vmatprep.mubr.bf16.mxu1 %v2526_v58 }
 0x367   : > { %v2405_v50 = vadd.f32 %v2404_v57, %v5515_v1  ;;  %v2406_v5 = vpop.f32.mrb[115].mxu0  ;;  %2791 = vmatmul.mubr.bf16.gmra.mrb[108].mxu1 %v2525_v31  ;;  %v2487_v13 = vmax.f32 %v2401_v51, 0.0 }
 0x368   : > { %v2407_v47 = vadd.f32 %v2406_v5, %v5518_v59  ;;  %v2488_v25 = vmax.f32 %v2403_v30, 0.0 }
 0x369   : > { %v2489_v4 = vmax.f32 %v2405_v50, 0.0 }
 0x36a   : > { %v2490_v38 = vmax.f32 %v2407_v47, 0.0 }
 0x36b   : > { %v2527_v19 = vpack.c.bf16 %v2489_v4, %v2487_v13 }
 0x36c   : > { %v2528_v14 = vpack.c.bf16 %v2490_v38, %v2488_v25  ;;  %v2410_v21 = vpop.f32.mrb[116].mxu0 }
 0x36d   : > { %v2411_v44 = vadd.f32 %v2410_v21, %v5515_v1  ;;  %v2412_v18 = vpop.f32.mrb[117].mxu0 }
 0x36e   : > { %v2413_v0 = vadd.f32 %v2412_v18, %v5518_v59  ;;  %v2414_v49 = vpop.f32.mrb[118].mxu0  ;;  %2798 = vmatprep.mubr.bf16.mxu1 %v2528_v14 }
 0x36f   : > { %v2415_v11 = vadd.f32 %v2414_v49, %v5515_v1  ;;  %v2416_v3 = vpop.f32.mrb[119].mxu0  ;;  %2799 = vmatmul.mubr.bf16.gmra.mrb[112].mxu1 %v2527_v19  ;;  %v2491_v16 = vmax.f32 %v2411_v44, 0.0 }
 0x370   : > { %v2417_v63 = vadd.f32 %v2416_v3, %v5518_v59  ;;  %v2492_v28 = vmax.f32 %v2413_v0, 0.0 }
 0x371   : > { %v2493_v2 = vmax.f32 %v2415_v11, 0.0 }
 0x372   : > { %v2494_v39 = vmax.f32 %v2417_v63, 0.0 }
 0x373   : > { %v2529_v56 = vpack.c.bf16 %v2493_v2, %v2491_v16 }
 0x374   : > { %v2530_v6 = vpack.c.bf16 %v2494_v39, %v2492_v28  ;;  %v2420_v33 = vpop.f32.mrb[120].mxu0 }
 0x375   : > { %v2421_v7 = vadd.f32 %v2420_v33, %v5515_v1  ;;  %v2422_v35 = vpop.f32.mrb[121].mxu0 }
 0x376   : > { %v2423_v17 = vadd.f32 %v2422_v35, %v5518_v59  ;;  %v2424_v34 = vpop.f32.mrb[122].mxu0  ;;  %2806 = vmatprep.mubr.bf16.mxu1 %v2530_v6 }
 0x377   : > { %v2425_v29 = vadd.f32 %v2424_v34, %v5515_v1  ;;  %v2426_v60 = vpop.f32.mrb[123].mxu0  ;;  %2807 = vmatmul.mubr.bf16.gmra.mrb[116].mxu1 %v2529_v56  ;;  %v2495_v40 = vmax.f32 %v2421_v7, 0.0 }
 0x378   : > { %v2427_v24 = vadd.f32 %v2426_v60, %v5518_v59  ;;  %v2496_v48 = vmax.f32 %v2423_v17, 0.0 }
 0x379   : > { %v2497_v15 = vmax.f32 %v2425_v29, 0.0 }
 0x37a   : > { %v2498_v9 = vmax.f32 %v2427_v24, 0.0 }
 0x37b   : > { %v2531_v8 = vpack.c.bf16 %v2497_v15, %v2495_v40 }
 0x37c   : > { %v2532_v27 = vpack.c.bf16 %v2498_v9, %v2496_v48 }
 0x37d   : > { %v2430_v22 = vpop.f32.mrb[124].mxu0 }
 0x37e   : > { %v2431_v23 = vadd.f32 %v2430_v22, %v5515_v1  ;;  %v2432_v43 = vpop.f32.mrb[125].mxu0  ;;  %2814 = vmatprep.mubr.bf16.mxu1 %v2532_v27 }
 0x37f   : > { %v2433_v20 = vadd.f32 %v2432_v43, %v5518_v59  ;;  %v2434_v32 = vpop.f32.mrb[126].mxu0  ;;  %2815 = vmatmul.mubr.bf16.gmra.mrb[120].mxu1 %v2531_v8 }
 0x380   : > { %v2435_v36 = vadd.f32 %v2434_v32, %v5515_v1  ;;  %v2436_v55 = vpop.f32.mrb[127].mxu0  ;;  %v2499_v54 = vmax.f32 %v2431_v23, 0.0 }
 0x381   : > { %v2437_v61 = vadd.f32 %v2436_v55, %v5518_v59  ;;  %v2500_v37 = vmax.f32 %v2433_v20, 0.0 }
 0x382   : > { %v2501_v26 = vmax.f32 %v2435_v36, 0.0 }
 0x383   : > { %v2502_v52 = vmax.f32 %v2437_v61, 0.0 }
 0x384   : > { %v2533_v46 = vpack.c.bf16 %v2501_v26, %v2499_v54 }
 0x385   : > { %v2534_v41 = vpack.c.bf16 %v2502_v52, %v2500_v37 }
 0x387   : > { %2822 = vmatprep.mubr.bf16.mxu1 %v2534_v41 }
 0x388   : > { %2823 = vmatmul.mubr.bf16.gmra.mrb[124].mxu1 %v2533_v46 }
 0x3c7   : > { %v3297_v12 = vpop.f32.mrb[64].mxu1 }
 0x3c8   : > { %v3298_v1 = vpop.f32.mrb[65].mxu1 }
 0x3c9   : > { %v3299_v45 = vadd.f32 %v3298_v1, %v3297_v12  ;;  %v3300_v42 = vpop.f32.mrb[66].mxu1 }
 0x3ca   : > { %v3301_v31 = vpop.f32.mrb[67].mxu1 }
 0x3cb   : > { %v2705_v59 = vadd.f32 %v3299_v45, %v5587_v53  ;;  %v3302_v58 = vadd.f32 %v3301_v31, %v3300_v42 }
 0x3cd   : > { %2831 = vst [vmem:[%s5591_s9] sm:$0xff] %v2705_v59  ;;  %v2708_v10 = vadd.f32 %v3302_v58, %v5587_v53 }
 0x3cf   : > { %2832 = vst [vmem:[%s5591_s9 + $0x8] sm:$0xff] %v2708_v10 }
 0x3d3   : > { %v3303_v51 = vpop.f32.mrb[68].mxu1 }
 0x3d4   : > { %v3304_v62 = vpop.f32.mrb[69].mxu1 }
 0x3d5   : > { %v3305_v30 = vadd.f32 %v3304_v62, %v3303_v51  ;;  %v3306_v57 = vpop.f32.mrb[70].mxu1 }
 0x3d6   : > { %v3307_v50 = vpop.f32.mrb[71].mxu1 }
 0x3d7   : > { %v2713_v5 = vadd.f32 %v3305_v30, %v5587_v53  ;;  %v3308_v47 = vadd.f32 %v3307_v50, %v3306_v57 }
 0x3d9   : > { %2833 = vst [vmem:[%s5591_s9 + $0x10] sm:$0xff] %v2713_v5  ;;  %v2716_v13 = vadd.f32 %v3308_v47, %v5587_v53 }
 0x3db   : > { %2834 = vst [vmem:[%s5591_s9 + $0x18] sm:$0xff] %v2716_v13 }
 0x3de   : > { %v3309_v4 = vpop.f32.mrb[72].mxu1 }
 0x3df   : > { %v3310_v25 = vpop.f32.mrb[73].mxu1 }
 0x3e0   : > { %v3311_v38 = vadd.f32 %v3310_v25, %v3309_v4  ;;  %v3312_v19 = vpop.f32.mrb[74].mxu1 }
 0x3e1   : > { %v3313_v14 = vpop.f32.mrb[75].mxu1 }
 0x3e2   : > { %v2721_v21 = vadd.f32 %v3311_v38, %v5587_v53  ;;  %v3314_v44 = vadd.f32 %v3313_v14, %v3312_v19 }
 0x3e4   : > { %2835 = vst [vmem:[%s5591_s9 + $0x20] sm:$0xff] %v2721_v21  ;;  %v2724_v18 = vadd.f32 %v3314_v44, %v5587_v53 }
 0x3e6   : > { %2836 = vst [vmem:[%s5591_s9 + $0x28] sm:$0xff] %v2724_v18 }
 0x3e8   : > { %v3315_v0 = vpop.f32.mrb[76].mxu1 }
 0x3e9   : > { %v3316_v49 = vpop.f32.mrb[77].mxu1 }
 0x3ea   : > { %v3317_v11 = vadd.f32 %v3316_v49, %v3315_v0  ;;  %v3318_v3 = vpop.f32.mrb[78].mxu1 }
 0x3eb   : > { %v3319_v63 = vpop.f32.mrb[79].mxu1 }
 0x3ec   : > { %v2729_v16 = vadd.f32 %v3317_v11, %v5587_v53  ;;  %v3320_v2 = vadd.f32 %v3319_v63, %v3318_v3 }
 0x3ee   : > { %2837 = vst [vmem:[%s5591_s9 + $0x30] sm:$0xff] %v2729_v16  ;;  %v2732_v28 = vadd.f32 %v3320_v2, %v5587_v53 }
 0x3f0   : > { %2838 = vst [vmem:[%s5591_s9 + $0x38] sm:$0xff] %v2732_v28 }
 0x3f3   : > { %v3321_v39 = vpop.f32.mrb[80].mxu1 }
 0x3f4   : > { %v3322_v56 = vpop.f32.mrb[81].mxu1 }
 0x3f5   : > { %v3323_v6 = vadd.f32 %v3322_v56, %v3321_v39  ;;  %v3324_v33 = vpop.f32.mrb[82].mxu1 }
 0x3f6   : > { %v3325_v7 = vpop.f32.mrb[83].mxu1 }
 0x3f7   : > { %v2737_v35 = vadd.f32 %v3323_v6, %v5587_v53  ;;  %v3326_v17 = vadd.f32 %v3325_v7, %v3324_v33 }
 0x3f9   : > { %2839 = vst [vmem:[%s5591_s9 + $0x40] sm:$0xff] %v2737_v35  ;;  %v2740_v34 = vadd.f32 %v3326_v17, %v5587_v53 }
 0x3fb   : > { %2840 = vst [vmem:[%s5591_s9 + $0x48] sm:$0xff] %v2740_v34 }
 0x3fd   : > { %v3327_v29 = vpop.f32.mrb[84].mxu1 }
 0x3fe   : > { %v3328_v60 = vpop.f32.mrb[85].mxu1 }
 0x3ff   : > { %v3329_v24 = vadd.f32 %v3328_v60, %v3327_v29  ;;  %v3330_v40 = vpop.f32.mrb[86].mxu1 }
 0x400   : > { %v3331_v15 = vpop.f32.mrb[87].mxu1 }
 0x401   : > { %v2745_v48 = vadd.f32 %v3329_v24, %v5587_v53  ;;  %v3332_v9 = vadd.f32 %v3331_v15, %v3330_v40 }
 0x403   : > { %2841 = vst [vmem:[%s5591_s9 + $0x50] sm:$0xff] %v2745_v48  ;;  %v2748_v8 = vadd.f32 %v3332_v9, %v5587_v53 }
 0x405   : > { %2842 = vst [vmem:[%s5591_s9 + $0x58] sm:$0xff] %v2748_v8 }
 0x408   : > { %v3333_v27 = vpop.f32.mrb[88].mxu1 }
 0x409   : > { %v3334_v22 = vpop.f32.mrb[89].mxu1 }
 0x40a   : > { %v3335_v23 = vadd.f32 %v3334_v22, %v3333_v27  ;;  %v3336_v43 = vpop.f32.mrb[90].mxu1 }
 0x40b   : > { %v3337_v20 = vpop.f32.mrb[91].mxu1 }
 0x40c   : > { %v2753_v32 = vadd.f32 %v3335_v23, %v5587_v53  ;;  %v3338_v36 = vadd.f32 %v3337_v20, %v3336_v43 }
 0x40e   : > { %2843 = vst [vmem:[%s5591_s9 + $0x60] sm:$0xff] %v2753_v32  ;;  %v2756_v55 = vadd.f32 %v3338_v36, %v5587_v53 }
 0x410   : > { %2844 = vst [vmem:[%s5591_s9 + $0x68] sm:$0xff] %v2756_v55 }
 0x413   : > { %v3339_v61 = vpop.f32.mrb[92].mxu1 }
 0x414   : > { %v3340_v54 = vpop.f32.mrb[93].mxu1 }
 0x415   : > { %v3341_v26 = vadd.f32 %v3340_v54, %v3339_v61  ;;  %v3342_v37 = vpop.f32.mrb[94].mxu1 }
 0x416   : > { %v3343_v52 = vpop.f32.mrb[95].mxu1 }
 0x417   : > { %v2761_v46 = vadd.f32 %v3341_v26, %v5587_v53  ;;  %v3344_v41 = vadd.f32 %v3343_v52, %v3342_v37 }
 0x419   : > { %2845 = vst [vmem:[%s5591_s9 + $0x70] sm:$0xff] %v2761_v46  ;;  %v2764_v12 = vadd.f32 %v3344_v41, %v5587_v53 }
 0x41b   : > { %2846 = vst [vmem:[%s5591_s9 + $0x78] sm:$0xff] %v2764_v12 }
 0x41d   : > { %v3345_v1 = vpop.f32.mrb[96].mxu1 }
 0x41e   : > { %v3346_v45 = vpop.f32.mrb[97].mxu1 }
 0x41f   : > { %v3347_v42 = vadd.f32 %v3346_v45, %v3345_v1  ;;  %v3348_v31 = vpop.f32.mrb[98].mxu1 }
 0x420   : > { %v3349_v59 = vpop.f32.mrb[99].mxu1 }
 0x421   : > { %v2769_v58 = vadd.f32 %v3347_v42, %v5587_v53  ;;  %v3350_v10 = vadd.f32 %v3349_v59, %v3348_v31 }
 0x423   : > { %2847 = vst [vmem:[%s5591_s9 + $0x80] sm:$0xff] %v2769_v58  ;;  %v2772_v51 = vadd.f32 %v3350_v10, %v5587_v53 }
 0x425   : > { %2848 = vst [vmem:[%s5591_s9 + $0x88] sm:$0xff] %v2772_v51 }
 0x427   : > { %v3351_v62 = vpop.f32.mrb[100].mxu1 }
 0x428   : > { %v3352_v30 = vpop.f32.mrb[101].mxu1 }
 0x429   : > { %v3353_v57 = vadd.f32 %v3352_v30, %v3351_v62  ;;  %v3354_v50 = vpop.f32.mrb[102].mxu1 }
 0x42a   : > { %v3355_v5 = vpop.f32.mrb[103].mxu1 }
 0x42b   : > { %v2777_v47 = vadd.f32 %v3353_v57, %v5587_v53  ;;  %v3356_v13 = vadd.f32 %v3355_v5, %v3354_v50 }
 0x42d   : > { %2849 = vst [vmem:[%s5591_s9 + $0x90] sm:$0xff] %v2777_v47  ;;  %v2780_v4 = vadd.f32 %v3356_v13, %v5587_v53 }
 0x42f   : > { %2850 = vst [vmem:[%s5591_s9 + $0x98] sm:$0xff] %v2780_v4 }
 0x432   : > { %v3357_v25 = vpop.f32.mrb[104].mxu1 }
 0x433   : > { %v3358_v38 = vpop.f32.mrb[105].mxu1 }
 0x434   : > { %v3359_v19 = vadd.f32 %v3358_v38, %v3357_v25  ;;  %v3360_v14 = vpop.f32.mrb[106].mxu1 }
 0x435   : > { %v3361_v21 = vpop.f32.mrb[107].mxu1 }
 0x436   : > { %v2785_v44 = vadd.f32 %v3359_v19, %v5587_v53  ;;  %v3362_v18 = vadd.f32 %v3361_v21, %v3360_v14 }
 0x438   : > { %2851 = vst [vmem:[%s5591_s9 + $0xa0] sm:$0xff] %v2785_v44  ;;  %v2788_v0 = vadd.f32 %v3362_v18, %v5587_v53 }
 0x43a   : > { %2852 = vst [vmem:[%s5591_s9 + $0xa8] sm:$0xff] %v2788_v0  ;;  %v3363_v49 = vpop.f32.mrb[108].mxu1 }
 0x43b   : > { %v3364_v11 = vpop.f32.mrb[109].mxu1 }
 0x43c   : > { %v3365_v3 = vadd.f32 %v3364_v11, %v3363_v49  ;;  %v3366_v63 = vpop.f32.mrb[110].mxu1 }
 0x43d   : > { %v3367_v16 = vpop.f32.mrb[111].mxu1 }
 0x43e   : > { %v2793_v2 = vadd.f32 %v3365_v3, %v5587_v53  ;;  %v3368_v28 = vadd.f32 %v3367_v16, %v3366_v63 }
 0x440   : > { %2853 = vst [vmem:[%s5591_s9 + $0xb0] sm:$0xff] %v2793_v2  ;;  %v2796_v39 = vadd.f32 %v3368_v28, %v5587_v53 }
 0x442   : > { %2854 = vst [vmem:[%s5591_s9 + $0xb8] sm:$0xff] %v2796_v39  ;;  %v3369_v56 = vpop.f32.mrb[112].mxu1 }
 0x443   : > { %v3370_v6 = vpop.f32.mrb[113].mxu1 }
 0x444   : > { %v3371_v33 = vadd.f32 %v3370_v6, %v3369_v56  ;;  %v3372_v7 = vpop.f32.mrb[114].mxu1 }
 0x445   : > { %v3373_v35 = vpop.f32.mrb[115].mxu1 }
 0x446   : > { %v2801_v17 = vadd.f32 %v3371_v33, %v5587_v53  ;;  %v3374_v34 = vadd.f32 %v3373_v35, %v3372_v7 }
 0x448   : > { %2855 = vst [vmem:[%s5591_s9 + $0xc0] sm:$0xff] %v2801_v17  ;;  %v2804_v29 = vadd.f32 %v3374_v34, %v5587_v53 }
 0x44a   : > { %2856 = vst [vmem:[%s5591_s9 + $0xc8] sm:$0xff] %v2804_v29  ;;  %v3375_v60 = vpop.f32.mrb[116].mxu1 }
 0x44b   : > { %v3376_v24 = vpop.f32.mrb[117].mxu1 }
 0x44c   : > { %v3377_v40 = vadd.f32 %v3376_v24, %v3375_v60  ;;  %v3378_v15 = vpop.f32.mrb[118].mxu1 }
 0x44d   : > { %v3379_v48 = vpop.f32.mrb[119].mxu1 }
 0x44e   : > { %v2809_v9 = vadd.f32 %v3377_v40, %v5587_v53  ;;  %v3380_v8 = vadd.f32 %v3379_v48, %v3378_v15 }
 0x450   : > { %2857 = vst [vmem:[%s5591_s9 + $0xd0] sm:$0xff] %v2809_v9  ;;  %v2812_v27 = vadd.f32 %v3380_v8, %v5587_v53 }
 0x452   : > { %2858 = vst [vmem:[%s5591_s9 + $0xd8] sm:$0xff] %v2812_v27  ;;  %v3381_v22 = vpop.f32.mrb[120].mxu1 }
 0x453   : > { %v3382_v23 = vpop.f32.mrb[121].mxu1 }
 0x454   : > { %v3383_v43 = vadd.f32 %v3382_v23, %v3381_v22  ;;  %v3384_v20 = vpop.f32.mrb[122].mxu1 }
 0x455   : > { %v3385_v32 = vpop.f32.mrb[123].mxu1 }
 0x456   : > { %v2817_v36 = vadd.f32 %v3383_v43, %v5587_v53  ;;  %v3386_v55 = vadd.f32 %v3385_v32, %v3384_v20 }
 0x458   : > { %2859 = vst [vmem:[%s5591_s9 + $0xe0] sm:$0xff] %v2817_v36  ;;  %v2820_v61 = vadd.f32 %v3386_v55, %v5587_v53 }
 0x45a   : > { %2860 = vst [vmem:[%s5591_s9 + $0xe8] sm:$0xff] %v2820_v61 }
 0x45b   : > { %v3387_v54 = vpop.f32.mrb[124].mxu1 }
 0x45c   : > { %v3388_v26 = vpop.f32.mrb[125].mxu1 }
 0x45d   : > { %v3389_v37 = vadd.f32 %v3388_v26, %v3387_v54  ;;  %v3390_v52 = vpop.f32.mrb[126].mxu1 }
 0x45e   : > { %v3391_v46 = vpop.f32.mrb[127].mxu1 }
 0x45f   : > { %v2825_v41 = vadd.f32 %v3389_v37, %v5587_v53  ;;  %v3392_v12 = vadd.f32 %v3391_v46, %v3390_v52 }
 0x461   : > { %2861 = vst [vmem:[%s5591_s9 + $0xf0] sm:$0xff] %v2825_v41  ;;  %v2828_v1 = vadd.f32 %v3392_v12, %v5587_v53 }
 0x463   : > { %2862 = vst [vmem:[%s5591_s9 + $0xf8] sm:$0xff] %v2828_v1 }
 0x464   : > { %4092 = shalt.err (!%p4089_p8)
}
 0x465   : > { %s4093_s18 = scalar_lea.hbm %s5658_s30, 4096  ;;  %s4097_s29 = scalar_lea.hbm %s5793_s21, 8192 }
 0x466   : > { %p4094_p11 = scmp.ne.s32.totalorder %s5658_s30, %s4093_s18  ;;  %p4098_p1 = scmp.lt.u32.totalorder %s5658_s30, %s5793_s21 }
 0x467   : > { %p4099_p2 = scmp.lt.u32.totalorder %s4097_s29, %s4093_s18  ;;  %p4101_p0 = scmp.lt.u32.totalorder %s4093_s18, %s5658_s30 }
 0x468   : > { %p4095_p7 = pnand %p4094_p11, %p4402_p3 }
 0x469   : > { %p4100_p13 = por %p4099_p2, %p4098_p1 }
 0x46a   : > { %p4096_p12 = pneg %p4095_p7 }
 0x46b   : > { %p4102_p4 = por %p4101_p0, %p4100_p13 }
 0x46d   : > { %p4103_p6 = pnand %p4102_p4, %p4096_p12 }
 0x46f   : > { %4106 = shalt.err (!%p4103_p6)
}
 0x470   : > { %s4174_s9 = smov 128   ;;  %s4175_s0 = smov 8  }
 0x471   : > { %3413 = dma.vmem_to_hbm [thread:$0]  (%p4402_p3), %s5660_s13, 4096, %s5658_s30, %s2864_s17, %s4174_s9, %s4174_s9, %s4175_s0  }
 0x472 PF: > { %s5794_s10 = sld [smem:[#allocation20_spill]]  ;;  %s5795_s24 = sld [smem:[#allocation21_spill]] }
 0x473   : > { %p5797_p5 = scmp.ge.s32.totalorder %s4161_s16, 2 }
 0x478   : > { %s2892_s23 = sand.u32 1, %s5794_s10   ;;  %p5796_p10 = scmp.ne.s32.totalorder %s5795_s24, 0 }
 0x479   : > { %s2893_s19 = scalar_lea.sflag [#allocation4], %s2892_s23 }
 0x47a   : > { %p3436_p9 = pnand %p5797_p5, %p5796_p10 }
 0x47c   : > { %4144 = dma.done.wait (!%p3436_p9), %s2893_s19, 4096  }
 0x47d   : > { %4146 = vsyncadd (!%p3436_p9), %s2893_s19, 4294963200  ;;  %p28_p8 = scmp.ge.s32.totalorder %s4389_s20, 4   ;;  %s5798_s13 = smov %s4153_s14 }
 0x47e   : > { %s5799_s14 = smov %s4157_s15  ;;  %s5800_s15 = smov %s4398_s25 }
 0x47f   : > { %s5801_s16 = smov %s4389_s20  ;;  %30 = sbr.rel (!%p28_p8) target bundleno = 15 (0xf), region = 134 }
 0x486   :  { %2898 = vsyncpa [#allocation3], 1 }
 0x487   :  { %2900 = vsyncpa [#allocation3 + $0x1], 1 }
 0x488   :  { %2901 = vsyncpa [#allocation6], 1 }
 0x489   :  { %2903 = vsyncpa [#allocation6 + $0x1], 1 }
 0x48a   :  { %2904 = vsyncpa [#allocation9], 1 }
 0x48b   :  { %2905 = vsyncpa [#allocation12], 1 }
 0x48c   :  { %2906 = vsyncpa [#allocation4], 1 }
 0x48d   :  { %2908 = vsyncpa [#allocation4 + $0x1], 1 }

// kernel: tpu_custom_call.1
= control target key start
LH: loop header
LB: loop body
LE: loop exit
PB: predicated region body
PF: predicated region fallthrough
CT: control target
= control target key end

     0   :  { %s5707_s0 = inlined_call_operand.hbm [shape: f32[512,128], index: 0, kind: input, shape index: {}]   ;;  %s5708_s1 = inlined_call_operand.hbm [shape: f32[512,128], index: 1, kind: input, shape index: {}]   ;;  %s5709_s2 = inlined_call_operand.hbm [shape: bf16[256,256], index: 2, kind: input, shape index: {}]   ;;  %s5710_s3 = inlined_call_operand.vmem [shape: f32[1,256], index: 3, kind: input, shape index: {}]   ;;  %s5711_s4 = inlined_call_operand.hbm [shape: bf16[256,256], index: 4, kind: input, shape index: {}]   ;;  %s5712_s5 = inlined_call_operand.vmem [shape: f32[1,256], index: 5, kind: input, shape index: {}]   ;;  %s5713_s6 = inlined_call_operand.hbm [shape: bf16[256,256], index: 6, kind: input, shape index: {}]   ;;  %s5714_s7 = inlined_call_operand.vmem [shape: f32[1,256], index: 7, kind: input, shape index: {}]   ;;  %s5715_s8 = inlined_call_operand.hbm [shape: bf16[256,128], index: 8, kind: input, shape index: {}]   ;;  %s5716_s9 = inlined_call_operand.vmem [shape: f32[1,128], index: 9, kind: input, shape index: {}]   ;;  %s5717_s10 = inlined_call_operand.hbm [shape: f32[512,128], index: 10, kind: output, shape index: {}]  }
   0x1   :  { %5730 = sst [smem:[#allocation36_spill]] %s5707_s0 }
   0x2   :  { %5731 = sst [smem:[#allocation37_spill]] %s5709_s2 }
   0x3   :  { %5732 = sst [smem:[#allocation38_spill]] %s5711_s4 }
   0x4   :  { %5733 = sst [smem:[#allocation39_spill]] %s5716_s9 }
   0x5   :  { %5734 = sst [smem:[#allocation40_spill]] %s5717_s10 }
   0x6   :  { %15 = vsyncpa [#allocation3], 0 }
   0x7   :  { %17 = vsyncpa [#allocation3 + $0x1], 0 }
   0x8   :  { %18 = vsyncpa [#allocation6], 0 }
   0x9   :  { %20 = vsyncpa [#allocation6 + $0x1], 0 }
   0xa   :  { %21 = vsyncpa [#allocation9], 0 }
   0xb   :  { %22 = vsyncpa [#allocation12], 0 }
   0xc   :  { %23 = vsyncpa [#allocation4], 0 }
   0xd   :  { %25 = vsyncpa [#allocation4 + $0x1], 0  ;;  %s4231_s13 = smov 0   ;;  %s4233_s14 = smov 0  }
   0xe   :  { %s4235_s15 = smov 0   ;;  %s4237_s16 = smov 0  }
   0xf LB: > { %5735 = sst [smem:[#allocation20_spill]] %s4149_s13  ;;  %s4252_s17 = sadd.s32 4294967295, %s4161_s16   ;;  %s4161_s16 = sphi %s4237_s16, %s5801_s16   ;;  %s4157_s15 = sphi %s4235_s15, %s5800_s15   ;;  %s4153_s14 = sphi %s4233_s14, %s5799_s14   ;;  %s4149_s13 = sphi %s4231_s13, %s5798_s13  }
  0x10   : > { %s3011_s18 = sadd.s32 4294967294, %s4161_s16   ;;  %p51_p0 = scmp.ne.s32.totalorder %s4153_s14, %s4149_s13 }
  0x11   : > { %p5718_p1 = scmp.eq.s32.totalorder %s4252_s17, 0  ;;  %p275_p3 = scmp.eq.s32.totalorder %s3011_s18, 1 }
  0x12   : > { %p3012_p5 = scmp.ge.s32.totalorder %s4161_s16, 1  ;;  %p282_p7 = scmp.lt.s32.totalorder %s4161_s16, 3 }
  0x13   : > { %p4261_p4 = por %p5718_p1, %p51_p0  ;;  %p4266_p6 = por %p275_p3, %p51_p0 }
  0x14   : > { %p4271_p8 = pnand %p3012_p5, %p282_p7  ;;  %s4163_s22 = smov [#allocation7]  }
  0x15   : > { %s5736_s19 = scalar_select %p4261_p4, 1, 0 }
  0x16   : > { %s5737_s20 = scalar_select %p4266_p6, 1, 0 }
  0x17   : > { %s5739_s21 = scalar_select %p4271_p8, 1, 0 }
  0x18   : > { %5738 = sst [smem:[#allocation21_spill]] %s5737_s20  ;;  %s294_s23 = sshll.u32 %s4163_s22, 4  ;;  %s4275_s23 = int_to_ptr.vmem [resolvable:$true] %s294_s23 }
  0x19   : > { %p3415_p9 = pneg %p4271_p8  ;;  %s4164_s25 = smov [#allocation8]  }
  0x1a   : > { %s310_s26 = sshll.u32 %s4164_s25, 4  ;;  %s4165_s27 = smov [#allocation10]   ;;  %s4286_s26 = int_to_ptr.vmem [resolvable:$true] %s310_s26 }
  0x1b   : > { %p4282_p11 = pnand %p3415_p9, %p5718_p1  ;;  %s4288_s28 = sshll.u32 %s4165_s27, 4  ;;  %s327_s28 = int_to_ptr.vmem [resolvable:$true] %s4288_s28 }
  0x1c   : > { %s5741_s2 = sld [smem:[#allocation37_spill]] }
  0x1d   : > { %p4298_p13 = pneg %p4282_p11 }
  0x22   : > { %s3907_s11 = scalar_lea.hbm %s5741_s2, 4096 }
  0x23   : > { %p3908_p12 = scmp.ne.s32.totalorder %s5741_s2, %s3907_s11  ;;  %p3914_p5 = scmp.lt.u32.totalorder %s3907_s11, %s5741_s2 }
  0x25   : > { %p3910_p0 = pnand %p4298_p13, %p3908_p12 }
  0x27   : > { %p3911_p3 = pneg %p3910_p0 }
  0x29   : > { %p3916_p7 = pnand %p3914_p5, %p3911_p3 }
  0x2b   : > { %3919 = shalt.err (!%p3916_p7)
}
  0x2c   : > { %s3920_s29 = scalar_lea.vmem %s4275_s23, 4096  ;;  %p3928_p2 = scmp.lt.s32.totalorder %s4275_s23, %s4275_s23 }
  0x2d   : > { %p3921_p9 = scmp.ne.s32.totalorder %s4275_s23, %s3920_s29  ;;  %p3929_p6 = scmp.lt.s32.totalorder %s3920_s29, %s3920_s29 }
  0x2f   : > { %p3923_p10 = pnand %p3921_p9, %p4298_p13  ;;  %p3930_p12 = por %p3929_p6, %p3928_p2 }
  0x31   : > { %p3924_p1 = pneg %p3923_p10 }
  0x33   : > { %p3931_p0 = pnand %p3930_p12, %p3924_p1 }
  0x35   : > { %3934 = shalt.err (!%p3931_p0)
}
  0x36   : > { %s5724_s30 = smov 128   ;;  %s5726_s11 = smov 8  }
  0x37   : > { %3418 = dma.hbm_to_vmem [thread:$0]  (!%p4282_p11), %s5741_s2, 4096, %s4275_s23, [#allocation6], %s5724_s30, %s5724_s30, %s5726_s11  }
  0x38   : > { %s5743_s4 = sld [smem:[#allocation38_spill]] }
  0x3e   : > { %s3935_s29 = scalar_lea.hbm %s5743_s4, 4096 }
  0x3f   : > { %p3936_p1 = scmp.ne.s32.totalorder %s5743_s4, %s3935_s29  ;;  %p3942_p10 = scmp.lt.u32.totalorder %s3935_s29, %s5743_s4 }
  0x41   : > { %p3938_p2 = pnand %p3936_p1, %p4298_p13 }
  0x43   : > { %p3939_p6 = pneg %p3938_p2 }
  0x45   : > { %p3944_p3 = pnand %p3942_p10, %p3939_p6 }
  0x47   : > { %3947 = shalt.err (!%p3944_p3)
}
  0x48   : > { %s3948_s23 = scalar_lea.vmem %s4286_s26, 4096  ;;  %p3956_p12 = scmp.lt.s32.totalorder %s4286_s26, %s4286_s26 }
  0x49   : > { %p3949_p5 = scmp.ne.s32.totalorder %s4286_s26, %s3948_s23  ;;  %p3957_p0 = scmp.lt.s32.totalorder %s3948_s23, %s3948_s23 }
  0x4b   : > { %p3951_p7 = pnand %p3949_p5, %p4298_p13  ;;  %p3958_p1 = por %p3957_p0, %p3956_p12 }
  0x4d   : > { %p3952_p9 = pneg %p3951_p7 }
  0x4f   : > { %p3959_p2 = pnand %p3958_p1, %p3952_p9 }
  0x51   : > { %3962 = shalt.err (!%p3959_p2)
}
  0x52   : > { %3421 = dma.hbm_to_vmem [thread:$0]  (!%p4282_p11), %s5743_s4, 4096, %s4286_s26, [#allocation9], %s5724_s30, %s5724_s30, %s5726_s11  }
  0x53   : > { %s3963_s12 = scalar_lea.hbm %s5713_s6, 4096 }
  0x54   : > { %p3964_p6 = scmp.ne.s32.totalorder %s5713_s6, %s3963_s12  ;;  %p3970_p5 = scmp.lt.u32.totalorder %s3963_s12, %s5713_s6 }
  0x56   : > { %p3966_p10 = pnand %p3964_p6, %p4298_p13 }
  0x58   : > { %p3967_p3 = pneg %p3966_p10 }
  0x5a   : > { %p3972_p7 = pnand %p3970_p5, %p3967_p3 }
  0x5c   : > { %3975 = shalt.err (!%p3972_p7)
}
  0x5d   : > { %s3976_s23 = scalar_lea.vmem %s327_s28, 4096  ;;  %p3984_p1 = scmp.lt.s32.totalorder %s327_s28, %s327_s28 }
  0x5e   : > { %p3977_p9 = scmp.ne.s32.totalorder %s327_s28, %s3976_s23  ;;  %p3985_p2 = scmp.lt.s32.totalorder %s3976_s23, %s3976_s23 }
  0x60   : > { %p3979_p12 = pnand %p3977_p9, %p4298_p13  ;;  %p3986_p4 = por %p3985_p2, %p3984_p1 }
  0x62   : > { %p3980_p0 = pneg %p3979_p12 }
  0x64   : > { %p3987_p8 = pnand %p3986_p4, %p3980_p0 }
  0x66   : > { %3990 = shalt.err (!%p3987_p8)
}
  0x67   : > { %3424 = dma.hbm_to_vmem [thread:$0]  (!%p4282_p11), %s5713_s6, 4096, %s327_s28, [#allocation9], %s5724_s30, %s5724_s30, %s5726_s11  }
  0x68   : > { %s4168_s10 = smov [#allocation11]   ;;  %s3991_s18 = scalar_lea.hbm %s5715_s8, 2048 }
  0x69   : > { %s342_s13 = sshll.u32 %s4168_s10, 4  ;;  %p3992_p4 = scmp.ne.s32.totalorder %s5715_s8, %s3991_s18  ;;  %s343_s13 = int_to_ptr.vmem [resolvable:$true] %s342_s13 }
  0x6a   : > { %p3998_p10 = scmp.lt.u32.totalorder %s3991_s18, %s5715_s8 }
  0x6b   : > { %p3994_p8 = pnand %p3992_p4, %p4298_p13 }
  0x6d   : > { %p3995_p6 = pneg %p3994_p8 }
  0x6f   : > { %p4000_p3 = pnand %p3998_p10, %p3995_p6 }
  0x71   : > { %4003 = shalt.err (!%p4000_p3)
}
  0x72   : > { %s4004_s28 = scalar_lea.vmem %s343_s13, 2048  ;;  %p4012_p12 = scmp.lt.s32.totalorder %s343_s13, %s343_s13 }
  0x73   : > { %p4005_p5 = scmp.ne.s32.totalorder %s343_s13, %s4004_s28  ;;  %p4013_p0 = scmp.lt.s32.totalorder %s4004_s28, %s4004_s28 }
  0x75   : > { %p4007_p7 = pnand %p4005_p5, %p4298_p13  ;;  %p4014_p1 = por %p4013_p0, %p4012_p12 }
  0x77   : > { %p4008_p9 = pneg %p4007_p7 }
  0x79   : > { %p4015_p2 = pnand %p4014_p1, %p4008_p9 }
  0x7b   : > { %4018 = shalt.err (!%p4015_p2)
}
  0x7c   : > { %s4169_s26 = smov 64   ;;  %s4170_s22 = smov 4  }
  0x7d   : > { %3427 = dma.hbm_to_vmem [thread:$0]  (!%p4282_p11), %s5715_s8, 2048, %s343_s13, [#allocation12], %s4169_s26, %s4169_s26, %s4170_s22  }
  0x7e   : > { %s4389_s20 = sadd.s32 1, %s4161_s16   ;;  %s38_s18 = sadd.s32 1, %s4157_s15 }
  0x7f   : > { %s35_s12 = ssub.s32 %s4161_s16, %s4389_s20  ;;  %p45_p4 = scmp.ne.s32.totalorder %s4157_s15, %s4153_s14 }
  0x80   : > { %p36_p13 = scmp.eq.s32.totalorder %s35_s12, 0  ;;  %p46_p8 = scmp.eq.s32.totalorder %s4161_s16, 0 }
  0x81   : > { %p5744_p10 = scmp.eq.s32.totalorder %s4252_s17, 1  ;;  %p3443_p5 = scmp.lt.s32.totalorder %s4161_s16, 2 }
  0x82   : > { %s4398_s25 = scalar_select %p36_p13, %s4157_s15, %s38_s18  }
  0x83   : > { %p47_p6 = por %p46_p8, %p45_p4  ;;  %p4402_p3 = por %p5744_p10, %p45_p4 }
  0x84   : > { %s359_s24 = sand.u32 1, %s4157_s15   ;;  %s3278_s13 = sshll.u32 %s4161_s16, 12 }
  0x85   : > { %s3018_s29 = sshll.u32 %s359_s24, 8  ;;  %s5746_s0 = sld [smem:[#allocation36_spill]] }
  0x86   : > { %s363_s22 = scalar_lea.vmem [#allocation2], %s3018_s29  ;;  %p4416_p11 = pnand %p3443_p5, %p47_p6 }
  0x87   : > { %s370_s9 = sshll.u32 %s363_s22, 4  ;;  %s4423_s23 = scalar_lea.hbm %s5708_s1, %s3278_s13  ;;  %s4414_s9 = int_to_ptr.vmem [resolvable:$true] %s370_s9 }
  0x88   : > { %s384_s28 = scalar_lea.vmem [#allocation5], %s3018_s29  ;;  %s4427_s11 = scalar_lea.sflag [#allocation3], %s359_s24 }
  0x89   : > { %s4425_s30 = sshll.u32 %s384_s28, 4  ;;  %p4021_p9 = pneg %p4416_p11  ;;  %s4459_s30 = int_to_ptr.vmem [resolvable:$true] %s4425_s30 }
  0x8b   : > { %s4412_s26 = scalar_lea.hbm %s5746_s0, %s3278_s13  ;;  %s4024_s12 = scalar_lea.hbm %s5746_s0, 8192 }
  0x8c   : > { %s4019_s22 = scalar_lea.hbm %s4412_s26, 4096  ;;  %p4025_p1 = scmp.lt.u32.totalorder %s4412_s26, %s5746_s0 }
  0x8d   : > { %p4020_p7 = scmp.ne.s32.totalorder %s4412_s26, %s4019_s22  ;;  %p4026_p2 = scmp.lt.u32.totalorder %s4024_s12, %s4019_s22 }
  0x8e   : > { %p4028_p4 = scmp.lt.u32.totalorder %s4019_s22, %s4412_s26 }
  0x8f   : > { %p4022_p12 = pnand %p4021_p9, %p4020_p7  ;;  %p4027_p13 = por %p4026_p2, %p4025_p1 }
  0x91   : > { %p4023_p0 = pneg %p4022_p12  ;;  %p4029_p8 = por %p4028_p4, %p4027_p13 }
  0x93   : > { %p4030_p6 = pnand %p4029_p8, %p4023_p0 }
  0x95   : > { %4033 = shalt.err (!%p4030_p6)
}
  0x96   : > { %s4034_s24 = scalar_lea.vmem %s4414_s9, 4096  ;;  %s4171_s2 = smov [#allocation2]  }
  0x97   : > { %p4035_p10 = scmp.ne.s32.totalorder %s4414_s9, %s4034_s24  ;;  %s4039_s4 = sshll.u32 %s4171_s2, 4  ;;  %s4040_s4 = int_to_ptr.vmem [resolvable:$false] %s4039_s4 }
  0x98   : > { %s4041_s29 = scalar_lea.vmem %s4040_s4, 8192  ;;  %p4042_p12 = scmp.lt.s32.totalorder %s4414_s9, %s4040_s4 }
  0x99   : > { %p4037_p5 = pnand %p4035_p10, %p4021_p9  ;;  %p4043_p1 = scmp.lt.s32.totalorder %s4041_s29, %s4034_s24 }
  0x9b   : > { %p4038_p7 = pneg %p4037_p5  ;;  %p4044_p2 = por %p4043_p1, %p4042_p12 }
  0x9d   : > { %p4045_p13 = pnand %p4044_p2, %p4038_p7 }
  0x9f   : > { %4048 = shalt.err (!%p4045_p13)
}
  0xa0   : > { %s5748_s28 = smov 8   ;;  %s5749_s22 = smov 128  }
  0xa1   : > { %3431 = dma.hbm_to_vmem [thread:$0]  (!%p4416_p11), %s4412_s26, 4096, %s4414_s9, %s4427_s11, %s5749_s22, %s5749_s22, %s5748_s28  }
  0xa2   : > { %s380_s12 = sand.u32 1, %s4161_s16   ;;  %s4049_s13 = scalar_lea.hbm %s4423_s23, 4096 }
  0xa3   : > { %s4462_s18 = scalar_lea.sflag [#allocation6], %s380_s12  ;;  %p4050_p0 = scmp.ne.s32.totalorder %s4423_s23, %s4049_s13 }
  0xa4   : > { %s4054_s4 = scalar_lea.hbm %s5708_s1, 8192  ;;  %p4055_p6 = scmp.lt.u32.totalorder %s4423_s23, %s5708_s1 }
  0xa5   : > { %p4052_p4 = pnand %p4050_p0, %p4021_p9  ;;  %p4056_p10 = scmp.lt.u32.totalorder %s4054_s4, %s4049_s13 }
  0xa6   : > { %p4058_p7 = scmp.lt.u32.totalorder %s4049_s13, %s4423_s23 }
  0xa7   : > { %p4053_p8 = pneg %p4052_p4  ;;  %p4057_p5 = por %p4056_p10, %p4055_p6 }
  0xa9   : > { %p4059_p12 = por %p4058_p7, %p4057_p5 }
  0xab   : > { %p4060_p1 = pnand %p4059_p12, %p4053_p8 }
  0xad   : > { %4063 = shalt.err (!%p4060_p1)
}
  0xae   : > { %s4064_s11 = scalar_lea.vmem %s4459_s30, 4096  ;;  %s4172_s26 = smov [#allocation5]  }
  0xaf   : > { %p4065_p2 = scmp.ne.s32.totalorder %s4459_s30, %s4064_s11  ;;  %s4069_s9 = sshll.u32 %s4172_s26, 4  ;;  %s4070_s9 = int_to_ptr.vmem [resolvable:$false] %s4069_s9 }
  0xb0   : > { %s4071_s0 = scalar_lea.vmem %s4070_s9, 8192  ;;  %p4072_p4 = scmp.lt.s32.totalorder %s4459_s30, %s4070_s9 }
  0xb1   : > { %p4067_p13 = pnand %p4065_p2, %p4021_p9  ;;  %p4073_p6 = scmp.lt.s32.totalorder %s4071_s0, %s4064_s11 }
  0xb3   : > { %p4068_p0 = pneg %p4067_p13  ;;  %p4074_p10 = por %p4073_p6, %p4072_p4 }
  0xb5   : > { %p4075_p5 = pnand %p4074_p10, %p4068_p0 }
  0xb7   : > { %4078 = shalt.err (!%p4075_p5)
}
  0xb8   : > { %3434 = dma.hbm_to_vmem [thread:$0]  (!%p4416_p11), %s4423_s23, 4096, %s4459_s30, %s4462_s18, %s5749_s22, %s5749_s22, %s5748_s28  }
  0xb9   : > { %p5750_p9 = scmp.ne.s32.totalorder %s5739_s21, 0 }
  0xbb   : > { %403 = sbr.rel (%p5750_p9) target bundleno = 1138 (0x472), region = 60 }
  0xc2   : > { %s4494_s12 = sand.u32 1, %s4153_s14   ;;  %p5751_p8 = scmp.ne.s32.totalorder %s5736_s19, 0 }
  0xc3   : > { %s4497_s13 = sshll.u32 %s4494_s12, 8  ;;  %s406_s10 = scalar_lea.sflag [#allocation3], %s4494_s12 }
  0xc4   : > { %s4501_s24 = scalar_lea.vmem [#allocation2], %s4497_s13 }
  0xc5   : > { %4124 = dma.done.wait (%p5751_p8), %s406_s10, 4096  }
  0xc6   : > { %4126 = vsyncadd (%p5751_p8), %s406_s10, 4294963200  ;;  %s414_s21 = sand.u32 1, %s4252_s17   ;;  %s4509_s23 = scalar_lea.vmem [#allocation5], %s4497_s13 }
  0xc7   : > { %s415_s30 = scalar_lea.sflag [#allocation6], %s414_s21 }
  0xc8   : > { %4128 = dma.done.wait (%p5751_p8), %s415_s30, 4096  }
  0xc9   : > { %4130 = vsyncadd (%p5751_p8), %s415_s30, 4294963200  ;;  %p5752_p11 = scmp.eq.s32.totalorder %s4252_s17, 0 }
  0xcb   : > { %4132 = dma.done.wait (%p5752_p11), [#allocation6], 4096   ;;  %p5753_p7 = pmov %p5752_p11 }
  0xcd   : > { %4134 = vsyncadd (%p5753_p7), [#allocation6], 4294963200  ;;  %p5754_p12 = pmov %p5753_p7 }
  0xce   : > { %p5755_p1 = pmov %p5753_p7 }
  0xcf   : > { %4136 = dma.done.wait (%p5754_p12), [#allocation9], 8192  }
  0xd0   : > { %4138 = vsyncadd (%p5755_p1), [#allocation9], 4294959104  ;;  %p5756_p2 = pmov %p5755_p1 }
  0xd1   : > { %p5757_p13 = pmov %p5755_p1 }
  0xd2   : > { %4140 = dma.done.wait (%p5756_p2), [#allocation12], 2048  }
  0xd3   : > { %4142 = vsyncadd (%p5757_p13), [#allocation12], 4294965248  ;;  %v3491_v0 = vld [vmem:[#allocation7 + $0x4] ss:$8 sps:$4 sm:$0xff]   ;;  %v3493_v1 = vld [vmem:[#allocation7] ss:$8 sps:$4 sm:$0xff]  }
  0xd4   : > { %780 = vmatprep.subr.bf16.mxu0 %v3491_v0  ;;  %v3494_v2 = vld [vmem:[#allocation7 + $0x14] ss:$8 sps:$4 sm:$0xff]   ;;  %v3496_v3 = vld [vmem:[#allocation7 + $0x10] ss:$8 sps:$4 sm:$0xff]   ;;  %v3497_v4 = vld [vmem:[#allocation7 + $0x24] ss:$8 sps:$4 sm:$0xff]  }
  0xd5   : > { %781 = vmatpush1.bf16.msra.mxu0 %v3493_v1  ;;  %v3499_v5 = vld [vmem:[#allocation7 + $0x20] ss:$8 sps:$4 sm:$0xff]   ;;  %v3500_v6 = vld [vmem:[#allocation7 + $0x34] ss:$8 sps:$4 sm:$0xff]   ;;  %v3512_v7 = vld [vmem:[#allocation8 + $0x4] ss:$8 sps:$4 sm:$0xff]  }
  0xd6   : > { %782 = vmatprep.subr.bf16.mxu0 %v3494_v2  ;;  %v3514_v8 = vld [vmem:[#allocation8] ss:$8 sps:$4 sm:$0xff]   ;;  %v3502_v9 = vld [vmem:[#allocation7 + $0x30] ss:$8 sps:$4 sm:$0xff]   ;;  %v3503_v10 = vld [vmem:[#allocation7 + $0x44] ss:$8 sps:$4 sm:$0xff]   ;;  %1177 = vmatprep.subr.bf16.mxu1 %v3512_v7 }
  0xd7   : > { %v3518_v11 = vld [vmem:[#allocation8 + $0x14] ss:$8 sps:$4 sm:$0xff]   ;;  %1178 = vmatpush1.bf16.msra.mxu1 %v3514_v8  ;;  %v3520_v12 = vld [vmem:[#allocation8 + $0x10] ss:$8 sps:$4 sm:$0xff]   ;;  %v3505_v13 = vld [vmem:[#allocation7 + $0x40] ss:$8 sps:$4 sm:$0xff]  }
  0xd8   : > { %1179 = vmatprep.subr.bf16.mxu1 %v3518_v11  ;;  %v3524_v14 = vld [vmem:[#allocation8 + $0x24] ss:$8 sps:$4 sm:$0xff]   ;;  %v3506_v15 = vld [vmem:[#allocation7 + $0x54] ss:$8 sps:$4 sm:$0xff]   ;;  %v3526_v16 = vld [vmem:[#allocation8 + $0x20] ss:$8 sps:$4 sm:$0xff]  }
  0xd9   : > { %783 = vmatpush1.bf16.msra.mxu0 %v3496_v3  ;;  %v3530_v17 = vld [vmem:[#allocation8 + $0x34] ss:$8 sps:$4 sm:$0xff]   ;;  %v3508_v18 = vld [vmem:[#allocation7 + $0x50] ss:$8 sps:$4 sm:$0xff]   ;;  %v3509_v19 = vld [vmem:[#allocation7 + $0x64] ss:$8 sps:$4 sm:$0xff]  }
  0xda   : > { %784 = vmatprep.subr.bf16.mxu0 %v3497_v4  ;;  %v3532_v20 = vld [vmem:[#allocation8 + $0x30] ss:$8 sps:$4 sm:$0xff]   ;;  %v3536_v21 = vld [vmem:[#allocation8 + $0x44] ss:$8 sps:$4 sm:$0xff]   ;;  %v3511_v22 = vld [vmem:[#allocation7 + $0x60] ss:$8 sps:$4 sm:$0xff]  }
  0xdb   : > { %1180 = vmatpush1.bf16.msra.mxu1 %v3520_v12  ;;  %v3515_v23 = vld [vmem:[#allocation7 + $0x74] ss:$8 sps:$4 sm:$0xff]   ;;  %v3538_v24 = vld [vmem:[#allocation8 + $0x40] ss:$8 sps:$4 sm:$0xff]   ;;  %v3517_v26 = vld [vmem:[#allocation7 + $0x70] ss:$8 sps:$4 sm:$0xff]  }
  0xdc   : > { %1181 = vmatprep.subr.bf16.mxu1 %v3524_v14  ;;  %v3542_v25 = vld [vmem:[#allocation8 + $0x54] ss:$8 sps:$4 sm:$0xff]   ;;  %v3521_v27 = vld [vmem:[#allocation7 + $0x84] ss:$8 sps:$4 sm:$0xff]   ;;  %v3544_v28 = vld [vmem:[#allocation8 + $0x50] ss:$8 sps:$4 sm:$0xff]  }
  0xdd   : > { %785 = vmatpush1.bf16.msra.mxu0 %v3499_v5  ;;  %v3548_v29 = vld [vmem:[#allocation8 + $0x64] ss:$8 sps:$4 sm:$0xff]   ;;  %v3523_v30 = vld [vmem:[#allocation7 + $0x80] ss:$8 sps:$4 sm:$0xff]   ;;  %v3527_v31 = vld [vmem:[#allocation7 + $0x94] ss:$8 sps:$4 sm:$0xff]  }
  0xde   : > { %786 = vmatprep.subr.bf16.mxu0 %v3500_v6  ;;  %v3550_v32 = vld [vmem:[#allocation8 + $0x60] ss:$8 sps:$4 sm:$0xff]   ;;  %v3554_v33 = vld [vmem:[#allocation8 + $0x74] ss:$8 sps:$4 sm:$0xff]   ;;  %v3529_v35 = vld [vmem:[#allocation7 + $0x90] ss:$8 sps:$4 sm:$0xff]  }
  0xdf   : > { %1182 = vmatpush1.bf16.msra.mxu1 %v3526_v16  ;;  %v512_v34 = vld [vmem:[%s4509_s23] sm:$0xff]  ;;  %v513_v36 = vld [vmem:[%s4509_s23 + $0x8] sm:$0xff]  ;;  %v3556_v39 = vld [vmem:[#allocation8 + $0x70] ss:$8 sps:$4 sm:$0xff]   ;;  %s5792_s26 = sld [smem:[#allocation39_spill]]  ;;  %s5591_s9 = scalar_lea.vmem [#allocation13], %s4497_s13 }
  0xe0   : > { %1183 = vmatprep.subr.bf16.mxu1 %v3530_v17  ;;  %v3533_v37 = vld [vmem:[#allocation7 + $0xa4] ss:$8 sps:$4 sm:$0xff]   ;;  %v545_v38 = vpack.c.bf16 %v513_v36, %v512_v34  ;;  %v3535_v41 = vld [vmem:[#allocation7 + $0xa0] ss:$8 sps:$4 sm:$0xff]   ;;  %v3539_v42 = vld [vmem:[#allocation7 + $0xb4] ss:$8 sps:$4 sm:$0xff]  }
  0xe1   : > { %787 = vmatpush1.bf16.msra.mxu0 %v3502_v9  ;;  %v3560_v40 = vld [vmem:[#allocation8 + $0x84] ss:$8 sps:$4 sm:$0xff]   ;;  %v3562_v43 = vld [vmem:[#allocation8 + $0x80] ss:$8 sps:$4 sm:$0xff]   ;;  %v3566_v44 = vld [vmem:[#allocation8 + $0x94] ss:$8 sps:$4 sm:$0xff]  }
  0xe2   : > { %788 = vmatprep.subr.bf16.mxu0 %v3503_v10  ;;  %812 = vmatprep.mubr.bf16.mxu0 %v545_v38  ;;  %v3541_v45 = vld [vmem:[#allocation7 + $0xb0] ss:$8 sps:$4 sm:$0xff]   ;;  %v3545_v46 = vld [vmem:[#allocation7 + $0xc4] ss:$8 sps:$4 sm:$0xff]   ;;  %v3547_v49 = vld [vmem:[#allocation7 + $0xc0] ss:$8 sps:$4 sm:$0xff]  }
  0xe3   : > { %1184 = vmatpush1.bf16.msra.mxu1 %v3532_v20  ;;  %1209 = vmatprep.mubr.bf16.mxu1 %v545_v38  ;;  %v3568_v47 = vld [vmem:[#allocation8 + $0x90] ss:$8 sps:$4 sm:$0xff]   ;;  %v3569_v48 = vld [vmem:[#allocation8 + $0xa4] ss:$8 sps:$4 sm:$0xff]   ;;  %v3551_v50 = vld [vmem:[#allocation7 + $0xd4] ss:$8 sps:$4 sm:$0xff]  }
  0xe4   : > { %1185 = vmatprep.subr.bf16.mxu1 %v3536_v21  ;;  %v3571_v51 = vld [vmem:[#allocation8 + $0xa0] ss:$8 sps:$4 sm:$0xff]   ;;  %v3572_v52 = vld [vmem:[#allocation8 + $0xb4] ss:$8 sps:$4 sm:$0xff]   ;;  %v3553_v53 = vld [vmem:[#allocation7 + $0xd0] ss:$8 sps:$4 sm:$0xff]  }
  0xe5   : > { %789 = vmatpush1.bf16.msra.mxu0 %v3505_v13  ;;  %v3557_v54 = vld [vmem:[#allocation7 + $0xe4] ss:$8 sps:$4 sm:$0xff]   ;;  %v3574_v55 = vld [vmem:[#allocation8 + $0xb0] ss:$8 sps:$4 sm:$0xff]   ;;  %v3559_v57 = vld [vmem:[#allocation7 + $0xe0] ss:$8 sps:$4 sm:$0xff]  }
  0xe6   : > { %790 = vmatprep.subr.bf16.mxu0 %v3506_v15  ;;  %v3575_v56 = vld [vmem:[#allocation8 + $0xc4] ss:$8 sps:$4 sm:$0xff]   ;;  %v3563_v58 = vld [vmem:[#allocation7 + $0xf4] ss:$8 sps:$4 sm:$0xff]   ;;  %v3577_v59 = vld [vmem:[#allocation8 + $0xc0] ss:$8 sps:$4 sm:$0xff]  }
  0xe7   : > { %1186 = vmatpush1.bf16.msra.mxu1 %v3538_v24  ;;  %v3578_v60 = vld [vmem:[#allocation8 + $0xd4] ss:$8 sps:$4 sm:$0xff]   ;;  %v3565_v61 = vld [vmem:[#allocation7 + $0xf0] ss:$8 sps:$4 sm:$0xff]   ;;  %v480_v62 = vld [vmem:[%s4501_s24] sm:$0xff]  ;;  %s3280_s0 = sshll.u32 %s4252_s17, 12 }
  0xe8   : > { %1187 = vmatprep.subr.bf16.mxu1 %v3542_v25  ;;  %v481_v63 = vld [vmem:[%s4501_s24 + $0x8] sm:$0xff]  ;;  %v514_v0 = vld [vmem:[%s4509_s23 + $0x10] sm:$0xff]  ;;  %v515_v1 = vld [vmem:[%s4509_s23 + $0x18] sm:$0xff]  ;;  %s2877_s13 = sshll.u32 %s5591_s9, 4  ;;  %s5793_s21 = sld [smem:[#allocation40_spill]]  ;;  %s5660_s13 = int_to_ptr.vmem [resolvable:$true] %s2877_s13 }
  0xe9   : > { %791 = vmatpush1.bf16.msra.mxu0 %v3508_v18  ;;  %v3580_v2 = vld [vmem:[#allocation8 + $0xd0] ss:$8 sps:$4 sm:$0xff]   ;;  %v544_v3 = vpack.c.bf16 %v481_v63, %v480_v62  ;;  %v3581_v4 = vld [vmem:[#allocation8 + $0xe4] ss:$8 sps:$4 sm:$0xff]   ;;  %v547_v5 = vpack.c.bf16 %v515_v1, %v514_v0  ;;  %v3583_v6 = vld [vmem:[#allocation8 + $0xe0] ss:$8 sps:$4 sm:$0xff]  }
  0xea   : > { %792 = vmatprep.subr.bf16.mxu0 %v3509_v19  ;;  %v3587_v7 = vld [vmem:[#allocation10] ss:$8 sps:$4 sm:$0xff]   ;;  %v482_v8 = vld [vmem:[%s4501_s24 + $0x10] sm:$0xff]  ;;  %v483_v9 = vld [vmem:[%s4501_s24 + $0x18] sm:$0xff]  ;;  %s2864_s17 = scalar_lea.sflag [#allocation4], %s4494_s12  ;;  %s4173_s19 = smov [#allocation13]  }
  0xeb   : > { %1188 = vmatpush1.bf16.msra.mxu1 %v3544_v28  ;;  %v3589_v10 = vld [vmem:[#allocation10 + $0x4] ss:$8 sps:$4 sm:$0xff]   ;;  %v3584_v12 = vld [vmem:[#allocation8 + $0xf4] ss:$8 sps:$4 sm:$0xff]   ;;  %v3586_v15 = vld [vmem:[#allocation8 + $0xf0] ss:$8 sps:$4 sm:$0xff]   ;;  %v546_v18 = vpack.c.bf16 %v483_v9, %v482_v8 }
  0xec   : > { %1189 = vmatprep.subr.bf16.mxu1 %v3548_v29  ;;  %v516_v11 = vld [vmem:[%s4509_s23 + $0x20] sm:$0xff]  ;;  %v3592_v13 = vld [vmem:[#allocation10 + $0x14] ss:$8 sps:$4 sm:$0xff]   ;;  %v517_v14 = vld [vmem:[%s4509_s23 + $0x28] sm:$0xff]  ;;  %s4083_s28 = sshll.u32 %s4173_s19, 4  ;;  %s4084_s28 = int_to_ptr.vmem [resolvable:$false] %s4083_s28 }
  0xed   : > { %793 = vmatpush1.bf16.msra.mxu0 %v3511_v22  ;;  %v3590_v16 = vld [vmem:[#allocation10 + $0x10] ss:$8 sps:$4 sm:$0xff]   ;;  %v3595_v17 = vld [vmem:[#allocation10 + $0x24] ss:$8 sps:$4 sm:$0xff]   ;;  %v549_v19 = vpack.c.bf16 %v517_v14, %v516_v11  ;;  %v3593_v20 = vld [vmem:[#allocation10 + $0x20] ss:$8 sps:$4 sm:$0xff]   ;;  %p4086_p10 = scmp.lt.s32.totalorder %s5660_s13, %s4084_s28 }
  0xee   : > { %794 = vmatprep.subr.bf16.mxu0 %v3515_v23  ;;  %v3598_v21 = vld [vmem:[#allocation10 + $0x34] ss:$8 sps:$4 sm:$0xff]   ;;  %v484_v22 = vld [vmem:[%s4501_s24 + $0x20] sm:$0xff]  ;;  %v485_v23 = vld [vmem:[%s4501_s24 + $0x28] sm:$0xff]  ;;  %s5658_s30 = scalar_lea.hbm %s5793_s21, %s3280_s0  ;;  %s4085_s22 = scalar_lea.vmem %s4084_s28, 8192 }
  0xef   : > { %1190 = vmatpush1.bf16.msra.mxu1 %v3550_v32  ;;  %v518_v24 = vld [vmem:[%s4509_s23 + $0x30] sm:$0xff]  ;;  %v519_v25 = vld [vmem:[%s4509_s23 + $0x38] sm:$0xff]  ;;  %v548_v28 = vpack.c.bf16 %v485_v23, %v484_v22  ;;  %v3599_v29 = vld [vmem:[#allocation10 + $0x40] ss:$8 sps:$4 sm:$0xff]  }
  0xf0   : > { %1191 = vmatprep.subr.bf16.mxu1 %v3554_v33  ;;  %v486_v32 = vld [vmem:[%s4501_s24 + $0x30] sm:$0xff]  ;;  %v487_v33 = vld [vmem:[%s4501_s24 + $0x38] sm:$0xff]  ;;  %v520_v34 = vld [vmem:[%s4509_s23 + $0x40] sm:$0xff] }
  0xf1   : > { %795 = vmatpush1.bf16.msra.mxu0 %v3517_v26  ;;  %v3596_v26 = vld [vmem:[#allocation10 + $0x30] ss:$8 sps:$4 sm:$0xff]   ;;  %v550_v38 = vpack.c.bf16 %v487_v33, %v486_v32  ;;  %v493_v62 = vld [vmem:[%s4501_s24 + $0x68] sm:$0xff]  ;;  %v496_v9 = vld [vmem:[%s4501_s24 + $0x80] sm:$0xff] }
  0xf2   : > { %796 = vmatprep.subr.bf16.mxu0 %v3521_v27  ;;  %v3601_v27 = vld [vmem:[#allocation10 + $0x44] ss:$8 sps:$4 sm:$0xff]   ;;  %v3602_v36 = vld [vmem:[#allocation10 + $0x50] ss:$8 sps:$4 sm:$0xff]  }
  0xf3   : > { %1192 = vmatpush1.bf16.msra.mxu1 %v3556_v39  ;;  %v3605_v39 = vld [vmem:[#allocation10 + $0x60] ss:$8 sps:$4 sm:$0xff]   ;;  %v526_v63 = vld [vmem:[%s4509_s23 + $0x70] sm:$0xff]  ;;  %v527_v0 = vld [vmem:[%s4509_s23 + $0x78] sm:$0xff] }
  0xf4   : > { %1193 = vmatprep.subr.bf16.mxu1 %v3560_v40  ;;  %v530_v11 = vld [vmem:[%s4509_s23 + $0x90] sm:$0xff]  ;;  %v501_v22 = vld [vmem:[%s4501_s24 + $0xa8] sm:$0xff]  ;;  %v504_v33 = vld [vmem:[%s4501_s24 + $0xc0] sm:$0xff] }
  0xf5   : > { %797 = vmatpush1.bf16.msra.mxu0 %v3523_v30  ;;  %v551_v30 = vpack.c.bf16 %v519_v25, %v518_v24  ;;  %v534_v23 = vld [vmem:[%s4509_s23 + $0xb0] sm:$0xff]  ;;  %v535_v24 = vld [vmem:[%s4509_s23 + $0xb8] sm:$0xff] }
  0xf6   : > { %798 = vmatprep.subr.bf16.mxu0 %v3527_v31  ;;  %v3604_v31 = vld [vmem:[#allocation10 + $0x54] ss:$8 sps:$4 sm:$0xff]  }
  0xf7   : > { %1194 = vmatpush1.bf16.msra.mxu1 %v3562_v43  ;;  %v489_v43 = vld [vmem:[%s4501_s24 + $0x48] sm:$0xff] }
  0xf8   : > { %1195 = vmatprep.subr.bf16.mxu1 %v3566_v44  ;;  %v522_v44 = vld [vmem:[%s4509_s23 + $0x50] sm:$0xff] }
  0xf9   : > { %799 = vmatpush1.bf16.msra.mxu0 %v3529_v35  ;;  %v521_v35 = vld [vmem:[%s4509_s23 + $0x48] sm:$0xff] }
  0xfa   : > { %800 = vmatprep.subr.bf16.mxu0 %v3533_v37  ;;  %v3607_v37 = vld [vmem:[#allocation10 + $0x64] ss:$8 sps:$4 sm:$0xff]   ;;  %v553_v40 = vpack.c.bf16 %v521_v35, %v520_v34  ;;  %v538_v35 = vld [vmem:[%s4509_s23 + $0xd0] sm:$0xff] }
  0xfb   : > { %1196 = vmatpush1.bf16.msra.mxu1 %v3568_v47  ;;  %v3613_v47 = vld [vmem:[#allocation10 + $0x84] ss:$8 sps:$4 sm:$0xff]  }
  0xfc   : > { %1197 = vmatprep.subr.bf16.mxu1 %v3569_v48  ;;  %v505_v34 = vld [vmem:[%s4501_s24 + $0xc8] sm:$0xff] }
  0xfd   : > { %801 = vmatpush1.bf16.msra.mxu0 %v3535_v41  ;;  %v3610_v41 = vld [vmem:[#allocation10 + $0x74] ss:$8 sps:$4 sm:$0xff]  }
  0xfe   : > { %802 = vmatprep.subr.bf16.mxu0 %v3539_v42  ;;  %v488_v42 = vld [vmem:[%s4501_s24 + $0x40] sm:$0xff] }
  0xff   : > { %1198 = vmatpush1.bf16.msra.mxu1 %v3571_v51  ;;  %v552_v48 = vpack.c.bf16 %v489_v43, %v488_v42  ;;  %v3616_v51 = vld [vmem:[#allocation10 + $0x94] ss:$8 sps:$4 sm:$0xff]   ;;  %v541_v42 = vld [vmem:[%s4509_s23 + $0xe8] sm:$0xff] }
 0x100   : > { %1199 = vmatprep.subr.bf16.mxu1 %v3572_v52  ;;  %v490_v52 = vld [vmem:[%s4501_s24 + $0x50] sm:$0xff] }
 0x101   : > { %803 = vmatpush1.bf16.msra.mxu0 %v3541_v45  ;;  %v523_v45 = vld [vmem:[%s4509_s23 + $0x58] sm:$0xff] }
 0x102   : > { %804 = vmatprep.subr.bf16.mxu0 %v3545_v46  ;;  %v3608_v46 = vld [vmem:[#allocation10 + $0x70] ss:$8 sps:$4 sm:$0xff]  }
 0x103   : > { %1200 = vmatpush1.bf16.msra.mxu1 %v3574_v55  ;;  %v525_v55 = vld [vmem:[%s4509_s23 + $0x68] sm:$0xff] }
 0x104   : > { %1201 = vmatprep.subr.bf16.mxu1 %v3575_v56  ;;  %v3614_v56 = vld [vmem:[#allocation10 + $0x90] ss:$8 sps:$4 sm:$0xff]  }
 0x105   : > { %805 = vmatpush1.bf16.msra.mxu0 %v3547_v49  ;;  %v555_v49 = vpack.c.bf16 %v523_v45, %v522_v44  ;;  %v3620_v45 = vld [vmem:[#allocation10 + $0xb0] ss:$8 sps:$4 sm:$0xff]  }
 0x106   : > { %806 = vmatprep.subr.bf16.mxu0 %v3551_v50  ;;  %v3611_v50 = vld [vmem:[#allocation10 + $0x80] ss:$8 sps:$4 sm:$0xff]  }
 0x107   : > { %1202 = vmatpush1.bf16.msra.mxu1 %v3577_v59 }
 0x108   : > { %1203 = vmatprep.subr.bf16.mxu1 %v3578_v60  ;;  %v3617_v60 = vld [vmem:[#allocation10 + $0xa0] ss:$8 sps:$4 sm:$0xff]  }
 0x109   : > { %807 = vmatpush1.bf16.msra.mxu0 %v3553_v53  ;;  %v491_v53 = vld [vmem:[%s4501_s24 + $0x58] sm:$0xff] }
 0x10a   : > { %808 = vmatprep.subr.bf16.mxu0 %v3557_v54  ;;  %v524_v54 = vld [vmem:[%s4509_s23 + $0x60] sm:$0xff] }
 0x10b   : > { %1204 = vmatpush1.bf16.msra.mxu1 %v3580_v2  ;;  %v557_v59 = vpack.c.bf16 %v525_v55, %v524_v54  ;;  %v559_v2 = vpack.c.bf16 %v527_v0, %v526_v63  ;;  %v3628_v55 = vld [vmem:[#allocation10 + $0xd4] ss:$8 sps:$4 sm:$0xff]   ;;  %v3632_v63 = vld [vmem:[#allocation10 + $0xf0] ss:$8 sps:$4 sm:$0xff]   ;;  %v610_v0 = vlaneseq }
 0x10c   : > { %1205 = vmatprep.subr.bf16.mxu1 %v3581_v4  ;;  %v495_v4 = vld [vmem:[%s4501_s24 + $0x78] sm:$0xff] }
 0x10d   : > { %809 = vmatpush1.bf16.msra.mxu0 %v3559_v57  ;;  %v3619_v57 = vld [vmem:[#allocation10 + $0xa4] ss:$8 sps:$4 sm:$0xff]  }
 0x10e   : > { %810 = vmatprep.subr.bf16.mxu0 %v3563_v58  ;;  %v554_v58 = vpack.c.bf16 %v491_v53, %v490_v52  ;;  %v3623_v52 = vld [vmem:[#allocation10 + $0xc0] ss:$8 sps:$4 sm:$0xff]  }
 0x10f   : > { %1206 = vmatpush1.bf16.msra.mxu1 %v3583_v6  ;;  %v529_v6 = vld [vmem:[%s4509_s23 + $0x88] sm:$0xff] }
 0x110   : > { %1207 = vmatprep.subr.bf16.mxu1 %v3584_v12  ;;  %v531_v12 = vld [vmem:[%s4509_s23 + $0x98] sm:$0xff] }
 0x111   : > { %811 = vmatpush1.bf16.msra.mxu0 %v3565_v61  ;;  %v492_v61 = vld [vmem:[%s4501_s24 + $0x60] sm:$0xff]  ;;  %v563_v14 = vpack.c.bf16 %v531_v12, %v530_v11 }
 0x112   : > { %2246 = vmatprep.subr.bf16.mxu0 %v3589_v10  ;;  %v556_v1 = vpack.c.bf16 %v493_v62, %v492_v61  ;;  %v497_v10 = vld [vmem:[%s4501_s24 + $0x88] sm:$0xff]  ;;  %v3634_v62 = vld [vmem:[#allocation10 + $0xf4] ss:$8 sps:$4 sm:$0xff]  }
 0x113   : > { %1208 = vmatpush1.bf16.msra.mxu1 %v3586_v15  ;;  %v498_v15 = vld [vmem:[%s4501_s24 + $0x90] sm:$0xff]  ;;  %v3629_v61 = vld [vmem:[#allocation10 + $0xe0] ss:$8 sps:$4 sm:$0xff]  }
 0x114   : > { %813 = vmatmul.mubr.bf16.vlgmr.msra.gmra.mrb[0].mxu0 %v544_v3 }
 0x115   : > { %822 = vmatprep.mubr.bf16.mxu0 %v547_v5  ;;  %2247 = vmatpush1.bf16.msra.mxu0 %v3587_v7 }
 0x116   : > { %2248 = vmatprep.subr.bf16.mxu0 %v3592_v13  ;;  %1210 = vmatmul.mubr.bf16.vlgmr.msra.gmra.mrb[0].mxu1 %v544_v3  ;;  %v494_v3 = vld [vmem:[%s4501_s24 + $0x70] sm:$0xff]  ;;  %v560_v13 = vpack.c.bf16 %v497_v10, %v496_v9 }
 0x117   : > { %1219 = vmatprep.mubr.bf16.mxu1 %v547_v5  ;;  %v528_v5 = vld [vmem:[%s4509_s23 + $0x80] sm:$0xff]  ;;  %v558_v7 = vpack.c.bf16 %v495_v4, %v494_v3 }
 0x118   : > { %v561_v8 = vpack.c.bf16 %v529_v6, %v528_v5  ;;  %v608_v3 = vld [vmem:[%s5710_s3] sm:$0x3] }
 0x119   : > { %2249 = vmatpush1.bf16.msra.mxu0 %v3590_v16  ;;  %v499_v16 = vld [vmem:[%s4501_s24 + $0x98] sm:$0xff] }
 0x11a   : > { %2250 = vmatprep.subr.bf16.mxu0 %v3595_v17  ;;  %v532_v17 = vld [vmem:[%s4509_s23 + $0xa0] sm:$0xff] }
 0x11c   : > { %823 = vmatmul.mubr.bf16.gmra.mrb[4].mxu0 %v546_v18 }
 0x11d   : > { %832 = vmatprep.mubr.bf16.mxu0 %v549_v19  ;;  %2251 = vmatpush1.bf16.msra.mxu0 %v3593_v20 }
 0x11e   : > { %2252 = vmatprep.subr.bf16.mxu0 %v3598_v21  ;;  %1220 = vmatmul.mubr.bf16.gmra.mrb[4].mxu1 %v546_v18  ;;  %v533_v18 = vld [vmem:[%s4509_s23 + $0xa8] sm:$0xff]  ;;  %v500_v21 = vld [vmem:[%s4501_s24 + $0xa0] sm:$0xff] }
 0x11f   : > { %1229 = vmatprep.mubr.bf16.mxu1 %v549_v19  ;;  %v562_v19 = vpack.c.bf16 %v499_v16, %v498_v15  ;;  %v565_v20 = vpack.c.bf16 %v533_v18, %v532_v17  ;;  %v564_v25 = vpack.c.bf16 %v501_v22, %v500_v21 }
 0x121   : > { %2253 = vmatpush1.bf16.msra.mxu0 %v3596_v26  ;;  %v567_v26 = vpack.c.bf16 %v535_v24, %v534_v23 }
 0x122   : > { %2254 = vmatprep.subr.bf16.mxu0 %v3601_v27  ;;  %v502_v27 = vld [vmem:[%s4501_s24 + $0xb0] sm:$0xff] }
 0x124   : > { %833 = vmatmul.mubr.bf16.gmra.mrb[8].mxu0 %v548_v28 }
 0x125   : > { %842 = vmatprep.mubr.bf16.mxu0 %v551_v30  ;;  %2255 = vmatpush1.bf16.msra.mxu0 %v3599_v29  ;;  %v536_v29 = vld [vmem:[%s4509_s23 + $0xc0] sm:$0xff] }
 0x126   : > { %2256 = vmatprep.subr.bf16.mxu0 %v3604_v31  ;;  %1230 = vmatmul.mubr.bf16.gmra.mrb[8].mxu1 %v548_v28  ;;  %v503_v28 = vld [vmem:[%s4501_s24 + $0xb8] sm:$0xff] }
 0x127   : > { %1239 = vmatprep.mubr.bf16.mxu1 %v551_v30  ;;  %v537_v30 = vld [vmem:[%s4509_s23 + $0xc8] sm:$0xff]  ;;  %v566_v31 = vpack.c.bf16 %v503_v28, %v502_v27 }
 0x128   : > { %v569_v32 = vpack.c.bf16 %v537_v30, %v536_v29 }
 0x129   : > { %2257 = vmatpush1.bf16.msra.mxu0 %v3602_v36  ;;  %v539_v36 = vld [vmem:[%s4509_s23 + $0xd8] sm:$0xff] }
 0x12a   : > { %2258 = vmatprep.subr.bf16.mxu0 %v3607_v37  ;;  %v568_v37 = vpack.c.bf16 %v505_v34, %v504_v33 }
 0x12c   : > { %843 = vmatmul.mubr.bf16.gmra.mrb[12].mxu0 %v550_v38 }
 0x12d   : > { %852 = vmatprep.mubr.bf16.mxu0 %v553_v40  ;;  %2259 = vmatpush1.bf16.msra.mxu0 %v3605_v39  ;;  %v506_v39 = vld [vmem:[%s4501_s24 + $0xd0] sm:$0xff] }
 0x12e   : > { %2260 = vmatprep.subr.bf16.mxu0 %v3610_v41  ;;  %1240 = vmatmul.mubr.bf16.gmra.mrb[12].mxu1 %v550_v38  ;;  %v571_v38 = vpack.c.bf16 %v539_v36, %v538_v35  ;;  %v540_v41 = vld [vmem:[%s4509_s23 + $0xe0] sm:$0xff] }
 0x12f   : > { %1249 = vmatprep.mubr.bf16.mxu1 %v553_v40  ;;  %v507_v40 = vld [vmem:[%s4501_s24 + $0xd8] sm:$0xff]  ;;  %v573_v44 = vpack.c.bf16 %v541_v42, %v540_v41  ;;  %v1005_v35 = vld [vmem:[%s5712_s5] sm:$0x3] }
 0x130   : > { %v570_v43 = vpack.c.bf16 %v507_v40, %v506_v39 }
 0x131   : > { %2261 = vmatpush1.bf16.msra.mxu0 %v3608_v46  ;;  %v3622_v46 = vld [vmem:[#allocation10 + $0xb4] ss:$8 sps:$4 sm:$0xff]  }
 0x132   : > { %2262 = vmatprep.subr.bf16.mxu0 %v3613_v47  ;;  %v508_v47 = vld [vmem:[%s4501_s24 + $0xe0] sm:$0xff] }
 0x134   : > { %853 = vmatmul.mubr.bf16.gmra.mrb[16].mxu0 %v552_v48 }
 0x135   : > { %862 = vmatprep.mubr.bf16.mxu0 %v555_v49  ;;  %2263 = vmatpush1.bf16.msra.mxu0 %v3611_v50  ;;  %v543_v50 = vld [vmem:[%s4509_s23 + $0xf8] sm:$0xff] }
 0x136   : > { %2264 = vmatprep.subr.bf16.mxu0 %v3616_v51  ;;  %1250 = vmatmul.mubr.bf16.gmra.mrb[16].mxu1 %v552_v48  ;;  %v509_v48 = vld [vmem:[%s4501_s24 + $0xe8] sm:$0xff] }
 0x137   : > { %1259 = vmatprep.mubr.bf16.mxu1 %v555_v49  ;;  %v542_v49 = vld [vmem:[%s4509_s23 + $0xf0] sm:$0xff]  ;;  %v3625_v51 = vld [vmem:[#allocation10 + $0xc4] ss:$8 sps:$4 sm:$0xff]   ;;  %v572_v53 = vpack.c.bf16 %v509_v48, %v508_v47  ;;  %s4079_s23 = scalar_lea.vmem %s5660_s13, 4096 }
 0x138   : > { %v575_v54 = vpack.c.bf16 %v543_v50, %v542_v49  ;;  %p4080_p0 = scmp.ne.s32.totalorder %s5660_s13, %s4079_s23  ;;  %p4087_p5 = scmp.lt.s32.totalorder %s4085_s22, %s4079_s23 }
 0x139   : > { %2265 = vmatpush1.bf16.msra.mxu0 %v3614_v56  ;;  %v3626_v56 = vld [vmem:[#allocation10 + $0xd0] ss:$8 sps:$4 sm:$0xff]  }
 0x13a   : > { %2266 = vmatprep.subr.bf16.mxu0 %v3619_v57  ;;  %v510_v57 = vld [vmem:[%s4501_s24 + $0xf0] sm:$0xff]  ;;  %p4081_p4 = pnand %p4080_p0, %p4402_p3  ;;  %p4088_p9 = por %p4087_p5, %p4086_p10 }
 0x13c   : > { %863 = vmatmul.mubr.bf16.gmra.mrb[20].mxu0 %v554_v58  ;;  %p4082_p6 = pneg %p4081_p4 }
 0x13d   : > { %872 = vmatprep.mubr.bf16.mxu0 %v557_v59  ;;  %2267 = vmatpush1.bf16.msra.mxu0 %v3617_v60 }
 0x13e   : > { %1260 = vmatmul.mubr.bf16.gmra.mrb[20].mxu1 %v554_v58  ;;  %2268 = vmatprep.subr.bf16.mxu0 %v3622_v46  ;;  %v511_v58 = vld [vmem:[%s4501_s24 + $0xf8] sm:$0xff]  ;;  %p4089_p8 = pnand %p4088_p9, %p4082_p6 }
 0x13f   : > { %1269 = vmatprep.mubr.bf16.mxu1 %v557_v59  ;;  %v3631_v59 = vld [vmem:[#allocation10 + $0xe4] ss:$8 sps:$4 sm:$0xff]   ;;  %v574_v60 = vpack.c.bf16 %v511_v58, %v510_v57 }
 0x141   : > { %2269 = vmatpush1.bf16.msra.mxu0 %v3620_v45 }
 0x142   : > { %2270 = vmatprep.subr.bf16.mxu0 %v3625_v51 }
 0x144   : > { %873 = vmatmul.mubr.bf16.gmra.mrb[24].mxu0 %v556_v1 }
 0x145   : > { %882 = vmatprep.mubr.bf16.mxu0 %v559_v2  ;;  %2271 = vmatpush1.bf16.msra.mxu0 %v3623_v52 }
 0x146   : > { %1270 = vmatmul.mubr.bf16.gmra.mrb[24].mxu1 %v556_v1  ;;  %2272 = vmatprep.subr.bf16.mxu0 %v3628_v55  ;;  %v611_v1 = vshrl.u32 %v610_v0, 7 }
 0x147   : > { %1279 = vmatprep.mubr.bf16.mxu1 %v559_v2 }
 0x148   : > { %v4591_v2 = vsub.s32 0, %v611_v1  ;;  %v4596_v4 = vsub.s32 1, %v611_v1 }
 0x149   : > { %2273 = vmatpush1.bf16.msra.mxu0 %v3626_v56 }
 0x14a   : > { %2274 = vmatprep.subr.bf16.mxu0 %v3631_v59  ;;  %5758 = vst [vmem:[#allocation22_spill] sm:$0xff] %v4591_v2  ;;  %5759 = vst [vmem:[#allocation23_spill] sm:$0xff] %v4596_v4  ;;  %v4599_v5 = vrot.slane %v608_v3, %v4591_v2  ;;  %v4602_v6 = vrot.slane %v608_v3, %v4596_v4  ;;  %v4623_v49 = vrot.slane %v1005_v35, %v4596_v4 }
 0x14c   : > { %883 = vmatmul.mubr.bf16.gmra.mrb[28].mxu0 %v558_v7 }
 0x14d   : > { %892 = vmatprep.mubr.bf16.mxu0 %v561_v8  ;;  %2275 = vmatpush1.bf16.msra.mxu0 %v3629_v61 }
 0x14e   : > { %1280 = vmatmul.mubr.bf16.gmra.mrb[28].mxu1 %v558_v7  ;;  %2276 = vmatprep.subr.bf16.mxu0 %v3634_v62 }
 0x14f   : > { %1289 = vmatprep.mubr.bf16.mxu1 %v561_v8 }
 0x151   : > { %2277 = vmatpush1.bf16.msra.mxu0 %v3632_v63 }
 0x154   : > { %893 = vmatmul.mubr.bf16.gmra.mrb[32].mxu0 %v560_v13 }
 0x155   : > { %902 = vmatprep.mubr.bf16.mxu0 %v563_v14 }
 0x156   : > { %1290 = vmatmul.mubr.bf16.gmra.mrb[32].mxu1 %v560_v13 }
 0x157   : > { %1299 = vmatprep.mubr.bf16.mxu1 %v563_v14 }
 0x15c   : > { %903 = vmatmul.mubr.bf16.gmra.mrb[36].mxu0 %v562_v19 }
 0x15d   : > { %912 = vmatprep.mubr.bf16.mxu0 %v565_v20 }
 0x15e   : > { %1300 = vmatmul.mubr.bf16.gmra.mrb[36].mxu1 %v562_v19 }
 0x15f   : > { %1309 = vmatprep.mubr.bf16.mxu1 %v565_v20 }
 0x164   : > { %913 = vmatmul.mubr.bf16.gmra.mrb[40].mxu0 %v564_v25 }
 0x165   : > { %922 = vmatprep.mubr.bf16.mxu0 %v567_v26 }
 0x166   : > { %1310 = vmatmul.mubr.bf16.gmra.mrb[40].mxu1 %v564_v25 }
 0x167   : > { %1319 = vmatprep.mubr.bf16.mxu1 %v567_v26 }
 0x16c   : > { %923 = vmatmul.mubr.bf16.gmra.mrb[44].mxu0 %v566_v31 }
 0x16d   : > { %932 = vmatprep.mubr.bf16.mxu0 %v569_v32 }
 0x16e   : > { %1320 = vmatmul.mubr.bf16.gmra.mrb[44].mxu1 %v566_v31 }
 0x16f   : > { %1329 = vmatprep.mubr.bf16.mxu1 %v569_v32 }
 0x174   : > { %933 = vmatmul.mubr.bf16.gmra.mrb[48].mxu0 %v568_v37 }
 0x175   : > { %942 = vmatprep.mubr.bf16.mxu0 %v571_v38 }
 0x176   : > { %1330 = vmatmul.mubr.bf16.gmra.mrb[48].mxu1 %v568_v37 }
 0x177   : > { %1339 = vmatprep.mubr.bf16.mxu1 %v571_v38 }
 0x17c   : > { %943 = vmatmul.mubr.bf16.gmra.mrb[52].mxu0 %v570_v43 }
 0x17d   : > { %952 = vmatprep.mubr.bf16.mxu0 %v573_v44 }
 0x17e   : > { %1340 = vmatmul.mubr.bf16.gmra.mrb[52].mxu1 %v570_v43 }
 0x17f   : > { %1349 = vmatprep.mubr.bf16.mxu1 %v573_v44  ;;  %v4619_v44 = vrot.slane %v1005_v35, %v4591_v2 }
 0x184   : > { %953 = vmatmul.mubr.bf16.gmra.mrb[56].mxu0 %v572_v53 }
 0x185   : > { %962 = vmatprep.mubr.bf16.mxu0 %v575_v54 }
 0x186   : > { %1350 = vmatmul.mubr.bf16.gmra.mrb[56].mxu1 %v572_v53 }
 0x187   : > { %1359 = vmatprep.mubr.bf16.mxu1 %v575_v54 }
 0x18c   : > { %963 = vmatmul.mubr.bf16.gmra.mrb[60].mxu0 %v574_v60 }
 0x18e   : > { %1360 = vmatmul.mubr.bf16.gmra.mrb[60].mxu1 %v574_v60 }
 0x1e7   : > { %v814_v7 = vpop.f32.mrb[0].mxu0 }
 0x1e8   : > { %v815_v8 = vadd.f32 %v814_v7, %v4599_v5  ;;  %v816_v9 = vpop.f32.mrb[1].mxu0 }
 0x1e9   : > { %v817_v10 = vadd.f32 %v816_v9, %v4602_v6  ;;  %v818_v11 = vpop.f32.mrb[2].mxu0  ;;  %v1211_v24 = vpop.f32.mrb[0].mxu1 }
 0x1ea   : > { %v3096_v12 = vmul.f32 -1.442695, %v815_v8  ;;  %v819_v13 = vadd.f32 %v818_v11, %v4599_v5  ;;  %v820_v14 = vpop.f32.mrb[3].mxu0  ;;  %v1213_v28 = vpop.f32.mrb[1].mxu1  ;;  %v4625_v51 = vmul.f32 0.5, %v815_v8  ;;  %v1212_v3 = vadd.f32 %v1211_v24, %v4619_v44 }
 0x1eb   : > { %v3097_v15 = vmul.f32 -1.442695, %v817_v10  ;;  %v821_v16 = vadd.f32 %v820_v14, %v4602_v6  ;;  %v1215_v31 = vpop.f32.mrb[2].mxu1  ;;  %v4627_v56 = vmul.f32 0.5, %v817_v10  ;;  %v1214_v10 = vadd.f32 %v1213_v28, %v4623_v49 }
 0x1ec   : > { %3651 = vpow2.f32 %v3096_v12  ;;  %v3098_v17 = vmul.f32 -1.442695, %v819_v13  ;;  %v4612_v33 = vpop.f32.mrb[3].mxu1  ;;  %v4632_v60 = vmul.f32 0.5, %v819_v13 }
 0x1ed   : > { %3653 = vpow2.f32 %v3097_v15  ;;  %v3099_v18 = vmul.f32 -1.442695, %v821_v16  ;;  %v4634_v61 = vmul.f32 0.5, %v821_v16  ;;  %v1216_v15 = vadd.f32 %v1215_v31, %v4619_v44 }
 0x1ee   : > { %3655 = vpow2.f32 %v3098_v17 }
 0x1ef   : > { %3657 = vpow2.f32 %v3099_v18  ;;  %v824_v19 = vpop.f32.mrb[4].mxu0 }
 0x1f0   : > { %v825_v20 = vadd.f32 %v824_v19, %v4599_v5  ;;  %v826_v21 = vpop.f32.mrb[5].mxu0 }
 0x1f1   : > { %v827_v22 = vadd.f32 %v826_v21, %v4602_v6  ;;  %v828_v23 = vpop.f32.mrb[6].mxu0  ;;  %v1221_v50 = vpop.f32.mrb[4].mxu1 }
 0x1f2   : > { %v3100_v25 = vmul.f32 -1.442695, %v825_v20  ;;  %v829_v26 = vadd.f32 %v828_v23, %v4599_v5  ;;  %v830_v27 = vpop.f32.mrb[7].mxu0  ;;  %v1223_v55 = vpop.f32.mrb[5].mxu1  ;;  %v4641_v0 = vmul.f32 0.5, %v825_v20 }
 0x1f3   : > { %v3101_v29 = vmul.f32 -1.442695, %v827_v22  ;;  %v831_v30 = vadd.f32 %v830_v27, %v4602_v6  ;;  %v4630_v59 = vpop.f32.mrb[6].mxu1  ;;  %v4644_v8 = vmul.f32 0.5, %v827_v22 }
 0x1f4   : > { %3659 = vpow2.f32 %v3100_v25  ;;  %v3102_v32 = vmul.f32 -1.442695, %v829_v26  ;;  %v4639_v63 = vpop.f32.mrb[7].mxu1  ;;  %v4648_v13 = vmul.f32 0.5, %v829_v26  ;;  %v1218_v25 = vadd.f32 %v4612_v33, %v4623_v49 }
 0x1f5   : > { %3661 = vpow2.f32 %v3101_v29  ;;  %v3103_v34 = vmul.f32 -1.442695, %v831_v30  ;;  %v4651_v18 = vmul.f32 0.5, %v831_v30 }
 0x1f6   : > { %v3652_v36 = vpop.eup %3651  ;;  %3663 = vpow2.f32 %v3102_v32 }
 0x1f7   : > { %v3654_v37 = vpop.eup %3653  ;;  %v1562_v38 = vadd.f32 1.0, %v3652_v36  ;;  %3665 = vpow2.f32 %v3103_v34  ;;  %v834_v39 = vpop.f32.mrb[8].mxu0 }
 0x1f8   : > { %v3656_v40 = vpop.eup %3655  ;;  %v1563_v41 = vadd.f32 1.0, %v3654_v37  ;;  %v835_v42 = vadd.f32 %v834_v39, %v4599_v5  ;;  %v836_v43 = vpop.f32.mrb[9].mxu0 }
 0x1f9   : > { %v3658_v45 = vpop.eup %3657  ;;  %3667 = vrcp.f32 %v1562_v38  ;;  %v1564_v46 = vadd.f32 1.0, %v3656_v40  ;;  %v837_v47 = vadd.f32 %v836_v43, %v4602_v6  ;;  %v838_v48 = vpop.f32.mrb[10].mxu0  ;;  %v1222_v40 = vadd.f32 %v1221_v50, %v4619_v44 }
 0x1fa   : > { %3669 = vrcp.f32 %v1563_v41  ;;  %v1565_v52 = vadd.f32 1.0, %v3658_v45  ;;  %v3104_v53 = vmul.f32 -1.442695, %v835_v42  ;;  %v840_v54 = vpop.f32.mrb[11].mxu0  ;;  %v839_v58 = vadd.f32 %v838_v48, %v4599_v5  ;;  %v4661_v26 = vpop.f32.mrb[8].mxu1 }
 0x1fb   : > { %3671 = vrcp.f32 %v1564_v46  ;;  %v3105_v57 = vmul.f32 -1.442695, %v837_v47  ;;  %v4637_v62 = vadd.f32 %v840_v54, %v4602_v6  ;;  %v4663_v28 = vmul.f32 0.5, %v835_v42  ;;  %v4666_v31 = vpop.f32.mrb[9].mxu1 }
 0x1fc   : > { %3673 = vrcp.f32 %v1565_v52  ;;  %v3106_v1 = vmul.f32 -1.442695, %v839_v58  ;;  %v4668_v34 = vmul.f32 0.5, %v837_v47  ;;  %v4674_v33 = vpop.f32.mrb[10].mxu1  ;;  %v1224_v46 = vadd.f32 %v1223_v55, %v4623_v49 }
 0x1fd   : > { %3675 = vpow2.f32 %v3104_v53  ;;  %v3107_v9 = vmul.f32 -1.442695, %v4637_v62  ;;  %v4680_v41 = vpop.f32.mrb[11].mxu1  ;;  %v4684_v48 = vmul.f32 0.5, %v839_v58 }
 0x1fe   : > { %v3660_v7 = vpop.eup %3659  ;;  %3677 = vpow2.f32 %v3105_v57 }
 0x1ff   : > { %v3662_v11 = vpop.eup %3661  ;;  %v1566_v12 = vadd.f32 1.0, %v3660_v7  ;;  %3679 = vpow2.f32 %v3106_v1  ;;  %v844_v14 = vpop.f32.mrb[12].mxu0 }
 0x200   : > { %v3664_v16 = vpop.eup %3663  ;;  %v1567_v17 = vadd.f32 1.0, %v3662_v11  ;;  %3681 = vpow2.f32 %v3107_v9  ;;  %v4654_v19 = vadd.f32 %v844_v14, %v4599_v5  ;;  %v846_v20 = vpop.f32.mrb[13].mxu0 }
 0x201   : > { %v3666_v21 = vpop.eup %3665  ;;  %3683 = vrcp.f32 %v1566_v12  ;;  %v1568_v22 = vadd.f32 1.0, %v3664_v16  ;;  %v4657_v23 = vadd.f32 %v846_v20, %v4602_v6  ;;  %v848_v24 = vpop.f32.mrb[14].mxu0 }
 0x202   : > { %3685 = vrcp.f32 %v1567_v17  ;;  %v1569_v27 = vadd.f32 1.0, %v3666_v21  ;;  %v3108_v29 = vmul.f32 -1.442695, %v4654_v19  ;;  %v850_v30 = vpop.f32.mrb[15].mxu0  ;;  %v4672_v36 = vadd.f32 %v848_v24, %v4599_v5  ;;  %v4696_v21 = vpop.f32.mrb[12].mxu1 }
 0x203   : > { %v3668_v32 = vpop.eup %3667  ;;  %3687 = vrcp.f32 %v1568_v22  ;;  %v3109_v35 = vmul.f32 -1.442695, %v4657_v23  ;;  %v4677_v39 = vadd.f32 %v850_v30, %v4602_v6  ;;  %v4701_v30 = vpop.f32.mrb[13].mxu1 }
 0x204   : > { %v3670_v37 = vpop.eup %3669  ;;  %3689 = vrcp.f32 %v1569_v27  ;;  %v3160_v38 = vadd.f32 -0.5, %v3668_v32  ;;  %v3110_v43 = vmul.f32 -1.442695, %v4672_v36 }
 0x205   : > { %v3672_v42 = vpop.eup %3671  ;;  %3691 = vpow2.f32 %v3108_v29  ;;  %v3161_v45 = vadd.f32 -0.5, %v3670_v37  ;;  %v3111_v53 = vmul.f32 -1.442695, %v4677_v39  ;;  %v1226_v29 = vadd.f32 %v4630_v59, %v4619_v44 }
 0x206   : > { %v3674_v47 = vpop.eup %3673  ;;  %3693 = vpow2.f32 %v3109_v35  ;;  %v1882_v52 = vmul.f32 %v3160_v38, %v1212_v3  ;;  %v3162_v50 = vadd.f32 -0.5, %v3672_v42  ;;  %v4707_v35 = vpop.f32.mrb[14].mxu1  ;;  %v4710_v38 = vmul.f32 0.5, %v4637_v62 }
 0x207   : > { %v3676_v54 = vpop.eup %3675  ;;  %3695 = vpow2.f32 %v3110_v43  ;;  %v1883_v57 = vmul.f32 %v3161_v45, %v1214_v10  ;;  %v3163_v1 = vadd.f32 -0.5, %v3674_v47  ;;  %v854_v7 = vpop.f32.mrb[16].mxu0 }
 0x208   : > { %v3678_v9 = vpop.eup %3677  ;;  %v1570_v11 = vadd.f32 1.0, %v3676_v54  ;;  %v4688_v12 = vadd.f32 %v1882_v52, %v4625_v51  ;;  %3697 = vpow2.f32 %v3111_v53  ;;  %v4691_v55 = vadd.f32 %v854_v7, %v4599_v5  ;;  %v856_v58 = vpop.f32.mrb[17].mxu0 }
 0x209   : > { %v3680_v14 = vpop.eup %3679  ;;  %v1571_v3 = vadd.f32 1.0, %v3678_v9  ;;  %v4694_v16 = vadd.f32 %v1883_v57, %v4627_v56  ;;  %v1884_v17 = vmul.f32 %v3162_v50, %v1216_v15  ;;  %v1885_v10 = vmul.f32 %v3163_v1, %v1218_v25  ;;  %v858_v20 = vpop.f32.mrb[18].mxu0 }
 0x20a   : > { %v3682_v22 = vpop.eup %3681  ;;  %3699 = vrcp.f32 %v1570_v11  ;;  %v1572_v24 = vadd.f32 1.0, %v3680_v14  ;;  %v3112_v51 = vmul.f32 -1.442695, %v4691_v55  ;;  %v860_v27 = vpop.f32.mrb[19].mxu0  ;;  %v4713_v42 = vadd.f32 %v856_v58, %v4602_v6 }
 0x20b   : > { %v3684_v32 = vpop.eup %3683  ;;  %3701 = vrcp.f32 %v1571_v3  ;;  %v1573_v56 = vadd.f32 1.0, %v3682_v22  ;;  %v4704_v15 = vadd.f32 %v1884_v17, %v4632_v60  ;;  %v1949_v25 = vadd.f32 %v1885_v10, %v4634_v61  ;;  %v4718_v45 = vpop.f32.mrb[15].mxu1 }
 0x20c   : > { %v3686_v37 = vpop.eup %3685  ;;  %v3164_v59 = vadd.f32 -0.5, %v3684_v32  ;;  %v4716_v43 = vadd.f32 %v858_v20, %v4599_v5  ;;  %3703 = vrcp.f32 %v1572_v24  ;;  %v4723_v52 = vadd.f32 %v860_v27, %v4602_v6  ;;  %v4739_v22 = vpop.f32.mrb[16].mxu1 }
 0x20d   : > { %v3688_v47 = vpop.eup %3687  ;;  %v2010_v60 = vpack.c.bf16 %v4704_v15, %v4688_v12  ;;  %v3165_v61 = vadd.f32 -0.5, %v3686_v37  ;;  %3705 = vpow2.f32 %v3112_v51  ;;  %v3113_v53 = vmul.f32 -1.442695, %v4713_v42  ;;  %v4744_v32 = vpop.f32.mrb[17].mxu1 }
 0x20e   : > { %v3690_v62 = vpop.eup %3689  ;;  %v1886_v54 = vmul.f32 %v3164_v59, %v1222_v40  ;;  %v1228_v57 = vadd.f32 %v4639_v63, %v4623_v49  ;;  %3707 = vrcp.f32 %v1573_v56  ;;  %v4729_v1 = vmul.f32 0.5, %v4654_v19  ;;  %v4752_v59 = vpop.f32.mrb[18].mxu1 }
 0x20f   : > { %v3692_v50 = vpop.eup %3691  ;;  %v3114_v7 = vmul.f32 -1.442695, %v4716_v43  ;;  %v1887_v9 = vmul.f32 %v3165_v61, %v1224_v46  ;;  %v864_v11 = vpop.f32.mrb[20].mxu0  ;;  %3709 = vpow2.f32 %v3113_v53  ;;  %v3115_v40 = vmul.f32 -1.442695, %v4723_v52 }
 0x210   : > { %v3694_v12 = vpop.eup %3693  ;;  %v1574_v58 = vadd.f32 1.0, %v3692_v50  ;;  %v4733_v14 = vadd.f32 %v1886_v54, %v4641_v0  ;;  %v866_v3 = vpop.f32.mrb[21].mxu0  ;;  %v3166_v19 = vadd.f32 -0.5, %v3688_v47  ;;  %v3167_v51 = vadd.f32 -0.5, %v3690_v62 }
 0x211   : > { %v3696_v17 = vpop.eup %3695  ;;  %v1575_v63 = vadd.f32 1.0, %v3694_v12  ;;  %3711 = vpow2.f32 %v3114_v7  ;;  %v4737_v10 = vadd.f32 %v1887_v9, %v4644_v8  ;;  %v868_v20 = vpop.f32.mrb[22].mxu0  ;;  %v4742_v0 = vadd.f32 %v864_v11, %v4599_v5  ;;  %v3635_v7 = vld [vmem:[#allocation11 + $0x40] sm:$0xff]  }
 0x212   : > { %v3698_v46 = vpop.eup %3697  ;;  %3713 = vrcp.f32 %v1574_v58  ;;  %v1576_v24 = vadd.f32 1.0, %v3696_v17  ;;  %v870_v27 = vpop.f32.mrb[23].mxu0  ;;  %v4747_v56 = vmul.f32 0.5, %v4657_v23  ;;  %v1888_v15 = vmul.f32 %v3166_v19, %v1226_v29  ;;  %v3636_v9 = vld [vmem:[#allocation11] sm:$0xff]   ;;  %3281 = vmatprep.subr.bf16.mxu1 %v3635_v7 }
 0x213   : > { %v2011_v8 = vpack.c.bf16 %v1949_v25, %v4694_v16  ;;  %v1232_v37 = vadd.f32 %v4661_v26, %v4619_v44  ;;  %3715 = vrcp.f32 %v1575_v63  ;;  %v1577_v61 = vadd.f32 1.0, %v3698_v46  ;;  %v4755_v54 = vpop.f32.mrb[19].mxu1  ;;  %3282 = vmatpush3.bf16.msra.mxu1 %v3636_v9 }
 0x214   : > { %v3700_v47 = vpop.eup %3699  ;;  %v1889_v62 = vmul.f32 %v3167_v51, %v1228_v57  ;;  %v3116_v53 = vmul.f32 -1.442695, %v4742_v0  ;;  %3717 = vrcp.f32 %v1576_v24  ;;  %v4758_v23 = vadd.f32 %v1888_v15, %v4648_v13  ;;  %v4783_v24 = vpop.f32.mrb[20].mxu1 }
 0x215   : > { %v3702_v50 = vpop.eup %3701  ;;  %2278 = vmatprep.mubr.bf16.mxu0 %v2011_v8  ;;  %v4761_v16 = vadd.f32 %v866_v3, %v4602_v6  ;;  %v3168_v26 = vadd.f32 -0.5, %v3700_v47  ;;  %3719 = vpow2.f32 %v3115_v40  ;;  %v4765_v25 = vadd.f32 %v868_v20, %v4599_v5 }
 0x216   : > { %v1953_v29 = vadd.f32 %v1889_v62, %v4651_v18  ;;  %2279 = vmatmul.mubr.bf16.vlgmr.msra.gmra.mrb[64].mxu0 %v2010_v60  ;;  %v1234_v57 = vadd.f32 %v4666_v31, %v4623_v49  ;;  %v3704_v11 = vpop.eup %3703  ;;  %v4770_v13 = vmul.f32 0.5, %v4672_v36  ;;  %3721 = vpow2.f32 %v3116_v53 }
 0x217   : > { %v3117_v12 = vmul.f32 -1.442695, %v4761_v16  ;;  %v1890_v58 = vmul.f32 %v3168_v26, %v1232_v37  ;;  %v874_v40 = vpop.f32.mrb[24].mxu0  ;;  %v3706_v3 = vpop.eup %3705  ;;  %3723 = vrcp.f32 %v1577_v61  ;;  %v3118_v18 = vmul.f32 -1.442695, %v4765_v25 }
 0x218   : > { %v3169_v60 = vadd.f32 -0.5, %v3702_v50  ;;  %v4775_v17 = vadd.f32 %v870_v27, %v4602_v6  ;;  %v876_v31 = vpop.f32.mrb[25].mxu0  ;;  %v3708_v63 = vpop.eup %3707  ;;  %v4778_v19 = vmul.f32 0.5, %v4677_v39  ;;  %v1578_v36 = vadd.f32 1.0, %v3706_v3 }
 0x219   : > { %3725 = vpow2.f32 %v3117_v12  ;;  %v4781_v20 = vadd.f32 %v1890_v58, %v4663_v28  ;;  %v878_v46 = vpop.f32.mrb[26].mxu0  ;;  %v3710_v51 = vpop.eup %3709  ;;  %v4786_v15 = vmul.f32 0.5, %v4691_v55  ;;  %v4792_v28 = vmul.f32 0.5, %v4713_v42 }
 0x21a   : > { %3727 = vpow2.f32 %v3118_v18  ;;  %v1891_v27 = vmul.f32 %v3169_v60, %v1234_v57  ;;  %v3119_v8 = vmul.f32 -1.442695, %v4775_v17  ;;  %v880_v37 = vpop.f32.mrb[27].mxu0  ;;  %v4789_v39 = vpop.f32.mrb[21].mxu1  ;;  %v1236_v61 = vadd.f32 %v4674_v33, %v4619_v44 }
 0x21b   : > { %v3712_v47 = vpop.eup %3711  ;;  %3729 = vrcp.f32 %v1578_v36  ;;  %v3170_v62 = vadd.f32 -0.5, %v3704_v11  ;;  %v4796_v53 = vpop.f32.mrb[22].mxu1  ;;  %v1579_v50 = vadd.f32 1.0, %v3710_v51  ;;  %v1238_v57 = vadd.f32 %v4680_v41, %v4623_v49 }
 0x21c   : > { %v3714_v55 = vpop.eup %3713  ;;  %v4799_v26 = vadd.f32 %v1891_v27, %v4668_v34  ;;  %v3171_v7 = vadd.f32 -0.5, %v3708_v63  ;;  %v4803_v9 = vpop.f32.mrb[23].mxu1  ;;  %v1580_v12 = vadd.f32 1.0, %v3712_v47  ;;  %v4806_v58 = vadd.f32 %v874_v40, %v4599_v5 }
 0x21d   : > { %v1892_v42 = vmul.f32 %v3170_v62, %v1236_v61  ;;  %v2013_v33 = vpack.c.bf16 %v1953_v29, %v4737_v10  ;;  %v3716_v11 = vpop.eup %3715  ;;  %3731 = vpow2.f32 %v3119_v8  ;;  %v4810_v18 = vadd.f32 %v876_v31, %v4602_v6  ;;  %v4832_v62 = vpop.f32.mrb[24].mxu1 }
 0x21e   : > { %v1893_v3 = vmul.f32 %v3171_v7, %v1238_v57  ;;  %v1242_v34 = vadd.f32 %v4696_v21, %v4619_v44  ;;  %v3718_v41 = vpop.eup %3717  ;;  %v4815_v60 = vmul.f32 0.5, %v4716_v43  ;;  %v3120_v40 = vmul.f32 -1.442695, %v4806_v58  ;;  %v4841_v57 = vpop.f32.mrb[25].mxu1 }
 0x21f   : > { %v4818_v63 = vadd.f32 %v1892_v42, %v4684_v48  ;;  %2288 = vmatprep.mubr.bf16.mxu0 %v2013_v33  ;;  %v3172_v10 = vadd.f32 -0.5, %v3714_v55  ;;  %v884_v29 = vpop.f32.mrb[28].mxu0  ;;  %v3720_v36 = vpop.eup %3719  ;;  %3733 = vrcp.f32 %v1579_v50  ;;  %v3121_v51 = vmul.f32 -1.442695, %v4810_v18 }
 0x220   : > { %v4822_v31 = vadd.f32 %v1893_v3, %v4710_v38  ;;  %v2012_v21 = vpack.c.bf16 %v4758_v23, %v4733_v14  ;;  %v886_v43 = vpop.f32.mrb[29].mxu0  ;;  %v3722_v27 = vpop.eup %3721  ;;  %v1581_v8 = vadd.f32 1.0, %v3720_v36  ;;  %3735 = vpow2.f32 %v3120_v40 }
 0x221   : > { %v1894_v48 = vmul.f32 %v3172_v10, %v1242_v34  ;;  %v4828_v47 = vadd.f32 %v878_v46, %v4599_v5  ;;  %v4830_v61 = vpop.f32.mrb[30].mxu0  ;;  %v3724_v55 = vpop.eup %3723  ;;  %3737 = vrcp.f32 %v1580_v12  ;;  %v4835_v38 = vmul.f32 0.5, %v4723_v52 }
 0x222   : > { %2289 = vmatmul.mubr.bf16.gmra.mrb[68].mxu0 %v2012_v21  ;;  %v1244_v14 = vadd.f32 %v4701_v30, %v4623_v49  ;;  %v3173_v23 = vadd.f32 -0.5, %v3716_v11  ;;  %v4839_v50 = vpop.f32.mrb[31].mxu0  ;;  %v1582_v7 = vadd.f32 1.0, %v3722_v27  ;;  %3739 = vpow2.f32 %v3121_v51  ;;  %v4847_v33 = vpop.f32.mrb[26].mxu1  ;;  %v3637_v51 = vld [vmem:[#allocation11 + $0x48] sm:$0xff]  }
 0x223   : > { %v3726_v46 = vpop.eup %3725  ;;  %v4844_v42 = vadd.f32 %v1894_v48, %v4729_v1  ;;  %v3122_v12 = vmul.f32 -1.442695, %v4828_v47  ;;  %3741 = vrcp.f32 %v1581_v8  ;;  %v4850_v3 = vmul.f32 0.5, %v4742_v0  ;;  %v4855_v34 = vpop.f32.mrb[27].mxu1  ;;  %v3638_v21 = vld [vmem:[#allocation11 + $0x8] sm:$0xff]   ;;  %3283 = vmatprep.subr.bf16.mxu1 %v3637_v51 }
 0x224   : > { %v3728_v52 = vpop.eup %3727  ;;  %v1895_v30 = vmul.f32 %v3173_v23, %v1244_v14  ;;  %v4853_v11 = vadd.f32 %v880_v37, %v4602_v6  ;;  %v1583_v10 = vadd.f32 1.0, %v3726_v46  ;;  %v1246_v1 = vadd.f32 %v4707_v35, %v4619_v44  ;;  %3284 = vmatpush3.bf16.msra.mxu1 %v3638_v21 }
 0x225   : > { %v3730_v40 = vpop.eup %3729  ;;  %3743 = vpow2.f32 %v3122_v12  ;;  %v3174_v36 = vadd.f32 -0.5, %v3718_v41  ;;  %v4860_v27 = vmul.f32 0.5, %v4761_v16  ;;  %v1584_v0 = vadd.f32 1.0, %v3728_v52 }
 0x226   : > { %v4863_v8 = vadd.f32 %v1895_v30, %v4747_v56  ;;  %v3123_v37 = vmul.f32 -1.442695, %v4853_v11  ;;  %3745 = vrcp.f32 %v1582_v7  ;;  %v4867_v48 = vmul.f32 0.5, %v4765_v25 }
 0x227   : > { %v1896_v14 = vmul.f32 %v3174_v36, %v1246_v1  ;;  %v1248_v35 = vadd.f32 %v4718_v45, %v4623_v49  ;;  %v4871_v41 = vpop.f32.mrb[32].mxu0  ;;  %v3732_v23 = vpop.eup %3731  ;;  %v3175_v16 = vadd.f32 -0.5, %v3724_v55  ;;  %v4874_v46 = vadd.f32 %v884_v29, %v4599_v5 }
 0x228   : > { %3747 = vpow2.f32 %v3123_v37  ;;  %v2015_v56 = vpack.c.bf16 %v4822_v31, %v4799_v26  ;;  %v4878_v7 = vpop.f32.mrb[33].mxu0  ;;  %v4884_v45 = vadd.f32 %v886_v43, %v4602_v6  ;;  %v1252_v12 = vadd.f32 %v4739_v22, %v4619_v44  ;;  %v4890_v29 = vpop.f32.mrb[28].mxu1  ;;  %v3640_v37 = vld [vmem:[#allocation11 + $0x10] sm:$0xff]  }
 0x229   : > { %3749 = vrcp.f32 %v1583_v10  ;;  %v4881_v25 = vadd.f32 %v1896_v14, %v4770_v13  ;;  %v4888_v55 = vpop.f32.mrb[34].mxu0  ;;  %v3734_v52 = vpop.eup %3733  ;;  %v1897_v26 = vmul.f32 %v3175_v16, %v1248_v35  ;;  %v3124_v31 = vmul.f32 -1.442695, %v4874_v46 }
 0x22a   : > { %3751 = vrcp.f32 %v1584_v0  ;;  %2298 = vmatprep.mubr.bf16.mxu0 %v2015_v56  ;;  %v3176_v30 = vadd.f32 -0.5, %v3730_v40  ;;  %v4893_v10 = vpop.f32.mrb[35].mxu0  ;;  %v4895_v13 = vpop.f32.mrb[29].mxu1  ;;  %v1585_v1 = vadd.f32 1.0, %v3732_v23  ;;  %v3125_v36 = vmul.f32 -1.442695, %v4884_v45 }
 0x22b   : > { %v3736_v43 = vpop.eup %3735  ;;  %v2014_v22 = vpack.c.bf16 %v4818_v63, %v4781_v20  ;;  %v4902_v51 = vadd.f32 %v4830_v61, %v4599_v5  ;;  %v4904_v21 = vpop.f32.mrb[30].mxu1  ;;  %v3639_v0 = vld [vmem:[#allocation11 + $0x50] sm:$0xff]   ;;  %v4907_v14 = vmul.f32 0.5, %v4775_v17  ;;  %v1961_v35 = vadd.f32 %v1897_v26, %v4778_v19  ;;  %v3641_v56 = vld [vmem:[#allocation11 + $0x58] sm:$0xff]  }
 0x22c   : > { %v3738_v40 = vpop.eup %3737  ;;  %3753 = vpow2.f32 %v3124_v31  ;;  %v1898_v23 = vmul.f32 %v3176_v30, %v1252_v12  ;;  %v4910_v16 = vpop.f32.mrb[31].mxu1  ;;  %v4913_v63 = vmul.f32 0.5, %v4806_v58  ;;  %v4916_v61 = vmul.f32 0.5, %v4810_v18  ;;  %3285 = vmatprep.subr.bf16.mxu1 %v3639_v0  ;;  %v3642_v58 = vld [vmem:[#allocation11 + $0x18] sm:$0xff]  }
 0x22d   : > { %5760 = vst [vmem:[#allocation24_spill] sm:$0xff] %v4910_v16  ;;  %v3740_v20 = vpop.eup %3739  ;;  %3755 = vpow2.f32 %v3125_v36  ;;  %2299 = vmatmul.mubr.bf16.gmra.mrb[72].mxu0 %v2014_v22  ;;  %v3126_v4 = vmul.f32 -1.442695, %v4902_v51  ;;  %v1586_v2 = vadd.f32 1.0, %v3736_v43  ;;  %v1254_v12 = vadd.f32 %v4744_v32, %v4623_v49  ;;  %3286 = vmatpush3.bf16.msra.mxu1 %v3640_v37 }
 0x22e   : > { %v3742_v17 = vpop.eup %3741  ;;  %v4920_v19 = vadd.f32 %v1898_v23, %v4786_v15  ;;  %v3177_v26 = vadd.f32 -0.5, %v3734_v52  ;;  %3757 = vrcp.f32 %v1585_v1  ;;  %v4926_v18 = vadd.f32 %v4839_v50, %v4602_v6  ;;  %3287 = vmatprep.subr.bf16.mxu1 %v3641_v56  ;;  %v3643_v15 = vld [vmem:[#allocation11 + $0x60] sm:$0xff]  }
 0x22f   : > { %v3744_v31 = vpop.eup %3743  ;;  %v1256_v30 = vadd.f32 %v4752_v59, %v4619_v44  ;;  %v3178_v36 = vadd.f32 -0.5, %v3738_v40  ;;  %v4930_v43 = vpop.f32.mrb[36].mxu0  ;;  %v1587_v22 = vadd.f32 1.0, %v3740_v20  ;;  %3759 = vpow2.f32 %v3126_v4 }
 0x230   : > { %v1588_v0 = vadd.f32 1.0, %v3744_v31  ;;  %v1899_v32 = vmul.f32 %v3177_v26, %v1254_v12  ;;  %v4932_v52 = vpop.f32.mrb[37].mxu0  ;;  %v3746_v37 = vpop.eup %3745  ;;  %v3127_v1 = vmul.f32 -1.442695, %v4926_v18  ;;  %v1258_v50 = vadd.f32 %v4755_v54, %v4623_v49  ;;  %v3644_v54 = vld [vmem:[#allocation11 + $0x20] sm:$0xff]  }
 0x231   : > { %v1900_v23 = vmul.f32 %v3178_v36, %v1256_v30  ;;  %v3179_v16 = vadd.f32 -0.5, %v3742_v17  ;;  %v4937_v59 = vpop.f32.mrb[38].mxu0  ;;  %v4939_v40 = vpop.f32.mrb[32].mxu1  ;;  %3761 = vrcp.f32 %v1586_v2  ;;  %v4946_v4 = vadd.f32 %v4871_v41, %v4599_v5  ;;  %3288 = vmatpush3.bf16.msra.mxu1 %v3642_v58  ;;  %v3645_v41 = vld [vmem:[#allocation11 + $0x68] sm:$0xff]  }
 0x232   : > { %v3748_v56 = vpop.eup %3747  ;;  %v4942_v20 = vadd.f32 %v1899_v32, %v4792_v28  ;;  %v2017_v12 = vpack.c.bf16 %v1961_v35, %v4863_v8  ;;  %v4949_v26 = vpop.f32.mrb[39].mxu0  ;;  %3763 = vpow2.f32 %v3127_v1  ;;  %3289 = vmatprep.subr.bf16.mxu1 %v3643_v15  ;;  %v4961_v35 = vadd.f32 %v4878_v7, %v4602_v6 }
 0x233   : > { %v4951_v31 = vpop.f32.mrb[33].mxu1  ;;  %v3750_v17 = vpop.eup %3749  ;;  %v1589_v30 = vadd.f32 1.0, %v3748_v56  ;;  %v4954_v2 = vadd.f32 %v1900_v23, %v4815_v60  ;;  %v1901_v28 = vmul.f32 %v3179_v16, %v1258_v50  ;;  %3765 = vrcp.f32 %v1587_v22 }
 0x234   : > { %v4956_v36 = vpop.f32.mrb[34].mxu1  ;;  %v3752_v32 = vpop.eup %3751  ;;  %v3128_v8 = vmul.f32 -1.442695, %v4946_v4  ;;  %2308 = vmatprep.mubr.bf16.mxu0 %v2017_v12  ;;  %v1262_v58 = vadd.f32 %v4783_v24, %v4619_v44  ;;  %3767 = vrcp.f32 %v1588_v0  ;;  %v3180_v16 = vadd.f32 -0.5, %v3746_v37  ;;  %v3646_v0 = vld [vmem:[#allocation11 + $0x28] sm:$0xff]  }
 0x235   : > { %v4965_v1 = vpop.f32.mrb[35].mxu1  ;;  %v4968_v60 = vadd.f32 %v1901_v28, %v4835_v38  ;;  %v2016_v15 = vpack.c.bf16 %v4881_v25, %v4844_v42  ;;  %v4973_v23 = vmul.f32 0.5, %v4828_v47  ;;  %3769 = vrcp.f32 %v1589_v30  ;;  %3290 = vmatpush3.bf16.msra.mxu1 %v3644_v54  ;;  %v3647_v47 = vld [vmem:[#allocation11 + $0x70] sm:$0xff]  }
 0x236   : > { %5761 = vst [vmem:[#allocation25_spill] sm:$0xff] %v4965_v1  ;;  %v3754_v22 = vpop.eup %3753  ;;  %v3129_v7 = vmul.f32 -1.442695, %v4961_v35  ;;  %v4978_v24 = vadd.f32 %v4888_v55, %v4599_v5  ;;  %3771 = vpow2.f32 %v3128_v8  ;;  %v1902_v38 = vmul.f32 %v3180_v16, %v1262_v58  ;;  %3291 = vmatprep.subr.bf16.mxu1 %v3645_v41  ;;  %v5002_v8 = vpop.f32.mrb[36].mxu1 }
 0x237   : > { %v3756_v50 = vpop.eup %3755  ;;  %2309 = vmatmul.mubr.bf16.gmra.mrb[76].mxu0 %v2016_v15  ;;  %v1264_v42 = vadd.f32 %v4789_v39, %v4623_v49  ;;  %v3181_v25 = vadd.f32 -0.5, %v3750_v17  ;;  %v4982_v37 = vpop.f32.mrb[40].mxu0  ;;  %v4985_v56 = vmul.f32 0.5, %v4853_v11  ;;  %v4988_v55 = vmul.f32 0.5, %v4874_v46  ;;  %5762 = vst [vmem:[#allocation26_spill] sm:$0xff] %v5002_v8 }
 0x238   : > { %3773 = vpow2.f32 %v3129_v7  ;;  %v3130_v12 = vmul.f32 -1.442695, %v4978_v24  ;;  %v4991_v54 = vpop.f32.mrb[41].mxu0  ;;  %v3758_v30 = vpop.eup %3757  ;;  %v1590_v28 = vadd.f32 1.0, %v3754_v22  ;;  %v4994_v39 = vadd.f32 %v1902_v38, %v4850_v3 }
 0x239   : > { %v1903_v17 = vmul.f32 %v3181_v25, %v1264_v42  ;;  %v4998_v41 = vadd.f32 %v4893_v10, %v4602_v6  ;;  %v5000_v11 = vpop.f32.mrb[42].mxu0  ;;  %v3760_v46 = vpop.eup %3759  ;;  %v1591_v58 = vadd.f32 1.0, %v3756_v50  ;;  %v5005_v16 = vmul.f32 0.5, %v4884_v45  ;;  %3292 = vmatpush3.bf16.msra.mxu1 %v3646_v0  ;;  %v3648_v10 = vld [vmem:[#allocation11 + $0x30] sm:$0xff]  }
 0x23a   : > { %v1266_v15 = vadd.f32 %v4796_v53, %v4619_v44  ;;  %v3182_v22 = vadd.f32 -0.5, %v3752_v32  ;;  %v5009_v3 = vpop.f32.mrb[43].mxu0  ;;  %v5011_v7 = vpop.f32.mrb[37].mxu1  ;;  %3775 = vpow2.f32 %v3130_v12  ;;  %v1268_v45 = vadd.f32 %v4803_v9, %v4623_v49  ;;  %3293 = vmatprep.subr.bf16.mxu1 %v3647_v47  ;;  %v3649_v53 = vld [vmem:[#allocation11 + $0x78] sm:$0xff]  }
 0x23b   : > { %v5014_v38 = vadd.f32 %v1903_v17, %v4860_v27  ;;  %v3131_v42 = vmul.f32 -1.442695, %v4998_v41  ;;  %v5019_v50 = vpop.f32.mrb[38].mxu1  ;;  %v3762_v32 = vpop.eup %3761  ;;  %v1592_v25 = vadd.f32 1.0, %v3760_v46  ;;  %v3183_v1 = vadd.f32 -0.5, %v3758_v30 }
 0x23c   : > { %v1904_v8 = vmul.f32 %v3182_v22, %v1266_v15  ;;  %v5023_v0 = vadd.f32 %v4930_v43, %v4599_v5  ;;  %v5025_v12 = vpop.f32.mrb[39].mxu1  ;;  %v3764_v27 = vpop.eup %3763  ;;  %3777 = vrcp.f32 %v1590_v28  ;;  %v5028_v17 = vmul.f32 0.5, %v4902_v51  ;;  %v3650_v28 = vld [vmem:[#allocation11 + $0x38] sm:$0xff]  }
 0x23d   : > { %v2019_v9 = vpack.c.bf16 %v4968_v60, %v4942_v20  ;;  %v5034_v47 = vadd.f32 %v4932_v52, %v4602_v6  ;;  %v3766_v46 = vpop.eup %3765  ;;  %3779 = vpow2.f32 %v3131_v42  ;;  %v1905_v43 = vmul.f32 %v3183_v1, %v1268_v45  ;;  %3294 = vmatpush3.bf16.msra.mxu1 %v3648_v10 }
 0x23e   : > { %v5037_v30 = vadd.f32 %v1904_v8, %v4867_v48  ;;  %v1272_v15 = vadd.f32 %v4832_v62, %v4619_v44  ;;  %v3768_v51 = vpop.eup %3767  ;;  %3781 = vrcp.f32 %v1591_v58  ;;  %v1593_v22 = vadd.f32 1.0, %v3764_v27  ;;  %3295 = vmatprep.subr.bf16.mxu1 %v3649_v53 }
 0x23f   : > { %v3132_v20 = vmul.f32 -1.442695, %v5023_v0  ;;  %2318 = vmatprep.mubr.bf16.mxu0 %v2019_v9  ;;  %v3133_v52 = vmul.f32 -1.442695, %v5034_v47  ;;  %v3770_v60 = vpop.eup %3769  ;;  %3783 = vrcp.f32 %v1592_v25  ;;  %v1969_v48 = vadd.f32 %v1905_v43, %v4907_v14  ;;  %v5046_v62 = vpop.f32.mrb[44].mxu0 }
 0x240   : > { %v3184_v8 = vadd.f32 -0.5, %v3762_v32  ;;  %v2018_v1 = vpack.c.bf16 %v4954_v2, %v4920_v19  ;;  %v3772_v10 = vpop.eup %3771  ;;  %v5049_v58 = vmul.f32 0.5, %v4926_v18  ;;  %v5053_v42 = vadd.f32 %v4937_v59, %v4599_v5  ;;  %v5057_v53 = vpop.f32.mrb[45].mxu0 }
 0x241   : > { %3785 = vpow2.f32 %v3132_v20  ;;  %v1274_v45 = vadd.f32 %v4841_v57, %v4623_v49  ;;  %v5059_v14 = vpop.f32.mrb[40].mxu1  ;;  %v3185_v2 = vadd.f32 -0.5, %v3766_v46  ;;  %v5063_v18 = vadd.f32 %v4949_v26, %v4602_v6  ;;  %v5065_v25 = vpop.f32.mrb[46].mxu0  ;;  %3296 = vmatpush3.bf16.msra.mxu1 %v3650_v28 }
 0x242   : > { %v3774_v32 = vpop.eup %3773  ;;  %3787 = vpow2.f32 %v3133_v52  ;;  %v1906_v19 = vmul.f32 %v3184_v8, %v1272_v15  ;;  %2319 = vmatmul.mubr.bf16.gmra.mrb[80].mxu0 %v2018_v1  ;;  %v5067_v59 = vpop.f32.mrb[41].mxu1  ;;  %v5070_v57 = vmul.f32 0.5, %v4946_v4  ;;  %v5073_v27 = vmul.f32 0.5, %v4961_v35 }
 0x243   : > { %5763 = vst [vmem:[#allocation27_spill] sm:$0xff] %v5067_v59  ;;  %3789 = vrcp.f32 %v1593_v22  ;;  %v3134_v9 = vmul.f32 -1.442695, %v5053_v42  ;;  %v5076_v43 = vpop.f32.mrb[47].mxu0  ;;  %v5078_v46 = vpop.f32.mrb[42].mxu1  ;;  %v1594_v26 = vadd.f32 1.0, %v3772_v10  ;;  %v1907_v20 = vmul.f32 %v3185_v2, %v1274_v45 }
 0x244   : > { %v5081_v15 = vadd.f32 %v1906_v19, %v4913_v63  ;;  %v3135_v28 = vmul.f32 -1.442695, %v5063_v18  ;;  %v5084_v22 = vpop.f32.mrb[43].mxu1  ;;  %v3776_v4 = vpop.eup %3775  ;;  %v1595_v52 = vadd.f32 1.0, %v3774_v32  ;;  %v1276_v35 = vadd.f32 %v4847_v33, %v4619_v44 }
 0x245   : > { %v3186_v8 = vadd.f32 -0.5, %v3768_v51  ;;  %v1278_v1 = vadd.f32 %v4855_v34, %v4623_v49  ;;  %v1596_v59 = vadd.f32 1.0, %v3776_v4  ;;  %3791 = vpow2.f32 %v3134_v9 }
 0x246   : > { %v5091_v10 = vadd.f32 %v1907_v20, %v4916_v61  ;;  %v3187_v63 = vadd.f32 -0.5, %v3770_v60  ;;  %v3778_v45 = vpop.eup %3777  ;;  %3793 = vpow2.f32 %v3135_v28  ;;  %v5095_v2 = vadd.f32 %v4982_v37, %v4599_v5 }
 0x247   : > { %v1908_v19 = vmul.f32 %v3186_v8, %v1276_v35  ;;  %v2021_v32 = vpack.c.bf16 %v1969_v48, %v5014_v38  ;;  %v5098_v33 = vpop.f32.mrb[48].mxu0  ;;  %v3780_v51 = vpop.eup %3779  ;;  %3795 = vrcp.f32 %v1594_v26  ;;  %v5102_v9 = vadd.f32 %v4991_v54, %v4602_v6 }
 0x248   : > { %v1909_v34 = vmul.f32 %v3187_v63, %v1278_v1  ;;  %v1282_v61 = vadd.f32 %v4890_v29, %v4619_v44  ;;  %v5106_v60 = vpop.f32.mrb[49].mxu0  ;;  %v3782_v20 = vpop.eup %3781  ;;  %3797 = vrcp.f32 %v1595_v52  ;;  %v5109_v37 = vmul.f32 0.5, %v4978_v24 }
 0x249   : > { %v5112_v38 = vadd.f32 %v1908_v19, %v4973_v23  ;;  %v3136_v48 = vmul.f32 -1.442695, %v5095_v2  ;;  %2328 = vmatprep.mubr.bf16.mxu0 %v2021_v32  ;;  %v5115_v26 = vpop.f32.mrb[50].mxu0  ;;  %v5117_v54 = vpop.f32.mrb[44].mxu1  ;;  %v1597_v4 = vadd.f32 1.0, %v3780_v51  ;;  %v3188_v52 = vadd.f32 -0.5, %v3778_v45 }
 0x24a   : > { %5764 = vst [vmem:[#allocation28_spill] sm:$0xff] %v5117_v54  ;;  %v3784_v28 = vpop.eup %3783  ;;  %v1973_v29 = vadd.f32 %v1909_v34, %v4985_v56  ;;  %v3137_v35 = vmul.f32 -1.442695, %v5102_v9  ;;  %v5121_v8 = vpop.f32.mrb[51].mxu0  ;;  %3799 = vrcp.f32 %v1596_v59  ;;  %v2020_v1 = vpack.c.bf16 %v5037_v30, %v4994_v39 }
 0x24b   : > { %v5123_v24 = vpop.f32.mrb[45].mxu1  ;;  %v3786_v23 = vpop.eup %3785  ;;  %v5129_v63 = vadd.f32 %v5000_v11, %v4599_v5  ;;  %v1284_v19 = vadd.f32 %v4895_v13, %v4623_v49  ;;  %3801 = vpow2.f32 %v3136_v48  ;;  %v1910_v51 = vmul.f32 %v3188_v52, %v1282_v61 }
 0x24c   : > { %5765 = vst [vmem:[#allocation29_spill] sm:$0xff] %v5123_v24  ;;  %v5133_v56 = vpop.f32.mrb[46].mxu1  ;;  %v3788_v32 = vpop.eup %3787  ;;  %v1598_v45 = vadd.f32 1.0, %v3786_v23  ;;  %v3189_v34 = vadd.f32 -0.5, %v3782_v20  ;;  %v5138_v54 = vmul.f32 0.5, %v4998_v41  ;;  %v5141_v39 = vmul.f32 0.5, %v5023_v0  ;;  %2329 = vmatmul.mubr.bf16.gmra.mrb[84].mxu0 %v2020_v1 }
 0x24d   : > { %v5135_v24 = vpop.f32.mrb[47].mxu1  ;;  %v3790_v59 = vpop.eup %3789  ;;  %3803 = vpow2.f32 %v3137_v35  ;;  %v3138_v13 = vmul.f32 -1.442695, %v5129_v63  ;;  %v5145_v11 = vadd.f32 %v1910_v51, %v4988_v55  ;;  %v5149_v61 = vadd.f32 %v5009_v3, %v4602_v6  ;;  %v5766_v3 = vld [vmem:[#allocation24_spill] sm:$0xff] }
 0x24e   : > { %3805 = vrcp.f32 %v1597_v4  ;;  %v1911_v30 = vmul.f32 %v3189_v34, %v1284_v19  ;;  %v1599_v20 = vadd.f32 1.0, %v3788_v32  ;;  %v5152_v41 = vmul.f32 0.5, %v5034_v47 }
 0x24f   : > { %v1286_v0 = vadd.f32 %v4904_v21, %v4619_v44  ;;  %v3190_v48 = vadd.f32 -0.5, %v3784_v28  ;;  %v5156_v35 = vpop.f32.mrb[52].mxu0  ;;  %v3792_v52 = vpop.eup %3791  ;;  %3807 = vrcp.f32 %v1598_v45  ;;  %v3139_v4 = vmul.f32 -1.442695, %v5149_v61 }
 0x250   : > { %v5159_v55 = vadd.f32 %v1911_v30, %v5005_v16  ;;  %v1288_v23 = vadd.f32 %v5766_v3, %v4623_v49  ;;  %v5164_v1 = vpop.f32.mrb[53].mxu0  ;;  %v3794_v47 = vpop.eup %3793  ;;  %3809 = vpow2.f32 %v3138_v13  ;;  %v3191_v32 = vadd.f32 -0.5, %v3790_v59 }
 0x251   : > { %v1912_v19 = vmul.f32 %v3190_v48, %v1286_v0  ;;  %v5168_v21 = vadd.f32 %v5046_v62, %v4599_v5  ;;  %v5170_v28 = vpop.f32.mrb[54].mxu0  ;;  %v5172_v45 = vpop.f32.mrb[48].mxu1  ;;  %v5175_v51 = vmul.f32 0.5, %v5053_v42  ;;  %3811 = vpow2.f32 %v3139_v4 }
 0x252   : > { %5767 = vst [vmem:[#allocation24_spill] sm:$0xff] %v5172_v45  ;;  %v3796_v16 = vpop.eup %3795  ;;  %v2023_v34 = vpack.c.bf16 %v1973_v29, %v5091_v10  ;;  %v5180_v13 = vadd.f32 %v5057_v53, %v4602_v6  ;;  %v5182_v59 = vpop.f32.mrb[55].mxu0  ;;  %v1600_v0 = vadd.f32 1.0, %v3792_v52  ;;  %v1913_v3 = vmul.f32 %v3191_v32, %v1288_v23 }
 0x253   : > { %v5184_v30 = vpop.f32.mrb[49].mxu1  ;;  %v3798_v62 = vpop.eup %3797  ;;  %v5187_v48 = vadd.f32 %v1912_v19, %v5028_v17  ;;  %v3140_v42 = vmul.f32 -1.442695, %v5168_v21  ;;  %3813 = vrcp.f32 %v1599_v20  ;;  %v1601_v10 = vadd.f32 1.0, %v3794_v47 }
 0x254   : > { %5768 = vst [vmem:[#allocation30_spill] sm:$0xff] %v5184_v30  ;;  %v5190_v45 = vpop.f32.mrb[50].mxu1  ;;  %v5193_v29 = vmul.f32 0.5, %v5063_v18  ;;  %2338 = vmatprep.mubr.bf16.mxu0 %v2023_v34  ;;  %v3141_v53 = vmul.f32 -1.442695, %v5180_v13  ;;  %v3800_v30 = vpop.eup %3799  ;;  %v1977_v52 = vadd.f32 %v1913_v3, %v5049_v58  ;;  %v1292_v17 = vadd.f32 %v4939_v40, %v4619_v44 }
 0x255   : > { %5769 = vst [vmem:[#allocation31_spill] sm:$0xff] %v5190_v45  ;;  %v5196_v4 = vpop.f32.mrb[51].mxu1  ;;  %3815 = vpow2.f32 %v3140_v42  ;;  %v3192_v23 = vadd.f32 -0.5, %v3796_v16  ;;  %v3802_v19 = vpop.eup %3801  ;;  %v2022_v20 = vpack.c.bf16 %v5112_v38, %v5081_v15  ;;  %v5205_v18 = vadd.f32 %v5065_v25, %v4599_v5 }
 0x256   : > { %5770 = vst [vmem:[#allocation32_spill] sm:$0xff] %v5196_v4  ;;  %3817 = vpow2.f32 %v3141_v53  ;;  %v1294_v47 = vadd.f32 %v4951_v31, %v4623_v49  ;;  %v3193_v34 = vadd.f32 -0.5, %v3798_v62  ;;  %v5211_v40 = vadd.f32 %v5076_v43, %v4602_v6 }
 0x257   : > { %v3804_v32 = vpop.eup %3803  ;;  %3819 = vrcp.f32 %v1600_v0  ;;  %v1914_v58 = vmul.f32 %v3192_v23, %v1292_v17  ;;  %v5213_v16 = vpop.f32.mrb[56].mxu0  ;;  %v5216_v15 = vmul.f32 0.5, %v5095_v2  ;;  %v5219_v25 = vmul.f32 0.5, %v5102_v9  ;;  %2339 = vmatmul.mubr.bf16.gmra.mrb[88].mxu0 %v2022_v20 }
 0x258   : > { %v3806_v3 = vpop.eup %3805  ;;  %3821 = vrcp.f32 %v1601_v10  ;;  %v3142_v31 = vmul.f32 -1.442695, %v5205_v18  ;;  %v5222_v38 = vpop.f32.mrb[57].mxu0  ;;  %v1602_v62 = vadd.f32 1.0, %v3802_v19  ;;  %v1915_v43 = vmul.f32 %v3193_v34, %v1294_v47  ;;  %v5773_v34 = vld [vmem:[#allocation25_spill] sm:$0xff] }
 0x259   : > { %v5225_v0 = vadd.f32 %v1914_v58, %v5070_v57  ;;  %v3143_v42 = vmul.f32 -1.442695, %v5211_v40  ;;  %v5228_v53 = vpop.f32.mrb[58].mxu0  ;;  %v5230_v10 = vpop.f32.mrb[52].mxu1  ;;  %v1603_v17 = vadd.f32 1.0, %v3804_v32  ;;  %v5233_v9 = vmul.f32 0.5, %v5129_v63 }
 0x25a   : > { %5771 = vst [vmem:[#allocation33_spill] sm:$0xff] %v5230_v10  ;;  %v3808_v2 = vpop.eup %3807  ;;  %v1296_v23 = vadd.f32 %v4956_v36, %v4619_v44  ;;  %v3194_v20 = vadd.f32 -0.5, %v3800_v30  ;;  %v5237_v19 = vpop.f32.mrb[59].mxu0  ;;  %3823 = vpow2.f32 %v3142_v31  ;;  %v5242_v58 = vadd.f32 %v1915_v43, %v5073_v27 }
 0x25b   : > { %v5239_v57 = vpop.f32.mrb[53].mxu1  ;;  %v3810_v47 = vpop.eup %3809  ;;  %v1298_v10 = vadd.f32 %v5773_v34, %v4623_v49  ;;  %v3195_v32 = vadd.f32 -0.5, %v3806_v3  ;;  %3825 = vpow2.f32 %v3143_v42  ;;  %v5250_v36 = vadd.f32 %v5098_v33, %v4599_v5 }
 0x25c   : > { %5772 = vst [vmem:[#allocation34_spill] sm:$0xff] %v5239_v57  ;;  %v5246_v4 = vpop.f32.mrb[54].mxu1  ;;  %v3812_v63 = vpop.eup %3811  ;;  %v1916_v45 = vmul.f32 %v3194_v20, %v1296_v23  ;;  %v2025_v30 = vpack.c.bf16 %v1977_v52, %v5159_v55  ;;  %3827 = vrcp.f32 %v1602_v62  ;;  %v5256_v27 = vmul.f32 0.5, %v5149_v61  ;;  %v5775_v55 = vld [vmem:[#allocation26_spill] sm:$0xff] }
 0x25d   : > { %v5253_v57 = vpop.f32.mrb[55].mxu1  ;;  %v1917_v31 = vmul.f32 %v3195_v32, %v1298_v10  ;;  %v5260_v3 = vadd.f32 %v5106_v60, %v4602_v6  ;;  %v3814_v43 = vpop.eup %3813  ;;  %v1604_v42 = vadd.f32 1.0, %v3810_v47  ;;  %v3144_v33 = vmul.f32 -1.442695, %v5250_v36 }
 0x25e   : > { %5774 = vst [vmem:[#allocation25_spill] sm:$0xff] %v5253_v57  ;;  %v5263_v23 = vadd.f32 %v1916_v45, %v5109_v37  ;;  %2348 = vmatprep.mubr.bf16.mxu0 %v2025_v30  ;;  %v1302_v52 = vadd.f32 %v5775_v55, %v4619_v44  ;;  %3829 = vrcp.f32 %v1603_v17  ;;  %v1605_v61 = vadd.f32 1.0, %v3812_v63 }
 0x25f   : > { %v3816_v62 = vpop.eup %3815  ;;  %v1981_v10 = vadd.f32 %v1917_v31, %v5138_v54  ;;  %v3145_v20 = vmul.f32 -1.442695, %v5260_v3  ;;  %v5270_v60 = vpop.f32.mrb[60].mxu0  ;;  %v5273_v47 = vmul.f32 0.5, %v5168_v21  ;;  %3831 = vpow2.f32 %v3144_v33 }
 0x260   : > { %v3818_v34 = vpop.eup %3817  ;;  %v3196_v37 = vadd.f32 -0.5, %v3808_v2  ;;  %v2024_v45 = vpack.c.bf16 %v5187_v48, %v5145_v11  ;;  %v5277_v32 = vpop.f32.mrb[61].mxu0  ;;  %v5280_v17 = vmul.f32 0.5, %v5180_v13  ;;  %v5284_v54 = vadd.f32 %v5115_v26, %v4599_v5 }
 0x261   : > { %v3820_v30 = vpop.eup %3819  ;;  %3833 = vpow2.f32 %v3145_v20  ;;  %v1304_v21 = vadd.f32 %v5011_v7, %v4623_v49  ;;  %v5288_v63 = vpop.f32.mrb[62].mxu0  ;;  %v3197_v48 = vadd.f32 -0.5, %v3814_v43  ;;  %v5294_v13 = vadd.f32 %v5121_v8, %v4602_v6 }
 0x262   : > { %v5290_v2 = vpop.f32.mrb[56].mxu1  ;;  %v3822_v31 = vpop.eup %3821  ;;  %3835 = vrcp.f32 %v1604_v42  ;;  %v1918_v11 = vmul.f32 %v3196_v37, %v1302_v52  ;;  %2349 = vmatmul.mubr.bf16.gmra.mrb[92].mxu0 %v2024_v45  ;;  %v1606_v55 = vadd.f32 1.0, %v3816_v62  ;;  %v1607_v7 = vadd.f32 1.0, %v3818_v34 }
 0x263   : > { %v5296_v33 = vpop.f32.mrb[63].mxu0  ;;  %v5298_v26 = vpop.f32.mrb[57].mxu1  ;;  %3837 = vrcp.f32 %v1605_v61  ;;  %v3146_v20 = vmul.f32 -1.442695, %v5284_v54  ;;  %v1919_v52 = vmul.f32 %v3197_v48, %v1304_v21  ;;  %v3147_v43 = vmul.f32 -1.442695, %v5294_v13 }
 0x264   : > { %5776 = vst [vmem:[#allocation26_spill] sm:$0xff] %v5298_v26  ;;  %v5301_v57 = vpop.f32.mrb[58].mxu1  ;;  %v5304_v42 = vadd.f32 %v1918_v11, %v5141_v39  ;;  %v1306_v8 = vadd.f32 %v5019_v50, %v4619_v44  ;;  %v3824_v45 = vpop.eup %3823  ;;  %v3198_v61 = vadd.f32 -0.5, %v3820_v30  ;;  %v1308_v62 = vadd.f32 %v5025_v12, %v4623_v49 }
 0x265   : > { %5777 = vst [vmem:[#allocation35_spill] sm:$0xff] %v5301_v57  ;;  %v5309_v37 = vpop.f32.mrb[59].mxu1  ;;  %3839 = vpow2.f32 %v3146_v20  ;;  %v3199_v34 = vadd.f32 -0.5, %v3822_v31  ;;  %v3826_v26 = vpop.eup %3825  ;;  %v1608_v57 = vadd.f32 1.0, %v3824_v45  ;;  %v5314_v39 = vadd.f32 %v1919_v52, %v5152_v41 }
 0x266   : > { %3841 = vpow2.f32 %v3147_v43  ;;  %v5318_v21 = vadd.f32 %v5156_v35, %v4599_v5  ;;  %v3828_v50 = vpop.eup %3827  ;;  %v1920_v11 = vmul.f32 %v3198_v61, %v1306_v8  ;;  %v2027_v30 = vpack.c.bf16 %v1981_v10, %v5242_v58  ;;  %v5332_v58 = vpop.f32.mrb[60].mxu1  ;;  %v5778_v8 = vld [vmem:[#allocation27_spill] sm:$0xff] }
 0x267   : > { %3843 = vrcp.f32 %v1606_v55  ;;  %v1921_v48 = vmul.f32 %v3199_v34, %v1308_v62  ;;  %v1609_v20 = vadd.f32 1.0, %v3826_v26  ;;  %v5324_v31 = vadd.f32 %v5164_v1, %v4602_v6 }
 0x268   : > { %3845 = vrcp.f32 %v1607_v7  ;;  %v3148_v12 = vmul.f32 -1.442695, %v5318_v21  ;;  %v3830_v41 = vpop.eup %3829  ;;  %v5327_v52 = vadd.f32 %v1920_v11, %v5175_v51  ;;  %2358 = vmatprep.mubr.bf16.mxu0 %v2027_v30  ;;  %v1312_v55 = vadd.f32 %v5059_v14, %v4619_v44 }
 0x269   : > { %3847 = vrcp.f32 %v1608_v57  ;;  %v1985_v35 = vadd.f32 %v1921_v48, %v5193_v29  ;;  %v3832_v10 = vpop.eup %3831  ;;  %v5335_v26 = vmul.f32 0.5, %v5205_v18  ;;  %v3149_v1 = vmul.f32 -1.442695, %v5324_v31  ;;  %v5338_v57 = vpop.f32.mrb[61].mxu1 }
 0x26a   : > { %3849 = vpow2.f32 %v3148_v12  ;;  %v3200_v7 = vadd.f32 -0.5, %v3828_v50  ;;  %v1610_v43 = vadd.f32 1.0, %v3832_v10  ;;  %v2026_v29 = vpack.c.bf16 %v5263_v23, %v5225_v0  ;;  %v5348_v18 = vpop.f32.mrb[62].mxu1 }
 0x26b   : > { %v3834_v51 = vpop.eup %3833  ;;  %v5344_v14 = vadd.f32 %v5170_v28, %v4599_v5  ;;  %v1314_v45 = vadd.f32 %v5778_v8, %v4623_v49  ;;  %v5351_v62 = vmul.f32 0.5, %v5211_v40  ;;  %3851 = vpow2.f32 %v3149_v1  ;;  %v5353_v11 = vpop.f32.mrb[63].mxu1 }
 0x26c   : > { %v3836_v61 = vpop.eup %3835  ;;  %v1922_v34 = vmul.f32 %v3200_v7, %v1312_v55  ;;  %v3201_v50 = vadd.f32 -0.5, %v3830_v41  ;;  %3853 = vrcp.f32 %v1609_v20  ;;  %v5356_v0 = vmul.f32 0.5, %v5250_v36  ;;  %2359 = vmatmul.mubr.bf16.gmra.mrb[96].mxu0 %v2026_v29 }
 0x26d   : > { %v3838_v48 = vpop.eup %3837  ;;  %v3150_v28 = vmul.f32 -1.442695, %v5344_v14  ;;  %v5361_v23 = vadd.f32 %v5182_v59, %v4602_v6  ;;  %3855 = vrcp.f32 %v1610_v43  ;;  %v1611_v40 = vadd.f32 1.0, %v3834_v51 }
 0x26e   : > { %v5364_v30 = vadd.f32 %v1922_v34, %v5216_v15  ;;  %v1923_v12 = vmul.f32 %v3201_v50, %v1314_v45  ;;  %v1316_v36 = vadd.f32 %v5078_v46, %v4619_v44  ;;  %v3202_v55 = vadd.f32 -0.5, %v3836_v61 }
 0x26f   : > { %v3840_v41 = vpop.eup %3839  ;;  %3857 = vpow2.f32 %v3150_v28  ;;  %v3151_v20 = vmul.f32 -1.442695, %v5361_v23  ;;  %v1318_v59 = vadd.f32 %v5084_v22, %v4623_v49  ;;  %v3203_v51 = vadd.f32 -0.5, %v3838_v48 }
 0x270   : > { %v3842_v10 = vpop.eup %3841  ;;  %v1612_v1 = vadd.f32 1.0, %v3840_v41  ;;  %v5370_v7 = vadd.f32 %v1923_v12, %v5219_v25  ;;  %v5375_v43 = vmul.f32 0.5, %v5260_v3  ;;  %v1924_v29 = vmul.f32 %v3202_v55, %v1316_v36 }
 0x271   : > { %v3844_v15 = vpop.eup %3843  ;;  %3859 = vpow2.f32 %v3151_v20  ;;  %v5379_v8 = vadd.f32 %v5213_v16, %v4599_v5  ;;  %v5382_v45 = vmul.f32 0.5, %v5284_v54  ;;  %v1925_v25 = vmul.f32 %v3203_v51, %v1318_v59 }
 0x272   : > { %v3846_v46 = vpop.eup %3845  ;;  %v2029_v61 = vpack.c.bf16 %v1985_v35, %v5314_v39  ;;  %v5387_v22 = vadd.f32 %v5222_v38, %v4602_v6  ;;  %3861 = vrcp.f32 %v1611_v40  ;;  %v1613_v3 = vadd.f32 1.0, %v3842_v10  ;;  %v5779_v39 = vld [vmem:[#allocation28_spill] sm:$0xff] }
 0x273   : > { %v3848_v34 = vpop.eup %3847  ;;  %v5390_v50 = vadd.f32 %v1924_v29, %v5233_v9  ;;  %v3152_v16 = vmul.f32 -1.442695, %v5379_v8  ;;  %3863 = vrcp.f32 %v1612_v1  ;;  %v1989_v54 = vadd.f32 %v1925_v25, %v5256_v27  ;;  %v5780_v27 = vld [vmem:[#allocation29_spill] sm:$0xff] }
 0x274   : > { %v3850_v48 = vpop.eup %3849  ;;  %2368 = vmatprep.mubr.bf16.mxu0 %v2029_v61  ;;  %v3153_v28 = vmul.f32 -1.442695, %v5387_v22  ;;  %v1322_v35 = vadd.f32 %v5779_v39, %v4619_v44  ;;  %v3204_v12 = vadd.f32 -0.5, %v3844_v15  ;;  %v2028_v40 = vpack.c.bf16 %v5327_v52, %v5304_v42 }
 0x275   : > { %v1614_v38 = vadd.f32 1.0, %v3850_v48  ;;  %3865 = vpow2.f32 %v3152_v16  ;;  %v3852_v9 = vpop.eup %3851  ;;  %v5401_v41 = vadd.f32 %v5228_v53, %v4599_v5  ;;  %v1324_v20 = vadd.f32 %v5780_v27, %v4623_v49 }
 0x276   : > { %3867 = vpow2.f32 %v3153_v28  ;;  %v3205_v36 = vadd.f32 -0.5, %v3846_v46  ;;  %v3854_v55 = vpop.eup %3853  ;;  %v5406_v10 = vmul.f32 0.5, %v5294_v13  ;;  %v1926_v1 = vmul.f32 %v3204_v12, %v1322_v35  ;;  %2369 = vmatmul.mubr.bf16.gmra.mrb[100].mxu0 %v2028_v40 }
 0x277   : > { %3869 = vrcp.f32 %v1613_v3  ;;  %v5410_v42 = vadd.f32 %v5237_v19, %v4602_v6  ;;  %v3856_v52 = vpop.eup %3855  ;;  %v5413_v59 = vmul.f32 0.5, %v5318_v21  ;;  %v1615_v53 = vadd.f32 1.0, %v3852_v9 }
 0x278   : > { %v3154_v51 = vmul.f32 -1.442695, %v5401_v41  ;;  %v1927_v15 = vmul.f32 %v3205_v36, %v1324_v20  ;;  %3871 = vrcp.f32 %v1614_v38  ;;  %v5417_v46 = vadd.f32 %v1926_v1, %v5273_v47 }
 0x279   : > { %v3858_v29 = vpop.eup %3857  ;;  %v3155_v13 = vmul.f32 -1.442695, %v5410_v42  ;;  %v1326_v25 = vadd.f32 %v5133_v56, %v4619_v44  ;;  %v3206_v21 = vadd.f32 -0.5, %v3848_v34  ;;  %v1328_v16 = vadd.f32 %v5135_v24, %v4623_v49 }
 0x27a   : > { %v1616_v19 = vadd.f32 1.0, %v3858_v29  ;;  %3873 = vpow2.f32 %v3154_v51  ;;  %v5423_v61 = vadd.f32 %v1927_v15, %v5280_v17  ;;  %v3207_v48 = vadd.f32 -0.5, %v3854_v55 }
 0x27b   : > { %v3860_v3 = vpop.eup %3859  ;;  %3875 = vpow2.f32 %v3155_v13  ;;  %v5429_v47 = vadd.f32 %v5270_v60, %v4599_v5  ;;  %v1928_v39 = vmul.f32 %v3206_v21, %v1326_v25  ;;  %v2031_v56 = vpack.c.bf16 %v1989_v54, %v5370_v7  ;;  %v5781_v60 = vld [vmem:[#allocation24_spill] sm:$0xff]  ;;  %v5783_v13 = vld [vmem:[#allocation31_spill] sm:$0xff] }
 0x27c   : > { %3877 = vrcp.f32 %v1615_v53  ;;  %v1617_v28 = vadd.f32 1.0, %v3860_v3  ;;  %v3862_v35 = vpop.eup %3861  ;;  %v1929_v17 = vmul.f32 %v3207_v48, %v1328_v16  ;;  %v5435_v38 = vadd.f32 %v5277_v32, %v4602_v6  ;;  %v5784_v21 = vld [vmem:[#allocation32_spill] sm:$0xff] }
 0x27d   : > { %3879 = vrcp.f32 %v1616_v19  ;;  %v3156_v34 = vmul.f32 -1.442695, %v5429_v47  ;;  %v3864_v24 = vpop.eup %3863  ;;  %v1992_v12 = vadd.f32 %v1928_v39, %v5335_v26  ;;  %2378 = vmatprep.mubr.bf16.mxu0 %v2031_v56  ;;  %v1332_v40 = vadd.f32 %v5781_v60, %v4619_v44 }
 0x27e   : > { %3881 = vrcp.f32 %v1617_v28  ;;  %v3208_v9 = vadd.f32 -0.5, %v3856_v52  ;;  %v5441_v7 = vmul.f32 0.5, %v5324_v31  ;;  %v1993_v54 = vadd.f32 %v1929_v17, %v5351_v62  ;;  %v5782_v31 = vld [vmem:[#allocation30_spill] sm:$0xff] }
 0x27f   : > { %v3866_v27 = vpop.eup %3865  ;;  %3883 = vpow2.f32 %v3156_v34  ;;  %v3157_v20 = vmul.f32 -1.442695, %v5435_v38  ;;  %v2030_v26 = vpack.c.bf16 %v5390_v50, %v5364_v30  ;;  %v5449_v1 = vadd.f32 %v5288_v63, %v4599_v5 }
 0x280   : > { %v3868_v32 = vpop.eup %3867  ;;  %v1618_v36 = vadd.f32 1.0, %v3866_v27  ;;  %v1930_v55 = vmul.f32 %v3208_v9, %v1332_v40  ;;  %v1334_v51 = vadd.f32 %v5782_v31, %v4623_v49  ;;  %v3209_v62 = vadd.f32 -0.5, %v3862_v35 }
 0x281   : > { %v3870_v52 = vpop.eup %3869  ;;  %v1619_v53 = vadd.f32 1.0, %v3868_v32  ;;  %3885 = vpow2.f32 %v3157_v20  ;;  %v5454_v15 = vmul.f32 0.5, %v5344_v14  ;;  %2379 = vmatmul.mubr.bf16.gmra.mrb[104].mxu0 %v2030_v26  ;;  %v3158_v30 = vmul.f32 -1.442695, %v5449_v1  ;;  %v5786_v32 = vld [vmem:[#allocation34_spill] sm:$0xff] }
 0x282   : > { %3887 = vrcp.f32 %v1618_v36  ;;  %v5457_v29 = vadd.f32 %v1930_v55, %v5356_v0  ;;  %v3872_v50 = vpop.eup %3871  ;;  %v1931_v5 = vmul.f32 %v3209_v62, %v1334_v51  ;;  %v5462_v63 = vadd.f32 %v5296_v33, %v4602_v6 }
 0x283   : > { %3889 = vrcp.f32 %v1619_v53  ;;  %v1336_v25 = vadd.f32 %v5783_v13, %v4619_v44  ;;  %v3210_v14 = vadd.f32 -0.5, %v3864_v24  ;;  %v1338_v0 = vadd.f32 %v5784_v21, %v4623_v49  ;;  %v5785_v24 = vld [vmem:[#allocation33_spill] sm:$0xff] }
 0x284   : > { %v3874_v19 = vpop.eup %3873  ;;  %3891 = vpow2.f32 %v3158_v30  ;;  %v3211_v3 = vadd.f32 -0.5, %v3870_v52  ;;  %v1809_v48 = vmul.f32 0.5, %v5361_v23  ;;  %v1995_v39 = vadd.f32 %v1931_v5, %v5375_v43 }
 0x285   : > { %v3876_v16 = vpop.eup %3875  ;;  %v1620_v28 = vadd.f32 1.0, %v3874_v19  ;;  %v3159_v56 = vmul.f32 -1.442695, %v5462_v63  ;;  %v1932_v35 = vmul.f32 %v3210_v14, %v1336_v25  ;;  %v2033_v34 = vpack.c.bf16 %v1993_v54, %v5423_v61 }
 0x286   : > { %v3878_v6 = vpop.eup %3877  ;;  %v1621_v33 = vadd.f32 1.0, %v3876_v16  ;;  %v1933_v17 = vmul.f32 %v3211_v3, %v1338_v0  ;;  %v1342_v40 = vadd.f32 %v5785_v24, %v4619_v44  ;;  %v3212_v9 = vadd.f32 -0.5, %v3872_v50  ;;  %v5788_v0 = vld [vmem:[#allocation26_spill] sm:$0xff] }
 0x287   : > { %v3880_v60 = vpop.eup %3879  ;;  %3893 = vrcp.f32 %v1620_v28  ;;  %v2032_v27 = vpack.c.bf16 %v1992_v12, %v5417_v46  ;;  %v1996_v43 = vadd.f32 %v1932_v35, %v5382_v45  ;;  %2388 = vmatprep.mubr.bf16.mxu0 %v2033_v34  ;;  %v1344_v36 = vadd.f32 %v5786_v32, %v4623_v49  ;;  %v5787_v12 = vld [vmem:[#allocation25_spill] sm:$0xff] }
 0x288   : > { %v3882_v23 = vpop.eup %3881  ;;  %3895 = vrcp.f32 %v1621_v33  ;;  %v1997_v20 = vadd.f32 %v1933_v17, %v5406_v10  ;;  %v1934_v61 = vmul.f32 %v3212_v9, %v1342_v40  ;;  %v3213_v54 = vadd.f32 -0.5, %v3878_v6  ;;  %v5789_v40 = vld [vmem:[#allocation35_spill] sm:$0xff] }
 0x289   : > { %v3884_v55 = vpop.eup %3883  ;;  %3897 = vpow2.f32 %v3159_v56  ;;  %v1346_v26 = vadd.f32 %v5246_v4, %v4619_v44  ;;  %2389 = vmatmul.mubr.bf16.gmra.mrb[108].mxu0 %v2032_v27  ;;  %v3214_v46 = vadd.f32 -0.5, %v3880_v60  ;;  %v1348_v53 = vadd.f32 %v5787_v12, %v4623_v49 }
 0x28a   : > { %v1622_v52 = vadd.f32 1.0, %v3884_v55  ;;  %v3215_v45 = vadd.f32 -0.5, %v3882_v23  ;;  %v1998_v10 = vadd.f32 %v1934_v61, %v5413_v59  ;;  %v1935_v51 = vmul.f32 %v3213_v54, %v1344_v36 }
 0x28b   : > { %v3886_v31 = vpop.eup %3885  ;;  %v2035_v62 = vpack.c.bf16 %v1997_v20, %v1995_v39  ;;  %v1352_v30 = vadd.f32 %v5290_v2, %v4619_v44  ;;  %v1936_v13 = vmul.f32 %v3214_v46, %v1346_v26  ;;  %v2034_v21 = vpack.c.bf16 %v1996_v43, %v5457_v29 }
 0x28c   : > { %v3888_v50 = vpop.eup %3887  ;;  %3899 = vrcp.f32 %v1622_v52  ;;  %v1623_v5 = vadd.f32 1.0, %v3886_v31  ;;  %v1937_v4 = vmul.f32 %v3215_v45, %v1348_v53  ;;  %v1999_v19 = vadd.f32 %v1935_v51, %v5441_v7 }
 0x28d   : > { %v3890_v25 = vpop.eup %3889  ;;  %2398 = vmatprep.mubr.bf16.mxu0 %v2035_v62  ;;  %v3216_v14 = vadd.f32 -0.5, %v3888_v50  ;;  %v1354_v59 = vadd.f32 %v5788_v0, %v4623_v49  ;;  %v2000_v16 = vadd.f32 %v1936_v13, %v5454_v15  ;;  %v1810_v39 = vmul.f32 0.5, %v5379_v8  ;;  %v5791_v0 = vld [vmem:[#allocation23_spill] sm:$0xff] }
 0x28e   : > { %v3892_v3 = vpop.eup %3891  ;;  %3901 = vrcp.f32 %v1623_v5  ;;  %v2001_v2 = vadd.f32 %v1937_v4, %v1809_v48  ;;  %v3217_v28 = vadd.f32 -0.5, %v3890_v25  ;;  %v1811_v33 = vmul.f32 0.5, %v5387_v22 }
 0x28f   : > { %v1624_v56 = vadd.f32 1.0, %v3892_v3  ;;  %v1938_v6 = vmul.f32 %v3216_v14, %v1352_v30  ;;  %v2036_v17 = vpack.c.bf16 %v2000_v16, %v1998_v10  ;;  %v1356_v15 = vadd.f32 %v5789_v40, %v4619_v44 }
 0x290   : > { %v1939_v7 = vmul.f32 %v3217_v28, %v1354_v59  ;;  %v2037_v35 = vpack.c.bf16 %v2001_v2, %v1999_v19  ;;  %v1358_v8 = vadd.f32 %v5309_v37, %v4623_v49  ;;  %v1812_v22 = vmul.f32 0.5, %v5401_v41 }
 0x291   : > { %v3894_v34 = vpop.eup %3893  ;;  %3903 = vrcp.f32 %v1624_v56  ;;  %v2002_v29 = vadd.f32 %v1938_v6, %v1810_v39  ;;  %2399 = vmatmul.mubr.bf16.gmra.mrb[112].mxu0 %v2034_v21  ;;  %v1813_v20 = vmul.f32 0.5, %v5410_v42  ;;  %v1362_v36 = vadd.f32 %v5332_v58, %v4619_v44 }
 0x292   : > { %v3896_v60 = vpop.eup %3895  ;;  %v2003_v24 = vadd.f32 %v1939_v7, %v1811_v33  ;;  %v3218_v48 = vadd.f32 -0.5, %v3894_v34  ;;  %2408 = vmatprep.mubr.bf16.mxu0 %v2037_v35  ;;  %v1364_v37 = vadd.f32 %v5338_v57, %v4623_v49  ;;  %v1814_v41 = vmul.f32 0.5, %v5429_v47 }
 0x293   : > { %v3898_v9 = vpop.eup %3897  ;;  %v3219_v27 = vadd.f32 -0.5, %v3896_v60  ;;  %v1815_v31 = vmul.f32 0.5, %v5435_v38  ;;  %v1366_v51 = vadd.f32 %v5348_v18, %v4619_v44  ;;  %v1816_v57 = vmul.f32 0.5, %v5449_v1  ;;  %v2074_v44 = vld [vmem:[%s5714_s7] sm:$0x3] }
 0x294   : > { %v1625_v23 = vadd.f32 1.0, %v3898_v9  ;;  %v1940_v43 = vmul.f32 %v3218_v48, %v1356_v15  ;;  %v1368_v13 = vadd.f32 %v5353_v11, %v4623_v49  ;;  %v1817_v38 = vmul.f32 0.5, %v5462_v63  ;;  %v5790_v18 = vld [vmem:[#allocation22_spill] sm:$0xff] }
 0x295   : > { %v1941_v32 = vmul.f32 %v3219_v27, %v1358_v8  ;;  %v5515_v1 = vrot.slane %v2074_v44, %v5790_v18  ;;  %v5518_v59 = vrot.slane %v2074_v44, %v5791_v0 }
 0x296   : > { %v3900_v55 = vpop.eup %3899  ;;  %3905 = vrcp.f32 %v1625_v23  ;;  %v2004_v61 = vadd.f32 %v1940_v43, %v1812_v22 }
 0x297   : > { %v2005_v54 = vadd.f32 %v1941_v32, %v1813_v20  ;;  %v3220_v26 = vadd.f32 -0.5, %v3900_v55 }
 0x298   : > { %v3902_v52 = vpop.eup %3901  ;;  %v2038_v46 = vpack.c.bf16 %v2004_v61, %v2002_v29 }
 0x299   : > { %v1942_v12 = vmul.f32 %v3220_v26, %v1362_v36  ;;  %v3221_v53 = vadd.f32 -0.5, %v3902_v52  ;;  %v2039_v45 = vpack.c.bf16 %v2005_v54, %v2003_v24  ;;  %2409 = vmatmul.mubr.bf16.gmra.mrb[116].mxu0 %v2036_v17 }
 0x29b   : > { %v3904_v42 = vpop.eup %3903  ;;  %v2006_v58 = vadd.f32 %v1942_v12, %v1814_v41  ;;  %v1943_v10 = vmul.f32 %v3221_v53, %v1364_v37  ;;  %2418 = vmatprep.mubr.bf16.mxu0 %v2039_v45 }
 0x29c   : > { %v3222_v62 = vadd.f32 -0.5, %v3904_v42 }
 0x29d   : > { %v2007_v30 = vadd.f32 %v1943_v10, %v1815_v31 }
 0x29e   : > { %v1944_v50 = vmul.f32 %v3222_v62, %v1366_v51 }
 0x2a0   : > { %v3906_v5 = vpop.eup %3905  ;;  %v2008_v47 = vadd.f32 %v1944_v50, %v1816_v57 }
 0x2a1   : > { %v3223_v4 = vadd.f32 -0.5, %v3906_v5  ;;  %2419 = vmatmul.mubr.bf16.gmra.mrb[120].mxu0 %v2038_v46 }
 0x2a2   : > { %v2040_v25 = vpack.c.bf16 %v2008_v47, %v2006_v58 }
 0x2a3   : > { %v1945_v19 = vmul.f32 %v3223_v4, %v1368_v13 }
 0x2a5   : > { %v2009_v14 = vadd.f32 %v1945_v19, %v1817_v38 }
 0x2a7   : > { %v2041_v21 = vpack.c.bf16 %v2009_v14, %v2007_v30 }
 0x2a9   : > { %2428 = vmatprep.mubr.bf16.mxu0 %v2041_v21 }
 0x2aa   : > { %2429 = vmatmul.mubr.bf16.gmra.mrb[124].mxu0 %v2040_v25 }
 0x2e9   : > { %v2280_v49 = vpop.f32.mrb[64].mxu0 }
 0x2ea   : > { %v2281_v11 = vadd.f32 %v2280_v49, %v5515_v1  ;;  %v2282_v3 = vpop.f32.mrb[65].mxu0 }
 0x2eb   : > { %v2283_v63 = vadd.f32 %v2282_v3, %v5518_v59  ;;  %v2284_v16 = vpop.f32.mrb[66].mxu0 }
 0x2ec   : > { %v2285_v2 = vadd.f32 %v2284_v16, %v5515_v1  ;;  %v2286_v28 = vpop.f32.mrb[67].mxu0  ;;  %v2439_v56 = vmax.f32 %v2281_v11, 0.0 }
 0x2ed   : > { %v2287_v39 = vadd.f32 %v2286_v28, %v5518_v59  ;;  %v2440_v33 = vmax.f32 %v2283_v63, 0.0 }
 0x2ee   : > { %v2441_v6 = vmax.f32 %v2285_v2, 0.0 }
 0x2ef   : > { %v2442_v7 = vmax.f32 %v2287_v39, 0.0 }
 0x2f0   : > { %v2503_v35 = vpack.c.bf16 %v2441_v6, %v2439_v56 }
 0x2f1   : > { %v2504_v17 = vpack.c.bf16 %v2442_v7, %v2440_v33 }
 0x2f3   : > { %2702 = vmatprep.mubr.bf16.mxu1 %v2504_v17 }
 0x2f4   : > { %2703 = vmatmul.mubr.bf16.vlgmr.msra.gmra.mrb[64].mxu1 %v2503_v35 }
 0x2f5   : > { %v2290_v34 = vpop.f32.mrb[68].mxu0 }
 0x2f6   : > { %v2291_v29 = vadd.f32 %v2290_v34, %v5515_v1  ;;  %v2292_v60 = vpop.f32.mrb[69].mxu0 }
 0x2f7   : > { %v2293_v24 = vadd.f32 %v2292_v60, %v5518_v59  ;;  %v2294_v40 = vpop.f32.mrb[70].mxu0 }
 0x2f8   : > { %v2295_v15 = vadd.f32 %v2294_v40, %v5515_v1  ;;  %v2296_v48 = vpop.f32.mrb[71].mxu0  ;;  %v2443_v8 = vmax.f32 %v2291_v29, 0.0 }
 0x2f9   : > { %v2297_v9 = vadd.f32 %v2296_v48, %v5518_v59  ;;  %v2444_v22 = vmax.f32 %v2293_v24, 0.0 }
 0x2fa   : > { %v2445_v27 = vmax.f32 %v2295_v15, 0.0 }
 0x2fb   : > { %v2446_v23 = vmax.f32 %v2297_v9, 0.0 }
 0x2fc   : > { %v2505_v43 = vpack.c.bf16 %v2445_v27, %v2443_v8 }
 0x2fd   : > { %v2506_v20 = vpack.c.bf16 %v2446_v23, %v2444_v22 }
 0x2ff   : > { %2710 = vmatprep.mubr.bf16.mxu1 %v2506_v20 }
 0x300   : > { %v2300_v32 = vpop.f32.mrb[72].mxu0  ;;  %2711 = vmatmul.mubr.bf16.gmra.mrb[68].mxu1 %v2505_v43 }
 0x301   : > { %v2301_v36 = vadd.f32 %v2300_v32, %v5515_v1  ;;  %v2302_v55 = vpop.f32.mrb[73].mxu0 }
 0x302   : > { %v2303_v61 = vadd.f32 %v2302_v55, %v5518_v59  ;;  %v2304_v54 = vpop.f32.mrb[74].mxu0 }
 0x303   : > { %v2305_v26 = vadd.f32 %v2304_v54, %v5515_v1  ;;  %v2306_v37 = vpop.f32.mrb[75].mxu0  ;;  %v2447_v46 = vmax.f32 %v2301_v36, 0.0 }
 0x304   : > { %v2307_v52 = vadd.f32 %v2306_v37, %v5518_v59  ;;  %v2448_v12 = vmax.f32 %v2303_v61, 0.0 }
 0x305   : > { %v2449_v41 = vmax.f32 %v2305_v26, 0.0 }
 0x306   : > { %v2450_v53 = vmax.f32 %v2307_v52, 0.0 }
 0x307   : > { %v2507_v45 = vpack.c.bf16 %v2449_v41, %v2447_v46 }
 0x308   : > { %v2508_v42 = vpack.c.bf16 %v2450_v53, %v2448_v12 }
 0x30a   : > { %v2310_v31 = vpop.f32.mrb[76].mxu0  ;;  %2718 = vmatprep.mubr.bf16.mxu1 %v2508_v42 }
 0x30b   : > { %v2311_v58 = vadd.f32 %v2310_v31, %v5515_v1  ;;  %v2312_v10 = vpop.f32.mrb[77].mxu0  ;;  %2719 = vmatmul.mubr.bf16.gmra.mrb[72].mxu1 %v2507_v45 }
 0x30c   : > { %v2313_v51 = vadd.f32 %v2312_v10, %v5518_v59  ;;  %v2314_v62 = vpop.f32.mrb[78].mxu0 }
 0x30d   : > { %v2315_v30 = vadd.f32 %v2314_v62, %v5515_v1  ;;  %v2316_v57 = vpop.f32.mrb[79].mxu0  ;;  %v2451_v5 = vmax.f32 %v2311_v58, 0.0 }
 0x30e   : > { %v2317_v50 = vadd.f32 %v2316_v57, %v5518_v59  ;;  %v2452_v13 = vmax.f32 %v2313_v51, 0.0 }
 0x30f   : > { %v2453_v47 = vmax.f32 %v2315_v30, 0.0 }
 0x310   : > { %v2454_v4 = vmax.f32 %v2317_v50, 0.0 }
 0x311   : > { %v2509_v25 = vpack.c.bf16 %v2453_v47, %v2451_v5 }
 0x312   : > { %v2510_v38 = vpack.c.bf16 %v2454_v4, %v2452_v13 }
 0x314   : > { %2726 = vmatprep.mubr.bf16.mxu1 %v2510_v38 }
 0x315   : > { %v2320_v19 = vpop.f32.mrb[80].mxu0  ;;  %2727 = vmatmul.mubr.bf16.gmra.mrb[76].mxu1 %v2509_v25 }
 0x316   : > { %v2321_v14 = vadd.f32 %v2320_v19, %v5515_v1  ;;  %v2322_v21 = vpop.f32.mrb[81].mxu0 }
 0x317   : > { %v2323_v44 = vadd.f32 %v2322_v21, %v5518_v59  ;;  %v2324_v18 = vpop.f32.mrb[82].mxu0 }
 0x318   : > { %v2325_v0 = vadd.f32 %v2324_v18, %v5515_v1  ;;  %v2326_v49 = vpop.f32.mrb[83].mxu0  ;;  %v2455_v3 = vmax.f32 %v2321_v14, 0.0 }
 0x319   : > { %v2327_v11 = vadd.f32 %v2326_v49, %v5518_v59  ;;  %v2456_v16 = vmax.f32 %v2323_v44, 0.0 }
 0x31a   : > { %v2457_v63 = vmax.f32 %v2325_v0, 0.0 }
 0x31b   : > { %v2458_v2 = vmax.f32 %v2327_v11, 0.0 }
 0x31c   : > { %v2511_v28 = vpack.c.bf16 %v2457_v63, %v2455_v3 }
 0x31d   : > { %v2512_v39 = vpack.c.bf16 %v2458_v2, %v2456_v16 }
 0x31f   : > { %2734 = vmatprep.mubr.bf16.mxu1 %v2512_v39  ;;  %v2330_v56 = vpop.f32.mrb[84].mxu0 }
 0x320   : > { %2735 = vmatmul.mubr.bf16.gmra.mrb[80].mxu1 %v2511_v28  ;;  %v2331_v6 = vadd.f32 %v2330_v56, %v5515_v1  ;;  %v2332_v33 = vpop.f32.mrb[85].mxu0 }
 0x321   : > { %v2333_v7 = vadd.f32 %v2332_v33, %v5518_v59  ;;  %v2334_v35 = vpop.f32.mrb[86].mxu0 }
 0x322   : > { %v2335_v17 = vadd.f32 %v2334_v35, %v5515_v1  ;;  %v2336_v34 = vpop.f32.mrb[87].mxu0  ;;  %v2459_v60 = vmax.f32 %v2331_v6, 0.0 }
 0x323   : > { %v2337_v29 = vadd.f32 %v2336_v34, %v5518_v59  ;;  %v2460_v40 = vmax.f32 %v2333_v7, 0.0 }
 0x324   : > { %v2461_v24 = vmax.f32 %v2335_v17, 0.0 }
 0x325   : > { %v2462_v15 = vmax.f32 %v2337_v29, 0.0 }
 0x326   : > { %v2513_v48 = vpack.c.bf16 %v2461_v24, %v2459_v60 }
 0x327   : > { %v2514_v9 = vpack.c.bf16 %v2462_v15, %v2460_v40 }
 0x329   : > { %2742 = vmatprep.mubr.bf16.mxu1 %v2514_v9 }
 0x32a   : > { %v2340_v8 = vpop.f32.mrb[88].mxu0  ;;  %2743 = vmatmul.mubr.bf16.gmra.mrb[84].mxu1 %v2513_v48 }
 0x32b   : > { %v2341_v27 = vadd.f32 %v2340_v8, %v5515_v1  ;;  %v2342_v22 = vpop.f32.mrb[89].mxu0 }
 0x32c   : > { %v2343_v23 = vadd.f32 %v2342_v22, %v5518_v59  ;;  %v2344_v43 = vpop.f32.mrb[90].mxu0 }
 0x32d   : > { %v2345_v20 = vadd.f32 %v2344_v43, %v5515_v1  ;;  %v2346_v32 = vpop.f32.mrb[91].mxu0  ;;  %v2463_v55 = vmax.f32 %v2341_v27, 0.0 }
 0x32e   : > { %v2347_v36 = vadd.f32 %v2346_v32, %v5518_v59  ;;  %v2464_v54 = vmax.f32 %v2343_v23, 0.0 }
 0x32f   : > { %v2465_v61 = vmax.f32 %v2345_v20, 0.0 }
 0x330   : > { %v2466_v26 = vmax.f32 %v2347_v36, 0.0 }
 0x331   : > { %v2515_v37 = vpack.c.bf16 %v2465_v61, %v2463_v55 }
 0x332   : > { %v2516_v52 = vpack.c.bf16 %v2466_v26, %v2464_v54 }
 0x334   : > { %2750 = vmatprep.mubr.bf16.mxu1 %v2516_v52 }
 0x335   : > { %v2350_v46 = vpop.f32.mrb[92].mxu0  ;;  %2751 = vmatmul.mubr.bf16.gmra.mrb[88].mxu1 %v2515_v37 }
 0x336   : > { %v2351_v41 = vadd.f32 %v2350_v46, %v5515_v1  ;;  %v2352_v12 = vpop.f32.mrb[93].mxu0 }
 0x337   : > { %v2353_v53 = vadd.f32 %v2352_v12, %v5518_v59  ;;  %v2354_v45 = vpop.f32.mrb[94].mxu0 }
 0x338   : > { %v2355_v42 = vadd.f32 %v2354_v45, %v5515_v1  ;;  %v2356_v31 = vpop.f32.mrb[95].mxu0  ;;  %v2467_v10 = vmax.f32 %v2351_v41, 0.0 }
 0x339   : > { %v2357_v58 = vadd.f32 %v2356_v31, %v5518_v59  ;;  %v2468_v62 = vmax.f32 %v2353_v53, 0.0 }
 0x33a   : > { %v2469_v51 = vmax.f32 %v2355_v42, 0.0 }
 0x33b   : > { %v2470_v30 = vmax.f32 %v2357_v58, 0.0 }
 0x33c   : > { %v2517_v57 = vpack.c.bf16 %v2469_v51, %v2467_v10 }
 0x33d   : > { %v2518_v50 = vpack.c.bf16 %v2470_v30, %v2468_v62 }
 0x33f   : > { %2758 = vmatprep.mubr.bf16.mxu1 %v2518_v50  ;;  %v2360_v5 = vpop.f32.mrb[96].mxu0 }
 0x340   : > { %2759 = vmatmul.mubr.bf16.gmra.mrb[92].mxu1 %v2517_v57  ;;  %v2361_v47 = vadd.f32 %v2360_v5, %v5515_v1  ;;  %v2362_v13 = vpop.f32.mrb[97].mxu0 }
 0x341   : > { %v2363_v4 = vadd.f32 %v2362_v13, %v5518_v59  ;;  %v2364_v25 = vpop.f32.mrb[98].mxu0 }
 0x342   : > { %v2365_v38 = vadd.f32 %v2364_v25, %v5515_v1  ;;  %v2366_v19 = vpop.f32.mrb[99].mxu0  ;;  %v2471_v21 = vmax.f32 %v2361_v47, 0.0 }
 0x343   : > { %v2367_v14 = vadd.f32 %v2366_v19, %v5518_v59  ;;  %v2472_v18 = vmax.f32 %v2363_v4, 0.0 }
 0x344   : > { %v2473_v44 = vmax.f32 %v2365_v38, 0.0 }
 0x345   : > { %v2474_v0 = vmax.f32 %v2367_v14, 0.0 }
 0x346   : > { %v2519_v49 = vpack.c.bf16 %v2473_v44, %v2471_v21 }
 0x347   : > { %v2520_v11 = vpack.c.bf16 %v2474_v0, %v2472_v18 }
 0x349   : > { %v2370_v3 = vpop.f32.mrb[100].mxu0  ;;  %2766 = vmatprep.mubr.bf16.mxu1 %v2520_v11 }
 0x34a   : > { %v2371_v63 = vadd.f32 %v2370_v3, %v5515_v1  ;;  %v2372_v16 = vpop.f32.mrb[101].mxu0  ;;  %2767 = vmatmul.mubr.bf16.gmra.mrb[96].mxu1 %v2519_v49 }
 0x34b   : > { %v2373_v2 = vadd.f32 %v2372_v16, %v5518_v59  ;;  %v2374_v28 = vpop.f32.mrb[102].mxu0 }
 0x34c   : > { %v2375_v39 = vadd.f32 %v2374_v28, %v5515_v1  ;;  %v2376_v56 = vpop.f32.mrb[103].mxu0  ;;  %v2475_v33 = vmax.f32 %v2371_v63, 0.0 }
 0x34d   : > { %v2377_v6 = vadd.f32 %v2376_v56, %v5518_v59  ;;  %v2476_v35 = vmax.f32 %v2373_v2, 0.0 }
 0x34e   : > { %v2477_v7 = vmax.f32 %v2375_v39, 0.0 }
 0x34f   : > { %v2478_v17 = vmax.f32 %v2377_v6, 0.0 }
 0x350   : > { %v2521_v34 = vpack.c.bf16 %v2477_v7, %v2475_v33 }
 0x351   : > { %v2522_v29 = vpack.c.bf16 %v2478_v17, %v2476_v35 }
 0x353   : > { %2774 = vmatprep.mubr.bf16.mxu1 %v2522_v29 }
 0x354   : > { %v2380_v60 = vpop.f32.mrb[104].mxu0  ;;  %2775 = vmatmul.mubr.bf16.gmra.mrb[100].mxu1 %v2521_v34 }
 0x355   : > { %v2381_v24 = vadd.f32 %v2380_v60, %v5515_v1  ;;  %v2382_v40 = vpop.f32.mrb[105].mxu0 }
 0x356   : > { %v2383_v15 = vadd.f32 %v2382_v40, %v5518_v59  ;;  %v2384_v48 = vpop.f32.mrb[106].mxu0 }
 0x357   : > { %v2385_v9 = vadd.f32 %v2384_v48, %v5515_v1  ;;  %v2386_v8 = vpop.f32.mrb[107].mxu0  ;;  %v2479_v22 = vmax.f32 %v2381_v24, 0.0 }
 0x358   : > { %v2387_v27 = vadd.f32 %v2386_v8, %v5518_v59  ;;  %v2480_v43 = vmax.f32 %v2383_v15, 0.0 }
 0x359   : > { %v2481_v23 = vmax.f32 %v2385_v9, 0.0 }
 0x35a   : > { %v2482_v20 = vmax.f32 %v2387_v27, 0.0 }
 0x35b   : > { %v2523_v32 = vpack.c.bf16 %v2481_v23, %v2479_v22 }
 0x35c   : > { %v2524_v36 = vpack.c.bf16 %v2482_v20, %v2480_v43  ;;  %v2390_v55 = vpop.f32.mrb[108].mxu0 }
 0x35d   : > { %v2391_v61 = vadd.f32 %v2390_v55, %v5515_v1  ;;  %v2392_v54 = vpop.f32.mrb[109].mxu0 }
 0x35e   : > { %v2393_v26 = vadd.f32 %v2392_v54, %v5518_v59  ;;  %v2394_v37 = vpop.f32.mrb[110].mxu0  ;;  %2782 = vmatprep.mubr.bf16.mxu1 %v2524_v36 }
 0x35f   : > { %v2395_v52 = vadd.f32 %v2394_v37, %v5515_v1  ;;  %v2396_v46 = vpop.f32.mrb[111].mxu0  ;;  %2783 = vmatmul.mubr.bf16.gmra.mrb[104].mxu1 %v2523_v32  ;;  %v2483_v12 = vmax.f32 %v2391_v61, 0.0 }
 0x360   : > { %v2397_v41 = vadd.f32 %v2396_v46, %v5518_v59  ;;  %v2484_v45 = vmax.f32 %v2393_v26, 0.0 }
 0x361   : > { %v2485_v53 = vmax.f32 %v2395_v52, 0.0 }
 0x362   : > { %v2486_v42 = vmax.f32 %v2397_v41, 0.0 }
 0x363   : > { %v2525_v31 = vpack.c.bf16 %v2485_v53, %v2483_v12  ;;  %v5587_v53 = vld [vmem:[%s5792_s26] ss:$0 sm:$0xff] }
 0x364   : > { %v2526_v58 = vpack.c.bf16 %v2486_v42, %v2484_v45  ;;  %v2400_v10 = vpop.f32.mrb[112].mxu0 }
 0x365   : > { %v2401_v51 = vadd.f32 %v2400_v10, %v5515_v1  ;;  %v2402_v62 = vpop.f32.mrb[113].mxu0 }
 0x366   : > { %v2403_v30 = vadd.f32 %v2402_v62, %v5518_v59  ;;  %v2404_v57 = vpop.f32.mrb[114].mxu0  ;;  %2790 = vmatprep.mubr.bf16.mxu1 %v2526_v58 }
 0x367   : > { %v2405_v50 = vadd.f32 %v2404_v57, %v5515_v1  ;;  %v2406_v5 = vpop.f32.mrb[115].mxu0  ;;  %2791 = vmatmul.mubr.bf16.gmra.mrb[108].mxu1 %v2525_v31  ;;  %v2487_v13 = vmax.f32 %v2401_v51, 0.0 }
 0x368   : > { %v2407_v47 = vadd.f32 %v2406_v5, %v5518_v59  ;;  %v2488_v25 = vmax.f32 %v2403_v30, 0.0 }
 0x369   : > { %v2489_v4 = vmax.f32 %v2405_v50, 0.0 }
 0x36a   : > { %v2490_v38 = vmax.f32 %v2407_v47, 0.0 }
 0x36b   : > { %v2527_v19 = vpack.c.bf16 %v2489_v4, %v2487_v13 }
 0x36c   : > { %v2528_v14 = vpack.c.bf16 %v2490_v38, %v2488_v25  ;;  %v2410_v21 = vpop.f32.mrb[116].mxu0 }
 0x36d   : > { %v2411_v44 = vadd.f32 %v2410_v21, %v5515_v1  ;;  %v2412_v18 = vpop.f32.mrb[117].mxu0 }
 0x36e   : > { %v2413_v0 = vadd.f32 %v2412_v18, %v5518_v59  ;;  %v2414_v49 = vpop.f32.mrb[118].mxu0  ;;  %2798 = vmatprep.mubr.bf16.mxu1 %v2528_v14 }
 0x36f   : > { %v2415_v11 = vadd.f32 %v2414_v49, %v5515_v1  ;;  %v2416_v3 = vpop.f32.mrb[119].mxu0  ;;  %2799 = vmatmul.mubr.bf16.gmra.mrb[112].mxu1 %v2527_v19  ;;  %v2491_v16 = vmax.f32 %v2411_v44, 0.0 }
 0x370   : > { %v2417_v63 = vadd.f32 %v2416_v3, %v5518_v59  ;;  %v2492_v28 = vmax.f32 %v2413_v0, 0.0 }
 0x371   : > { %v2493_v2 = vmax.f32 %v2415_v11, 0.0 }
 0x372   : > { %v2494_v39 = vmax.f32 %v2417_v63, 0.0 }
 0x373   : > { %v2529_v56 = vpack.c.bf16 %v2493_v2, %v2491_v16 }
 0x374   : > { %v2530_v6 = vpack.c.bf16 %v2494_v39, %v2492_v28  ;;  %v2420_v33 = vpop.f32.mrb[120].mxu0 }
 0x375   : > { %v2421_v7 = vadd.f32 %v2420_v33, %v5515_v1  ;;  %v2422_v35 = vpop.f32.mrb[121].mxu0 }
 0x376   : > { %v2423_v17 = vadd.f32 %v2422_v35, %v5518_v59  ;;  %v2424_v34 = vpop.f32.mrb[122].mxu0  ;;  %2806 = vmatprep.mubr.bf16.mxu1 %v2530_v6 }
 0x377   : > { %v2425_v29 = vadd.f32 %v2424_v34, %v5515_v1  ;;  %v2426_v60 = vpop.f32.mrb[123].mxu0  ;;  %2807 = vmatmul.mubr.bf16.gmra.mrb[116].mxu1 %v2529_v56  ;;  %v2495_v40 = vmax.f32 %v2421_v7, 0.0 }
 0x378   : > { %v2427_v24 = vadd.f32 %v2426_v60, %v5518_v59  ;;  %v2496_v48 = vmax.f32 %v2423_v17, 0.0 }
 0x379   : > { %v2497_v15 = vmax.f32 %v2425_v29, 0.0 }
 0x37a   : > { %v2498_v9 = vmax.f32 %v2427_v24, 0.0 }
 0x37b   : > { %v2531_v8 = vpack.c.bf16 %v2497_v15, %v2495_v40 }
 0x37c   : > { %v2532_v27 = vpack.c.bf16 %v2498_v9, %v2496_v48 }
 0x37d   : > { %v2430_v22 = vpop.f32.mrb[124].mxu0 }
 0x37e   : > { %v2431_v23 = vadd.f32 %v2430_v22, %v5515_v1  ;;  %v2432_v43 = vpop.f32.mrb[125].mxu0  ;;  %2814 = vmatprep.mubr.bf16.mxu1 %v2532_v27 }
 0x37f   : > { %v2433_v20 = vadd.f32 %v2432_v43, %v5518_v59  ;;  %v2434_v32 = vpop.f32.mrb[126].mxu0  ;;  %2815 = vmatmul.mubr.bf16.gmra.mrb[120].mxu1 %v2531_v8 }
 0x380   : > { %v2435_v36 = vadd.f32 %v2434_v32, %v5515_v1  ;;  %v2436_v55 = vpop.f32.mrb[127].mxu0  ;;  %v2499_v54 = vmax.f32 %v2431_v23, 0.0 }
 0x381   : > { %v2437_v61 = vadd.f32 %v2436_v55, %v5518_v59  ;;  %v2500_v37 = vmax.f32 %v2433_v20, 0.0 }
 0x382   : > { %v2501_v26 = vmax.f32 %v2435_v36, 0.0 }
 0x383   : > { %v2502_v52 = vmax.f32 %v2437_v61, 0.0 }
 0x384   : > { %v2533_v46 = vpack.c.bf16 %v2501_v26, %v2499_v54 }
 0x385   : > { %v2534_v41 = vpack.c.bf16 %v2502_v52, %v2500_v37 }
 0x387   : > { %2822 = vmatprep.mubr.bf16.mxu1 %v2534_v41 }
 0x388   : > { %2823 = vmatmul.mubr.bf16.gmra.mrb[124].mxu1 %v2533_v46 }
 0x3c7   : > { %v3297_v12 = vpop.f32.mrb[64].mxu1 }
 0x3c8   : > { %v3298_v1 = vpop.f32.mrb[65].mxu1 }
 0x3c9   : > { %v3299_v45 = vadd.f32 %v3298_v1, %v3297_v12  ;;  %v3300_v42 = vpop.f32.mrb[66].mxu1 }
 0x3ca   : > { %v3301_v31 = vpop.f32.mrb[67].mxu1 }
 0x3cb   : > { %v2705_v59 = vadd.f32 %v3299_v45, %v5587_v53  ;;  %v3302_v58 = vadd.f32 %v3301_v31, %v3300_v42 }
 0x3cd   : > { %2831 = vst [vmem:[%s5591_s9] sm:$0xff] %v2705_v59  ;;  %v2708_v10 = vadd.f32 %v3302_v58, %v5587_v53 }
 0x3cf   : > { %2832 = vst [vmem:[%s5591_s9 + $0x8] sm:$0xff] %v2708_v10 }
 0x3d3   : > { %v3303_v51 = vpop.f32.mrb[68].mxu1 }
 0x3d4   : > { %v3304_v62 = vpop.f32.mrb[69].mxu1 }
 0x3d5   : > { %v3305_v30 = vadd.f32 %v3304_v62, %v3303_v51  ;;  %v3306_v57 = vpop.f32.mrb[70].mxu1 }
 0x3d6   : > { %v3307_v50 = vpop.f32.mrb[71].mxu1 }
 0x3d7   : > { %v2713_v5 = vadd.f32 %v3305_v30, %v5587_v53  ;;  %v3308_v47 = vadd.f32 %v3307_v50, %v3306_v57 }
 0x3d9   : > { %2833 = vst [vmem:[%s5591_s9 + $0x10] sm:$0xff] %v2713_v5  ;;  %v2716_v13 = vadd.f32 %v3308_v47, %v5587_v53 }
 0x3db   : > { %2834 = vst [vmem:[%s5591_s9 + $0x18] sm:$0xff] %v2716_v13 }
 0x3de   : > { %v3309_v4 = vpop.f32.mrb[72].mxu1 }
 0x3df   : > { %v3310_v25 = vpop.f32.mrb[73].mxu1 }
 0x3e0   : > { %v3311_v38 = vadd.f32 %v3310_v25, %v3309_v4  ;;  %v3312_v19 = vpop.f32.mrb[74].mxu1 }
 0x3e1   : > { %v3313_v14 = vpop.f32.mrb[75].mxu1 }
 0x3e2   : > { %v2721_v21 = vadd.f32 %v3311_v38, %v5587_v53  ;;  %v3314_v44 = vadd.f32 %v3313_v14, %v3312_v19 }
 0x3e4   : > { %2835 = vst [vmem:[%s5591_s9 + $0x20] sm:$0xff] %v2721_v21  ;;  %v2724_v18 = vadd.f32 %v3314_v44, %v5587_v53 }
 0x3e6   : > { %2836 = vst [vmem:[%s5591_s9 + $0x28] sm:$0xff] %v2724_v18 }
 0x3e8   : > { %v3315_v0 = vpop.f32.mrb[76].mxu1 }
 0x3e9   : > { %v3316_v49 = vpop.f32.mrb[77].mxu1 }
 0x3ea   : > { %v3317_v11 = vadd.f32 %v3316_v49, %v3315_v0  ;;  %v3318_v3 = vpop.f32.mrb[78].mxu1 }
 0x3eb   : > { %v3319_v63 = vpop.f32.mrb[79].mxu1 }
 0x3ec   : > { %v2729_v16 = vadd.f32 %v3317_v11, %v5587_v53  ;;  %v3320_v2 = vadd.f32 %v3319_v63, %v3318_v3 }
 0x3ee   : > { %2837 = vst [vmem:[%s5591_s9 + $0x30] sm:$0xff] %v2729_v16  ;;  %v2732_v28 = vadd.f32 %v3320_v2, %v5587_v53 }
 0x3f0   : > { %2838 = vst [vmem:[%s5591_s9 + $0x38] sm:$0xff] %v2732_v28 }
 0x3f3   : > { %v3321_v39 = vpop.f32.mrb[80].mxu1 }
 0x3f4   : > { %v3322_v56 = vpop.f32.mrb[81].mxu1 }
 0x3f5   : > { %v3323_v6 = vadd.f32 %v3322_v56, %v3321_v39  ;;  %v3324_v33 = vpop.f32.mrb[82].mxu1 }
 0x3f6   : > { %v3325_v7 = vpop.f32.mrb[83].mxu1 }
 0x3f7   : > { %v2737_v35 = vadd.f32 %v3323_v6, %v5587_v53  ;;  %v3326_v17 = vadd.f32 %v3325_v7, %v3324_v33 }
 0x3f9   : > { %2839 = vst [vmem:[%s5591_s9 + $0x40] sm:$0xff] %v2737_v35  ;;  %v2740_v34 = vadd.f32 %v3326_v17, %v5587_v53 }
 0x3fb   : > { %2840 = vst [vmem:[%s5591_s9 + $0x48] sm:$0xff] %v2740_v34 }
 0x3fd   : > { %v3327_v29 = vpop.f32.mrb[84].mxu1 }
 0x3fe   : > { %v3328_v60 = vpop.f32.mrb[85].mxu1 }
 0x3ff   : > { %v3329_v24 = vadd.f32 %v3328_v60, %v3327_v29  ;;  %v3330_v40 = vpop.f32.mrb[86].mxu1 }
 0x400   : > { %v3331_v15 = vpop.f32.mrb[87].mxu1 }
 0x401   : > { %v2745_v48 = vadd.f32 %v3329_v24, %v5587_v53  ;;  %v3332_v9 = vadd.f32 %v3331_v15, %v3330_v40 }
 0x403   : > { %2841 = vst [vmem:[%s5591_s9 + $0x50] sm:$0xff] %v2745_v48  ;;  %v2748_v8 = vadd.f32 %v3332_v9, %v5587_v53 }
 0x405   : > { %2842 = vst [vmem:[%s5591_s9 + $0x58] sm:$0xff] %v2748_v8 }
 0x408   : > { %v3333_v27 = vpop.f32.mrb[88].mxu1 }
 0x409   : > { %v3334_v22 = vpop.f32.mrb[89].mxu1 }
 0x40a   : > { %v3335_v23 = vadd.f32 %v3334_v22, %v3333_v27  ;;  %v3336_v43 = vpop.f32.mrb[90].mxu1 }
 0x40b   : > { %v3337_v20 = vpop.f32.mrb[91].mxu1 }
 0x40c   : > { %v2753_v32 = vadd.f32 %v3335_v23, %v5587_v53  ;;  %v3338_v36 = vadd.f32 %v3337_v20, %v3336_v43 }
 0x40e   : > { %2843 = vst [vmem:[%s5591_s9 + $0x60] sm:$0xff] %v2753_v32  ;;  %v2756_v55 = vadd.f32 %v3338_v36, %v5587_v53 }
 0x410   : > { %2844 = vst [vmem:[%s5591_s9 + $0x68] sm:$0xff] %v2756_v55 }
 0x413   : > { %v3339_v61 = vpop.f32.mrb[92].mxu1 }
 0x414   : > { %v3340_v54 = vpop.f32.mrb[93].mxu1 }
 0x415   : > { %v3341_v26 = vadd.f32 %v3340_v54, %v3339_v61  ;;  %v3342_v37 = vpop.f32.mrb[94].mxu1 }
 0x416   : > { %v3343_v52 = vpop.f32.mrb[95].mxu1 }
 0x417   : > { %v2761_v46 = vadd.f32 %v3341_v26, %v5587_v53  ;;  %v3344_v41 = vadd.f32 %v3343_v52, %v3342_v37 }
 0x419   : > { %2845 = vst [vmem:[%s5591_s9 + $0x70] sm:$0xff] %v2761_v46  ;;  %v2764_v12 = vadd.f32 %v3344_v41, %v5587_v53 }
 0x41b   : > { %2846 = vst [vmem:[%s5591_s9 + $0x78] sm:$0xff] %v2764_v12 }
 0x41d   : > { %v3345_v1 = vpop.f32.mrb[96].mxu1 }
 0x41e   : > { %v3346_v45 = vpop.f32.mrb[97].mxu1 }
 0x41f   : > { %v3347_v42 = vadd.f32 %v3346_v45, %v3345_v1  ;;  %v3348_v31 = vpop.f32.mrb[98].mxu1 }
 0x420   : > { %v3349_v59 = vpop.f32.mrb[99].mxu1 }
 0x421   : > { %v2769_v58 = vadd.f32 %v3347_v42, %v5587_v53  ;;  %v3350_v10 = vadd.f32 %v3349_v59, %v3348_v31 }
 0x423   : > { %2847 = vst [vmem:[%s5591_s9 + $0x80] sm:$0xff] %v2769_v58  ;;  %v2772_v51 = vadd.f32 %v3350_v10, %v5587_v53 }
 0x425   : > { %2848 = vst [vmem:[%s5591_s9 + $0x88] sm:$0xff] %v2772_v51 }
 0x427   : > { %v3351_v62 = vpop.f32.mrb[100].mxu1 }
 0x428   : > { %v3352_v30 = vpop.f32.mrb[101].mxu1 }
 0x429   : > { %v3353_v57 = vadd.f32 %v3352_v30, %v3351_v62  ;;  %v3354_v50 = vpop.f32.mrb[102].mxu1 }
 0x42a   : > { %v3355_v5 = vpop.f32.mrb[103].mxu1 }
 0x42b   : > { %v2777_v47 = vadd.f32 %v3353_v57, %v5587_v53  ;;  %v3356_v13 = vadd.f32 %v3355_v5, %v3354_v50 }
 0x42d   : > { %2849 = vst [vmem:[%s5591_s9 + $0x90] sm:$0xff] %v2777_v47  ;;  %v2780_v4 = vadd.f32 %v3356_v13, %v5587_v53 }
 0x42f   : > { %2850 = vst [vmem:[%s5591_s9 + $0x98] sm:$0xff] %v2780_v4 }
 0x432   : > { %v3357_v25 = vpop.f32.mrb[104].mxu1 }
 0x433   : > { %v3358_v38 = vpop.f32.mrb[105].mxu1 }
 0x434   : > { %v3359_v19 = vadd.f32 %v3358_v38, %v3357_v25  ;;  %v3360_v14 = vpop.f32.mrb[106].mxu1 }
 0x435   : > { %v3361_v21 = vpop.f32.mrb[107].mxu1 }
 0x436   : > { %v2785_v44 = vadd.f32 %v3359_v19, %v5587_v53  ;;  %v3362_v18 = vadd.f32 %v3361_v21, %v3360_v14 }
 0x438   : > { %2851 = vst [vmem:[%s5591_s9 + $0xa0] sm:$0xff] %v2785_v44  ;;  %v2788_v0 = vadd.f32 %v3362_v18, %v5587_v53 }
 0x43a   : > { %2852 = vst [vmem:[%s5591_s9 + $0xa8] sm:$0xff] %v2788_v0  ;;  %v3363_v49 = vpop.f32.mrb[108].mxu1 }
 0x43b   : > { %v3364_v11 = vpop.f32.mrb[109].mxu1 }
 0x43c   : > { %v3365_v3 = vadd.f32 %v3364_v11, %v3363_v49  ;;  %v3366_v63 = vpop.f32.mrb[110].mxu1 }
 0x43d   : > { %v3367_v16 = vpop.f32.mrb[111].mxu1 }
 0x43e   : > { %v2793_v2 = vadd.f32 %v3365_v3, %v5587_v53  ;;  %v3368_v28 = vadd.f32 %v3367_v16, %v3366_v63 }
 0x440   : > { %2853 = vst [vmem:[%s5591_s9 + $0xb0] sm:$0xff] %v2793_v2  ;;  %v2796_v39 = vadd.f32 %v3368_v28, %v5587_v53 }
 0x442   : > { %2854 = vst [vmem:[%s5591_s9 + $0xb8] sm:$0xff] %v2796_v39  ;;  %v3369_v56 = vpop.f32.mrb[112].mxu1 }
 0x443   : > { %v3370_v6 = vpop.f32.mrb[113].mxu1 }
 0x444   : > { %v3371_v33 = vadd.f32 %v3370_v6, %v3369_v56  ;;  %v3372_v7 = vpop.f32.mrb[114].mxu1 }
 0x445   : > { %v3373_v35 = vpop.f32.mrb[115].mxu1 }
 0x446   : > { %v2801_v17 = vadd.f32 %v3371_v33, %v5587_v53  ;;  %v3374_v34 = vadd.f32 %v3373_v35, %v3372_v7 }
 0x448   : > { %2855 = vst [vmem:[%s5591_s9 + $0xc0] sm:$0xff] %v2801_v17  ;;  %v2804_v29 = vadd.f32 %v3374_v34, %v5587_v53 }
 0x44a   : > { %2856 = vst [vmem:[%s5591_s9 + $0xc8] sm:$0xff] %v2804_v29  ;;  %v3375_v60 = vpop.f32.mrb[116].mxu1 }
 0x44b   : > { %v3376_v24 = vpop.f32.mrb[117].mxu1 }
 0x44c   : > { %v3377_v40 = vadd.f32 %v3376_v24, %v3375_v60  ;;  %v3378_v15 = vpop.f32.mrb[118].mxu1 }
 0x44d   : > { %v3379_v48 = vpop.f32.mrb[119].mxu1 }
 0x44e   : > { %v2809_v9 = vadd.f32 %v3377_v40, %v5587_v53  ;;  %v3380_v8 = vadd.f32 %v3379_v48, %v3378_v15 }
 0x450   : > { %2857 = vst [vmem:[%s5591_s9 + $0xd0] sm:$0xff] %v2809_v9  ;;  %v2812_v27 = vadd.f32 %v3380_v8, %v5587_v53 }
 0x452   : > { %2858 = vst [vmem:[%s5591_s9 + $0xd8] sm:$0xff] %v2812_v27  ;;  %v3381_v22 = vpop.f32.mrb[120].mxu1 }
 0x453   : > { %v3382_v23 = vpop.f32.mrb[121].mxu1 }
 0x454   : > { %v3383_v43 = vadd.f32 %v3382_v23, %v3381_v22  ;;  %v3384_v20 = vpop.f32.mrb[122].mxu1 }
 0x455   : > { %v3385_v32 = vpop.f32.mrb[123].mxu1 }
 0x456   : > { %v2817_v36 = vadd.f32 %v3383_v43, %v5587_v53  ;;  %v3386_v55 = vadd.f32 %v3385_v32, %v3384_v20 }
 0x458   : > { %2859 = vst [vmem:[%s5591_s9 + $0xe0] sm:$0xff] %v2817_v36  ;;  %v2820_v61 = vadd.f32 %v3386_v55, %v5587_v53 }
 0x45a   : > { %2860 = vst [vmem:[%s5591_s9 + $0xe8] sm:$0xff] %v2820_v61 }
 0x45b   : > { %v3387_v54 = vpop.f32.mrb[124].mxu1 }
 0x45c   : > { %v3388_v26 = vpop.f32.mrb[125].mxu1 }
 0x45d   : > { %v3389_v37 = vadd.f32 %v3388_v26, %v3387_v54  ;;  %v3390_v52 = vpop.f32.mrb[126].mxu1 }
 0x45e   : > { %v3391_v46 = vpop.f32.mrb[127].mxu1 }
 0x45f   : > { %v2825_v41 = vadd.f32 %v3389_v37, %v5587_v53  ;;  %v3392_v12 = vadd.f32 %v3391_v46, %v3390_v52 }
 0x461   : > { %2861 = vst [vmem:[%s5591_s9 + $0xf0] sm:$0xff] %v2825_v41  ;;  %v2828_v1 = vadd.f32 %v3392_v12, %v5587_v53 }
 0x463   : > { %2862 = vst [vmem:[%s5591_s9 + $0xf8] sm:$0xff] %v2828_v1 }
 0x464   : > { %4092 = shalt.err (!%p4089_p8)
}
 0x465   : > { %s4093_s18 = scalar_lea.hbm %s5658_s30, 4096  ;;  %s4097_s29 = scalar_lea.hbm %s5793_s21, 8192 }
 0x466   : > { %p4094_p11 = scmp.ne.s32.totalorder %s5658_s30, %s4093_s18  ;;  %p4098_p1 = scmp.lt.u32.totalorder %s5658_s30, %s5793_s21 }
 0x467   : > { %p4099_p2 = scmp.lt.u32.totalorder %s4097_s29, %s4093_s18  ;;  %p4101_p0 = scmp.lt.u32.totalorder %s4093_s18, %s5658_s30 }
 0x468   : > { %p4095_p7 = pnand %p4094_p11, %p4402_p3 }
 0x469   : > { %p4100_p13 = por %p4099_p2, %p4098_p1 }
 0x46a   : > { %p4096_p12 = pneg %p4095_p7 }
 0x46b   : > { %p4102_p4 = por %p4101_p0, %p4100_p13 }
 0x46d   : > { %p4103_p6 = pnand %p4102_p4, %p4096_p12 }
 0x46f   : > { %4106 = shalt.err (!%p4103_p6)
}
 0x470   : > { %s4174_s9 = smov 128   ;;  %s4175_s0 = smov 8  }
 0x471   : > { %3413 = dma.vmem_to_hbm [thread:$0]  (%p4402_p3), %s5660_s13, 4096, %s5658_s30, %s2864_s17, %s4174_s9, %s4174_s9, %s4175_s0  }
 0x472 PF: > { %s5794_s10 = sld [smem:[#allocation20_spill]]  ;;  %s5795_s24 = sld [smem:[#allocation21_spill]] }
 0x473   : > { %p5797_p5 = scmp.ge.s32.totalorder %s4161_s16, 2 }
 0x478   : > { %s2892_s23 = sand.u32 1, %s5794_s10   ;;  %p5796_p10 = scmp.ne.s32.totalorder %s5795_s24, 0 }
 0x479   : > { %s2893_s19 = scalar_lea.sflag [#allocation4], %s2892_s23 }
 0x47a   : > { %p3436_p9 = pnand %p5797_p5, %p5796_p10 }
 0x47c   : > { %4144 = dma.done.wait (!%p3436_p9), %s2893_s19, 4096  }
 0x47d   : > { %4146 = vsyncadd (!%p3436_p9), %s2893_s19, 4294963200  ;;  %p28_p8 = scmp.ge.s32.totalorder %s4389_s20, 4   ;;  %s5798_s13 = smov %s4153_s14 }
 0x47e   : > { %s5799_s14 = smov %s4157_s15  ;;  %s5800_s15 = smov %s4398_s25 }
 0x47f   : > { %s5801_s16 = smov %s4389_s20  ;;  %30 = sbr.rel (!%p28_p8) target bundleno = 15 (0xf), region = 134 }
 0x486   :  { %2898 = vsyncpa [#allocation3], 1 }
 0x487   :  { %2900 = vsyncpa [#allocation3 + $0x1], 1 }
 0x488   :  { %2901 = vsyncpa [#allocation6], 1 }
 0x489   :  { %2903 = vsyncpa [#allocation6 + $0x1], 1 }
 0x48a   :  { %2904 = vsyncpa [#allocation9], 1 }
 0x48b   :  { %2905 = vsyncpa [#allocation12], 1 }
 0x48c   :  { %2906 = vsyncpa [#allocation4], 1 }
 0x48d   :  { %2908 = vsyncpa [#allocation4 + $0x1], 1 }

</bundles_post_ra>
